<compile_context>
chip_gen: v7x
topology: tpu7x:2x2x1
jax: 0.10.0
libtpu: 0.0.40
codegen_flags: <defaults>
</compile_context>

<pallas_src>
import functools

import jax
import jax.numpy as jnp
from jax import lax
from jax.experimental import pallas as pl
from jax.experimental.pallas import tpu as pltpu

_LOG2E = 1.4426950408889634


# ---------------------------------------------------------------------------
# Glue: im2col matching torch's  F.pad + unfold(2,k,1).unfold(3,k,1)
# ---------------------------------------------------------------------------
def _im2col_nchw(x, ksize, pad):
    """x: [N, C, H, W] -> [N*H*W, C*k*k], flatten order (C, ku, kv)."""
    n, c, h, w = x.shape
    xp = jnp.pad(x, ((0, 0), (0, 0), (pad, pad), (pad, pad)))
    rows = []
    for du in range(ksize):
        cols = []
        for dv in range(ksize):
            cols.append(xp[:, :, du:du + h, dv:dv + w])
        rows.append(jnp.stack(cols, axis=-1))        # [N, C, H, W, kv]
    pat = jnp.stack(rows, axis=-2)                   # [N, C, H, W, ku, kv]
    pat = jnp.transpose(pat, (0, 2, 3, 1, 4, 5))     # [N, H, W, C, ku, kv]
    return pat.reshape(n * h * w, c * ksize * ksize)


def _pad_rows(a, mult, value=0.0):
    r = (-a.shape[0]) % mult
    if r:
        pad_cfg = ((0, r),) + ((0, 0),) * (a.ndim - 1)
        a = jnp.pad(a, pad_cfg, constant_values=value)
    return a


def _pick_softmax_dtype():
    """bf16 softmax chain on v6e / v7x (bf16 VPU/EUP), f32 elsewhere (v5e, ...)."""
    try:
        kind = jax.devices()[0].device_kind.lower()
    except Exception:  # pragma: no cover - defensive
        return jnp.float32
    if ("v6" in kind) or ("v7" in kind) or ("7x" in kind):
        return jnp.bfloat16
    return jnp.float32


# ---------------------------------------------------------------------------
# Pallas kernel: online softmax over training patches
# ---------------------------------------------------------------------------
def _lescore_kernel(q_ref, k_ref, vc_ref, xc_ref,      # inputs
                    o_ref,                             # output
                    m_sc, acc_sc,                      # scratch (persist over j)
                    *, compute_dtype):
    j = pl.program_id(1)

    @pl.when(j == 0)
    def _():
        m_sc[...] = jnp.full_like(m_sc, -jnp.inf)
        acc_sc[...] = jnp.zeros_like(acc_sc)

    # One MXU call produces the log2-domain logits directly: q rows carry
    # [log2e*at/bt^2 * q, 1, 1] and k rows carry [k, c_hi, c_lo] where
    # c = -log2e*at^2*||k||^2/(2*bt^2) (hi/lo split for accuracy, -1e30 on
    # padded training patches).  No elementwise post-processing needed.
    logits = lax.dot_general(q_ref[...], k_ref[...], (((1,), (1,)), ((), ())),
                             preferred_element_type=compute_dtype)   # (tm, tp)

    # Online (flash-style) max subtraction over the training-patch axis.
    # Running max stays f32 so the pad-masking property is never lost.
    m_prev = m_sc[...]                                                # (tm, 1) f32
    m_new = jnp.maximum(m_prev,
                        jnp.max(logits, axis=-1, keepdims=True).astype(jnp.float32))
    alpha = jnp.exp2(m_prev - m_new)                                  # (tm, 1) f32
    p = jnp.exp2(logits - m_new.astype(logits.dtype))                 # (tm, tp)
    # vc_ref carries an appended ones column, so one MXU call produces both the
    # softmax-weighted (pre-scaled) patch centers and the softmax denominator.
    acc_sc[...] = alpha * acc_sc[...] + jnp.dot(
        p.astype(jnp.bfloat16), vc_ref[...], preferred_element_type=jnp.float32)
    m_sc[...] = m_new

    @pl.when(j == pl.num_programs(1) - 1)
    def _():
        cdim = o_ref.shape[-1]
        acc = acc_sc[...]                                             # (tm, C+1)
        weighted = acc[:, :cdim]           # sum_p exp * (at/bt^2 * center)
        denom = acc[:, cdim:cdim + 1]      # sum_p exp
        inv = pl.reciprocal(denom, approx=True)
        # score = (at*mean_center - x) / bt^2; all scales pre-folded host-side.
        o_ref[...] = (weighted * inv - xc_ref[...]).astype(o_ref.dtype)


# ---------------------------------------------------------------------------
# Wrapper
# ---------------------------------------------------------------------------
def le_score(x, train_images, t, schedule, kernel_size=3, tm=512, tp=512,
             compute_dtype=None):
    """x: [B, C, H, W], train_images: [N, C, H, W] -> score [B, C, H, W]."""
    b, c, h, w = x.shape
    pad = kernel_size // 2
    d = c * kernel_size * kernel_size

    if compute_dtype is None:
        compute_dtype = _pick_softmax_dtype()

    sched = schedule(t).astype(jnp.float32)
    bt2 = sched                                   # bt^2 == schedule(t)
    at = jnp.sqrt(1.0 - sched)
    qa = jnp.float32(_LOG2E) * at / bt2           # q pre-scale (log2-domain a1)
    ca = -jnp.float32(_LOG2E) * (at * at) / (2.0 * bt2)   # bias coefficient

    q = _im2col_nchw(x, kernel_size, pad).astype(jnp.float32)                # [M, D]
    kpt = _im2col_nchw(train_images, kernel_size, pad).astype(jnp.float32)   # [P, D]
    pnorms = jnp.sum(kpt * kpt, axis=1)                                      # [P]
    vc = jnp.transpose(train_images, (0, 2, 3, 1)).reshape(-1, c).astype(jnp.float32)
    xc = jnp.transpose(x, (0, 2, 3, 1)).reshape(-1, c).astype(jnp.float32)

    m_rows, p_rows = q.shape[0], kpt.shape[0]
    mp = m_rows + ((-m_rows) % tm)
    pp = p_rows + ((-p_rows) % tp)

    # --- M-side operands (i-indexed, resident across j) ----------------------
    ones_m = jnp.ones((m_rows, 2), jnp.float32)
    q_aug = jnp.concatenate([qa * q, ones_m], axis=1).astype(jnp.bfloat16)   # [M, D+2]
    q_p = _pad_rows(q_aug, tm)
    xc_p = _pad_rows(xc / bt2, tm)                 # finalize: weighted*inv - xc/bt^2

    # --- P-side operands (j-indexed, streamed) --------------------------------
    # per-training-patch log2-domain bias; padded patches get -1e30 so they are
    # masked out of the softmax.  hi/lo split keeps ~f32 accuracy in bf16.
    cvec = jnp.pad(ca * pnorms, (0, pp - p_rows), constant_values=-1e30)     # [pp]
    c_hi = cvec.astype(jnp.bfloat16).astype(jnp.float32)
    c_lo = cvec - c_hi
    kpt_p = _pad_rows(kpt, tp)                                               # [pp, D]
    k_aug = jnp.concatenate([kpt_p, c_hi[:, None], c_lo[:, None]],
                            axis=1).astype(jnp.bfloat16)                     # [pp, D+2]
    # centers pre-scaled by at/bt^2; ones column yields the softmax denominator.
    vc_aug = jnp.concatenate([(at / bt2) * vc, jnp.ones((p_rows, 1), jnp.float32)],
                             axis=1)
    vc_p = _pad_rows(vc_aug.astype(jnp.bfloat16), tp)                        # [pp, C+1]

    d_aug = d + 2
    kernel = functools.partial(_lescore_kernel, compute_dtype=compute_dtype)

    out = pl.pallas_call(
        kernel,
        out_shape=jax.ShapeDtypeStruct((mp, c), jnp.float32),
        grid_spec=pltpu.PrefetchScalarGridSpec(
            num_scalar_prefetch=0,
            grid=(mp // tm, pp // tp),
            in_specs=[
                pl.BlockSpec((tm, d_aug), lambda i, j: (i, 0)),      # q (+ones)
                pl.BlockSpec((tp, d_aug), lambda i, j: (j, 0)),      # patches (+bias)
                pl.BlockSpec((tp, c + 1), lambda i, j: (j, 0)),      # centers + ones
                pl.BlockSpec((tm, c), lambda i, j: (i, 0)),          # x / bt^2
            ],
            out_specs=pl.BlockSpec((tm, c), lambda i, j: (i, 0)),
            scratch_shapes=[
                pltpu.VMEM((tm, 1), jnp.float32),       # running max (log2 domain)
                pltpu.VMEM((tm, c + 1), jnp.float32),   # [weighted centers | denom]
            ],
        ),
        compiler_params=pltpu.CompilerParams(
            dimension_semantics=("parallel", "arbitrary")),
    )(q_p, k_aug, vc_p, xc_p)

    out = out[:m_rows].reshape(b, h, w, c)
    return jnp.transpose(out, (0, 3, 1, 2))                          # back to NCHW


# ---------------------------------------------------------------------------
# Pure-JAX reference (mirrors the PyTorch forward, dense, f32)
# ---------------------------------------------------------------------------
def le_score_reference(x, train_images, t, schedule, kernel_size=3):
    b, c, h, w = x.shape
    pad = kernel_size // 2
    sched = schedule(t).astype(jnp.float32)
    bt = jnp.sqrt(sched)
    at = jnp.sqrt(1.0 - sched)
    q = _im2col_nchw(x, kernel_size, pad)
    km = _im2col_nchw(train_images, kernel_size, pad)
    vc = jnp.transpose(train_images, (0, 2, 3, 1)).reshape(-1, c)
    xc = jnp.transpose(x, (0, 2, 3, 1)).reshape(-1, c)
    s = jnp.dot(q, km.T, precision=lax.Precision.HIGHEST)
    logits = -(jnp.sum(q * q, 1, keepdims=True) - 2.0 * at * s
               + at * at * jnp.sum(km * km, 1)[None, :]) / (2.0 * bt * bt)
    wts = jax.nn.softmax(logits, axis=-1)
    weighted = jnp.dot(wts, vc, precision=lax.Precision.HIGHEST)
    out = -(xc - at * weighted) / (bt * bt)
    return jnp.transpose(out.reshape(b, h, w, c), (0, 3, 1, 2))


if __name__ == "__main__":
    key = jax.random.PRNGKey(0)
    k1, k2 = jax.random.split(key)

    B, C, H, W = 2, 4, 16, 16          # x: [B, C, H, W]
    N_TRAIN = 8                        # synthetic "dataset": [N, C, H, W]
    KSIZE = 3

    x = 0.5 * jax.random.normal(k1, (B, C, H, W), dtype=jnp.float32)
    train_images = 0.5 * jax.random.normal(k2, (N_TRAIN, C, H, W), dtype=jnp.float32)

    def schedule(t):
        # simple linear cumulative-noise schedule: schedule(t) = t
        return jnp.asarray(t, dtype=jnp.float32)

    t = 0.4

    out = le_score(x, train_images, t, schedule, kernel_size=KSIZE)
    out = jax.block_until_ready(out)

    assert out.shape == (B, C, H, W)
    assert bool(jnp.all(jnp.isfinite(out)))

    ref = le_score_reference(x, train_images, t, schedule, kernel_size=KSIZE)
    assert bool(jnp.allclose(out, ref, atol=1e-1, rtol=1e-1))

    print("KERNEL_OK")
</pallas_src>

<mosaic_0001>
module attributes {stable_mosaic.version = 11 : i64} {
  func.func @_lescore_kernel(%arg0: i32, %arg1: i32, %arg2: memref<512x38xbf16, #tpu.memory_space<vmem>>, %arg3: memref<512x38xbf16, #tpu.memory_space<vmem>>, %arg4: memref<512x5xbf16, #tpu.memory_space<vmem>>, %arg5: memref<512x4xf32, #tpu.memory_space<vmem>>, %arg6: memref<512x4xf32, #tpu.memory_space<vmem>>, %arg7: memref<512x1xf32, #tpu.memory_space<vmem>>, %arg8: memref<512x5xf32, #tpu.memory_space<vmem>>) attributes {dimension_semantics = [#tpu.dimension_semantics<parallel>, #tpu.dimension_semantics<arbitrary>], iteration_bounds = array<i64: 1, 4>, scalar_prefetch = 0 : i64, scratch_operands = 2 : i64, tpu.core_type = #tpu.core_type<tc>, window_params = [{transform_indices = @transform_0, window_bounds = array<i64: 512, 38>}, {transform_indices = @transform_1, window_bounds = array<i64: 512, 38>}, {transform_indices = @transform_2, window_bounds = array<i64: 512, 5>}, {transform_indices = @transform_3, window_bounds = array<i64: 512, 4>}, {transform_indices = @transform_4, window_bounds = array<i64: 512, 4>}]} {
    %c0_i32 = arith.constant 0 : i32
    %0 = arith.cmpi eq, %arg1, %c0_i32 : i32
    %1 = arith.extui %0 : i1 to i32
    %c0_i32_0 = arith.constant 0 : i32
    %2 = arith.cmpi ne, %1, %c0_i32_0 : i32
    scf.if %2 {
      %cst_17 = arith.constant 0xFF800000 : f32
      %27 = vector.broadcast %cst_17 : f32 to vector<512x1xf32>
      %c0_18 = arith.constant 0 : index
      %c0_19 = arith.constant 0 : index
      %28 = vector.load %arg7[%c0_18, %c0_19] : memref<512x1xf32, #tpu.memory_space<vmem>>, vector<512x1xf32>
      tpu.vector_store %arg7[%c0_18, %c0_19], %27 {strides = array<i32>} : memref<512x1xf32, #tpu.memory_space<vmem>>, vector<512x1xf32>,
      %cst_20 = arith.constant 0.000000e+00 : f32
      %29 = vector.broadcast %cst_20 : f32 to vector<512x5xf32>
      %c0_21 = arith.constant 0 : index
      %c0_22 = arith.constant 0 : index
      %30 = vector.load %arg8[%c0_21, %c0_22] : memref<512x5xf32, #tpu.memory_space<vmem>>, vector<512x5xf32>
      tpu.vector_store %arg8[%c0_21, %c0_22], %29 {strides = array<i32>} : memref<512x5xf32, #tpu.memory_space<vmem>>, vector<512x5xf32>,
    } else {
    }
    %c0 = arith.constant 0 : index
    %c0_1 = arith.constant 0 : index
    %3 = vector.load %arg2[%c0, %c0_1] : memref<512x38xbf16, #tpu.memory_space<vmem>>, vector<512x38xbf16>
    %c0_2 = arith.constant 0 : index
    %c0_3 = arith.constant 0 : index
    %4 = vector.load %arg3[%c0_2, %c0_3] : memref<512x38xbf16, #tpu.memory_space<vmem>>, vector<512x38xbf16>
    %cst = arith.constant dense<0.000000e+00> : vector<512x512xf32>
    %5 = tpu.matmul %3, %4, %cst {dimension_numbers = #tpu.dot_dimension_numbers<[1], [1], [0], [0], [0, 0, 1, 0], [], []>} : vector<512x38xbf16>, vector<512x38xbf16>, vector<512x512xf32> -> vector<512x512xf32>
    %c0_4 = arith.constant 0 : index
    %c0_5 = arith.constant 0 : index
    %6 = vector.load %arg7[%c0_4, %c0_5] : memref<512x1xf32, #tpu.memory_space<vmem>>, vector<512x1xf32>
    %cst_6 = arith.constant dense<0xFF800000> : vector<512xf32>
    %7 = vector.multi_reduction <maximumf>, %5, %cst_6 [1] : vector<512x512xf32> to vector<512xf32>
    %8 = vector.shape_cast %7 : vector<512xf32> to vector<512x1xf32>
    %9 = arith.maximumf %6, %8 : vector<512x1xf32>
    %10 = arith.subf %6, %9 : vector<512x1xf32>
    %11 = math.exp2 %10 : vector<512x1xf32>
    %12 = vector.broadcast %9 : vector<512x1xf32> to vector<512x512xf32>
    %13 = arith.subf %5, %12 : vector<512x512xf32>
    %14 = math.exp2 %13 : vector<512x512xf32>
    %c0_7 = arith.constant 0 : index
    %c0_8 = arith.constant 0 : index
    %15 = vector.load %arg8[%c0_7, %c0_8] : memref<512x5xf32, #tpu.memory_space<vmem>>, vector<512x5xf32>
    %16 = vector.broadcast %11 : vector<512x1xf32> to vector<512x5xf32>
    %17 = arith.mulf %16, %15 : vector<512x5xf32>
    %18 = arith.truncf %14 : vector<512x512xf32> to vector<512x512xbf16>
    %c0_9 = arith.constant 0 : index
    %c0_10 = arith.constant 0 : index
    %19 = vector.load %arg4[%c0_9, %c0_10] : memref<512x5xbf16, #tpu.memory_space<vmem>>, vector<512x5xbf16>
    %cst_11 = arith.constant dense<0.000000e+00> : vector<512x5xf32>
    %20 = tpu.matmul %18, %19, %cst_11 {dimension_numbers = #tpu.dot_dimension_numbers<[1], [0], [0], [1], [0, 0, 1, 1], [], []>} : vector<512x512xbf16>, vector<512x5xbf16>, vector<512x5xf32> -> vector<512x5xf32>
    %21 = arith.addf %17, %20 : vector<512x5xf32>
    %c0_12 = arith.constant 0 : index
    %c0_13 = arith.constant 0 : index
    %22 = vector.load %arg8[%c0_12, %c0_13] : memref<512x5xf32, #tpu.memory_space<vmem>>, vector<512x5xf32>
    tpu.vector_store %arg8[%c0_12, %c0_13], %21 {strides = array<i32>} : memref<512x5xf32, #tpu.memory_space<vmem>>, vector<512x5xf32>,
    %c0_14 = arith.constant 0 : index
    %c0_15 = arith.constant 0 : index
    %23 = vector.load %arg7[%c0_14, %c0_15] : memref<512x1xf32, #tpu.memory_space<vmem>>, vector<512x1xf32>
    tpu.vector_store %arg7[%c0_14, %c0_15], %9 {strides = array<i32>} : memref<512x1xf32, #tpu.memory_space<vmem>>, vector<512x1xf32>,
    %c3_i32 = arith.constant 3 : i32
    %24 = arith.cmpi eq, %arg1, %c3_i32 : i32
    %25 = arith.extui %24 : i1 to i32
    %c0_i32_16 = arith.constant 0 : i32
    %26 = arith.cmpi ne, %25, %c0_i32_16 : i32
    scf.if %26 {
      %c0_17 = arith.constant 0 : index
      %c0_18 = arith.constant 0 : index
      %27 = vector.load %arg8[%c0_17, %c0_18] : memref<512x5xf32, #tpu.memory_space<vmem>>, vector<512x5xf32>
      %28 = vector.extract_strided_slice %27 {offsets = [0, 0], sizes = [512, 4], strides = [1, 1]} : vector<512x5xf32> to vector<512x4xf32>
      %29 = vector.extract_strided_slice %27 {offsets = [0, 4], sizes = [512, 1], strides = [1, 1]} : vector<512x5xf32> to vector<512x1xf32>
      %30 = tpu.reciprocal %29 {approx = true} : vector<512x1xf32> -> vector<512x1xf32>
      %31 = vector.broadcast %30 : vector<512x1xf32> to vector<512x4xf32>
      %32 = arith.mulf %28, %31 : vector<512x4xf32>
      %c0_19 = arith.constant 0 : index
      %c0_20 = arith.constant 0 : index
      %33 = vector.load %arg5[%c0_19, %c0_20] : memref<512x4xf32, #tpu.memory_space<vmem>>, vector<512x4xf32>
      %34 = arith.subf %32, %33 : vector<512x4xf32>
      %c0_21 = arith.constant 0 : index
      %c0_22 = arith.constant 0 : index
      %35 = vector.load %arg6[%c0_21, %c0_22] : memref<512x4xf32, #tpu.memory_space<vmem>>, vector<512x4xf32>
      tpu.vector_store %arg6[%c0_21, %c0_22], %34 {strides = array<i32>} : memref<512x4xf32, #tpu.memory_space<vmem>>, vector<512x4xf32>,
    } else {
    }
    return
  }
  func.func @transform_0(%arg0: i32, %arg1: i32) -> (i32, i32) {
    %c0_i32 = arith.constant 0 : i32
    %c0_i32_0 = arith.constant 0 : i32
    return %arg0, %c0_i32 : i32, i32
  }
  func.func @transform_1(%arg0: i32, %arg1: i32) -> (i32, i32) {
    %c0_i32 = arith.constant 0 : i32
    %c0_i32_0 = arith.constant 0 : i32
    return %arg1, %c0_i32 : i32, i32
  }
  func.func @transform_2(%arg0: i32, %arg1: i32) -> (i32, i32) {
    %c0_i32 = arith.constant 0 : i32
    %c0_i32_0 = arith.constant 0 : i32
    return %arg1, %c0_i32 : i32, i32
  }
  func.func @transform_3(%arg0: i32, %arg1: i32) -> (i32, i32) {
    %c0_i32 = arith.constant 0 : i32
    %c0_i32_0 = arith.constant 0 : i32
    return %arg0, %c0_i32 : i32, i32
  }
  func.func @transform_4(%arg0: i32, %arg1: i32) -> (i32, i32) {
    %c0_i32 = arith.constant 0 : i32
    %c0_i32_0 = arith.constant 0 : i32
    return %arg0, %c0_i32 : i32, i32
  }
}

</mosaic_0001>

<bundles_post_ra>
// kernel: tpu_custom_call.1
= control target key start
LH: loop header
LB: loop body
LE: loop exit
PB: predicated region body
PF: predicated region fallthrough
CT: control target
= control target key end

     0   :  { %s6887_s15 = smov 0   ;;  %s6889_s16 = smov 0   ;;  %s11153_s0 = inlined_call_operand.vmem [shape: bf16[512,38], index: 0, kind: input, shape index: {}]   ;;  %s11154_s1 = inlined_call_operand.vmem [shape: bf16[2048,38], index: 1, kind: input, shape index: {}]   ;;  %s11155_s2 = inlined_call_operand.vmem [shape: bf16[2048,5], index: 2, kind: input, shape index: {}]   ;;  %s11156_s3 = inlined_call_operand.vmem [shape: f32[512,4], index: 3, kind: input, shape index: {}]   ;;  %s11157_s4 = inlined_call_operand.vmem [shape: f32[512,4], index: 4, kind: output, shape index: {}]  }
   0x1   :  { %s6891_s17 = smov 0  }
   0x2 LB: > { %s23_s18 = sadd.s32 1, %s6852_s16  ;;  %p5591_p0 = scmp.ge.s32.totalorder %s6856_s17, 1  ;;  %s6856_s17 = sphi %s6891_s17, %s14_s17   ;;  %s6852_s16 = sphi %s6889_s16, %s12582_s16   ;;  %s6848_s15 = sphi %s6887_s15, %s12581_s15  }
   0x3   : > { %p24_p1 = scmp.ge.s32.totalorder %s23_s18, 4  ;;  %p208_p2 = scmp.lt.s32.totalorder %s6856_s17, 5 }
   0x5   : > { %s12584_s18 = smov (%p24_p1, %s23_s18), 0  ;;  %p209_p3 = pnand %p5591_p0, %p208_p2 }
   0x7   : > { %212 = sbr.rel (%p209_p3) target bundleno = 2030 (0x7ee), region = 36 }
   0xe   : > { %s5592_s19 = sshll.u32 %s6848_s15, 6  ;;  %p5596_p5 = scmp.ne.s32.totalorder %s6848_s15, 0 }
   0xf   : > { %p256_p4 = scmp.lt.s32.totalorder %s5592_s19, 255  ;;  %vm284_vm0 = vcmask (!%p5596_p5), 7168   ;;  %vm349_vm1 = vcmask (!%p5596_p5), 39936   ;;  %v6858_v0 = vmov (!%p5596_p5), -inf   ;;  %v6859_v1 = vmov (!%p5596_p5), 0.0  }
  0x10   : > { %283 = sbr.rel (%p5596_p5) target bundleno = 80 (0x50), region = 40  ;;  %285 = vst.msk [vmem:[#allocation2] sm:$0xff] (!%p5596_p5), %vm284_vm0, %v6858_v0  ;;  %286 = vst.msk [vmem:[#allocation2 + $0x8] sm:$0xff] (!%p5596_p5), %vm284_vm0, %v6858_v0 }
  0x11   : > { %s12586_s19 = smov (!%p256_p4, %s5592_s19), 255  ;;  %287 = vst.msk [vmem:[#allocation2 + $0x10] sm:$0xff] (!%p5596_p5), %vm284_vm0, %v6858_v0  ;;  %288 = vst.msk [vmem:[#allocation2 + $0x18] sm:$0xff] (!%p5596_p5), %vm284_vm0, %v6858_v0 }
  0x12   : > { %s5593_s20 = sshll.u32 %s12586_s19, 2  ;;  %289 = vst.msk [vmem:[#allocation2 + $0x20] sm:$0xff] (!%p5596_p5), %vm284_vm0, %v6858_v0  ;;  %290 = vst.msk [vmem:[#allocation2 + $0x28] sm:$0xff] (!%p5596_p5), %vm284_vm0, %v6858_v0 }
  0x13   : > { %s6911_s23 = scalar_lea.vmem %s11154_s1, %s5593_s20  ;;  %s6916_s26 = scalar_lea.vmem %s11155_s2, %s5593_s20  ;;  %291 = vst.msk [vmem:[#allocation2 + $0x30] sm:$0xff] (!%p5596_p5), %vm284_vm0, %v6858_v0  ;;  %292 = vst.msk [vmem:[#allocation2 + $0x38] sm:$0xff] (!%p5596_p5), %vm284_vm0, %v6858_v0 }
  0x14   : > { %293 = vst.msk [vmem:[#allocation2 + $0x40] sm:$0xff] (!%p5596_p5), %vm284_vm0, %v6858_v0  ;;  %294 = vst.msk [vmem:[#allocation2 + $0x48] sm:$0xff] (!%p5596_p5), %vm284_vm0, %v6858_v0 }
  0x15   : > { %295 = vst.msk [vmem:[#allocation2 + $0x50] sm:$0xff] (!%p5596_p5), %vm284_vm0, %v6858_v0  ;;  %296 = vst.msk [vmem:[#allocation2 + $0x58] sm:$0xff] (!%p5596_p5), %vm284_vm0, %v6858_v0 }
  0x16   : > { %297 = vst.msk [vmem:[#allocation2 + $0x60] sm:$0xff] (!%p5596_p5), %vm284_vm0, %v6858_v0  ;;  %298 = vst.msk [vmem:[#allocation2 + $0x68] sm:$0xff] (!%p5596_p5), %vm284_vm0, %v6858_v0 }
  0x17   : > { %299 = vst.msk [vmem:[#allocation2 + $0x70] sm:$0xff] %vm284_vm0, %v6858_v0  ;;  %300 = vst.msk [vmem:[#allocation2 + $0x78] sm:$0xff] %vm284_vm0, %v6858_v0 }
  0x18   : > { %301 = vst.msk [vmem:[#allocation2 + $0x80] sm:$0xff] %vm284_vm0, %v6858_v0  ;;  %302 = vst.msk [vmem:[#allocation2 + $0x88] sm:$0xff] %vm284_vm0, %v6858_v0 }
  0x19   : > { %303 = vst.msk [vmem:[#allocation2 + $0x90] sm:$0xff] %vm284_vm0, %v6858_v0  ;;  %304 = vst.msk [vmem:[#allocation2 + $0x98] sm:$0xff] %vm284_vm0, %v6858_v0 }
  0x1a   : > { %305 = vst.msk [vmem:[#allocation2 + $0xa0] sm:$0xff] %vm284_vm0, %v6858_v0  ;;  %306 = vst.msk [vmem:[#allocation2 + $0xa8] sm:$0xff] %vm284_vm0, %v6858_v0 }
  0x1b   : > { %307 = vst.msk [vmem:[#allocation2 + $0xb0] sm:$0xff] %vm284_vm0, %v6858_v0  ;;  %308 = vst.msk [vmem:[#allocation2 + $0xb8] sm:$0xff] %vm284_vm0, %v6858_v0 }
  0x1c   : > { %309 = vst.msk [vmem:[#allocation2 + $0xc0] sm:$0xff] %vm284_vm0, %v6858_v0  ;;  %310 = vst.msk [vmem:[#allocation2 + $0xc8] sm:$0xff] %vm284_vm0, %v6858_v0 }
  0x1d   : > { %311 = vst.msk [vmem:[#allocation2 + $0xd0] sm:$0xff] %vm284_vm0, %v6858_v0  ;;  %312 = vst.msk [vmem:[#allocation2 + $0xd8] sm:$0xff] %vm284_vm0, %v6858_v0 }
  0x1e   : > { %313 = vst.msk [vmem:[#allocation2 + $0xe0] sm:$0xff] %vm284_vm0, %v6858_v0  ;;  %314 = vst.msk [vmem:[#allocation2 + $0xe8] sm:$0xff] %vm284_vm0, %v6858_v0 }
  0x1f   : > { %315 = vst.msk [vmem:[#allocation2 + $0xf0] sm:$0xff] %vm284_vm0, %v6858_v0  ;;  %316 = vst.msk [vmem:[#allocation2 + $0xf8] sm:$0xff] %vm284_vm0, %v6858_v0 }
  0x20   : > { %317 = vst.msk [vmem:[#allocation2 + $0x100] sm:$0xff] %vm284_vm0, %v6858_v0  ;;  %318 = vst.msk [vmem:[#allocation2 + $0x108] sm:$0xff] %vm284_vm0, %v6858_v0 }
  0x21   : > { %319 = vst.msk [vmem:[#allocation2 + $0x110] sm:$0xff] %vm284_vm0, %v6858_v0  ;;  %320 = vst.msk [vmem:[#allocation2 + $0x118] sm:$0xff] %vm284_vm0, %v6858_v0 }
  0x22   : > { %321 = vst.msk [vmem:[#allocation2 + $0x120] sm:$0xff] %vm284_vm0, %v6858_v0  ;;  %322 = vst.msk [vmem:[#allocation2 + $0x128] sm:$0xff] %vm284_vm0, %v6858_v0 }
  0x23   : > { %323 = vst.msk [vmem:[#allocation2 + $0x130] sm:$0xff] %vm284_vm0, %v6858_v0  ;;  %324 = vst.msk [vmem:[#allocation2 + $0x138] sm:$0xff] %vm284_vm0, %v6858_v0 }
  0x24   : > { %325 = vst.msk [vmem:[#allocation2 + $0x140] sm:$0xff] %vm284_vm0, %v6858_v0  ;;  %326 = vst.msk [vmem:[#allocation2 + $0x148] sm:$0xff] %vm284_vm0, %v6858_v0 }
  0x25   : > { %327 = vst.msk [vmem:[#allocation2 + $0x150] sm:$0xff] %vm284_vm0, %v6858_v0  ;;  %328 = vst.msk [vmem:[#allocation2 + $0x158] sm:$0xff] %vm284_vm0, %v6858_v0 }
  0x26   : > { %329 = vst.msk [vmem:[#allocation2 + $0x160] sm:$0xff] %vm284_vm0, %v6858_v0  ;;  %330 = vst.msk [vmem:[#allocation2 + $0x168] sm:$0xff] %vm284_vm0, %v6858_v0 }
  0x27   : > { %331 = vst.msk [vmem:[#allocation2 + $0x170] sm:$0xff] %vm284_vm0, %v6858_v0  ;;  %332 = vst.msk [vmem:[#allocation2 + $0x178] sm:$0xff] %vm284_vm0, %v6858_v0 }
  0x28   : > { %333 = vst.msk [vmem:[#allocation2 + $0x180] sm:$0xff] %vm284_vm0, %v6858_v0  ;;  %334 = vst.msk [vmem:[#allocation2 + $0x188] sm:$0xff] %vm284_vm0, %v6858_v0 }
  0x29   : > { %335 = vst.msk [vmem:[#allocation2 + $0x190] sm:$0xff] %vm284_vm0, %v6858_v0  ;;  %336 = vst.msk [vmem:[#allocation2 + $0x198] sm:$0xff] %vm284_vm0, %v6858_v0 }
  0x2a   : > { %337 = vst.msk [vmem:[#allocation2 + $0x1a0] sm:$0xff] %vm284_vm0, %v6858_v0  ;;  %338 = vst.msk [vmem:[#allocation2 + $0x1a8] sm:$0xff] %vm284_vm0, %v6858_v0 }
  0x2b   : > { %339 = vst.msk [vmem:[#allocation2 + $0x1b0] sm:$0xff] %vm284_vm0, %v6858_v0  ;;  %340 = vst.msk [vmem:[#allocation2 + $0x1b8] sm:$0xff] %vm284_vm0, %v6858_v0 }
  0x2c   : > { %341 = vst.msk [vmem:[#allocation2 + $0x1c0] sm:$0xff] %vm284_vm0, %v6858_v0  ;;  %342 = vst.msk [vmem:[#allocation2 + $0x1c8] sm:$0xff] %vm284_vm0, %v6858_v0 }
  0x2d   : > { %343 = vst.msk [vmem:[#allocation2 + $0x1d0] sm:$0xff] %vm284_vm0, %v6858_v0  ;;  %344 = vst.msk [vmem:[#allocation2 + $0x1d8] sm:$0xff] %vm284_vm0, %v6858_v0 }
  0x2e   : > { %345 = vst.msk [vmem:[#allocation2 + $0x1e0] sm:$0xff] %vm284_vm0, %v6858_v0  ;;  %346 = vst.msk [vmem:[#allocation2 + $0x1e8] sm:$0xff] %vm284_vm0, %v6858_v0 }
  0x2f   : > { %347 = vst.msk [vmem:[#allocation2 + $0x1f0] sm:$0xff] %vm284_vm0, %v6858_v0  ;;  %348 = vst.msk [vmem:[#allocation2 + $0x1f8] sm:$0xff] %vm284_vm0, %v6858_v0 }
  0x30   : > { %350 = vst.msk [vmem:[#allocation3] sm:$0xff] %vm349_vm1, %v6859_v1  ;;  %351 = vst.msk [vmem:[#allocation3 + $0x8] sm:$0xff] %vm349_vm1, %v6859_v1 }
  0x31   : > { %352 = vst.msk [vmem:[#allocation3 + $0x10] sm:$0xff] %vm349_vm1, %v6859_v1  ;;  %353 = vst.msk [vmem:[#allocation3 + $0x18] sm:$0xff] %vm349_vm1, %v6859_v1 }
  0x32   : > { %354 = vst.msk [vmem:[#allocation3 + $0x20] sm:$0xff] %vm349_vm1, %v6859_v1  ;;  %355 = vst.msk [vmem:[#allocation3 + $0x28] sm:$0xff] %vm349_vm1, %v6859_v1 }
  0x33   : > { %356 = vst.msk [vmem:[#allocation3 + $0x30] sm:$0xff] %vm349_vm1, %v6859_v1  ;;  %357 = vst.msk [vmem:[#allocation3 + $0x38] sm:$0xff] %vm349_vm1, %v6859_v1 }
  0x34   : > { %358 = vst.msk [vmem:[#allocation3 + $0x40] sm:$0xff] %vm349_vm1, %v6859_v1  ;;  %359 = vst.msk [vmem:[#allocation3 + $0x48] sm:$0xff] %vm349_vm1, %v6859_v1 }
  0x35   : > { %360 = vst.msk [vmem:[#allocation3 + $0x50] sm:$0xff] %vm349_vm1, %v6859_v1  ;;  %361 = vst.msk [vmem:[#allocation3 + $0x58] sm:$0xff] %vm349_vm1, %v6859_v1 }
  0x36   : > { %362 = vst.msk [vmem:[#allocation3 + $0x60] sm:$0xff] %vm349_vm1, %v6859_v1  ;;  %363 = vst.msk [vmem:[#allocation3 + $0x68] sm:$0xff] %vm349_vm1, %v6859_v1 }
  0x37   : > { %364 = vst.msk [vmem:[#allocation3 + $0x70] sm:$0xff] %vm349_vm1, %v6859_v1  ;;  %365 = vst.msk [vmem:[#allocation3 + $0x78] sm:$0xff] %vm349_vm1, %v6859_v1 }
  0x38   : > { %366 = vst.msk [vmem:[#allocation3 + $0x80] sm:$0xff] %vm349_vm1, %v6859_v1  ;;  %367 = vst.msk [vmem:[#allocation3 + $0x88] sm:$0xff] %vm349_vm1, %v6859_v1 }
  0x39   : > { %368 = vst.msk [vmem:[#allocation3 + $0x90] sm:$0xff] %vm349_vm1, %v6859_v1  ;;  %369 = vst.msk [vmem:[#allocation3 + $0x98] sm:$0xff] %vm349_vm1, %v6859_v1 }
  0x3a   : > { %370 = vst.msk [vmem:[#allocation3 + $0xa0] sm:$0xff] %vm349_vm1, %v6859_v1  ;;  %371 = vst.msk [vmem:[#allocation3 + $0xa8] sm:$0xff] %vm349_vm1, %v6859_v1 }
  0x3b   : > { %372 = vst.msk [vmem:[#allocation3 + $0xb0] sm:$0xff] %vm349_vm1, %v6859_v1  ;;  %373 = vst.msk [vmem:[#allocation3 + $0xb8] sm:$0xff] %vm349_vm1, %v6859_v1 }
  0x3c   : > { %374 = vst.msk [vmem:[#allocation3 + $0xc0] sm:$0xff] %vm349_vm1, %v6859_v1  ;;  %375 = vst.msk [vmem:[#allocation3 + $0xc8] sm:$0xff] %vm349_vm1, %v6859_v1 }
  0x3d   : > { %376 = vst.msk [vmem:[#allocation3 + $0xd0] sm:$0xff] %vm349_vm1, %v6859_v1  ;;  %377 = vst.msk [vmem:[#allocation3 + $0xd8] sm:$0xff] %vm349_vm1, %v6859_v1 }
  0x3e   : > { %378 = vst.msk [vmem:[#allocation3 + $0xe0] sm:$0xff] %vm349_vm1, %v6859_v1  ;;  %379 = vst.msk [vmem:[#allocation3 + $0xe8] sm:$0xff] %vm349_vm1, %v6859_v1 }
  0x3f   : > { %380 = vst.msk [vmem:[#allocation3 + $0xf0] sm:$0xff] %vm349_vm1, %v6859_v1  ;;  %381 = vst.msk [vmem:[#allocation3 + $0xf8] sm:$0xff] %vm349_vm1, %v6859_v1 }
  0x40   : > { %382 = vst.msk [vmem:[#allocation3 + $0x100] sm:$0xff] %vm349_vm1, %v6859_v1  ;;  %383 = vst.msk [vmem:[#allocation3 + $0x108] sm:$0xff] %vm349_vm1, %v6859_v1 }
  0x41   : > { %384 = vst.msk [vmem:[#allocation3 + $0x110] sm:$0xff] %vm349_vm1, %v6859_v1  ;;  %385 = vst.msk [vmem:[#allocation3 + $0x118] sm:$0xff] %vm349_vm1, %v6859_v1 }
  0x42   : > { %386 = vst.msk [vmem:[#allocation3 + $0x120] sm:$0xff] %vm349_vm1, %v6859_v1  ;;  %387 = vst.msk [vmem:[#allocation3 + $0x128] sm:$0xff] %vm349_vm1, %v6859_v1 }
  0x43   : > { %388 = vst.msk [vmem:[#allocation3 + $0x130] sm:$0xff] %vm349_vm1, %v6859_v1  ;;  %389 = vst.msk [vmem:[#allocation3 + $0x138] sm:$0xff] %vm349_vm1, %v6859_v1 }
  0x44   : > { %390 = vst.msk [vmem:[#allocation3 + $0x140] sm:$0xff] %vm349_vm1, %v6859_v1  ;;  %391 = vst.msk [vmem:[#allocation3 + $0x148] sm:$0xff] %vm349_vm1, %v6859_v1 }
  0x45   : > { %392 = vst.msk [vmem:[#allocation3 + $0x150] sm:$0xff] %vm349_vm1, %v6859_v1  ;;  %393 = vst.msk [vmem:[#allocation3 + $0x158] sm:$0xff] %vm349_vm1, %v6859_v1 }
  0x46   : > { %394 = vst.msk [vmem:[#allocation3 + $0x160] sm:$0xff] %vm349_vm1, %v6859_v1  ;;  %395 = vst.msk [vmem:[#allocation3 + $0x168] sm:$0xff] %vm349_vm1, %v6859_v1 }
  0x47   : > { %396 = vst.msk [vmem:[#allocation3 + $0x170] sm:$0xff] %vm349_vm1, %v6859_v1  ;;  %397 = vst.msk [vmem:[#allocation3 + $0x178] sm:$0xff] %vm349_vm1, %v6859_v1 }
  0x48   : > { %398 = vst.msk [vmem:[#allocation3 + $0x180] sm:$0xff] %vm349_vm1, %v6859_v1  ;;  %399 = vst.msk [vmem:[#allocation3 + $0x188] sm:$0xff] %vm349_vm1, %v6859_v1 }
  0x49   : > { %400 = vst.msk [vmem:[#allocation3 + $0x190] sm:$0xff] %vm349_vm1, %v6859_v1  ;;  %401 = vst.msk [vmem:[#allocation3 + $0x198] sm:$0xff] %vm349_vm1, %v6859_v1 }
  0x4a   : > { %402 = vst.msk [vmem:[#allocation3 + $0x1a0] sm:$0xff] %vm349_vm1, %v6859_v1  ;;  %403 = vst.msk [vmem:[#allocation3 + $0x1a8] sm:$0xff] %vm349_vm1, %v6859_v1 }
  0x4b   : > { %404 = vst.msk [vmem:[#allocation3 + $0x1b0] sm:$0xff] %vm349_vm1, %v6859_v1  ;;  %405 = vst.msk [vmem:[#allocation3 + $0x1b8] sm:$0xff] %vm349_vm1, %v6859_v1 }
  0x4c   : > { %406 = vst.msk [vmem:[#allocation3 + $0x1c0] sm:$0xff] %vm349_vm1, %v6859_v1  ;;  %407 = vst.msk [vmem:[#allocation3 + $0x1c8] sm:$0xff] %vm349_vm1, %v6859_v1 }
  0x4d   : > { %408 = vst.msk [vmem:[#allocation3 + $0x1d0] sm:$0xff] %vm349_vm1, %v6859_v1  ;;  %409 = vst.msk [vmem:[#allocation3 + $0x1d8] sm:$0xff] %vm349_vm1, %v6859_v1 }
  0x4e   : > { %410 = vst.msk [vmem:[#allocation3 + $0x1e0] sm:$0xff] %vm349_vm1, %v6859_v1  ;;  %411 = vst.msk [vmem:[#allocation3 + $0x1e8] sm:$0xff] %vm349_vm1, %v6859_v1 }
  0x4f   : > { %412 = vst.msk [vmem:[#allocation3 + $0x1f0] sm:$0xff] %vm349_vm1, %v6859_v1  ;;  %413 = vst.msk [vmem:[#allocation3 + $0x1f8] sm:$0xff] %vm349_vm1, %v6859_v1 }
  0x50 PF: > { %v5968_v2 = vld [vmem:[%s6911_s23 + $0x40] sm:$0xff]   ;;  %vm862_vm2 = vcmask 310272   ;;  %v5972_v7 = vld [vmem:[%s6911_s23 + $0x48] sm:$0xff]   ;;  %v5976_v13 = vld [vmem:[%s6911_s23 + $0x50] sm:$0xff]   ;;  %vm4708_vm3 = vcmask 7168   ;;  %vm4643_vm4 = vcmask 39936  }
  0x51   : > { %v5969_v3 = vld [vmem:[%s6911_s23 + $0xc0] sm:$0xff]   ;;  %5922 = vmatprep.subr.msk.bf16.mxu0 %vm862_vm2, %v5968_v2  ;;  %v5973_v9 = vld [vmem:[%s6911_s23 + $0xc8] sm:$0xff]   ;;  %v5977_v15 = vld [vmem:[%s6911_s23 + $0xd0] sm:$0xff]   ;;  %p5757_p6 = scmp.ne.s32.totalorder %s6848_s15, 3 }
  0x52   : > { %v5970_v4 = vld [vmem:[%s6911_s23] sm:$0xff]   ;;  %5930 = vmatprep.subr.msk.bf16.mxu1 %vm862_vm2, %v5969_v3  ;;  %v5974_v10 = vld [vmem:[%s6911_s23 + $0x8] sm:$0xff]   ;;  %v5978_v16 = vld [vmem:[%s6911_s23 + $0x10] sm:$0xff]  }
  0x53   : > { %v5971_v5 = vld [vmem:[%s6911_s23 + $0x80] sm:$0xff]   ;;  %v960_v6 = vsel %vm862_vm2, %v5970_v4, 0  ;;  %v5975_v11 = vld [vmem:[%s6911_s23 + $0x88] sm:$0xff]   ;;  %v963_v12 = vsel %vm862_vm2, %v5974_v10, 0  ;;  %v5979_v17 = vld [vmem:[%s6911_s23 + $0x90] sm:$0xff]   ;;  %v966_v18 = vsel %vm862_vm2, %v5978_v16, 0 }
  0x54   : > { %5763 = vmatpush3.bf16.xpose.msra.mxu0 %v960_v6  ;;  %v1008_v8 = vsel %vm862_vm2, %v5971_v5, 0  ;;  %v1011_v14 = vsel %vm862_vm2, %v5975_v11, 0  ;;  %v5980_v19 = vld [vmem:[%s6911_s23 + $0x58] sm:$0xff]   ;;  %v1014_v20 = vsel %vm862_vm2, %v5979_v17, 0  ;;  %v5984_v25 = vld [vmem:[%s6911_s23 + $0x60] sm:$0xff]   ;;  %v5988_v32 = vld [vmem:[%s6911_s23 + $0x68] sm:$0xff]  }
  0x55   : > { %5843 = vmatpush3.bf16.xpose.msra.mxu1 %v1008_v8  ;;  %5923 = vmatprep.subr.msk.bf16.mxu0 %vm862_vm2, %v5972_v7  ;;  %v5981_v21 = vld [vmem:[%s6911_s23 + $0xd8] sm:$0xff]   ;;  %v5985_v27 = vld [vmem:[%s6911_s23 + $0xe0] sm:$0xff]   ;;  %v5989_v34 = vld [vmem:[%s6911_s23 + $0xe8] sm:$0xff]  }
  0x56   : > { %5931 = vmatprep.subr.msk.bf16.mxu1 %vm862_vm2, %v5973_v9  ;;  %v5982_v22 = vld [vmem:[%s6911_s23 + $0x18] sm:$0xff]   ;;  %v5986_v28 = vld [vmem:[%s6911_s23 + $0x20] sm:$0xff]   ;;  %v5990_v35 = vld [vmem:[%s6911_s23 + $0x28] sm:$0xff]  }
  0x57   : > { %v5983_v23 = vld [vmem:[%s6911_s23 + $0x98] sm:$0xff]   ;;  %v969_v24 = vsel %vm862_vm2, %v5982_v22, 0  ;;  %v5987_v29 = vld [vmem:[%s6911_s23 + $0xa0] sm:$0xff]   ;;  %v972_v31 = vsel %vm862_vm2, %v5986_v28, 0  ;;  %v5991_v36 = vld [vmem:[%s6911_s23 + $0xa8] sm:$0xff]   ;;  %v975_v39 = vsel %vm862_vm2, %v5990_v35, 0 }
  0x58   : > { %v1017_v26 = vsel %vm862_vm2, %v5983_v23, 0  ;;  %v6000_v30 = vld [vmem:[%s11153_s0] sm:$0xff]   ;;  %v1020_v33 = vsel %vm862_vm2, %v5987_v29, 0  ;;  %v5992_v37 = vld [vmem:[%s6911_s23 + $0x70] sm:$0xff]   ;;  %v1023_v41 = vsel %vm862_vm2, %v5991_v36, 0  ;;  %v5998_v45 = vld [vmem:[%s6911_s23 + $0x38] sm:$0xff]  }
  0x59   : > { %5778 = vmatprep.mubr.msk.bf16.mxu0 %vm862_vm2, %v6000_v30  ;;  %5858 = vmatprep.mubr.msk.bf16.mxu1 %vm862_vm2, %v6000_v30  ;;  %v5994_v38 = vld [vmem:[%s6911_s23 + $0x30] sm:$0xff]   ;;  %v5999_v46 = vld [vmem:[%s6911_s23 + $0xb8] sm:$0xff]   ;;  %v981_v49 = vsel %vm862_vm2, %v5998_v45, 0  ;;  %v6001_v51 = vld [vmem:[%s11153_s0 + $0x8] sm:$0xff]  }
  0x5a   : > { %v5995_v40 = vld [vmem:[%s6911_s23 + $0xb0] sm:$0xff]   ;;  %v978_v43 = vsel %vm862_vm2, %v5994_v38, 0  ;;  %v5996_v47 = vld [vmem:[%s6911_s23 + $0x78] sm:$0xff]   ;;  %v1029_v50 = vsel %vm862_vm2, %v5999_v46, 0  ;;  %v6004_v54 = vld [vmem:[%s11153_s0 + $0x20] sm:$0xff]  }
  0x5b   : > { %v5993_v42 = vld [vmem:[%s6911_s23 + $0xf0] sm:$0xff]   ;;  %v1026_v44 = vsel %vm862_vm2, %v5995_v40, 0  ;;  %v5997_v48 = vld [vmem:[%s6911_s23 + $0xf8] sm:$0xff]   ;;  %v6005_v55 = vld [vmem:[%s11153_s0 + $0x28] sm:$0xff]  }
  0x5c   : > { %5765 = vmatpush3.bf16.xpose.msra.mxu0 %v963_v12  ;;  %v6002_v52 = vld [vmem:[%s11153_s0 + $0x10] sm:$0xff]   ;;  %v6003_v53 = vld [vmem:[%s11153_s0 + $0x18] sm:$0xff]   ;;  %v6008_v58 = vld [vmem:[%s11153_s0 + $0x40] sm:$0xff]  }
  0x5d   : > { %5845 = vmatpush3.bf16.xpose.msra.mxu1 %v1011_v14  ;;  %5924 = vmatprep.subr.msk.bf16.mxu0 %vm862_vm2, %v5976_v13  ;;  %v6006_v56 = vld [vmem:[%s11153_s0 + $0x30] sm:$0xff]   ;;  %v6007_v57 = vld [vmem:[%s11153_s0 + $0x38] sm:$0xff]   ;;  %v6009_v59 = vld [vmem:[%s11153_s0 + $0x48] sm:$0xff]  }
  0x5e   : > { %5932 = vmatprep.subr.msk.bf16.mxu1 %vm862_vm2, %v5977_v15  ;;  %v6010_v60 = vld [vmem:[%s11153_s0 + $0x50] sm:$0xff]   ;;  %v6011_v61 = vld [vmem:[%s11153_s0 + $0x58] sm:$0xff]   ;;  %v6012_v62 = vld [vmem:[%s11153_s0 + $0x60] sm:$0xff]  }
  0x5f   : > { %v6013_v63 = vld [vmem:[%s11153_s0 + $0x68] sm:$0xff]   ;;  %v6014_v0 = vld [vmem:[%s11153_s0 + $0x70] sm:$0xff]   ;;  %v6015_v1 = vld [vmem:[%s11153_s0 + $0x78] sm:$0xff]  }
  0x60   : > { %v6016_v2 = vld [vmem:[%s11153_s0 + $0x80] sm:$0xff]   ;;  %v6017_v3 = vld [vmem:[%s11153_s0 + $0x88] sm:$0xff]   ;;  %v6018_v4 = vld [vmem:[%s11153_s0 + $0x90] sm:$0xff]  }
  0x61   : > { %v6019_v5 = vld [vmem:[%s11153_s0 + $0x98] sm:$0xff]   ;;  %v6020_v6 = vld [vmem:[%s11153_s0 + $0xa0] sm:$0xff]   ;;  %v6021_v7 = vld [vmem:[%s11153_s0 + $0xa8] sm:$0xff]  }
  0x62   : > { %v6022_v8 = vld [vmem:[%s11153_s0 + $0xb0] sm:$0xff]   ;;  %v6023_v9 = vld [vmem:[%s11153_s0 + $0xb8] sm:$0xff]   ;;  %v6024_v10 = vld [vmem:[%s11153_s0 + $0xc0] sm:$0xff]  }
  0x64   : > { %5767 = vmatpush3.bf16.xpose.msra.mxu0 %v966_v18 }
  0x65   : > { %5847 = vmatpush3.bf16.xpose.msra.mxu1 %v1014_v20  ;;  %5925 = vmatprep.subr.msk.bf16.mxu0 %vm862_vm2, %v5980_v19 }
  0x66   : > { %5933 = vmatprep.subr.msk.bf16.mxu1 %vm862_vm2, %v5981_v21 }
  0x6c   : > { %5769 = vmatpush3.bf16.xpose.msra.mxu0 %v969_v24 }
  0x6d   : > { %5849 = vmatpush3.bf16.xpose.msra.mxu1 %v1017_v26  ;;  %5926 = vmatprep.subr.msk.bf16.mxu0 %vm862_vm2, %v5984_v25 }
  0x6e   : > { %5934 = vmatprep.subr.msk.bf16.mxu1 %vm862_vm2, %v5985_v27 }
  0x74   : > { %5771 = vmatpush3.bf16.xpose.msra.mxu0 %v972_v31 }
  0x75   : > { %5851 = vmatpush3.bf16.xpose.msra.mxu1 %v1020_v33  ;;  %5927 = vmatprep.subr.msk.bf16.mxu0 %vm862_vm2, %v5988_v32 }
  0x76   : > { %5935 = vmatprep.subr.msk.bf16.mxu1 %vm862_vm2, %v5989_v34 }
  0x7c   : > { %5773 = vmatpush3.bf16.xpose.msra.mxu0 %v975_v39 }
  0x7d   : > { %5853 = vmatpush3.bf16.xpose.msra.mxu1 %v1023_v41  ;;  %5928 = vmatprep.subr.msk.bf16.mxu0 %vm862_vm2, %v5992_v37 }
  0x7e   : > { %5936 = vmatprep.subr.msk.bf16.mxu1 %vm862_vm2, %v5993_v42 }
  0x84   : > { %5775 = vmatpush3.bf16.xpose.msra.mxu0 %v978_v43 }
  0x85   : > { %5855 = vmatpush3.bf16.xpose.msra.mxu1 %v1026_v44  ;;  %5929 = vmatprep.subr.msk.bf16.mxu0 %vm862_vm2, %v5996_v47 }
  0x86   : > { %5937 = vmatprep.subr.msk.bf16.mxu1 %vm862_vm2, %v5997_v48 }
  0x8c   : > { %5777 = vmatpush3.bf16.xpose.msra.mxu0 %v981_v49 }
  0x8d   : > { %5857 = vmatpush3.bf16.xpose.msra.mxu1 %v1029_v50 }
  0x93   : > { %5779 = vmatmul.mubr.msk.bf16.vlgmr.msra.gmra.mrb[0].mxu0 %vm862_vm2, %v6000_v30 }
  0x94   : > { %5859 = vmatmul.mubr.msk.bf16.vlgmr.msra.gmra.mrb[0].mxu1 %vm862_vm2, %v6000_v30  ;;  %5780 = vmatprep.mubr.msk.bf16.mxu0 %vm862_vm2, %v6001_v51 }
  0x95   : > { %5860 = vmatprep.mubr.msk.bf16.mxu1 %vm862_vm2, %v6001_v51 }
  0x9b   : > { %5781 = vmatmul.mubr.msk.bf16.gmra.mrb[4].mxu0 %vm862_vm2, %v6001_v51 }
  0x9c   : > { %5861 = vmatmul.mubr.msk.bf16.gmra.mrb[4].mxu1 %vm862_vm2, %v6001_v51  ;;  %5782 = vmatprep.mubr.msk.bf16.mxu0 %vm862_vm2, %v6002_v52 }
  0x9d   : > { %5862 = vmatprep.mubr.msk.bf16.mxu1 %vm862_vm2, %v6002_v52 }
  0xa3   : > { %5783 = vmatmul.mubr.msk.bf16.gmra.mrb[8].mxu0 %vm862_vm2, %v6002_v52 }
  0xa4   : > { %5863 = vmatmul.mubr.msk.bf16.gmra.mrb[8].mxu1 %vm862_vm2, %v6002_v52  ;;  %5784 = vmatprep.mubr.msk.bf16.mxu0 %vm862_vm2, %v6003_v53 }
  0xa5   : > { %5864 = vmatprep.mubr.msk.bf16.mxu1 %vm862_vm2, %v6003_v53 }
  0xab   : > { %5785 = vmatmul.mubr.msk.bf16.gmra.mrb[12].mxu0 %vm862_vm2, %v6003_v53 }
  0xac   : > { %5865 = vmatmul.mubr.msk.bf16.gmra.mrb[12].mxu1 %vm862_vm2, %v6003_v53  ;;  %5786 = vmatprep.mubr.msk.bf16.mxu0 %vm862_vm2, %v6004_v54 }
  0xad   : > { %5866 = vmatprep.mubr.msk.bf16.mxu1 %vm862_vm2, %v6004_v54 }
  0xb3   : > { %5787 = vmatmul.mubr.msk.bf16.gmra.mrb[16].mxu0 %vm862_vm2, %v6004_v54 }
  0xb4   : > { %5867 = vmatmul.mubr.msk.bf16.gmra.mrb[16].mxu1 %vm862_vm2, %v6004_v54  ;;  %5788 = vmatprep.mubr.msk.bf16.mxu0 %vm862_vm2, %v6005_v55 }
  0xb5   : > { %5868 = vmatprep.mubr.msk.bf16.mxu1 %vm862_vm2, %v6005_v55 }
  0xbb   : > { %5789 = vmatmul.mubr.msk.bf16.gmra.mrb[20].mxu0 %vm862_vm2, %v6005_v55 }
  0xbc   : > { %5869 = vmatmul.mubr.msk.bf16.gmra.mrb[20].mxu1 %vm862_vm2, %v6005_v55  ;;  %5790 = vmatprep.mubr.msk.bf16.mxu0 %vm862_vm2, %v6006_v56 }
  0xbd   : > { %5870 = vmatprep.mubr.msk.bf16.mxu1 %vm862_vm2, %v6006_v56 }
  0xc3   : > { %5791 = vmatmul.mubr.msk.bf16.gmra.mrb[24].mxu0 %vm862_vm2, %v6006_v56 }
  0xc4   : > { %5871 = vmatmul.mubr.msk.bf16.gmra.mrb[24].mxu1 %vm862_vm2, %v6006_v56  ;;  %5792 = vmatprep.mubr.msk.bf16.mxu0 %vm862_vm2, %v6007_v57 }
  0xc5   : > { %5872 = vmatprep.mubr.msk.bf16.mxu1 %vm862_vm2, %v6007_v57 }
  0xcb   : > { %5793 = vmatmul.mubr.msk.bf16.gmra.mrb[28].mxu0 %vm862_vm2, %v6007_v57 }
  0xcc   : > { %5873 = vmatmul.mubr.msk.bf16.gmra.mrb[28].mxu1 %vm862_vm2, %v6007_v57  ;;  %5794 = vmatprep.mubr.msk.bf16.mxu0 %vm862_vm2, %v6008_v58 }
  0xcd   : > { %5874 = vmatprep.mubr.msk.bf16.mxu1 %vm862_vm2, %v6008_v58 }
  0xd3   : > { %5795 = vmatmul.mubr.msk.bf16.gmra.mrb[32].mxu0 %vm862_vm2, %v6008_v58 }
  0xd4   : > { %5875 = vmatmul.mubr.msk.bf16.gmra.mrb[32].mxu1 %vm862_vm2, %v6008_v58  ;;  %5796 = vmatprep.mubr.msk.bf16.mxu0 %vm862_vm2, %v6009_v59 }
  0xd5   : > { %5876 = vmatprep.mubr.msk.bf16.mxu1 %vm862_vm2, %v6009_v59 }
  0xdb   : > { %5797 = vmatmul.mubr.msk.bf16.gmra.mrb[36].mxu0 %vm862_vm2, %v6009_v59 }
  0xdc   : > { %5877 = vmatmul.mubr.msk.bf16.gmra.mrb[36].mxu1 %vm862_vm2, %v6009_v59  ;;  %5798 = vmatprep.mubr.msk.bf16.mxu0 %vm862_vm2, %v6010_v60 }
  0xdd   : > { %5878 = vmatprep.mubr.msk.bf16.mxu1 %vm862_vm2, %v6010_v60 }
  0xe3   : > { %5799 = vmatmul.mubr.msk.bf16.gmra.mrb[40].mxu0 %vm862_vm2, %v6010_v60 }
  0xe4   : > { %5879 = vmatmul.mubr.msk.bf16.gmra.mrb[40].mxu1 %vm862_vm2, %v6010_v60  ;;  %5800 = vmatprep.mubr.msk.bf16.mxu0 %vm862_vm2, %v6011_v61 }
  0xe5   : > { %5880 = vmatprep.mubr.msk.bf16.mxu1 %vm862_vm2, %v6011_v61 }
  0xeb   : > { %5801 = vmatmul.mubr.msk.bf16.gmra.mrb[44].mxu0 %vm862_vm2, %v6011_v61 }
  0xec   : > { %5881 = vmatmul.mubr.msk.bf16.gmra.mrb[44].mxu1 %vm862_vm2, %v6011_v61  ;;  %5802 = vmatprep.mubr.msk.bf16.mxu0 %vm862_vm2, %v6012_v62  ;;  %v6025_v61 = vld [vmem:[%s11153_s0 + $0xc8] sm:$0xff]  }
  0xed   : > { %5882 = vmatprep.mubr.msk.bf16.mxu1 %vm862_vm2, %v6012_v62 }
  0xf3   : > { %5803 = vmatmul.mubr.msk.bf16.gmra.mrb[48].mxu0 %vm862_vm2, %v6012_v62 }
  0xf4   : > { %5883 = vmatmul.mubr.msk.bf16.gmra.mrb[48].mxu1 %vm862_vm2, %v6012_v62  ;;  %5804 = vmatprep.mubr.msk.bf16.mxu0 %vm862_vm2, %v6013_v63 }
  0xf5   : > { %5884 = vmatprep.mubr.msk.bf16.mxu1 %vm862_vm2, %v6013_v63 }
  0xfb   : > { %5805 = vmatmul.mubr.msk.bf16.gmra.mrb[52].mxu0 %vm862_vm2, %v6013_v63 }
  0xfc   : > { %5885 = vmatmul.mubr.msk.bf16.gmra.mrb[52].mxu1 %vm862_vm2, %v6013_v63  ;;  %5806 = vmatprep.mubr.msk.bf16.mxu0 %vm862_vm2, %v6014_v0 }
  0xfd   : > { %5886 = vmatprep.mubr.msk.bf16.mxu1 %vm862_vm2, %v6014_v0 }
 0x103   : > { %5807 = vmatmul.mubr.msk.bf16.gmra.mrb[56].mxu0 %vm862_vm2, %v6014_v0 }
 0x104   : > { %5887 = vmatmul.mubr.msk.bf16.gmra.mrb[56].mxu1 %vm862_vm2, %v6014_v0  ;;  %5808 = vmatprep.mubr.msk.bf16.mxu0 %vm862_vm2, %v6015_v1 }
 0x105   : > { %5888 = vmatprep.mubr.msk.bf16.mxu1 %vm862_vm2, %v6015_v1 }
 0x10b   : > { %5809 = vmatmul.mubr.msk.bf16.gmra.mrb[60].mxu0 %vm862_vm2, %v6015_v1 }
 0x10c   : > { %5889 = vmatmul.mubr.msk.bf16.gmra.mrb[60].mxu1 %vm862_vm2, %v6015_v1  ;;  %5810 = vmatprep.mubr.msk.bf16.mxu0 %vm862_vm2, %v6016_v2 }
 0x10d   : > { %5890 = vmatprep.mubr.msk.bf16.mxu1 %vm862_vm2, %v6016_v2 }
 0x113   : > { %5811 = vmatmul.mubr.msk.bf16.gmra.mrb[64].mxu0 %vm862_vm2, %v6016_v2 }
 0x114   : > { %5891 = vmatmul.mubr.msk.bf16.gmra.mrb[64].mxu1 %vm862_vm2, %v6016_v2  ;;  %5812 = vmatprep.mubr.msk.bf16.mxu0 %vm862_vm2, %v6017_v3 }
 0x115   : > { %5892 = vmatprep.mubr.msk.bf16.mxu1 %vm862_vm2, %v6017_v3 }
 0x11b   : > { %5813 = vmatmul.mubr.msk.bf16.gmra.mrb[68].mxu0 %vm862_vm2, %v6017_v3 }
 0x11c   : > { %5893 = vmatmul.mubr.msk.bf16.gmra.mrb[68].mxu1 %vm862_vm2, %v6017_v3  ;;  %5814 = vmatprep.mubr.msk.bf16.mxu0 %vm862_vm2, %v6018_v4 }
 0x11d   : > { %5894 = vmatprep.mubr.msk.bf16.mxu1 %vm862_vm2, %v6018_v4 }
 0x123   : > { %5815 = vmatmul.mubr.msk.bf16.gmra.mrb[72].mxu0 %vm862_vm2, %v6018_v4 }
 0x124   : > { %5895 = vmatmul.mubr.msk.bf16.gmra.mrb[72].mxu1 %vm862_vm2, %v6018_v4  ;;  %5816 = vmatprep.mubr.msk.bf16.mxu0 %vm862_vm2, %v6019_v5 }
 0x125   : > { %5896 = vmatprep.mubr.msk.bf16.mxu1 %vm862_vm2, %v6019_v5 }
 0x12b   : > { %5817 = vmatmul.mubr.msk.bf16.gmra.mrb[76].mxu0 %vm862_vm2, %v6019_v5 }
 0x12c   : > { %5897 = vmatmul.mubr.msk.bf16.gmra.mrb[76].mxu1 %vm862_vm2, %v6019_v5  ;;  %5818 = vmatprep.mubr.msk.bf16.mxu0 %vm862_vm2, %v6020_v6 }
 0x12d   : > { %5898 = vmatprep.mubr.msk.bf16.mxu1 %vm862_vm2, %v6020_v6 }
 0x133   : > { %5819 = vmatmul.mubr.msk.bf16.gmra.mrb[80].mxu0 %vm862_vm2, %v6020_v6 }
 0x134   : > { %5899 = vmatmul.mubr.msk.bf16.gmra.mrb[80].mxu1 %vm862_vm2, %v6020_v6  ;;  %5820 = vmatprep.mubr.msk.bf16.mxu0 %vm862_vm2, %v6021_v7 }
 0x135   : > { %5900 = vmatprep.mubr.msk.bf16.mxu1 %vm862_vm2, %v6021_v7 }
 0x13b   : > { %5821 = vmatmul.mubr.msk.bf16.gmra.mrb[84].mxu0 %vm862_vm2, %v6021_v7 }
 0x13c   : > { %5901 = vmatmul.mubr.msk.bf16.gmra.mrb[84].mxu1 %vm862_vm2, %v6021_v7  ;;  %5822 = vmatprep.mubr.msk.bf16.mxu0 %vm862_vm2, %v6022_v8 }
 0x13d   : > { %5902 = vmatprep.mubr.msk.bf16.mxu1 %vm862_vm2, %v6022_v8 }
 0x143   : > { %5823 = vmatmul.mubr.msk.bf16.gmra.mrb[88].mxu0 %vm862_vm2, %v6022_v8 }
 0x144   : > { %5903 = vmatmul.mubr.msk.bf16.gmra.mrb[88].mxu1 %vm862_vm2, %v6022_v8  ;;  %5824 = vmatprep.mubr.msk.bf16.mxu0 %vm862_vm2, %v6023_v9 }
 0x145   : > { %5904 = vmatprep.mubr.msk.bf16.mxu1 %vm862_vm2, %v6023_v9 }
 0x14b   : > { %5825 = vmatmul.mubr.msk.bf16.gmra.mrb[92].mxu0 %vm862_vm2, %v6023_v9 }
 0x14c   : > { %5905 = vmatmul.mubr.msk.bf16.gmra.mrb[92].mxu1 %vm862_vm2, %v6023_v9  ;;  %5826 = vmatprep.mubr.msk.bf16.mxu0 %vm862_vm2, %v6024_v10 }
 0x14d   : > { %5906 = vmatprep.mubr.msk.bf16.mxu1 %vm862_vm2, %v6024_v10 }
 0x153   : > { %5827 = vmatmul.mubr.msk.bf16.gmra.mrb[96].mxu0 %vm862_vm2, %v6024_v10 }
 0x154   : > { %5907 = vmatmul.mubr.msk.bf16.gmra.mrb[96].mxu1 %vm862_vm2, %v6024_v10  ;;  %5828 = vmatprep.mubr.msk.bf16.mxu0 %vm862_vm2, %v6025_v61 }
 0x155   : > { %5908 = vmatprep.mubr.msk.bf16.mxu1 %vm862_vm2, %v6025_v61 }
 0x15b   : > { %5829 = vmatmul.mubr.msk.bf16.gmra.mrb[100].mxu0 %vm862_vm2, %v6025_v61 }
 0x15c   : > { %5909 = vmatmul.mubr.msk.bf16.gmra.mrb[100].mxu1 %vm862_vm2, %v6025_v61 }
 0x166   : > { %v7414_v11 = vpop.f32.mrb[0].mxu0 }
 0x167   : > { %v7416_v12 = vpop.f32.mrb[0].mxu1  ;;  %v7418_v13 = vpop.f32.mrb[1].mxu0 }
 0x168   : > { %v1825_v14 = vmax.f32 %v7414_v11, %v7418_v13  ;;  %v7422_v15 = vpop.f32.mrb[1].mxu1  ;;  %v7424_v16 = vpop.f32.mrb[2].mxu0 }
 0x169   : > { %v7426_v17 = vpop.f32.mrb[2].mxu1  ;;  %v7428_v18 = vpop.f32.mrb[3].mxu0 }
 0x16a   : > { %v1830_v19 = vmax.f32 %v7424_v16, %v7428_v18  ;;  %v7432_v20 = vpop.f32.mrb[3].mxu1  ;;  %v1826_v21 = vmax.f32 %v1825_v14, %v7416_v12 }
 0x16c   : > { %v1827_v22 = vmax.f32 %v1826_v21, %v7422_v15  ;;  %v1831_v23 = vmax.f32 %v1830_v19, %v7426_v17 }
 0x16e   : > { %1828 = vmax.xlane.f32.xlu0 %v1827_v22  ;;  %v7437_v24 = vpop.f32.mrb[4].mxu0  ;;  %v1832_v25 = vmax.f32 %v1831_v23, %v7432_v20 }
 0x16f   : > { %v7440_v26 = vpop.f32.mrb[4].mxu1  ;;  %v7442_v27 = vpop.f32.mrb[5].mxu0 }
 0x170   : > { %v1835_v28 = vmax.f32 %v7437_v24, %v7442_v27  ;;  %v7446_v29 = vpop.f32.mrb[5].mxu1  ;;  %v7448_v30 = vpop.f32.mrb[6].mxu0 }
 0x171   : > { %v7450_v31 = vpop.f32.mrb[6].mxu1  ;;  %v7452_v32 = vpop.f32.mrb[7].mxu0 }
 0x172   : > { %v1840_v33 = vmax.f32 %v7448_v30, %v7452_v32  ;;  %v7456_v34 = vpop.f32.mrb[7].mxu1  ;;  %1833 = vmax.xlane.f32.xlu0 %v1832_v25  ;;  %v1836_v35 = vmax.f32 %v1835_v28, %v7440_v26 }
 0x174   : > { %v1837_v36 = vmax.f32 %v1836_v35, %v7446_v29  ;;  %v1841_v37 = vmax.f32 %v1840_v33, %v7450_v31 }
 0x176   : > { %1838 = vmax.xlane.f32.xlu1 %v1837_v36  ;;  %v7461_v38 = vpop.f32.mrb[8].mxu0  ;;  %v1842_v39 = vmax.f32 %v1841_v37, %v7456_v34 }
 0x177   : > { %v7464_v40 = vpop.f32.mrb[8].mxu1  ;;  %v7466_v41 = vpop.f32.mrb[9].mxu0 }
 0x178   : > { %v1845_v42 = vmax.f32 %v7461_v38, %v7466_v41  ;;  %v7470_v43 = vpop.f32.mrb[9].mxu1  ;;  %v7472_v44 = vpop.f32.mrb[10].mxu0 }
 0x179   : > { %v7474_v45 = vpop.f32.mrb[10].mxu1  ;;  %v7476_v46 = vpop.f32.mrb[11].mxu0 }
 0x17a   : > { %v1850_v47 = vmax.f32 %v7472_v44, %v7476_v46  ;;  %v7480_v48 = vpop.f32.mrb[11].mxu1  ;;  %1843 = vmax.xlane.f32.xlu1 %v1842_v39  ;;  %v1846_v49 = vmax.f32 %v1845_v42, %v7464_v40 }
 0x17b   : > { %11622 = vst [vmem:[#allocation4_spill] sm:$0xff] %v7480_v48 }
 0x17c   : > { %v1847_v50 = vmax.f32 %v1846_v49, %v7470_v43  ;;  %v1851_v51 = vmax.f32 %v1850_v47, %v7474_v45 }
 0x17e   : > { %1848 = vmax.xlane.f32.xlu0 %v1847_v50  ;;  %v7485_v52 = vpop.f32.mrb[12].mxu0  ;;  %v1852_v53 = vmax.f32 %v1851_v51, %v7480_v48  ;;  %v11158_v50 = vmov 0   ;;  %v8245_v48 = vld [vmem:[#allocation2 + $0x68] sm:$0xff] }
 0x17f   : > { %11623 = vst [vmem:[#allocation5_spill] sm:$0xff] %v7485_v52  ;;  %v7488_v54 = vpop.f32.mrb[12].mxu1  ;;  %v7490_v55 = vpop.f32.mrb[13].mxu0  ;;  %5967 = vset.pattern.permute.xlu1 %v11158_v50  ;;  %5966 = vset.pattern.permute.xlu0 %v11158_v50  ;;  %11821 = vst [vmem:[#allocation202_spill] sm:$0xff] %v8245_v48 }
 0x180   : > { %11624 = vst [vmem:[#allocation6_spill] sm:$0xff] %v7488_v54  ;;  %11625 = vst [vmem:[#allocation7_spill] sm:$0xff] %v7490_v55  ;;  %v1855_v56 = vmax.f32 %v7485_v52, %v7490_v55  ;;  %v7494_v57 = vpop.f32.mrb[13].mxu1  ;;  %1853 = vmax.xlane.f32.xlu1 %v1852_v53  ;;  %v7496_v58 = vpop.f32.mrb[14].mxu0  ;;  %4001 = vmatprep.subr.bf16.mxu0 %v11158_v50  ;;  %v8205_v55 = vld [vmem:[#allocation2 + $0x58] sm:$0xff] }
 0x181   : > { %11626 = vst [vmem:[#allocation8_spill] sm:$0xff] %v7494_v57  ;;  %11627 = vst [vmem:[#allocation9_spill] sm:$0xff] %v7496_v58  ;;  %v7498_v59 = vpop.f32.mrb[14].mxu1  ;;  %v7500_v60 = vpop.f32.mrb[15].mxu0  ;;  %4290 = vmatprep.subr.bf16.mxu1 %v11158_v50 }
 0x182   : > { %11628 = vst [vmem:[#allocation10_spill] sm:$0xff] %v7498_v59  ;;  %11629 = vst [vmem:[#allocation11_spill] sm:$0xff] %v7500_v60  ;;  %v1860_v62 = vmax.f32 %v7496_v58, %v7500_v60  ;;  %v7507_v63 = vpop.f32.mrb[15].mxu1  ;;  %v1856_v0 = vmax.f32 %v1855_v56, %v7488_v54  ;;  %v6060_v60 = vld [vmem:[%s6916_s26 + $0x70] sm:$0xff]  }
 0x183   : > { %11630 = vst [vmem:[#allocation12_spill] sm:$0xff] %v7507_v63  ;;  %v6061_v58 = vld [vmem:[%s6916_s26 + $0xf0] sm:$0xff]   ;;  %11813 = vst [vmem:[#allocation194_spill] sm:$0xff] %v8205_v55 }
 0x184   : > { %v1857_v1 = vmax.f32 %v1856_v0, %v7494_v57  ;;  %v1861_v2 = vmax.f32 %v1860_v62, %v7498_v59  ;;  %v8188_v54 = vld [vmem:[#allocation2 + $0x50] sm:$0xff] }
 0x185   : > { %11809 = vst [vmem:[#allocation190_spill] sm:$0xff] %v8188_v54 }
 0x186   : > { %1858 = vmax.xlane.f32.xlu0 %v1857_v1  ;;  %v7516_v3 = vpop.f32.mrb[16].mxu0  ;;  %v1862_v4 = vmax.f32 %v1861_v2, %v7507_v63 }
 0x187   : > { %11631 = vst [vmem:[#allocation13_spill] sm:$0xff] %v7516_v3  ;;  %v7519_v5 = vpop.f32.mrb[16].mxu1  ;;  %v7521_v6 = vpop.f32.mrb[17].mxu0 }
 0x188   : > { %11632 = vst [vmem:[#allocation14_spill] sm:$0xff] %v7519_v5  ;;  %11633 = vst [vmem:[#allocation15_spill] sm:$0xff] %v7521_v6  ;;  %v1865_v7 = vmax.f32 %v7516_v3, %v7521_v6  ;;  %v7525_v8 = vpop.f32.mrb[17].mxu1  ;;  %1863 = vmax.xlane.f32.xlu1 %v1862_v4  ;;  %v7527_v9 = vpop.f32.mrb[18].mxu0 }
 0x189   : > { %11634 = vst [vmem:[#allocation16_spill] sm:$0xff] %v7525_v8  ;;  %11635 = vst [vmem:[#allocation17_spill] sm:$0xff] %v7527_v9  ;;  %v7529_v10 = vpop.f32.mrb[18].mxu1  ;;  %v7531_v14 = vpop.f32.mrb[19].mxu0 }
 0x18a   : > { %11636 = vst [vmem:[#allocation18_spill] sm:$0xff] %v7529_v10  ;;  %11637 = vst [vmem:[#allocation19_spill] sm:$0xff] %v7531_v14  ;;  %v1870_v19 = vmax.f32 %v7527_v9, %v7531_v14  ;;  %v7535_v21 = vpop.f32.mrb[19].mxu1  ;;  %v1866_v22 = vmax.f32 %v1865_v7, %v7519_v5  ;;  %v8148_v9 = vld [vmem:[#allocation2 + $0x48] sm:$0xff] }
 0x18b   : > { %11638 = vst [vmem:[#allocation20_spill] sm:$0xff] %v7535_v21  ;;  %11801 = vst [vmem:[#allocation182_spill] sm:$0xff] %v8148_v9 }
 0x18c   : > { %v1867_v23 = vmax.f32 %v1866_v22, %v7525_v8  ;;  %v1871_v25 = vmax.f32 %v1870_v19, %v7529_v10  ;;  %v8032_v8 = vld [vmem:[#allocation2 + $0x28] sm:$0xff] }
 0x18d   : > { %11776 = vst [vmem:[#allocation157_spill] sm:$0xff] %v8032_v8 }
 0x18e   : > { %1868 = vmax.xlane.f32.xlu0 %v1867_v23  ;;  %v7540_v28 = vpop.f32.mrb[20].mxu0  ;;  %v1872_v33 = vmax.f32 %v1871_v25, %v7535_v21  ;;  %v8093_v21 = vld [vmem:[#allocation2 + $0x38] sm:$0xff] }
 0x18f   : > { %11639 = vst [vmem:[#allocation21_spill] sm:$0xff] %v7540_v28  ;;  %v7543_v35 = vpop.f32.mrb[20].mxu1  ;;  %v7545_v36 = vpop.f32.mrb[21].mxu0  ;;  %11789 = vst [vmem:[#allocation170_spill] sm:$0xff] %v8093_v21 }
 0x190   : > { %11640 = vst [vmem:[#allocation22_spill] sm:$0xff] %v7543_v35  ;;  %11641 = vst [vmem:[#allocation23_spill] sm:$0xff] %v7545_v36  ;;  %v1875_v37 = vmax.f32 %v7540_v28, %v7545_v36  ;;  %v7549_v39 = vpop.f32.mrb[21].mxu1  ;;  %1873 = vmax.xlane.f32.xlu1 %v1872_v33  ;;  %v7551_v42 = vpop.f32.mrb[22].mxu0  ;;  %v6048_v28 = vld [vmem:[%s6916_s26 + $0xc8] sm:$0xff]  }
 0x191   : > { %11642 = vst [vmem:[#allocation24_spill] sm:$0xff] %v7549_v39  ;;  %11643 = vst [vmem:[#allocation25_spill] sm:$0xff] %v7551_v42  ;;  %v7553_v47 = vpop.f32.mrb[22].mxu1  ;;  %v7555_v49 = vpop.f32.mrb[23].mxu0 }
 0x192   : > { %11644 = vst [vmem:[#allocation26_spill] sm:$0xff] %v7553_v47  ;;  %11645 = vst [vmem:[#allocation27_spill] sm:$0xff] %v7555_v49  ;;  %v1880_v51 = vmax.f32 %v7551_v42, %v7555_v49  ;;  %v7561_v53 = vpop.f32.mrb[23].mxu1  ;;  %v1876_v56 = vmax.f32 %v1875_v37, %v7543_v35  ;;  %v7925_v35 = vld [vmem:[#allocation2 + $0x8] sm:$0xff] }
 0x193   : > { %11646 = vst [vmem:[#allocation28_spill] sm:$0xff] %v7561_v53  ;;  %11754 = vst [vmem:[#allocation135_spill] sm:$0xff] %v7925_v35  ;;  %v6049_v49 = vld [vmem:[%s11153_s0 + $0xe8] sm:$0xff]  }
 0x194   : > { %v1877_v61 = vmax.f32 %v1876_v56, %v7549_v39  ;;  %v1881_v62 = vmax.f32 %v1880_v51, %v7553_v47 }
 0x196   : > { %1878 = vmax.xlane.f32.xlu0 %v1877_v61  ;;  %v7568_v0 = vpop.f32.mrb[24].mxu0  ;;  %v1882_v1 = vmax.f32 %v1881_v62, %v7561_v53  ;;  %v8012_v53 = vld [vmem:[#allocation2 + $0x20] sm:$0xff] }
 0x197   : > { %11647 = vst [vmem:[#allocation29_spill] sm:$0xff] %v7568_v0  ;;  %v7571_v2 = vpop.f32.mrb[24].mxu1  ;;  %v7573_v4 = vpop.f32.mrb[25].mxu0  ;;  %11772 = vst [vmem:[#allocation153_spill] sm:$0xff] %v8012_v53 }
 0x198   : > { %11648 = vst [vmem:[#allocation30_spill] sm:$0xff] %v7571_v2  ;;  %11649 = vst [vmem:[#allocation31_spill] sm:$0xff] %v7573_v4  ;;  %v1885_v7 = vmax.f32 %v7568_v0, %v7573_v4  ;;  %v7577_v19 = vpop.f32.mrb[25].mxu1  ;;  %1883 = vmax.xlane.f32.xlu1 %v1882_v1  ;;  %v7579_v22 = vpop.f32.mrb[26].mxu0 }
 0x199   : > { %11650 = vst [vmem:[#allocation32_spill] sm:$0xff] %v7577_v19  ;;  %11651 = vst [vmem:[#allocation33_spill] sm:$0xff] %v7579_v22  ;;  %v7581_v23 = vpop.f32.mrb[26].mxu1  ;;  %v7583_v25 = vpop.f32.mrb[27].mxu0 }
 0x19a   : > { %11652 = vst [vmem:[#allocation34_spill] sm:$0xff] %v7581_v23  ;;  %11653 = vst [vmem:[#allocation35_spill] sm:$0xff] %v7583_v25  ;;  %v1890_v33 = vmax.f32 %v7579_v22, %v7583_v25  ;;  %v7587_v37 = vpop.f32.mrb[27].mxu1  ;;  %v1886_v51 = vmax.f32 %v1885_v7, %v7571_v2 }
 0x19b   : > { %11654 = vst [vmem:[#allocation36_spill] sm:$0xff] %v7587_v37 }
 0x19c   : > { %v1887_v56 = vmax.f32 %v1886_v51, %v7577_v19  ;;  %v1891_v61 = vmax.f32 %v1890_v33, %v7581_v23 }
 0x19e   : > { %1888 = vmax.xlane.f32.xlu0 %v1887_v56  ;;  %v7592_v62 = vpop.f32.mrb[28].mxu0  ;;  %v1892_v1 = vmax.f32 %v1891_v61, %v7587_v37 }
 0x19f   : > { %11655 = vst [vmem:[#allocation37_spill] sm:$0xff] %v7592_v62  ;;  %v7595_v50 = vpop.f32.mrb[28].mxu1  ;;  %v7597_v4 = vpop.f32.mrb[29].mxu0 }
 0x1a0   : > { %11656 = vst [vmem:[#allocation38_spill] sm:$0xff] %v7595_v50  ;;  %11657 = vst [vmem:[#allocation39_spill] sm:$0xff] %v7597_v4  ;;  %v1895_v0 = vmax.f32 %v7592_v62, %v7597_v4  ;;  %v7601_v25 = vpop.f32.mrb[29].mxu1  ;;  %1893 = vmax.xlane.f32.xlu1 %v1892_v1  ;;  %v7603_v7 = vpop.f32.mrb[30].mxu0 }
 0x1a1   : > { %11658 = vst [vmem:[#allocation40_spill] sm:$0xff] %v7601_v25  ;;  %11659 = vst [vmem:[#allocation41_spill] sm:$0xff] %v7603_v7  ;;  %v7605_v51 = vpop.f32.mrb[30].mxu1  ;;  %v7607_v33 = vpop.f32.mrb[31].mxu0 }
 0x1a2   : > { %11660 = vst [vmem:[#allocation42_spill] sm:$0xff] %v7605_v51  ;;  %11661 = vst [vmem:[#allocation43_spill] sm:$0xff] %v7607_v33  ;;  %v1900_v56 = vmax.f32 %v7603_v7, %v7607_v33  ;;  %v7611_v61 = vpop.f32.mrb[31].mxu1  ;;  %v1896_v19 = vmax.f32 %v1895_v0, %v7595_v50 }
 0x1a3   : > { %11662 = vst [vmem:[#allocation44_spill] sm:$0xff] %v7611_v61 }
 0x1a4   : > { %v1897_v2 = vmax.f32 %v1896_v19, %v7601_v25  ;;  %v1901_v4 = vmax.f32 %v1900_v56, %v7605_v51 }
 0x1a6   : > { %1898 = vmax.xlane.f32.xlu0 %v1897_v2  ;;  %v7616_v62 = vpop.f32.mrb[32].mxu0  ;;  %v1902_v1 = vmax.f32 %v1901_v4, %v7611_v61 }
 0x1a7   : > { %11663 = vst [vmem:[#allocation45_spill] sm:$0xff] %v7616_v62  ;;  %v7619_v37 = vpop.f32.mrb[32].mxu1  ;;  %v7621_v23 = vpop.f32.mrb[33].mxu0 }
 0x1a8   : > { %11664 = vst [vmem:[#allocation46_spill] sm:$0xff] %v7619_v37  ;;  %11665 = vst [vmem:[#allocation47_spill] sm:$0xff] %v7621_v23  ;;  %v1905_v33 = vmax.f32 %v7616_v62, %v7621_v23  ;;  %v7625_v7 = vpop.f32.mrb[33].mxu1  ;;  %1903 = vmax.xlane.f32.xlu1 %v1902_v1  ;;  %v7627_v0 = vpop.f32.mrb[34].mxu0 }
 0x1a9   : > { %11666 = vst [vmem:[#allocation48_spill] sm:$0xff] %v7625_v7  ;;  %11667 = vst [vmem:[#allocation49_spill] sm:$0xff] %v7627_v0  ;;  %v7629_v19 = vpop.f32.mrb[34].mxu1  ;;  %v7631_v56 = vpop.f32.mrb[35].mxu0 }
 0x1aa   : > { %11668 = vst [vmem:[#allocation50_spill] sm:$0xff] %v7629_v19  ;;  %11669 = vst [vmem:[#allocation51_spill] sm:$0xff] %v7631_v56  ;;  %v1910_v2 = vmax.f32 %v7627_v0, %v7631_v56  ;;  %v7635_v4 = vpop.f32.mrb[35].mxu1  ;;  %v1906_v25 = vmax.f32 %v1905_v33, %v7619_v37 }
 0x1ab   : > { %11670 = vst [vmem:[#allocation52_spill] sm:$0xff] %v7635_v4 }
 0x1ac   : > { %v1907_v50 = vmax.f32 %v1906_v25, %v7625_v7  ;;  %v1911_v23 = vmax.f32 %v1910_v2, %v7629_v19 }
 0x1ae   : > { %1908 = vmax.xlane.f32.xlu0 %v1907_v50  ;;  %v7640_v62 = vpop.f32.mrb[36].mxu0  ;;  %v1912_v1 = vmax.f32 %v1911_v23, %v7635_v4  ;;  %v6026_v4 = vld [vmem:[%s11153_s0 + $0xd0] sm:$0xff]  }
 0x1af   : > { %11671 = vst [vmem:[#allocation53_spill] sm:$0xff] %v7640_v62  ;;  %v7643_v61 = vpop.f32.mrb[36].mxu1  ;;  %v7645_v51 = vpop.f32.mrb[37].mxu0  ;;  %5830 = vmatprep.mubr.msk.bf16.mxu0 %vm862_vm2, %v6026_v4  ;;  %5910 = vmatprep.mubr.msk.bf16.mxu1 %vm862_vm2, %v6026_v4 }
 0x1b0   : > { %11672 = vst [vmem:[#allocation54_spill] sm:$0xff] %v7643_v61  ;;  %11673 = vst [vmem:[#allocation55_spill] sm:$0xff] %v7645_v51  ;;  %v1915_v56 = vmax.f32 %v7640_v62, %v7645_v51  ;;  %v7649_v0 = vpop.f32.mrb[37].mxu1  ;;  %1913 = vmax.xlane.f32.xlu1 %v1912_v1  ;;  %v7651_v33 = vpop.f32.mrb[38].mxu0  ;;  %5831 = vmatmul.mubr.msk.bf16.gmra.mrb[104].mxu0 %vm862_vm2, %v6026_v4 }
 0x1b1   : > { %11674 = vst [vmem:[#allocation56_spill] sm:$0xff] %v7649_v0  ;;  %11675 = vst [vmem:[#allocation57_spill] sm:$0xff] %v7651_v33  ;;  %v7653_v25 = vpop.f32.mrb[38].mxu1  ;;  %v7655_v2 = vpop.f32.mrb[39].mxu0  ;;  %5911 = vmatmul.mubr.msk.bf16.gmra.mrb[104].mxu1 %vm862_vm2, %v6026_v4 }
 0x1b2   : > { %11676 = vst [vmem:[#allocation58_spill] sm:$0xff] %v7653_v25  ;;  %11677 = vst [vmem:[#allocation59_spill] sm:$0xff] %v7655_v2  ;;  %v1920_v50 = vmax.f32 %v7651_v33, %v7655_v2  ;;  %v7659_v23 = vpop.f32.mrb[39].mxu1  ;;  %v1916_v7 = vmax.f32 %v1915_v56, %v7643_v61 }
 0x1b3   : > { %11678 = vst [vmem:[#allocation60_spill] sm:$0xff] %v7659_v23 }
 0x1b4   : > { %v1917_v37 = vmax.f32 %v1916_v7, %v7649_v0  ;;  %v1921_v51 = vmax.f32 %v1920_v50, %v7653_v25 }
 0x1b6   : > { %1918 = vmax.xlane.f32.xlu0 %v1917_v37  ;;  %v7664_v62 = vpop.f32.mrb[40].mxu0  ;;  %v1922_v1 = vmax.f32 %v1921_v51, %v7659_v23 }
 0x1b7   : > { %11679 = vst [vmem:[#allocation61_spill] sm:$0xff] %v7664_v62  ;;  %v7670_v19 = vpop.f32.mrb[40].mxu1  ;;  %v7672_v2 = vpop.f32.mrb[41].mxu0 }
 0x1b8   : > { %11680 = vst [vmem:[#allocation62_spill] sm:$0xff] %v7670_v19  ;;  %11681 = vst [vmem:[#allocation63_spill] sm:$0xff] %v7672_v2  ;;  %v1925_v56 = vmax.f32 %v7664_v62, %v7672_v2  ;;  %v7676_v61 = vpop.f32.mrb[41].mxu1  ;;  %1923 = vmax.xlane.f32.xlu1 %v1922_v1  ;;  %v7678_v7 = vpop.f32.mrb[42].mxu0 }
 0x1b9   : > { %11682 = vst [vmem:[#allocation64_spill] sm:$0xff] %v7676_v61  ;;  %11683 = vst [vmem:[#allocation65_spill] sm:$0xff] %v7678_v7  ;;  %v7681_v37 = vpop.f32.mrb[42].mxu1  ;;  %v7683_v51 = vpop.f32.mrb[43].mxu0 }
 0x1ba   : > { %11684 = vst [vmem:[#allocation66_spill] sm:$0xff] %v7681_v37  ;;  %11685 = vst [vmem:[#allocation67_spill] sm:$0xff] %v7683_v51  ;;  %v1930_v50 = vmax.f32 %v7678_v7, %v7683_v51  ;;  %v7689_v0 = vpop.f32.mrb[43].mxu1  ;;  %v1926_v2 = vmax.f32 %v1925_v56, %v7670_v19 }
 0x1bb   : > { %11686 = vst [vmem:[#allocation68_spill] sm:$0xff] %v7689_v0 }
 0x1bc   : > { %v1927_v1 = vmax.f32 %v1926_v2, %v7676_v61  ;;  %v1931_v62 = vmax.f32 %v1930_v50, %v7681_v37 }
 0x1be   : > { %1928 = vmax.xlane.f32.xlu0 %v1927_v1  ;;  %v7695_v23 = vpop.f32.mrb[44].mxu0  ;;  %v1932_v25 = vmax.f32 %v1931_v62, %v7689_v0 }
 0x1bf   : > { %11687 = vst [vmem:[#allocation69_spill] sm:$0xff] %v7695_v23  ;;  %v7698_v33 = vpop.f32.mrb[44].mxu1  ;;  %v7700_v22 = vpop.f32.mrb[45].mxu0 }
 0x1c0   : > { %11688 = vst [vmem:[#allocation70_spill] sm:$0xff] %v7698_v33  ;;  %11689 = vst [vmem:[#allocation71_spill] sm:$0xff] %v7700_v22  ;;  %v1935_v51 = vmax.f32 %v7695_v23, %v7700_v22  ;;  %v7704_v7 = vpop.f32.mrb[45].mxu1  ;;  %1933 = vmax.xlane.f32.xlu1 %v1932_v25  ;;  %v7706_v4 = vpop.f32.mrb[46].mxu0 }
 0x1c1   : > { %11690 = vst [vmem:[#allocation72_spill] sm:$0xff] %v7704_v7  ;;  %11691 = vst [vmem:[#allocation73_spill] sm:$0xff] %v7706_v4  ;;  %v7708_v2 = vpop.f32.mrb[46].mxu1  ;;  %v7710_v56 = vpop.f32.mrb[47].mxu0 }
 0x1c2   : > { %11692 = vst [vmem:[#allocation74_spill] sm:$0xff] %v7708_v2  ;;  %11693 = vst [vmem:[#allocation75_spill] sm:$0xff] %v7710_v56  ;;  %v1940_v50 = vmax.f32 %v7706_v4, %v7710_v56  ;;  %v7714_v62 = vpop.f32.mrb[47].mxu1  ;;  %v1936_v1 = vmax.f32 %v1935_v51, %v7698_v33 }
 0x1c3   : > { %11694 = vst [vmem:[#allocation76_spill] sm:$0xff] %v7714_v62 }
 0x1c4   : > { %v1937_v61 = vmax.f32 %v1936_v1, %v7704_v7  ;;  %v1941_v22 = vmax.f32 %v1940_v50, %v7708_v2 }
 0x1c6   : > { %1938 = vmax.xlane.f32.xlu0 %v1937_v61  ;;  %v7719_v23 = vpop.f32.mrb[48].mxu0  ;;  %v1942_v25 = vmax.f32 %v1941_v22, %v7714_v62 }
 0x1c7   : > { %11695 = vst [vmem:[#allocation77_spill] sm:$0xff] %v7719_v23  ;;  %v7722_v19 = vpop.f32.mrb[48].mxu1  ;;  %v7724_v0 = vpop.f32.mrb[49].mxu0 }
 0x1c8   : > { %11696 = vst [vmem:[#allocation78_spill] sm:$0xff] %v7722_v19  ;;  %11697 = vst [vmem:[#allocation79_spill] sm:$0xff] %v7724_v0  ;;  %v1945_v56 = vmax.f32 %v7719_v23, %v7724_v0  ;;  %v7728_v4 = vpop.f32.mrb[49].mxu1  ;;  %1943 = vmax.xlane.f32.xlu1 %v1942_v25  ;;  %v7730_v51 = vpop.f32.mrb[50].mxu0 }
 0x1c9   : > { %11698 = vst [vmem:[#allocation80_spill] sm:$0xff] %v7728_v4  ;;  %11699 = vst [vmem:[#allocation81_spill] sm:$0xff] %v7730_v51  ;;  %v7732_v1 = vpop.f32.mrb[50].mxu1  ;;  %v7734_v50 = vpop.f32.mrb[51].mxu0 }
 0x1ca   : > { %11700 = vst [vmem:[#allocation82_spill] sm:$0xff] %v7732_v1  ;;  %11701 = vst [vmem:[#allocation83_spill] sm:$0xff] %v7734_v50  ;;  %v1950_v61 = vmax.f32 %v7730_v51, %v7734_v50  ;;  %v7738_v22 = vpop.f32.mrb[51].mxu1  ;;  %v1946_v7 = vmax.f32 %v1945_v56, %v7722_v19 }
 0x1cb   : > { %11702 = vst [vmem:[#allocation84_spill] sm:$0xff] %v7738_v22 }
 0x1cc   : > { %v1947_v33 = vmax.f32 %v1946_v7, %v7728_v4  ;;  %v1951_v0 = vmax.f32 %v1950_v61, %v7732_v1 }
 0x1ce   : > { %1948 = vmax.xlane.f32.xlu0 %v1947_v33  ;;  %v7743_v23 = vpop.f32.mrb[52].mxu0  ;;  %v1952_v25 = vmax.f32 %v1951_v0, %v7738_v22 }
 0x1cf   : > { %11703 = vst [vmem:[#allocation85_spill] sm:$0xff] %v7743_v23  ;;  %v7746_v62 = vpop.f32.mrb[52].mxu1  ;;  %v7748_v2 = vpop.f32.mrb[53].mxu0 }
 0x1d0   : > { %11704 = vst [vmem:[#allocation86_spill] sm:$0xff] %v7746_v62  ;;  %11705 = vst [vmem:[#allocation87_spill] sm:$0xff] %v7748_v2  ;;  %v1955_v50 = vmax.f32 %v7743_v23, %v7748_v2  ;;  %v7752_v51 = vpop.f32.mrb[53].mxu1  ;;  %1953 = vmax.xlane.f32.xlu1 %v1952_v25  ;;  %v7754_v56 = vpop.f32.mrb[54].mxu0 }
 0x1d1   : > { %11706 = vst [vmem:[#allocation88_spill] sm:$0xff] %v7752_v51  ;;  %11707 = vst [vmem:[#allocation89_spill] sm:$0xff] %v7754_v56  ;;  %v7756_v7 = vpop.f32.mrb[54].mxu1  ;;  %v7758_v61 = vpop.f32.mrb[55].mxu0 }
 0x1d2   : > { %11708 = vst [vmem:[#allocation90_spill] sm:$0xff] %v7756_v7  ;;  %11709 = vst [vmem:[#allocation91_spill] sm:$0xff] %v7758_v61  ;;  %v1960_v33 = vmax.f32 %v7754_v56, %v7758_v61  ;;  %v7762_v0 = vpop.f32.mrb[55].mxu1  ;;  %v1956_v4 = vmax.f32 %v1955_v50, %v7746_v62 }
 0x1d3   : > { %11710 = vst [vmem:[#allocation92_spill] sm:$0xff] %v7762_v0 }
 0x1d4   : > { %v1957_v19 = vmax.f32 %v1956_v4, %v7752_v51  ;;  %v1961_v2 = vmax.f32 %v1960_v33, %v7756_v7 }
 0x1d6   : > { %1958 = vmax.xlane.f32.xlu0 %v1957_v19  ;;  %v7767_v23 = vpop.f32.mrb[56].mxu0  ;;  %v1962_v25 = vmax.f32 %v1961_v2, %v7762_v0 }
 0x1d7   : > { %11711 = vst [vmem:[#allocation93_spill] sm:$0xff] %v7767_v23  ;;  %v7770_v22 = vpop.f32.mrb[56].mxu1  ;;  %v7772_v1 = vpop.f32.mrb[57].mxu0 }
 0x1d8   : > { %11712 = vst [vmem:[#allocation94_spill] sm:$0xff] %v7770_v22  ;;  %11713 = vst [vmem:[#allocation95_spill] sm:$0xff] %v7772_v1  ;;  %v1965_v61 = vmax.f32 %v7767_v23, %v7772_v1  ;;  %v7776_v56 = vpop.f32.mrb[57].mxu1  ;;  %1963 = vmax.xlane.f32.xlu1 %v1962_v25  ;;  %v7778_v50 = vpop.f32.mrb[58].mxu0 }
 0x1d9   : > { %11714 = vst [vmem:[#allocation96_spill] sm:$0xff] %v7776_v56  ;;  %11715 = vst [vmem:[#allocation97_spill] sm:$0xff] %v7778_v50  ;;  %v7780_v4 = vpop.f32.mrb[58].mxu1  ;;  %v7782_v33 = vpop.f32.mrb[59].mxu0 }
 0x1da   : > { %11716 = vst [vmem:[#allocation98_spill] sm:$0xff] %v7780_v4  ;;  %11717 = vst [vmem:[#allocation99_spill] sm:$0xff] %v7782_v33  ;;  %v1970_v19 = vmax.f32 %v7778_v50, %v7782_v33  ;;  %v7786_v2 = vpop.f32.mrb[59].mxu1  ;;  %v1966_v51 = vmax.f32 %v1965_v61, %v7770_v22 }
 0x1db   : > { %11718 = vst [vmem:[#allocation100_spill] sm:$0xff] %v7786_v2 }
 0x1dc   : > { %v1967_v62 = vmax.f32 %v1966_v51, %v7776_v56  ;;  %v1971_v1 = vmax.f32 %v1970_v19, %v7780_v4 }
 0x1de   : > { %1968 = vmax.xlane.f32.xlu0 %v1967_v62  ;;  %v7791_v25 = vpop.f32.mrb[60].mxu0  ;;  %v1972_v23 = vmax.f32 %v1971_v1, %v7786_v2 }
 0x1df   : > { %11719 = vst [vmem:[#allocation101_spill] sm:$0xff] %v7791_v25  ;;  %v7794_v0 = vpop.f32.mrb[60].mxu1  ;;  %v7796_v7 = vpop.f32.mrb[61].mxu0 }
 0x1e0   : > { %11720 = vst [vmem:[#allocation102_spill] sm:$0xff] %v7794_v0  ;;  %11721 = vst [vmem:[#allocation103_spill] sm:$0xff] %v7796_v7  ;;  %v1975_v33 = vmax.f32 %v7791_v25, %v7796_v7  ;;  %v7800_v50 = vpop.f32.mrb[61].mxu1  ;;  %1973 = vmax.xlane.f32.xlu1 %v1972_v23  ;;  %v7802_v51 = vpop.f32.mrb[62].mxu0  ;;  %v6027_v25 = vld [vmem:[%s6916_s26] sm:$0xff]  }
 0x1e1   : > { %11722 = vst [vmem:[#allocation104_spill] sm:$0xff] %v7800_v50  ;;  %11723 = vst [vmem:[#allocation105_spill] sm:$0xff] %v7802_v51  ;;  %v7804_v61 = vpop.f32.mrb[62].mxu1  ;;  %v7806_v62 = vpop.f32.mrb[63].mxu0  ;;  %v6028_v23 = vld [vmem:[%s6916_s26 + $0x80] sm:$0xff]   ;;  %4002 = vmatpush1.bf16.msra.mxu0 %v6027_v25 }
 0x1e2   : > { %11724 = vst [vmem:[#allocation106_spill] sm:$0xff] %v7804_v61  ;;  %11725 = vst [vmem:[#allocation107_spill] sm:$0xff] %v7806_v62  ;;  %v1980_v19 = vmax.f32 %v7802_v51, %v7806_v62  ;;  %v7810_v1 = vpop.f32.mrb[63].mxu1  ;;  %v1976_v56 = vmax.f32 %v1975_v33, %v7794_v0  ;;  %4291 = vmatpush1.bf16.msra.mxu1 %v6028_v23  ;;  %v11730_v33 = vmov 0   ;;  %v6032_v51 = vld [vmem:[%s6916_s26 + $0x10] sm:$0xff]  }
 0x1e3   : > { %11726 = vst [vmem:[#allocation108_spill] sm:$0xff] %v7810_v1  ;;  %4003 = vmatprep.subr.bf16.mxu0 %v11730_v33  ;;  %4292 = vmatprep.subr.bf16.mxu1 %v11730_v33 }
 0x1e4   : > { %v1977_v22 = vmax.f32 %v1976_v56, %v7800_v50  ;;  %v1981_v7 = vmax.f32 %v1980_v19, %v7804_v61 }
 0x1e6   : > { %1978 = vmax.xlane.f32.xlu0 %v1977_v22  ;;  %v7817_v2 = vpop.f32.mrb[64].mxu0  ;;  %v1982_v4 = vmax.f32 %v1981_v7, %v7810_v1  ;;  %v6029_v22 = vld [vmem:[%s6916_s26 + $0x8] sm:$0xff]  }
 0x1e7   : > { %11727 = vst [vmem:[#allocation109_spill] sm:$0xff] %v7817_v2  ;;  %v7820_v37 = vpop.f32.mrb[64].mxu1  ;;  %v7822_v62 = vpop.f32.mrb[65].mxu0  ;;  %v6030_v7 = vld [vmem:[%s6916_s26 + $0x88] sm:$0xff]   ;;  %4004 = vmatpush1.bf16.msra.mxu0 %v6029_v22 }
 0x1e8   : > { %11728 = vst [vmem:[#allocation110_spill] sm:$0xff] %v7820_v37  ;;  %11729 = vst [vmem:[#allocation111_spill] sm:$0xff] %v7822_v62  ;;  %v1985_v56 = vmax.f32 %v7817_v2, %v7822_v62  ;;  %v7827_v19 = vpop.f32.mrb[65].mxu1  ;;  %1983 = vmax.xlane.f32.xlu1 %v1982_v4  ;;  %v7829_v50 = vpop.f32.mrb[66].mxu0  ;;  %4293 = vmatpush1.bf16.msra.mxu1 %v6030_v7  ;;  %v6031_v4 = vld [vmem:[%s11153_s0 + $0xd8] sm:$0xff]  }
 0x1e9   : > { %11731 = vst [vmem:[#allocation112_spill] sm:$0xff] %v7827_v19  ;;  %11732 = vst [vmem:[#allocation113_spill] sm:$0xff] %v7829_v50  ;;  %v7834_v25 = vpop.f32.mrb[66].mxu1  ;;  %v7836_v0 = vpop.f32.mrb[67].mxu0  ;;  %4005 = vmatprep.subr.bf16.mxu0 %v11730_v33  ;;  %4294 = vmatprep.subr.bf16.mxu1 %v11730_v33 }
 0x1ea   : > { %11733 = vst [vmem:[#allocation114_spill] sm:$0xff] %v7834_v25  ;;  %11734 = vst [vmem:[#allocation115_spill] sm:$0xff] %v7836_v0  ;;  %v1990_v23 = vmax.f32 %v7829_v50, %v7836_v0  ;;  %v7840_v1 = vpop.f32.mrb[67].mxu1  ;;  %v1986_v62 = vmax.f32 %v1985_v56, %v7820_v37  ;;  %v6033_v0 = vld [vmem:[%s6916_s26 + $0x90] sm:$0xff]   ;;  %5832 = vmatprep.mubr.msk.bf16.mxu0 %vm862_vm2, %v6031_v4  ;;  %5912 = vmatprep.mubr.msk.bf16.mxu1 %vm862_vm2, %v6031_v4  ;;  %v6037_v50 = vld [vmem:[%s6916_s26 + $0xa0] sm:$0xff]  }
 0x1eb   : > { %11735 = vst [vmem:[#allocation116_spill] sm:$0xff] %v7840_v1  ;;  %5833 = vmatmul.mubr.msk.bf16.gmra.mrb[108].mxu0 %vm862_vm2, %v6031_v4  ;;  %5913 = vmatmul.mubr.msk.bf16.gmra.mrb[108].mxu1 %vm862_vm2, %v6031_v4 }
 0x1ec   : > { %v1987_v2 = vmax.f32 %v1986_v62, %v7827_v19  ;;  %v1991_v61 = vmax.f32 %v1990_v23, %v7834_v25  ;;  %4006 = vmatpush1.bf16.msra.mxu0 %v6032_v51  ;;  %4295 = vmatpush1.bf16.msra.mxu1 %v6033_v0 }
 0x1ed   : > { %4007 = vmatprep.subr.bf16.mxu0 %v11730_v33  ;;  %4296 = vmatprep.subr.bf16.mxu1 %v11730_v33 }
 0x1ee   : > { %1988 = vmax.xlane.f32.xlu0 %v1987_v2  ;;  %v7854_v56 = vpop.f32.mrb[68].mxu0  ;;  %v1992_v22 = vmax.f32 %v1991_v61, %v7840_v1  ;;  %v6034_v2 = vld [vmem:[%s6916_s26 + $0x18] sm:$0xff]  }
 0x1ef   : > { %11736 = vst [vmem:[#allocation117_spill] sm:$0xff] %v7854_v56  ;;  %v7858_v62 = vpop.f32.mrb[68].mxu1  ;;  %v7860_v7 = vpop.f32.mrb[69].mxu0  ;;  %v6035_v61 = vld [vmem:[%s6916_s26 + $0x98] sm:$0xff]  }
 0x1f0   : > { %11737 = vst [vmem:[#allocation118_spill] sm:$0xff] %v7858_v62  ;;  %11738 = vst [vmem:[#allocation119_spill] sm:$0xff] %v7860_v7  ;;  %v1995_v23 = vmax.f32 %v7854_v56, %v7860_v7  ;;  %v7864_v19 = vpop.f32.mrb[69].mxu1  ;;  %1993 = vmax.xlane.f32.xlu1 %v1992_v22  ;;  %v7866_v37 = vpop.f32.mrb[70].mxu0  ;;  %4008 = vmatpush1.bf16.msra.mxu0 %v6034_v2  ;;  %v6036_v56 = vld [vmem:[%s6916_s26 + $0x20] sm:$0xff]  }
 0x1f1   : > { %11739 = vst [vmem:[#allocation120_spill] sm:$0xff] %v7864_v19  ;;  %11740 = vst [vmem:[#allocation121_spill] sm:$0xff] %v7866_v37  ;;  %v7871_v1 = vpop.f32.mrb[70].mxu1  ;;  %v7873_v25 = vpop.f32.mrb[71].mxu0  ;;  %4297 = vmatpush1.bf16.msra.mxu1 %v6035_v61  ;;  %4009 = vmatprep.subr.bf16.mxu0 %v11730_v33 }
 0x1f2   : > { %11741 = vst [vmem:[#allocation122_spill] sm:$0xff] %v7871_v1  ;;  %11742 = vst [vmem:[#allocation123_spill] sm:$0xff] %v7873_v25  ;;  %v2000_v0 = vmax.f32 %v7866_v37, %v7873_v25  ;;  %v7879_v51 = vpop.f32.mrb[71].mxu1  ;;  %v1996_v22 = vmax.f32 %v1995_v23, %v7858_v62  ;;  %4298 = vmatprep.subr.bf16.mxu1 %v11730_v33 }
 0x1f3   : > { %11743 = vst [vmem:[#allocation124_spill] sm:$0xff] %v7879_v51 }
 0x1f4   : > { %v1997_v4 = vmax.f32 %v1996_v22, %v7864_v19  ;;  %v2001_v7 = vmax.f32 %v2000_v0, %v7871_v1  ;;  %4010 = vmatpush1.bf16.msra.mxu0 %v6036_v56  ;;  %v6039_v19 = vld [vmem:[%s6916_s26 + $0xa8] sm:$0xff]   ;;  %v7908_v56 = vld [vmem:[#allocation2] sm:$0xff] }
 0x1f5   : > { %4299 = vmatpush1.bf16.msra.mxu1 %v6037_v50  ;;  %4011 = vmatprep.subr.bf16.mxu0 %v11730_v33  ;;  %11751 = vst [vmem:[#allocation132_spill] sm:$0xff] %v7908_v56 }
 0x1f6   : > { %1998 = vmax.xlane.f32.xlu0 %v1997_v4  ;;  %v7888_v25 = vpop.f32.mrb[72].mxu0  ;;  %v2002_v37 = vmax.f32 %v2001_v7, %v7879_v51  ;;  %v6038_v4 = vld [vmem:[%s6916_s26 + $0x28] sm:$0xff]   ;;  %4300 = vmatprep.subr.bf16.mxu1 %v11730_v33 }
 0x1f7   : > { %11744 = vst [vmem:[#allocation125_spill] sm:$0xff] %v7888_v25  ;;  %v7891_v23 = vpop.f32.mrb[72].mxu1  ;;  %v7893_v2 = vpop.f32.mrb[73].mxu0 }
 0x1f8   : > { %11745 = vst [vmem:[#allocation126_spill] sm:$0xff] %v7891_v23  ;;  %11746 = vst [vmem:[#allocation127_spill] sm:$0xff] %v7893_v2  ;;  %v2005_v61 = vmax.f32 %v7888_v25, %v7893_v2  ;;  %v7897_v0 = vpop.f32.mrb[73].mxu1  ;;  %2003 = vmax.xlane.f32.xlu1 %v2002_v37  ;;  %v7899_v22 = vpop.f32.mrb[74].mxu0  ;;  %4012 = vmatpush1.bf16.msra.mxu0 %v6038_v4 }
 0x1f9   : > { %11747 = vst [vmem:[#allocation128_spill] sm:$0xff] %v7897_v0  ;;  %11748 = vst [vmem:[#allocation129_spill] sm:$0xff] %v7899_v22  ;;  %v7904_v62 = vpop.f32.mrb[74].mxu1  ;;  %v7906_v7 = vpop.f32.mrb[75].mxu0  ;;  %4301 = vmatpush1.bf16.msra.mxu1 %v6039_v19  ;;  %4013 = vmatprep.subr.bf16.mxu0 %v11730_v33 }
 0x1fa   : > { %11749 = vst [vmem:[#allocation130_spill] sm:$0xff] %v7904_v62  ;;  %11750 = vst [vmem:[#allocation131_spill] sm:$0xff] %v7906_v7  ;;  %v2010_v50 = vmax.f32 %v7899_v22, %v7906_v7  ;;  %v7913_v37 = vpop.f32.mrb[75].mxu1  ;;  %v2006_v2 = vmax.f32 %v2005_v61, %v7891_v23  ;;  %4302 = vmatprep.subr.bf16.mxu1 %v11730_v33  ;;  %v6040_v7 = vld [vmem:[%s6916_s26 + $0x30] sm:$0xff]  }
 0x1fb   : > { %11752 = vst [vmem:[#allocation133_spill] sm:$0xff] %v7913_v37  ;;  %v1829_v25 = vpop.xlane.xlu0 %1828  ;;  %v6041_v22 = vld [vmem:[%s6916_s26 + $0xb0] sm:$0xff]  }
 0x1fc   : > { %v7917_v51 = vmax.f32 %v7908_v56, %v1829_v25  ;;  %v2007_v1 = vmax.f32 %v2006_v2, %v7897_v0  ;;  %v2011_v39 = vmax.f32 %v2010_v50, %v7904_v62  ;;  %4014 = vmatpush1.bf16.msra.mxu0 %v6040_v7  ;;  %v7948_v23 = vld [vmem:[#allocation2 + $0x10] sm:$0xff] }
 0x1fd   : > { %4303 = vmatpush1.bf16.msra.mxu1 %v6041_v22  ;;  %4015 = vmatprep.subr.bf16.mxu0 %v11730_v33  ;;  %11760 = vst [vmem:[#allocation141_spill] sm:$0xff] %v7948_v23 }
 0x1fe   : > { %11753 = vst [vmem:[#allocation134_spill] sm:$0xff] %v7917_v51  ;;  %4709 = vst.msk [vmem:[#allocation2] sm:$0xff] %vm4708_vm3, %v7917_v51  ;;  %2008 = vmax.xlane.f32.xlu0 %v2007_v1  ;;  %v2012_v19 = vmax.f32 %v2011_v39, %v7913_v37  ;;  %v7932_v25 = vpop.f32.mrb[76].mxu0  ;;  %v6042_v39 = vld [vmem:[%s6916_s26 + $0x38] sm:$0xff]   ;;  %4304 = vmatprep.subr.bf16.mxu1 %v11730_v33 }
 0x1ff   : > { %11755 = vst [vmem:[#allocation136_spill] sm:$0xff] %v7932_v25  ;;  %v1834_v2 = vpop.xlane.xlu0 %1833  ;;  %v7934_v4 = vpop.f32.mrb[77].mxu0  ;;  %v6043_v1 = vld [vmem:[%s6916_s26 + $0xb8] sm:$0xff]  }
 0x200   : > { %11756 = vst [vmem:[#allocation137_spill] sm:$0xff] %v7934_v4  ;;  %v7937_v50 = vmax.f32 %v7925_v35, %v1834_v2  ;;  %2013 = vmax.xlane.f32.xlu1 %v2012_v19  ;;  %v2015_v61 = vmax.f32 %v7932_v25, %v7934_v4  ;;  %v7941_v56 = vpop.f32.mrb[78].mxu0  ;;  %v7943_v0 = vpop.f32.mrb[76].mxu1  ;;  %v6044_v25 = vld [vmem:[%s11153_s0 + $0xe0] sm:$0xff]   ;;  %4016 = vmatpush1.bf16.msra.mxu0 %v6042_v39 }
 0x201   : > { %11758 = vst [vmem:[#allocation139_spill] sm:$0xff] %v7941_v56  ;;  %11759 = vst [vmem:[#allocation140_spill] sm:$0xff] %v7943_v0  ;;  %v7950_v37 = vpop.f32.mrb[79].mxu0  ;;  %v7952_v22 = vpop.f32.mrb[77].mxu1  ;;  %4305 = vmatpush1.bf16.msra.mxu1 %v6043_v1  ;;  %5834 = vmatprep.mubr.msk.bf16.mxu0 %vm862_vm2, %v6044_v25  ;;  %v6047_v1 = vld [vmem:[%s6916_s26 + $0x48] sm:$0xff]  }
 0x202   : > { %11757 = vst [vmem:[#allocation138_spill] sm:$0xff] %v7937_v50  ;;  %11761 = vst [vmem:[#allocation142_spill] sm:$0xff] %v7950_v37  ;;  %v2020_v19 = vmax.f32 %v7941_v56, %v7950_v37  ;;  %v7962_v2 = vmax.f32 %v2015_v61, %v7943_v0  ;;  %v7964_v4 = vpop.f32.mrb[78].mxu1  ;;  %5914 = vmatprep.mubr.msk.bf16.mxu1 %vm862_vm2, %v6044_v25  ;;  %v6045_v37 = vld [vmem:[%s6916_s26 + $0x40] sm:$0xff]   ;;  %v7983_v0 = vld [vmem:[#allocation2 + $0x18] sm:$0xff]  ;;  %5835 = vmatmul.mubr.msk.bf16.gmra.mrb[112].mxu0 %vm862_vm2, %v6044_v25 }
 0x203   : > { %11762 = vst [vmem:[#allocation143_spill] sm:$0xff] %v7952_v22  ;;  %4710 = vst.msk [vmem:[#allocation2 + $0x8] sm:$0xff] %vm4708_vm3, %v7937_v50  ;;  %v1839_v62 = vpop.xlane.xlu1 %1838  ;;  %v7969_v36 = vpop.f32.mrb[79].mxu1  ;;  %v6046_v56 = vld [vmem:[%s6916_s26 + $0xc0] sm:$0xff]   ;;  %5915 = vmatmul.mubr.msk.bf16.gmra.mrb[112].mxu1 %vm862_vm2, %v6044_v25  ;;  %4017 = vmatprep.subr.bf16.mxu0 %v11730_v33 }
 0x204   : > { %11763 = vst [vmem:[#allocation144_spill] sm:$0xff] %v7964_v4  ;;  %11764 = vst [vmem:[#allocation145_spill] sm:$0xff] %v7969_v36  ;;  %v7972_v7 = vmax.f32 %v7948_v23, %v1839_v62  ;;  %v7975_v35 = vmax.f32 %v2020_v19, %v7964_v4  ;;  %4306 = vmatprep.subr.bf16.mxu1 %v11730_v33  ;;  %4018 = vmatpush1.bf16.msra.mxu0 %v6045_v37 }
 0x205   : > { %11766 = vst [vmem:[#allocation147_spill] sm:$0xff] %v7983_v0  ;;  %4307 = vmatpush1.bf16.msra.mxu1 %v6046_v56  ;;  %4019 = vmatprep.subr.bf16.mxu0 %v11730_v33 }
 0x206   : > { %11765 = vst [vmem:[#allocation146_spill] sm:$0xff] %v7972_v7  ;;  %4711 = vst.msk [vmem:[#allocation2 + $0x10] sm:$0xff] %vm4708_vm3, %v7972_v7  ;;  %v7991_v39 = vpop.f32.mrb[80].mxu0  ;;  %4308 = vmatprep.subr.bf16.mxu1 %v11730_v33  ;;  %5836 = vmatprep.mubr.msk.bf16.mxu0 %vm862_vm2, %v6049_v49 }
 0x207   : > { %11767 = vst [vmem:[#allocation148_spill] sm:$0xff] %v7991_v39  ;;  %v1844_v19 = vpop.xlane.xlu1 %1843  ;;  %v7997_v61 = vpop.f32.mrb[81].mxu0  ;;  %5916 = vmatprep.mubr.msk.bf16.mxu1 %vm862_vm2, %v6049_v49 }
 0x208   : > { %11768 = vst [vmem:[#allocation149_spill] sm:$0xff] %v7997_v61  ;;  %v8000_v25 = vmax.f32 %v7983_v0, %v1844_v19  ;;  %v2025_v62 = vmax.f32 %v7991_v39, %v7997_v61  ;;  %v8004_v23 = vpop.f32.mrb[82].mxu0  ;;  %v8006_v4 = vpop.f32.mrb[80].mxu1  ;;  %4020 = vmatpush1.bf16.msra.mxu0 %v6047_v1  ;;  %v6052_v1 = vld [vmem:[%s6916_s26 + $0x58] sm:$0xff]  }
 0x209   : > { %11770 = vst [vmem:[#allocation151_spill] sm:$0xff] %v8004_v23  ;;  %11771 = vst [vmem:[#allocation152_spill] sm:$0xff] %v8006_v4  ;;  %v8014_v37 = vpop.f32.mrb[83].mxu0  ;;  %v8016_v56 = vpop.f32.mrb[81].mxu1  ;;  %4309 = vmatpush1.bf16.msra.mxu1 %v6048_v28  ;;  %4021 = vmatprep.subr.bf16.mxu0 %v11730_v33 }
 0x20a   : > { %11769 = vst [vmem:[#allocation150_spill] sm:$0xff] %v8000_v25  ;;  %11773 = vst [vmem:[#allocation154_spill] sm:$0xff] %v8014_v37  ;;  %v2030_v61 = vmax.f32 %v8004_v23, %v8014_v37  ;;  %v8025_v39 = vmax.f32 %v2025_v62, %v8006_v4  ;;  %v8027_v47 = vpop.f32.mrb[82].mxu1  ;;  %v6050_v23 = vld [vmem:[%s6916_s26 + $0x50] sm:$0xff]   ;;  %5837 = vmatmul.mubr.msk.bf16.gmra.mrb[116].mxu0 %vm862_vm2, %v6049_v49  ;;  %4310 = vmatprep.subr.bf16.mxu1 %v11730_v33 }
 0x20b   : > { %11774 = vst [vmem:[#allocation155_spill] sm:$0xff] %v8016_v56  ;;  %4712 = vst.msk [vmem:[#allocation2 + $0x18] sm:$0xff] %vm4708_vm3, %v8000_v25  ;;  %v1849_v42 = vpop.xlane.xlu0 %1848  ;;  %v8034_v19 = vpop.f32.mrb[83].mxu1  ;;  %v6051_v4 = vld [vmem:[%s6916_s26 + $0xd0] sm:$0xff]   ;;  %5917 = vmatmul.mubr.msk.bf16.gmra.mrb[116].mxu1 %vm862_vm2, %v6049_v49 }
 0x20c   : > { %11775 = vst [vmem:[#allocation156_spill] sm:$0xff] %v8027_v47  ;;  %11777 = vst [vmem:[#allocation158_spill] sm:$0xff] %v8034_v19  ;;  %v8037_v0 = vmax.f32 %v8012_v53, %v1849_v42  ;;  %v8040_v37 = vmax.f32 %v2030_v61, %v8027_v47  ;;  %4022 = vmatpush1.bf16.msra.mxu0 %v6050_v23  ;;  %v6053_v47 = vld [vmem:[%s6916_s26 + $0xd8] sm:$0xff]   ;;  %v8080_v23 = vld [vmem:[#allocation2 + $0x30] sm:$0xff] }
 0x20d   : > { %v1854_v5 = vpop.xlane.xlu1 %1853  ;;  %4311 = vmatpush1.bf16.msra.mxu1 %v6051_v4  ;;  %4023 = vmatprep.subr.bf16.mxu0 %v11730_v33  ;;  %11785 = vst [vmem:[#allocation166_spill] sm:$0xff] %v8080_v23 }
 0x20e   : > { %11778 = vst [vmem:[#allocation159_spill] sm:$0xff] %v8037_v0  ;;  %4713 = vst.msk [vmem:[#allocation2 + $0x20] sm:$0xff] %vm4708_vm3, %v8037_v0  ;;  %v8055_v42 = vmax.f32 %v8032_v8, %v1854_v5  ;;  %v8057_v61 = vpop.f32.mrb[84].mxu0  ;;  %4312 = vmatprep.subr.bf16.mxu1 %v11730_v33 }
 0x20f   : > { %11780 = vst [vmem:[#allocation161_spill] sm:$0xff] %v8057_v61  ;;  %v8063_v49 = vpop.f32.mrb[85].mxu0  ;;  %v8065_v28 = vpop.f32.mrb[84].mxu1 }
 0x210   : > { %11779 = vst [vmem:[#allocation160_spill] sm:$0xff] %v8055_v42  ;;  %11781 = vst [vmem:[#allocation162_spill] sm:$0xff] %v8063_v49  ;;  %v2035_v5 = vmax.f32 %v8057_v61, %v8063_v49  ;;  %v8071_v62 = vpop.f32.mrb[86].mxu0  ;;  %v8073_v53 = vpop.f32.mrb[85].mxu1  ;;  %4024 = vmatpush1.bf16.msra.mxu0 %v6052_v1 }
 0x211   : > { %11782 = vst [vmem:[#allocation163_spill] sm:$0xff] %v8065_v28  ;;  %4714 = vst.msk [vmem:[#allocation2 + $0x28] sm:$0xff] %vm4708_vm3, %v8055_v42  ;;  %2344 = vperm.xlu1 %5967, %v7937_v50   ;;  %v8082_v4 = vpop.f32.mrb[87].mxu0  ;;  %v8084_v8 = vpop.f32.mrb[86].mxu1  ;;  %4313 = vmatpush1.bf16.msra.mxu1 %v6053_v47 }
 0x212   : > { %11783 = vst [vmem:[#allocation164_spill] sm:$0xff] %v8071_v62  ;;  %11784 = vst [vmem:[#allocation165_spill] sm:$0xff] %v8073_v53  ;;  %v2040_v49 = vmax.f32 %v8071_v62, %v8082_v4  ;;  %v8089_v61 = vmax.f32 %v2035_v5, %v8065_v28  ;;  %v8091_v6 = vpop.f32.mrb[87].mxu1  ;;  %v6054_v5 = vld [vmem:[%s11153_s0 + $0xf0] sm:$0xff]   ;;  %4025 = vmatprep.subr.bf16.mxu0 %v11730_v33  ;;  %4314 = vmatprep.subr.bf16.mxu1 %v11730_v33 }
 0x213   : > { %11786 = vst [vmem:[#allocation167_spill] sm:$0xff] %v8082_v4  ;;  %11787 = vst [vmem:[#allocation168_spill] sm:$0xff] %v8084_v8  ;;  %v1859_v3 = vpop.xlane.xlu0 %1858  ;;  %5838 = vmatprep.mubr.msk.bf16.mxu0 %vm862_vm2, %v6054_v5  ;;  %5918 = vmatprep.mubr.msk.bf16.mxu1 %vm862_vm2, %v6054_v5 }
 0x214   : > { %11788 = vst [vmem:[#allocation169_spill] sm:$0xff] %v8091_v6  ;;  %v8096_v50 = vmax.f32 %v8080_v23, %v1859_v3  ;;  %2339 = vperm.xlu0 %5966, %v7917_v51   ;;  %v8100_v10 = vmax.f32 %v2040_v49, %v8084_v8  ;;  %5839 = vmatmul.mubr.msk.bf16.gmra.mrb[120].mxu0 %vm862_vm2, %v6054_v5  ;;  %v6055_v51 = vld [vmem:[%s6916_s26 + $0x60] sm:$0xff]  }
 0x215   : > { %v1864_v62 = vpop.xlane.xlu1 %1863  ;;  %2349 = vperm.xlu1 %5967, %v7972_v7   ;;  %5919 = vmatmul.mubr.msk.bf16.gmra.mrb[120].mxu1 %vm862_vm2, %v6054_v5  ;;  %v6056_v23 = vld [vmem:[%s6916_s26 + $0xe0] sm:$0xff]  }
 0x216   : > { %11790 = vst [vmem:[#allocation171_spill] sm:$0xff] %v8096_v50  ;;  %4715 = vst.msk [vmem:[#allocation2 + $0x30] sm:$0xff] %vm4708_vm3, %v8096_v50  ;;  %v8113_v3 = vmax.f32 %v8093_v21, %v1864_v62  ;;  %v8115_v47 = vpop.f32.mrb[88].mxu0  ;;  %v8135_v8 = vld [vmem:[#allocation2 + $0x40] sm:$0xff]  ;;  %4026 = vmatpush1.bf16.msra.mxu0 %v6055_v51  ;;  %4315 = vmatpush1.bf16.msra.mxu1 %v6056_v23 }
 0x217   : > { %11792 = vst [vmem:[#allocation173_spill] sm:$0xff] %v8115_v47  ;;  %v8119_v1 = vpop.f32.mrb[89].mxu0  ;;  %v8121_v49 = vpop.f32.mrb[88].mxu1  ;;  %11797 = vst [vmem:[#allocation178_spill] sm:$0xff] %v8135_v8  ;;  %4027 = vmatprep.subr.bf16.mxu0 %v11730_v33  ;;  %4316 = vmatprep.subr.bf16.mxu1 %v11730_v33 }
 0x218   : > { %11791 = vst [vmem:[#allocation172_spill] sm:$0xff] %v8113_v3  ;;  %11793 = vst [vmem:[#allocation174_spill] sm:$0xff] %v8119_v1  ;;  %v2045_v62 = vmax.f32 %v8115_v47, %v8119_v1  ;;  %v8129_v4 = vpop.f32.mrb[89].mxu1  ;;  %v8131_v7 = vpop.f32.mrb[90].mxu0 }
 0x219   : > { %11794 = vst [vmem:[#allocation175_spill] sm:$0xff] %v8121_v49  ;;  %4716 = vst.msk [vmem:[#allocation2 + $0x38] sm:$0xff] %vm4708_vm3, %v8113_v3  ;;  %v8137_v21 = vpop.f32.mrb[91].mxu0  ;;  %v8139_v28 = vpop.f32.mrb[90].mxu1 }
 0x21a   : > { %11795 = vst [vmem:[#allocation176_spill] sm:$0xff] %v8129_v4  ;;  %11796 = vst [vmem:[#allocation177_spill] sm:$0xff] %v8131_v7  ;;  %v8142_v5 = vmax.f32 %v2045_v62, %v8121_v49  ;;  %v2050_v14 = vmax.f32 %v8131_v7, %v8137_v21  ;;  %v8146_v1 = vpop.f32.mrb[91].mxu1  ;;  %v6057_v49 = vld [vmem:[%s6916_s26 + $0x68] sm:$0xff]  }
 0x21b   : > { %11798 = vst [vmem:[#allocation179_spill] sm:$0xff] %v8137_v21  ;;  %11799 = vst [vmem:[#allocation180_spill] sm:$0xff] %v8139_v28  ;;  %v1869_v47 = vpop.xlane.xlu0 %1868  ;;  %4028 = vmatpush1.bf16.msra.mxu0 %v6057_v49 }
 0x21c   : > { %11800 = vst [vmem:[#allocation181_spill] sm:$0xff] %v8146_v1  ;;  %v8153_v63 = vmax.f32 %v8135_v8, %v1869_v47  ;;  %v8158_v21 = vmax.f32 %v2050_v14, %v8139_v28  ;;  %v6058_v47 = vld [vmem:[%s6916_s26 + $0xe8] sm:$0xff]   ;;  %v6059_v14 = vld [vmem:[%s11153_s0 + $0xf8] sm:$0xff]   ;;  %4029 = vmatprep.subr.bf16.mxu0 %v11730_v33 }
 0x21d   : > { %v1874_v7 = vpop.xlane.xlu1 %1873  ;;  %4317 = vmatpush1.bf16.msra.mxu1 %v6058_v47  ;;  %5840 = vmatprep.mubr.msk.bf16.mxu0 %vm862_vm2, %v6059_v14 }
 0x21e   : > { %11802 = vst [vmem:[#allocation183_spill] sm:$0xff] %v8153_v63  ;;  %4717 = vst.msk [vmem:[#allocation2 + $0x40] sm:$0xff] %vm4708_vm3, %v8153_v63  ;;  %v8163_v51 = vmax.f32 %v8148_v9, %v1874_v7  ;;  %v8165_v23 = vpop.f32.mrb[92].mxu0  ;;  %5920 = vmatprep.mubr.msk.bf16.mxu1 %vm862_vm2, %v6059_v14  ;;  %5841 = vmatmul.mubr.msk.bf16.gmra.mrb[124].mxu0 %vm862_vm2, %v6059_v14 }
 0x21f   : > { %11804 = vst [vmem:[#allocation185_spill] sm:$0xff] %v8165_v23  ;;  %v8169_v8 = vpop.f32.mrb[93].mxu0  ;;  %v8171_v59 = vpop.f32.mrb[92].mxu1  ;;  %5921 = vmatmul.mubr.msk.bf16.gmra.mrb[124].mxu1 %vm862_vm2, %v6059_v14  ;;  %4318 = vmatprep.subr.bf16.mxu1 %v11730_v33  ;;  %v6062_v14 = vld [vmem:[%s6916_s26 + $0x78] sm:$0xff]  }
 0x220   : > { %11803 = vst [vmem:[#allocation184_spill] sm:$0xff] %v8163_v51  ;;  %11805 = vst [vmem:[#allocation186_spill] sm:$0xff] %v8169_v8  ;;  %v2055_v7 = vmax.f32 %v8165_v23, %v8169_v8  ;;  %v8182_v28 = vpop.f32.mrb[93].mxu1  ;;  %v8186_v57 = vpop.f32.mrb[94].mxu0  ;;  %4030 = vmatpush1.bf16.msra.mxu0 %v6060_v60 }
 0x221   : > { %11806 = vst [vmem:[#allocation187_spill] sm:$0xff] %v8171_v59  ;;  %4718 = vst.msk [vmem:[#allocation2 + $0x48] sm:$0xff] %vm4708_vm3, %v8163_v51  ;;  %v8192_v62 = vpop.f32.mrb[95].mxu0  ;;  %v8194_v9 = vpop.f32.mrb[94].mxu1  ;;  %4319 = vmatpush1.bf16.msra.mxu1 %v6061_v58  ;;  %4031 = vmatprep.subr.bf16.mxu0 %v11730_v33 }
 0x222   : > { %11807 = vst [vmem:[#allocation188_spill] sm:$0xff] %v8182_v28  ;;  %11808 = vst [vmem:[#allocation189_spill] sm:$0xff] %v8186_v57  ;;  %v8197_v8 = vmax.f32 %v2055_v7, %v8171_v59  ;;  %v2060_v49 = vmax.f32 %v8186_v57, %v8192_v62  ;;  %v8203_v47 = vpop.f32.mrb[95].mxu1  ;;  %v6063_v59 = vld [vmem:[%s6916_s26 + $0xf8] sm:$0xff]   ;;  %4320 = vmatprep.subr.bf16.mxu1 %v11730_v33  ;;  %v8236_v33 = vld [vmem:[#allocation2 + $0x60] sm:$0xff] }
 0x223   : > { %11810 = vst [vmem:[#allocation191_spill] sm:$0xff] %v8192_v62  ;;  %11811 = vst [vmem:[#allocation192_spill] sm:$0xff] %v8194_v9  ;;  %v1879_v23 = vpop.xlane.xlu0 %1878 }
 0x224   : > { %11812 = vst [vmem:[#allocation193_spill] sm:$0xff] %v8203_v47  ;;  %v8210_v52 = vmax.f32 %v8188_v54, %v1879_v23  ;;  %v8217_v62 = vmax.f32 %v2060_v49, %v8194_v9  ;;  %4032 = vmatpush1.bf16.msra.mxu0 %v6062_v14  ;;  %11819 = vst [vmem:[#allocation200_spill] sm:$0xff] %v8236_v33 }
 0x225   : > { %v1884_v57 = vpop.xlane.xlu1 %1883  ;;  %4321 = vmatpush1.bf16.msra.mxu1 %v6063_v59 }
 0x226   : > { %11814 = vst [vmem:[#allocation195_spill] sm:$0xff] %v8210_v52  ;;  %4719 = vst.msk [vmem:[#allocation2 + $0x50] sm:$0xff] %vm4708_vm3, %v8210_v52  ;;  %v8224_v23 = vmax.f32 %v8205_v55, %v1884_v57  ;;  %v8226_v54 = vpop.f32.mrb[96].mxu0 }
 0x227   : > { %11816 = vst [vmem:[#allocation197_spill] sm:$0xff] %v8226_v54  ;;  %v8228_v60 = vpop.f32.mrb[97].mxu0  ;;  %v8234_v49 = vpop.f32.mrb[96].mxu1 }
 0x228   : > { %11815 = vst [vmem:[#allocation196_spill] sm:$0xff] %v8224_v23  ;;  %11817 = vst [vmem:[#allocation198_spill] sm:$0xff] %v8228_v60  ;;  %v2065_v58 = vmax.f32 %v8226_v54, %v8228_v60  ;;  %v8238_v7 = vpop.f32.mrb[97].mxu1 }
 0x229   : > { %4720 = vst.msk [vmem:[#allocation2 + $0x58] sm:$0xff] %vm4708_vm3, %v8224_v23  ;;  %11818 = vst [vmem:[#allocation199_spill] sm:$0xff] %v8234_v49 }
 0x22a   : > { %11820 = vst [vmem:[#allocation201_spill] sm:$0xff] %v8238_v7  ;;  %v8243_v9 = vmax.f32 %v2065_v58, %v8234_v49  ;;  %v8259_v58 = vld [vmem:[#allocation2 + $0x70] sm:$0xff]  ;;  %v8264_v49 = vld [vmem:[#allocation2 + $0x78] sm:$0xff] }
 0x22b   : > { %v1889_v55 = vpop.xlane.xlu0 %1888  ;;  %11824 = vst [vmem:[#allocation205_spill] sm:$0xff] %v8259_v58  ;;  %11826 = vst [vmem:[#allocation206_spill] sm:$0xff] %v8264_v49 }
 0x22c   : > { %v8248_v59 = vmax.f32 %v8236_v33, %v1889_v55  ;;  %v11825_v55 = vmax.f32 %v7962_v2, %v7952_v22  ;;  %v11830_v2 = vmax.f32 %v7975_v35, %v7969_v36  ;;  %v11835_v35 = vmax.f32 %v8142_v5, %v8129_v4  ;;  %v8316_v5 = vld [vmem:[#allocation2 + $0xa0] sm:$0xff]  ;;  %v8319_v36 = vld [vmem:[#allocation2 + $0xa8] sm:$0xff] }
 0x22d   : > { %v1894_v60 = vpop.xlane.xlu1 %1893  ;;  %11839 = vst [vmem:[#allocation215_spill] sm:$0xff] %v8316_v5  ;;  %11840 = vst [vmem:[#allocation216_spill] sm:$0xff] %v8319_v36 }
 0x22e   : > { %11822 = vst [vmem:[#allocation203_spill] sm:$0xff] %v8248_v59  ;;  %4721 = vst.msk [vmem:[#allocation2 + $0x60] sm:$0xff] %vm4708_vm3, %v8248_v59  ;;  %v8255_v54 = vmax.f32 %v8245_v48, %v1894_v60  ;;  %v11829_v48 = vmax.f32 %v8025_v39, %v8016_v56 }
 0x230   : > { %11823 = vst [vmem:[#allocation204_spill] sm:$0xff] %v8255_v54  ;;  %4722 = vst.msk [vmem:[#allocation2 + $0x68] sm:$0xff] %vm4708_vm3, %v8255_v54 }
 0x233   : > { %v1899_v57 = vpop.xlane.xlu0 %1898  ;;  %2018 = vmax.xlane.f32.xlu0 %v11825_v55 }
 0x234   : > { %v8267_v14 = vmax.f32 %v8259_v58, %v1899_v57  ;;  %v8282_v57 = vld [vmem:[#allocation2 + $0x80] sm:$0xff]  ;;  %v11832_v58 = vmax.f32 %v8089_v61, %v8073_v53  ;;  %v8302_v61 = vld [vmem:[#allocation2 + $0x90] sm:$0xff] }
 0x235   : > { %v1904_v33 = vpop.xlane.xlu1 %1903  ;;  %11831 = vst [vmem:[#allocation209_spill] sm:$0xff] %v8282_v57  ;;  %11836 = vst [vmem:[#allocation212_spill] sm:$0xff] %v8302_v61 }
 0x236   : > { %11827 = vst [vmem:[#allocation207_spill] sm:$0xff] %v8267_v14  ;;  %4723 = vst.msk [vmem:[#allocation2 + $0x70] sm:$0xff] %vm4708_vm3, %v8267_v14  ;;  %v8272_v60 = vmax.f32 %v8264_v49, %v1904_v33  ;;  %v8287_v33 = vld [vmem:[#allocation2 + $0x88] sm:$0xff] }
 0x237   : > { %2028 = vmax.xlane.f32.xlu0 %v11829_v48  ;;  %11833 = vst [vmem:[#allocation210_spill] sm:$0xff] %v8287_v33 }
 0x238   : > { %11828 = vst [vmem:[#allocation208_spill] sm:$0xff] %v8272_v60  ;;  %4724 = vst.msk [vmem:[#allocation2 + $0x78] sm:$0xff] %vm4708_vm3, %v8272_v60 }
 0x239   : > { %2023 = vmax.xlane.f32.xlu1 %v11830_v2  ;;  %v8304_v2 = vld [vmem:[#allocation2 + $0x98] sm:$0xff] }
 0x23a   : > { %11837 = vst [vmem:[#allocation213_spill] sm:$0xff] %v8304_v2 }
 0x23b   : > { %v1909_v55 = vpop.xlane.xlu0 %1908  ;;  %2038 = vmax.xlane.f32.xlu0 %v11832_v58 }
 0x23c   : > { %v8290_v49 = vmax.f32 %v8282_v57, %v1909_v55 }
 0x23d   : > { %v1914_v48 = vpop.xlane.xlu1 %1913 }
 0x23e   : > { %11834 = vst [vmem:[#allocation211_spill] sm:$0xff] %v8290_v49  ;;  %4725 = vst.msk [vmem:[#allocation2 + $0x80] sm:$0xff] %vm4708_vm3, %v8290_v49  ;;  %v8295_v39 = vmax.f32 %v8287_v33, %v1914_v48  ;;  %v8334_v33 = vld [vmem:[#allocation2 + $0xb8] sm:$0xff] }
 0x23f   : > { %2048 = vmax.xlane.f32.xlu0 %v11835_v35  ;;  %11843 = vst [vmem:[#allocation219_spill] sm:$0xff] %v8334_v33 }
 0x240   : > { %4726 = vst.msk [vmem:[#allocation2 + $0x88] sm:$0xff] %vm4708_vm3, %v8295_v39 }
 0x243   : > { %v1919_v58 = vpop.xlane.xlu0 %1918 }
 0x244   : > { %v8307_v55 = vmax.f32 %v8302_v61, %v1919_v58 }
 0x245   : > { %v1924_v57 = vpop.xlane.xlu1 %1923 }
 0x246   : > { %11838 = vst [vmem:[#allocation214_spill] sm:$0xff] %v8307_v55  ;;  %4727 = vst.msk [vmem:[#allocation2 + $0x90] sm:$0xff] %vm4708_vm3, %v8307_v55  ;;  %v8312_v48 = vmax.f32 %v8304_v2, %v1924_v57  ;;  %v8332_v2 = vld [vmem:[#allocation2 + $0xb0] sm:$0xff] }
 0x247   : > { %11842 = vst [vmem:[#allocation218_spill] sm:$0xff] %v8332_v2 }
 0x248   : > { %4728 = vst.msk [vmem:[#allocation2 + $0x98] sm:$0xff] %vm4708_vm3, %v8312_v48 }
 0x24a   : > { %2354 = vperm.xlu1 %5967, %v8000_v25   ;;  %v8351_v25 = vpop.f32.mrb[98].mxu1 }
 0x24b   : > { %v1929_v35 = vpop.xlane.xlu0 %1928  ;;  %11847 = vst [vmem:[#allocation223_spill] sm:$0xff] %v8351_v25  ;;  %v8364_v56 = vpop.f32.mrb[99].mxu1 }
 0x24c   : > { %v8322_v58 = vmax.f32 %v8316_v5, %v1929_v35  ;;  %11852 = vst [vmem:[#allocation228_spill] sm:$0xff] %v8364_v56 }
 0x24d   : > { %v1934_v61 = vpop.xlane.xlu1 %1933 }
 0x24e   : > { %11841 = vst [vmem:[#allocation217_spill] sm:$0xff] %v8322_v58  ;;  %4729 = vst.msk [vmem:[#allocation2 + $0xa0] sm:$0xff] %vm4708_vm3, %v8322_v58  ;;  %v8327_v57 = vmax.f32 %v8319_v36, %v1934_v61  ;;  %2359 = vperm.xlu1 %5967, %v8037_v0   ;;  %v8347_v0 = vld [vmem:[#allocation2 + $0xc0] sm:$0xff]  ;;  %v8349_v36 = vpop.f32.mrb[98].mxu0 }
 0x24f   : > { %11845 = vst [vmem:[#allocation221_spill] sm:$0xff] %v8347_v0  ;;  %11846 = vst [vmem:[#allocation222_spill] sm:$0xff] %v8349_v36  ;;  %v8355_v53 = vpop.f32.mrb[99].mxu0 }
 0x250   : > { %4730 = vst.msk [vmem:[#allocation2 + $0xa8] sm:$0xff] %vm4708_vm3, %v8327_v57  ;;  %11849 = vst [vmem:[#allocation225_spill] sm:$0xff] %v8355_v53 }
 0x253   : > { %v1939_v4 = vpop.xlane.xlu0 %1938 }
 0x254   : > { %v8337_v35 = vmax.f32 %v8332_v2, %v1939_v4  ;;  %v8353_v2 = vld [vmem:[#allocation2 + $0xc8] sm:$0xff] }
 0x255   : > { %v1944_v5 = vpop.xlane.xlu1 %1943  ;;  %2384 = vperm.xlu0 %5966, %v8163_v51   ;;  %11848 = vst [vmem:[#allocation224_spill] sm:$0xff] %v8353_v2 }
 0x256   : > { %11844 = vst [vmem:[#allocation220_spill] sm:$0xff] %v8337_v35  ;;  %4731 = vst.msk [vmem:[#allocation2 + $0xb0] sm:$0xff] %vm4708_vm3, %v8337_v35  ;;  %v8343_v61 = vmax.f32 %v8334_v33, %v1944_v5  ;;  %v2070_v5 = vmax.f32 %v8349_v36, %v8355_v53  ;;  %v8362_v33 = vpop.f32.mrb[100].mxu0  ;;  %v8378_v53 = vpop.f32.mrb[100].mxu1 }
 0x257   : > { %11851 = vst [vmem:[#allocation227_spill] sm:$0xff] %v8362_v33  ;;  %v8366_v35 = vpop.f32.mrb[101].mxu0  ;;  %11855 = vst [vmem:[#allocation231_spill] sm:$0xff] %v8378_v53  ;;  %v8380_v36 = vpop.f32.mrb[101].mxu1 }
 0x258   : > { %4732 = vst.msk [vmem:[#allocation2 + $0xb8] sm:$0xff] %vm4708_vm3, %v8343_v61  ;;  %11853 = vst [vmem:[#allocation229_spill] sm:$0xff] %v8366_v35 }
 0x259   : > { %11856 = vst [vmem:[#allocation232_spill] sm:$0xff] %v8380_v36 }
 0x25b   : > { %v1949_v4 = vpop.xlane.xlu0 %1948 }
 0x25c   : > { %v8358_v51 = vmax.f32 %v8347_v0, %v1949_v4  ;;  %v2075_v4 = vmax.f32 %v8362_v33, %v8366_v35  ;;  %v8376_v0 = vmax.f32 %v2070_v5, %v8351_v25  ;;  %v8393_v33 = vld [vmem:[#allocation2 + $0xd8] sm:$0xff]  ;;  %v8407_v35 = vld [vmem:[#allocation2 + $0xe8] sm:$0xff] }
 0x25d   : > { %v1954_v22 = vpop.xlane.xlu1 %1953  ;;  %11858 = vst [vmem:[#allocation234_spill] sm:$0xff] %v8393_v33  ;;  %11862 = vst [vmem:[#allocation238_spill] sm:$0xff] %v8407_v35 }
 0x25e   : > { %11850 = vst [vmem:[#allocation226_spill] sm:$0xff] %v8358_v51  ;;  %4733 = vst.msk [vmem:[#allocation2 + $0xc0] sm:$0xff] %vm4708_vm3, %v8358_v51  ;;  %v8371_v58 = vmax.f32 %v8353_v2, %v1954_v22  ;;  %v8387_v51 = vmax.f32 %v2075_v4, %v8378_v53  ;;  %v8389_v22 = vld [vmem:[#allocation2 + $0xd0] sm:$0xff]  ;;  %v8405_v4 = vld [vmem:[#allocation2 + $0xe0] sm:$0xff] }
 0x25f   : > { %11857 = vst [vmem:[#allocation233_spill] sm:$0xff] %v8389_v22  ;;  %11861 = vst [vmem:[#allocation237_spill] sm:$0xff] %v8405_v4 }
 0x260   : > { %11854 = vst [vmem:[#allocation230_spill] sm:$0xff] %v8371_v58  ;;  %4734 = vst.msk [vmem:[#allocation2 + $0xc8] sm:$0xff] %vm4708_vm3, %v8371_v58 }
 0x263   : > { %v1959_v5 = vpop.xlane.xlu0 %1958 }
 0x264   : > { %v8396_v25 = vmax.f32 %v8389_v22, %v1959_v5 }
 0x265   : > { %v1964_v2 = vpop.xlane.xlu1 %1963 }
 0x266   : > { %11859 = vst [vmem:[#allocation235_spill] sm:$0xff] %v8396_v25  ;;  %4735 = vst.msk [vmem:[#allocation2 + $0xd0] sm:$0xff] %vm4708_vm3, %v8396_v25  ;;  %v8401_v55 = vmax.f32 %v8393_v33, %v1964_v2  ;;  %v8419_v2 = vld [vmem:[#allocation2 + $0xf0] sm:$0xff]  ;;  %v11866_v33 = vmax.f32 %v8040_v37, %v8034_v19  ;;  %v8439_v37 = vld [vmem:[#allocation2 + $0x100] sm:$0xff] }
 0x267   : > { %11865 = vst [vmem:[#allocation241_spill] sm:$0xff] %v8419_v2  ;;  %11871 = vst [vmem:[#allocation245_spill] sm:$0xff] %v8439_v37  ;;  %v8441_v19 = vld [vmem:[#allocation2 + $0x108] sm:$0xff] }
 0x268   : > { %11860 = vst [vmem:[#allocation236_spill] sm:$0xff] %v8401_v55  ;;  %4736 = vst.msk [vmem:[#allocation2 + $0xd8] sm:$0xff] %vm4708_vm3, %v8401_v55  ;;  %v8424_v55 = vld [vmem:[#allocation2 + $0xf8] sm:$0xff] }
 0x269   : > { %11867 = vst [vmem:[#allocation242_spill] sm:$0xff] %v8424_v55  ;;  %11872 = vst [vmem:[#allocation246_spill] sm:$0xff] %v8441_v19 }
 0x26b   : > { %v1969_v53 = vpop.xlane.xlu0 %1968 }
 0x26c   : > { %v8410_v58 = vmax.f32 %v8405_v4, %v1969_v53  ;;  %v11869_v4 = vmax.f32 %v8197_v8, %v8182_v28  ;;  %v8456_v28 = vld [vmem:[#allocation2 + $0x118] sm:$0xff] }
 0x26d   : > { %v1974_v5 = vpop.xlane.xlu1 %1973  ;;  %11876 = vst [vmem:[#allocation250_spill] sm:$0xff] %v8456_v28 }
 0x26e   : > { %11863 = vst [vmem:[#allocation239_spill] sm:$0xff] %v8410_v58  ;;  %4737 = vst.msk [vmem:[#allocation2 + $0xe0] sm:$0xff] %vm4708_vm3, %v8410_v58  ;;  %v8415_v22 = vmax.f32 %v8407_v35, %v1974_v5 }
 0x270   : > { %11864 = vst [vmem:[#allocation240_spill] sm:$0xff] %v8415_v22  ;;  %4738 = vst.msk [vmem:[#allocation2 + $0xe8] sm:$0xff] %vm4708_vm3, %v8415_v22 }
 0x272   : > { %2033 = vmax.xlane.f32.xlu1 %v11866_v33 }
 0x273   : > { %v1979_v25 = vpop.xlane.xlu0 %1978 }
 0x274   : > { %v8427_v53 = vmax.f32 %v8419_v2, %v1979_v25  ;;  %2058 = vmax.xlane.f32.xlu0 %v11869_v4 }
 0x275   : > { %v1984_v5 = vpop.xlane.xlu1 %1983 }
 0x276   : > { %11868 = vst [vmem:[#allocation243_spill] sm:$0xff] %v8427_v53  ;;  %4739 = vst.msk [vmem:[#allocation2 + $0xf0] sm:$0xff] %vm4708_vm3, %v8427_v53  ;;  %v8435_v35 = vmax.f32 %v8424_v55, %v1984_v5  ;;  %v8453_v5 = vld [vmem:[#allocation2 + $0x110] sm:$0xff] }
 0x277   : > { %11875 = vst [vmem:[#allocation249_spill] sm:$0xff] %v8453_v5 }
 0x278   : > { %11870 = vst [vmem:[#allocation244_spill] sm:$0xff] %v8435_v35  ;;  %4740 = vst.msk [vmem:[#allocation2 + $0xf8] sm:$0xff] %vm4708_vm3, %v8435_v35 }
 0x27b   : > { %v1989_v33 = vpop.xlane.xlu0 %1988 }
 0x27c   : > { %v8444_v25 = vmax.f32 %v8439_v37, %v1989_v33 }
 0x27d   : > { %v1994_v8 = vpop.xlane.xlu1 %1993 }
 0x27e   : > { %11873 = vst [vmem:[#allocation247_spill] sm:$0xff] %v8444_v25  ;;  %4741 = vst.msk [vmem:[#allocation2 + $0x100] sm:$0xff] %vm4708_vm3, %v8444_v25  ;;  %v8449_v4 = vmax.f32 %v8441_v19, %v1994_v8  ;;  %v8469_v19 = vld [vmem:[#allocation2 + $0x120] sm:$0xff] }
 0x27f   : > { %11879 = vst [vmem:[#allocation253_spill] sm:$0xff] %v8469_v19 }
 0x280   : > { %11874 = vst [vmem:[#allocation248_spill] sm:$0xff] %v8449_v4  ;;  %4742 = vst.msk [vmem:[#allocation2 + $0x108] sm:$0xff] %vm4708_vm3, %v8449_v4 }
 0x283   : > { %v1999_v2 = vpop.xlane.xlu0 %1998  ;;  %2364 = vperm.xlu1 %5967, %v8055_v42   ;;  %v8472_v42 = vld [vmem:[#allocation2 + $0x128] sm:$0xff] }
 0x284   : > { %v8459_v33 = vmax.f32 %v8453_v5, %v1999_v2  ;;  %11880 = vst [vmem:[#allocation254_spill] sm:$0xff] %v8472_v42 }
 0x285   : > { %v2004_v37 = vpop.xlane.xlu1 %2003 }
 0x286   : > { %11877 = vst [vmem:[#allocation251_spill] sm:$0xff] %v8459_v33  ;;  %4743 = vst.msk [vmem:[#allocation2 + $0x110] sm:$0xff] %vm4708_vm3, %v8459_v33  ;;  %v8464_v8 = vmax.f32 %v8456_v28, %v2004_v37 }
 0x287   : > { %2369 = vperm.xlu1 %5967, %v8096_v50   ;;  %v8484_v50 = vpop.f32.mrb[102].mxu0 }
 0x288   : > { %11878 = vst [vmem:[#allocation252_spill] sm:$0xff] %v8464_v8  ;;  %4744 = vst.msk [vmem:[#allocation2 + $0x118] sm:$0xff] %vm4708_vm3, %v8464_v8 }
 0x289   : > { %11883 = vst [vmem:[#allocation257_spill] sm:$0xff] %v8484_v50 }
 0x28a   : > { %2394 = vperm.xlu0 %5966, %v8224_v23   ;;  %v8486_v23 = vpop.f32.mrb[103].mxu0 }
 0x28b   : > { %v2009_v55 = vpop.xlane.xlu0 %2008  ;;  %11884 = vst [vmem:[#allocation258_spill] sm:$0xff] %v8486_v23  ;;  %v8491_v25 = vpop.f32.mrb[104].mxu0  ;;  %v2080_v53 = vmax.f32 %v8484_v50, %v8486_v23 }
 0x28c   : > { %v8475_v2 = vmax.f32 %v8469_v19, %v2009_v55  ;;  %11885 = vst [vmem:[#allocation259_spill] sm:$0xff] %v8491_v25  ;;  %v8498_v58 = vpop.f32.mrb[105].mxu0 }
 0x28d   : > { %v2014_v5 = vpop.xlane.xlu1 %2013  ;;  %11887 = vst [vmem:[#allocation261_spill] sm:$0xff] %v8498_v58 }
 0x28e   : > { %11881 = vst [vmem:[#allocation255_spill] sm:$0xff] %v8475_v2  ;;  %4745 = vst.msk [vmem:[#allocation2 + $0x120] sm:$0xff] %vm4708_vm3, %v8475_v2  ;;  %v8480_v37 = vmax.f32 %v8472_v42, %v2014_v5  ;;  %v8493_v2 = vpop.f32.mrb[102].mxu1 }
 0x28f   : > { %11886 = vst [vmem:[#allocation260_spill] sm:$0xff] %v8493_v2  ;;  %v8507_v8 = vmax.f32 %v2080_v53, %v8493_v2 }
 0x290   : > { %11882 = vst [vmem:[#allocation256_spill] sm:$0xff] %v8480_v37  ;;  %4746 = vst.msk [vmem:[#allocation2 + $0x128] sm:$0xff] %vm4708_vm3, %v8480_v37 }
 0x291   : > { %v2345_v28 = vpop.permute.xlu1 %2344 }
 0x292   : > { %v2661_v33 = vsub.f32 %v7424_v16, %v2345_v28  ;;  %v2662_v55 = vsub.f32 %v7428_v18, %v2345_v28  ;;  %v2663_v19 = vsub.f32 %v7426_v17, %v2345_v28  ;;  %v2664_v5 = vsub.f32 %v7432_v20, %v2345_v28  ;;  %v8501_v16 = vpop.f32.mrb[103].mxu1 }
 0x293   : > { %v2340_v42 = vpop.permute.xlu0 %2339  ;;  %11888 = vst [vmem:[#allocation262_spill] sm:$0xff] %v8501_v16  ;;  %v2085_v18 = vmax.f32 %v8491_v25, %v8498_v58  ;;  %v8509_v20 = vpop.f32.mrb[104].mxu1 }
 0x294   : > { %6064 = vpow2.f32 %v2661_v33  ;;  %v2657_v37 = vsub.f32 %v7414_v11, %v2340_v42  ;;  %v2658_v17 = vsub.f32 %v7418_v13, %v2340_v42  ;;  %11889 = vst [vmem:[#allocation263_spill] sm:$0xff] %v8509_v20  ;;  %v2659_v28 = vsub.f32 %v7416_v12, %v2340_v42  ;;  %v8512_v23 = vpop.f32.mrb[105].mxu1 }
 0x295   : > { %6066 = vpow2.f32 %v2662_v55  ;;  %11890 = vst [vmem:[#allocation264_spill] sm:$0xff] %v8512_v23  ;;  %v2660_v11 = vsub.f32 %v7422_v15, %v2340_v42  ;;  %v8516_v33 = vmax.f32 %v2085_v18, %v8509_v20 }
 0x296   : > { %6068 = vpow2.f32 %v2663_v19 }
 0x297   : > { %6070 = vpow2.f32 %v2664_v5 }
 0x298   : > { %6072 = vpow2.f32 %v2657_v37  ;;  %v11891_v37 = vmax.f32 %v8243_v9, %v8238_v7  ;;  %v8540_v9 = vld [vmem:[#allocation2 + $0x138] sm:$0xff] }
 0x299   : > { %6074 = vpow2.f32 %v2658_v17  ;;  %v11892_v17 = vmax.f32 %v8100_v10, %v8091_v6  ;;  %11896 = vst [vmem:[#allocation268_spill] sm:$0xff] %v8540_v9 }
 0x29a   : > { %6076 = vpow2.f32 %v2659_v28  ;;  %v8529_v28 = vld [vmem:[#allocation2 + $0x130] sm:$0xff] }
 0x29b   : > { %6078 = vpow2.f32 %v2660_v11  ;;  %11893 = vst [vmem:[#allocation265_spill] sm:$0xff] %v8529_v28 }
 0x29e   : > { %v6065_v19 = vpop.eup %6064 }
 0x29f   : > { %v6067_v12 = vpop.eup %6066 }
 0x2a0   : > { %v6069_v55 = vpop.eup %6068 }
 0x2a1   : > { %v6071_v58 = vpop.eup %6070 }
 0x2a2   : > { %v6073_v5 = vpop.eup %6072 }
 0x2a3   : > { %v6075_v25 = vpop.eup %6074  ;;  %v3617_v15 = vpack.c.bf16 %v6065_v19, %v6073_v5  ;;  %v8546_v19 = vpop.f32.mrb[106].mxu0  ;;  %v8549_v5 = vld [vmem:[#allocation2 + $0x150] sm:$0xff] }
 0x2a4   : > { %v6077_v42 = vpop.eup %6076  ;;  %v3618_v18 = vpack.c.bf16 %v6067_v12, %v6075_v25  ;;  %11898 = vst [vmem:[#allocation270_spill] sm:$0xff] %v8546_v19  ;;  %11899 = vst [vmem:[#allocation271_spill] sm:$0xff] %v8549_v5 }
 0x2a5   : > { %v6079_v20 = vpop.eup %6078  ;;  %v3619_v2 = vpack.c.bf16 %v6069_v55, %v6077_v42 }
 0x2a6   : > { %4033 = vmatprep.mubr.bf16.mxu0 %v3618_v18  ;;  %v3620_v13 = vpack.c.bf16 %v6071_v58, %v6079_v20  ;;  %v8536_v20 = vld [vmem:[#allocation2 + $0x140] sm:$0xff] }
 0x2a7   : > { %4034 = vmatmul.mubr.bf16.vlgmr.msra.gmra.mrb[128].mxu0 %v3617_v15  ;;  %11895 = vst [vmem:[#allocation267_spill] sm:$0xff] %v8536_v20  ;;  %v8551_v15 = vpop.f32.mrb[107].mxu0 }
 0x2a8   : > { %4322 = vmatprep.mubr.bf16.mxu1 %v3620_v13  ;;  %11900 = vst [vmem:[#allocation272_spill] sm:$0xff] %v8551_v15 }
 0x2a9   : > { %4323 = vmatmul.mubr.bf16.vlgmr.msra.gmra.mrb[128].mxu1 %v3619_v2  ;;  %2068 = vmax.xlane.f32.xlu0 %v11891_v37  ;;  %v2350_v2 = vpop.permute.xlu1 %2349 }
 0x2aa   : > { %v2665_v11 = vsub.f32 %v7437_v24, %v2350_v2  ;;  %v2666_v12 = vsub.f32 %v7442_v27, %v2350_v2  ;;  %v2667_v42 = vsub.f32 %v7440_v26, %v2350_v2  ;;  %v2090_v24 = vmax.f32 %v8546_v19, %v8551_v15 }
 0x2ab   : > { %2043 = vmax.xlane.f32.xlu1 %v11892_v17  ;;  %v2668_v27 = vsub.f32 %v7446_v29, %v2350_v2 }
 0x2ac   : > { %6080 = vpow2.f32 %v2665_v11 }
 0x2ad   : > { %6082 = vpow2.f32 %v2666_v12 }
 0x2ae   : > { %6084 = vpow2.f32 %v2667_v42 }
 0x2af   : > { %6086 = vpow2.f32 %v2668_v27 }
 0x2bc   : > { %2374 = vperm.xlu1 %5967, %v8113_v3  }
 0x2be   : > { %v8561_v37 = vpop.f32.mrb[108].mxu0 }
 0x2bf   : > { %2404 = vperm.xlu0 %5966, %v8255_v54   ;;  %11902 = vst [vmem:[#allocation274_spill] sm:$0xff] %v8561_v37 }
 0x2c0   : > { %2379 = vperm.xlu1 %5967, %v8153_v63   ;;  %v2019_v58 = vpop.xlane.xlu0 %2018 }
 0x2c1   : > { %v8534_v25 = vmax.f32 %v8529_v28, %v2019_v58  ;;  %v8564_v58 = vpop.f32.mrb[109].mxu0 }
 0x2c2   : > { %11903 = vst [vmem:[#allocation275_spill] sm:$0xff] %v8564_v58 }
 0x2c3   : > { %11894 = vst [vmem:[#allocation266_spill] sm:$0xff] %v8534_v25  ;;  %4747 = vst.msk [vmem:[#allocation2 + $0x130] sm:$0xff] %vm4708_vm3, %v8534_v25 }
 0x2c4   : > { %v2029_v10 = vpop.xlane.xlu0 %2028 }
 0x2c5   : > { %v8544_v13 = vmax.f32 %v8536_v20, %v2029_v10  ;;  %v2095_v10 = vmax.f32 %v8561_v37, %v8564_v58  ;;  %v8575_v20 = vld [vmem:[#allocation2 + $0x160] sm:$0xff] }
 0x2c6   : > { %v2024_v55 = vpop.xlane.xlu1 %2023  ;;  %11906 = vst [vmem:[#allocation278_spill] sm:$0xff] %v8575_v20 }
 0x2c7   : > { %11897 = vst [vmem:[#allocation269_spill] sm:$0xff] %v8544_v13  ;;  %v8555_v18 = vmax.f32 %v8540_v9, %v2024_v55  ;;  %4749 = vst.msk [vmem:[#allocation2 + $0x140] sm:$0xff] %vm4708_vm3, %v8544_v13  ;;  %v8573_v55 = vpop.f32.mrb[106].mxu1 }
 0x2c8   : > { %v2039_v17 = vpop.xlane.xlu0 %2038  ;;  %11905 = vst [vmem:[#allocation277_spill] sm:$0xff] %v8573_v55  ;;  %v8578_v29 = vmax.f32 %v2090_v24, %v8573_v55  ;;  %v8580_v2 = vpop.f32.mrb[107].mxu1 }
 0x2c9   : > { %11901 = vst [vmem:[#allocation273_spill] sm:$0xff] %v8555_v18  ;;  %4748 = vst.msk [vmem:[#allocation2 + $0x138] sm:$0xff] %vm4708_vm3, %v8555_v18  ;;  %v8569_v26 = vmax.f32 %v8549_v5, %v2039_v17  ;;  %v8587_v28 = vpop.f32.mrb[108].mxu1 }
 0x2ca   : > { %v2355_v53 = vpop.permute.xlu1 %2354  ;;  %11907 = vst [vmem:[#allocation279_spill] sm:$0xff] %v8580_v2  ;;  %11908 = vst [vmem:[#allocation280_spill] sm:$0xff] %v8587_v28  ;;  %v8591_v24 = vmax.f32 %v2095_v10, %v8587_v28  ;;  %v8593_v37 = vpop.f32.mrb[109].mxu1 }
 0x2cb   : > { %11904 = vst [vmem:[#allocation276_spill] sm:$0xff] %v8569_v26  ;;  %v2669_v11 = vsub.f32 %v7448_v30, %v2355_v53  ;;  %v2670_v17 = vsub.f32 %v7452_v32, %v2355_v53  ;;  %v2671_v5 = vsub.f32 %v7450_v31, %v2355_v53  ;;  %4751 = vst.msk [vmem:[#allocation2 + $0x150] sm:$0xff] %vm4708_vm3, %v8569_v26  ;;  %v8609_v32 = vpop.f32.mrb[110].mxu1 }
 0x2cc   : > { %v2672_v12 = vsub.f32 %v7456_v34, %v2355_v53  ;;  %v2049_v58 = vpop.xlane.xlu0 %2048  ;;  %11909 = vst [vmem:[#allocation281_spill] sm:$0xff] %v8593_v37  ;;  %v6081_v34 = vpop.eup %6080  ;;  %11913 = vst [vmem:[#allocation284_spill] sm:$0xff] %v8609_v32 }
 0x2cd   : > { %6088 = vpow2.f32 %v2669_v11  ;;  %v8596_v30 = vmax.f32 %v8575_v20, %v2049_v58  ;;  %v6083_v53 = vpop.eup %6082 }
 0x2ce   : > { %6090 = vpow2.f32 %v2670_v17  ;;  %v6085_v42 = vpop.eup %6084  ;;  %v2360_v26 = vpop.permute.xlu1 %2359 }
 0x2cf   : > { %11910 = vst [vmem:[#allocation282_spill] sm:$0xff] %v8596_v30  ;;  %6092 = vpow2.f32 %v2671_v5  ;;  %4753 = vst.msk [vmem:[#allocation2 + $0x160] sm:$0xff] %vm4708_vm3, %v8596_v30  ;;  %v6087_v27 = vpop.eup %6086  ;;  %v11911_v5 = vmax.f32 %v8387_v51, %v8380_v36 }
 0x2d0   : > { %6094 = vpow2.f32 %v2672_v12  ;;  %v8607_v12 = vpop.f32.mrb[110].mxu0 }
 0x2d1   : > { %11912 = vst [vmem:[#allocation283_spill] sm:$0xff] %v8607_v12  ;;  %v8611_v63 = vpop.f32.mrb[111].mxu0 }
 0x2d2   : > { %11914 = vst [vmem:[#allocation285_spill] sm:$0xff] %v8611_v63 }
 0x2d7   : > { %v6089_v10 = vpop.eup %6088 }
 0x2d8   : > { %v6091_v11 = vpop.eup %6090  ;;  %v3621_v58 = vpack.c.bf16 %v6089_v10, %v6081_v34  ;;  %v8613_v34 = vpop.f32.mrb[111].mxu1 }
 0x2d9   : > { %v6093_v20 = vpop.eup %6092  ;;  %v3622_v28 = vpack.c.bf16 %v6091_v11, %v6083_v53  ;;  %11915 = vst [vmem:[#allocation286_spill] sm:$0xff] %v8613_v34 }
 0x2da   : > { %v6095_v7 = vpop.eup %6094  ;;  %v3623_v31 = vpack.c.bf16 %v6093_v20, %v6085_v42  ;;  %v11916_v20 = vmax.f32 %v8158_v21, %v8146_v1 }
 0x2db   : > { %4041 = vmatprep.mubr.bf16.mxu0 %v3622_v28  ;;  %v3624_v17 = vpack.c.bf16 %v6095_v7, %v6087_v27  ;;  %v8620_v28 = vpop.f32.mrb[112].mxu0 }
 0x2dc   : > { %4042 = vmatmul.mubr.bf16.gmra.mrb[132].mxu0 %v3621_v58  ;;  %11917 = vst [vmem:[#allocation287_spill] sm:$0xff] %v8620_v28  ;;  %v8624_v51 = vpop.f32.mrb[113].mxu0 }
 0x2dd   : > { %4330 = vmatprep.mubr.bf16.mxu1 %v3624_v17  ;;  %11919 = vst [vmem:[#allocation289_spill] sm:$0xff] %v8624_v51  ;;  %v8630_v27 = vpop.f32.mrb[114].mxu0 }
 0x2de   : > { %4331 = vmatmul.mubr.bf16.gmra.mrb[132].mxu1 %v3623_v31  ;;  %2078 = vmax.xlane.f32.xlu0 %v11911_v5  ;;  %v8622_v31 = vpop.f32.mrb[112].mxu1  ;;  %11921 = vst [vmem:[#allocation291_spill] sm:$0xff] %v8630_v27  ;;  %v8634_v21 = vpop.f32.mrb[115].mxu0 }
 0x2df   : > { %11918 = vst [vmem:[#allocation288_spill] sm:$0xff] %v8622_v31  ;;  %v8626_v53 = vpop.f32.mrb[113].mxu1  ;;  %11923 = vst [vmem:[#allocation293_spill] sm:$0xff] %v8634_v21  ;;  %v2110_v58 = vmax.f32 %v8630_v27, %v8634_v21  ;;  %v8640_v17 = vpop.f32.mrb[116].mxu0 }
 0x2e0   : > { %11920 = vst [vmem:[#allocation290_spill] sm:$0xff] %v8626_v53  ;;  %v8632_v10 = vpop.f32.mrb[114].mxu1  ;;  %11925 = vst [vmem:[#allocation295_spill] sm:$0xff] %v8640_v17  ;;  %v2675_v17 = vsub.f32 %v7464_v40, %v2360_v26 }
 0x2e1   : > { %11922 = vst [vmem:[#allocation292_spill] sm:$0xff] %v8632_v10  ;;  %v8636_v11 = vpop.f32.mrb[115].mxu1 }
 0x2e2   : > { %11924 = vst [vmem:[#allocation294_spill] sm:$0xff] %v8636_v11  ;;  %v8642_v5 = vpop.f32.mrb[116].mxu1 }
 0x2e3   : > { %11926 = vst [vmem:[#allocation296_spill] sm:$0xff] %v8642_v5  ;;  %v8646_v7 = vpop.f32.mrb[117].mxu1 }
 0x2e4   : > { %2053 = vmax.xlane.f32.xlu1 %v11916_v20  ;;  %v8644_v20 = vpop.f32.mrb[117].mxu0  ;;  %11928 = vst [vmem:[#allocation298_spill] sm:$0xff] %v8646_v7  ;;  %v8652_v1 = vpop.f32.mrb[118].mxu1  ;;  %v2674_v7 = vsub.f32 %v7466_v41, %v2360_v26 }
 0x2e5   : > { %11927 = vst [vmem:[#allocation297_spill] sm:$0xff] %v8644_v20  ;;  %v8650_v36 = vpop.f32.mrb[118].mxu0  ;;  %11930 = vst [vmem:[#allocation300_spill] sm:$0xff] %v8652_v1  ;;  %v8656_v55 = vpop.f32.mrb[119].mxu1 }
 0x2e6   : > { %11929 = vst [vmem:[#allocation299_spill] sm:$0xff] %v8650_v36  ;;  %v8654_v6 = vpop.f32.mrb[119].mxu0  ;;  %11932 = vst [vmem:[#allocation302_spill] sm:$0xff] %v8656_v55 }
 0x2e7   : > { %11931 = vst [vmem:[#allocation301_spill] sm:$0xff] %v8654_v6  ;;  %v8662_v15 = vpop.f32.mrb[120].mxu0 }
 0x2e8   : > { %v8660_v27 = vpop.f32.mrb[120].mxu1  ;;  %11934 = vst [vmem:[#allocation304_spill] sm:$0xff] %v8662_v15  ;;  %v8666_v9 = vpop.f32.mrb[121].mxu0 }
 0x2e9   : > { %11933 = vst [vmem:[#allocation303_spill] sm:$0xff] %v8660_v27  ;;  %v8664_v19 = vpop.f32.mrb[121].mxu1  ;;  %11936 = vst [vmem:[#allocation306_spill] sm:$0xff] %v8666_v9  ;;  %v8674_v54 = vpop.f32.mrb[122].mxu0  ;;  %v8698_v9 = vld [vmem:[#allocation2 + $0x148] sm:$0xff]  ;;  %v2673_v27 = vsub.f32 %v7461_v38, %v2360_v26 }
 0x2ea   : > { %11935 = vst [vmem:[#allocation305_spill] sm:$0xff] %v8664_v19  ;;  %v8668_v42 = vpop.f32.mrb[122].mxu1  ;;  %11938 = vst [vmem:[#allocation308_spill] sm:$0xff] %v8674_v54  ;;  %v8678_v3 = vpop.f32.mrb[123].mxu0 }
 0x2eb   : > { %11937 = vst [vmem:[#allocation307_spill] sm:$0xff] %v8668_v42  ;;  %v8676_v21 = vpop.f32.mrb[123].mxu1  ;;  %11940 = vst [vmem:[#allocation310_spill] sm:$0xff] %v8678_v3  ;;  %6096 = vpow2.f32 %v2673_v27  ;;  %v11951_v27 = vld [vmem:[#allocation4_spill] sm:$0xff] }
 0x2ec   : > { %11939 = vst [vmem:[#allocation309_spill] sm:$0xff] %v8676_v21  ;;  %6098 = vpow2.f32 %v2674_v7 }
 0x2ed   : > { %6100 = vpow2.f32 %v2675_v17 }
 0x2f1   : > { %v8684_v13 = vpop.f32.mrb[124].mxu0 }
 0x2f2   : > { %v8680_v18 = vpop.f32.mrb[124].mxu1  ;;  %11942 = vst [vmem:[#allocation312_spill] sm:$0xff] %v8684_v13  ;;  %v8688_v50 = vpop.f32.mrb[125].mxu0 }
 0x2f3   : > { %11941 = vst [vmem:[#allocation311_spill] sm:$0xff] %v8680_v18  ;;  %v8686_v25 = vpop.f32.mrb[125].mxu1  ;;  %11944 = vst [vmem:[#allocation314_spill] sm:$0xff] %v8688_v50  ;;  %v2135_v19 = vmax.f32 %v8684_v13, %v8688_v50  ;;  %v8696_v4 = vpop.f32.mrb[126].mxu0  ;;  %v8711_v50 = vld [vmem:[#allocation2 + $0x170] sm:$0xff]  ;;  %v8714_v13 = vmax.f32 %v2110_v58, %v8632_v10 }
 0x2f4   : > { %2414 = vperm.xlu0 %5966, %v8272_v60   ;;  %11943 = vst [vmem:[#allocation313_spill] sm:$0xff] %v8686_v25  ;;  %v8690_v60 = vpop.f32.mrb[126].mxu1  ;;  %11946 = vst [vmem:[#allocation316_spill] sm:$0xff] %v8696_v4  ;;  %v8700_v15 = vpop.f32.mrb[127].mxu0 }
 0x2f5   : > { %2389 = vperm.xlu1 %5967, %v8210_v52   ;;  %11945 = vst [vmem:[#allocation315_spill] sm:$0xff] %v8690_v60  ;;  %v8692_v52 = vpop.permute.xlu0 %2384  ;;  %11947 = vst [vmem:[#allocation317_spill] sm:$0xff] %v8700_v15  ;;  %v8702_v30 = vpop.f32.mrb[127].mxu1  ;;  %v8706_v35 = vmax.f32 %v2135_v19, %v8680_v18  ;;  %v2140_v22 = vmax.f32 %v8696_v4, %v8700_v15  ;;  %v2676_v18 = vsub.f32 %v7470_v43, %v2360_v26 }
 0x2f6   : > { %11948 = vst [vmem:[#allocation318_spill] sm:$0xff] %v8702_v30  ;;  %11949 = vst [vmem:[#allocation319_spill] sm:$0xff] %v8711_v50  ;;  %v11952_v4 = vmax.f32 %v8516_v33, %v8512_v23  ;;  %v11965_v23 = vld [vmem:[#allocation17_spill] sm:$0xff] }
 0x2f7   : > { %v8723_v19 = vmax.f32 %v2140_v22, %v8690_v60  ;;  %6102 = vpow2.f32 %v2676_v18 }
 0x2ff   : > { %v2034_v20 = vpop.xlane.xlu1 %2033 }
 0x300   : > { %v8718_v5 = vmax.f32 %v8698_v9, %v2034_v20 }
 0x301   : > { %v2059_v41 = vpop.xlane.xlu0 %2058 }
 0x302   : > { %4750 = vst.msk [vmem:[#allocation2 + $0x148] sm:$0xff] %vm4708_vm3, %v8718_v5  ;;  %v8733_v40 = vmax.f32 %v8711_v50, %v2059_v41  ;;  %v6097_v41 = vpop.eup %6096 }
 0x303   : > { %v2365_v20 = vpop.permute.xlu1 %2364  ;;  %v6099_v7 = vpop.eup %6098 }
 0x304   : > { %11950 = vst [vmem:[#allocation320_spill] sm:$0xff] %v8733_v40  ;;  %v2677_v43 = vsub.f32 %v7472_v44, %v2365_v20  ;;  %v2678_v26 = vsub.f32 %v7476_v46, %v2365_v20  ;;  %v2679_v38 = vsub.f32 %v7474_v45, %v2365_v20  ;;  %4755 = vst.msk [vmem:[#allocation2 + $0x170] sm:$0xff] %vm4708_vm3, %v8733_v40  ;;  %v6101_v22 = vpop.eup %6100 }
 0x305   : > { %v2680_v58 = vsub.f32 %v11951_v27, %v2365_v20  ;;  %v6103_v17 = vpop.eup %6102 }
 0x306   : > { %6104 = vpow2.f32 %v2677_v43  ;;  %v8753_v43 = vld [vmem:[#allocation2 + $0x180] sm:$0xff] }
 0x307   : > { %6106 = vpow2.f32 %v2678_v26  ;;  %11954 = vst [vmem:[#allocation4_spill] sm:$0xff] %v8753_v43  ;;  %v11956_v26 = vld [vmem:[#allocation5_spill] sm:$0xff] }
 0x308   : > { %6108 = vpow2.f32 %v2679_v38  ;;  %v11953_v38 = vmax.f32 %v8217_v62, %v8203_v47  ;;  %v12291_v47 = vld [vmem:[#allocation165_spill] sm:$0xff] }
 0x309   : > { %6110 = vpow2.f32 %v2680_v58  ;;  %v2370_v58 = vpop.permute.xlu1 %2369 }
 0x30a   : > { %v2681_v27 = vsub.f32 %v11956_v26, %v2370_v58 }
 0x30c   : > { %6112 = vpow2.f32 %v2681_v27 }
 0x310   : > { %v6105_v15 = vpop.eup %6104 }
 0x311   : > { %v6107_v44 = vpop.eup %6106  ;;  %v3625_v50 = vpack.c.bf16 %v6105_v15, %v6097_v41  ;;  %v8751_v15 = vpop.permute.xlu0 %2394 }
 0x312   : > { %v6109_v46 = vpop.eup %6108  ;;  %v3626_v60 = vpack.c.bf16 %v6107_v44, %v6099_v7  ;;  %v11958_v7 = vld [vmem:[#allocation7_spill] sm:$0xff] }
 0x313   : > { %v6111_v45 = vpop.eup %6110  ;;  %2088 = vmax.xlane.f32.xlu0 %v11952_v4  ;;  %v3627_v18 = vpack.c.bf16 %v6109_v46, %v6101_v22  ;;  %v8761_v4 = vld [vmem:[#allocation2 + $0x158] sm:$0xff]  ;;  %v11959_v46 = vld [vmem:[#allocation6_spill] sm:$0xff] }
 0x314   : > { %4049 = vmatprep.mubr.bf16.mxu0 %v3626_v60  ;;  %v3628_v20 = vpack.c.bf16 %v6111_v45, %v6103_v17  ;;  %v11955_v60 = vmax.f32 %v8650_v36, %v8654_v6  ;;  %v2682_v17 = vsub.f32 %v11958_v7, %v2370_v58  ;;  %v2683_v45 = vsub.f32 %v11959_v46, %v2370_v58  ;;  %v11962_v7 = vld [vmem:[#allocation11_spill] sm:$0xff]  ;;  %v11963_v46 = vld [vmem:[#allocation10_spill] sm:$0xff]  ;;  %v12045_v36 = vld [vmem:[#allocation256_spill] sm:$0xff] }
 0x315   : > { %4050 = vmatmul.mubr.bf16.gmra.mrb[136].mxu0 %v3625_v50 }
 0x316   : > { %4338 = vmatprep.mubr.bf16.mxu1 %v3628_v20  ;;  %v8759_v50 = vmax.f32 %v11955_v60, %v8652_v1  ;;  %v11960_v20 = vld [vmem:[#allocation8_spill] sm:$0xff]  ;;  %6114 = vpow2.f32 %v2682_v17 }
 0x317   : > { %4339 = vmatmul.mubr.bf16.gmra.mrb[136].mxu1 %v3627_v18  ;;  %6116 = vpow2.f32 %v2683_v45  ;;  %v11967_v45 = vld [vmem:[#allocation18_spill] sm:$0xff]  ;;  %v11972_v1 = vld [vmem:[#allocation16_spill] sm:$0xff] }
 0x319   : > { %2063 = vmax.xlane.f32.xlu1 %v11953_v38  ;;  %v2684_v38 = vsub.f32 %v11960_v20, %v2370_v58  ;;  %v11966_v58 = vld [vmem:[#allocation19_spill] sm:$0xff]  ;;  %v2695_v20 = vsub.f32 %v11967_v45, %v8692_v52 }
 0x31a   : > { %v2694_v27 = vsub.f32 %v11966_v58, %v8692_v52 }
 0x31b   : > { %6118 = vpow2.f32 %v2684_v38  ;;  %v11969_v38 = vld [vmem:[#allocation13_spill] sm:$0xff] }
 0x329   : > { %2424 = vperm.xlu0 %5966, %v8295_v39  }
 0x32a   : > { %2399 = vperm.xlu1 %5967, %v8248_v59   ;;  %v2693_v59 = vsub.f32 %v11965_v23, %v8692_v52 }
 0x336   : > { %v2069_v33 = vpop.xlane.xlu0 %2068 }
 0x337   : > { %v8769_v41 = vmax.f32 %v8753_v43, %v2069_v33  ;;  %v11961_v33 = vld [vmem:[#allocation9_spill] sm:$0xff] }
 0x338   : > { %v2044_v44 = vpop.xlane.xlu1 %2043 }
 0x339   : > { %11957 = vst [vmem:[#allocation5_spill] sm:$0xff] %v8769_v41  ;;  %v8774_v18 = vmax.f32 %v8761_v4, %v2044_v44  ;;  %4757 = vst.msk [vmem:[#allocation2 + $0x180] sm:$0xff] %vm4708_vm3, %v8769_v41  ;;  %v11964_v44 = vld [vmem:[#allocation12_spill] sm:$0xff] }
 0x33b   : > { %4752 = vst.msk [vmem:[#allocation2 + $0x158] sm:$0xff] %vm4708_vm3, %v8774_v18 }
 0x33c   : > { %v2375_v60 = vpop.permute.xlu1 %2374 }
 0x33d   : > { %v2685_v26 = vsub.f32 %v11961_v33, %v2375_v60  ;;  %v2686_v22 = vsub.f32 %v11962_v7, %v2375_v60  ;;  %v2687_v62 = vsub.f32 %v11963_v46, %v2375_v60  ;;  %v2688_v43 = vsub.f32 %v11964_v44, %v2375_v60  ;;  %v11968_v33 = vld [vmem:[#allocation20_spill] sm:$0xff]  ;;  %v11970_v46 = vld [vmem:[#allocation15_spill] sm:$0xff]  ;;  %v11971_v44 = vld [vmem:[#allocation14_spill] sm:$0xff] }
 0x33e   : > { %v2696_v7 = vsub.f32 %v11968_v33, %v8692_v52  ;;  %v11973_v52 = vmax.f32 %v8591_v24, %v8593_v37 }
 0x33f   : > { %6120 = vpow2.f32 %v2685_v26  ;;  %v6113_v26 = vpop.eup %6112 }
 0x340   : > { %6122 = vpow2.f32 %v2686_v22  ;;  %v2380_v17 = vpop.permute.xlu1 %2379  ;;  %v6115_v22 = vpop.eup %6114 }
 0x341   : > { %6124 = vpow2.f32 %v2687_v62  ;;  %v2689_v60 = vsub.f32 %v11969_v38, %v2380_v17  ;;  %v2690_v23 = vsub.f32 %v11970_v46, %v2380_v17  ;;  %v2691_v58 = vsub.f32 %v11971_v44, %v2380_v17  ;;  %v6117_v45 = vpop.eup %6116 }
 0x342   : > { %6126 = vpow2.f32 %v2688_v43  ;;  %v2692_v6 = vsub.f32 %v11972_v1, %v2380_v17  ;;  %v6119_v62 = vpop.eup %6118 }
 0x343   : > { %6128 = vpow2.f32 %v2693_v59 }
 0x344   : > { %6130 = vpow2.f32 %v2694_v27 }
 0x345   : > { %6132 = vpow2.f32 %v2695_v20 }
 0x346   : > { %6134 = vpow2.f32 %v2696_v7 }
 0x347   : > { %6136 = vpow2.f32 %v2689_v60  ;;  %v11974_v60 = vmax.f32 %v8376_v0, %v8364_v56  ;;  %v8806_v0 = vpop.permute.xlu0 %2404 }
 0x348   : > { %6138 = vpow2.f32 %v2690_v23  ;;  %2098 = vmax.xlane.f32.xlu0 %v11973_v52 }
 0x349   : > { %v6121_v59 = vpop.eup %6120  ;;  %6140 = vpow2.f32 %v2691_v58 }
 0x34a   : > { %v6123_v43 = vpop.eup %6122  ;;  %6142 = vpow2.f32 %v2692_v6  ;;  %v3629_v27 = vpack.c.bf16 %v6121_v59, %v6113_v26 }
 0x34b   : > { %v6125_v20 = vpop.eup %6124  ;;  %v3630_v33 = vpack.c.bf16 %v6123_v43, %v6115_v22 }
 0x34c   : > { %v6127_v38 = vpop.eup %6126  ;;  %v3631_v46 = vpack.c.bf16 %v6125_v20, %v6117_v45 }
 0x34d   : > { %v6129_v7 = vpop.eup %6128  ;;  %4057 = vmatprep.mubr.bf16.mxu0 %v3630_v33  ;;  %v3632_v1 = vpack.c.bf16 %v6127_v38, %v6119_v62  ;;  %v8808_v62 = vld [vmem:[#allocation2 + $0x190] sm:$0xff]  ;;  %v11978_v38 = vmax.f32 %v8674_v54, %v8678_v3 }
 0x34e   : > { %v6131_v17 = vpop.eup %6130  ;;  %4058 = vmatmul.mubr.bf16.gmra.mrb[140].mxu0 %v3629_v27  ;;  %2073 = vmax.xlane.f32.xlu1 %v11974_v60  ;;  %11975 = vst [vmem:[#allocation7_spill] sm:$0xff] %v8808_v62  ;;  %v11976_v27 = vmax.f32 %v8607_v12, %v8611_v63 }
 0x34f   : > { %v6133_v24 = vpop.eup %6132  ;;  %4346 = vmatprep.mubr.bf16.mxu1 %v3632_v1  ;;  %v8829_v1 = vld [vmem:[#allocation2 + $0x168] sm:$0xff] }
 0x350   : > { %v6135_v23 = vpop.eup %6134  ;;  %4347 = vmatmul.mubr.bf16.gmra.mrb[140].mxu1 %v3631_v46  ;;  %v8814_v20 = vmax.f32 %v11976_v27, %v8609_v32  ;;  %v8823_v46 = vmax.f32 %v11978_v38, %v8668_v42  ;;  %v11984_v38 = vld [vmem:[#allocation23_spill] sm:$0xff] }
 0x351   : > { %v6137_v44 = vpop.eup %6136 }
 0x352   : > { %v6139_v6 = vpop.eup %6138  ;;  %v3633_v26 = vpack.c.bf16 %v6129_v7, %v6137_v44 }
 0x353   : > { %v6141_v58 = vpop.eup %6140  ;;  %v3634_v22 = vpack.c.bf16 %v6131_v17, %v6139_v6  ;;  %v11980_v6 = vld [vmem:[#allocation27_spill] sm:$0xff] }
 0x354   : > { %v6143_v52 = vpop.eup %6142  ;;  %v3635_v45 = vpack.c.bf16 %v6133_v24, %v6141_v58  ;;  %v11981_v58 = vld [vmem:[#allocation26_spill] sm:$0xff] }
 0x355   : > { %4065 = vmatprep.mubr.bf16.mxu0 %v3634_v22  ;;  %v3636_v59 = vpack.c.bf16 %v6135_v23, %v6143_v52  ;;  %v11979_v23 = vld [vmem:[#allocation25_spill] sm:$0xff]  ;;  %v2703_v22 = vsub.f32 %v11981_v58, %v8751_v15 }
 0x356   : > { %4066 = vmatmul.mubr.bf16.gmra.mrb[144].mxu0 %v3633_v26  ;;  %v2701_v44 = vsub.f32 %v11979_v23, %v8751_v15  ;;  %v2702_v26 = vsub.f32 %v11980_v6, %v8751_v15  ;;  %v11985_v23 = vld [vmem:[#allocation22_spill] sm:$0xff]  ;;  %v11986_v6 = vld [vmem:[#allocation24_spill] sm:$0xff] }
 0x357   : > { %4354 = vmatprep.mubr.bf16.mxu1 %v3636_v59 }
 0x358   : > { %4355 = vmatmul.mubr.bf16.gmra.mrb[144].mxu1 %v3635_v45  ;;  %v11982_v45 = vld [vmem:[#allocation28_spill] sm:$0xff]  ;;  %6144 = vpow2.f32 %v2701_v44 }
 0x359   : > { %v2704_v59 = vsub.f32 %v11982_v45, %v8751_v15  ;;  %6146 = vpow2.f32 %v2702_v26 }
 0x35a   : > { %6148 = vpow2.f32 %v2703_v22 }
 0x35b   : > { %6150 = vpow2.f32 %v2704_v59 }
 0x35e   : > { %2434 = vperm.xlu0 %5966, %v8312_v48  }
 0x35f   : > { %2409 = vperm.xlu1 %5967, %v8267_v14   ;;  %v12043_v14 = vld [vmem:[#allocation47_spill] sm:$0xff] }
 0x362   : > { %2444 = vperm.xlu0 %5966, %v8327_v57  }
 0x36b   : > { %v2079_v43 = vpop.xlane.xlu0 %2078 }
 0x36c   : > { %v8817_v33 = vmax.f32 %v8808_v62, %v2079_v43  ;;  %v11983_v43 = vld [vmem:[#allocation21_spill] sm:$0xff] }
 0x36e   : > { %11977 = vst [vmem:[#allocation6_spill] sm:$0xff] %v8817_v33  ;;  %4759 = vst.msk [vmem:[#allocation2 + $0x190] sm:$0xff] %vm4708_vm3, %v8817_v33 }
 0x371   : > { %v2054_v60 = vpop.xlane.xlu1 %2053 }
 0x372   : > { %v8834_v24 = vmax.f32 %v8829_v1, %v2054_v60 }
 0x374   : > { %4754 = vst.msk [vmem:[#allocation2 + $0x168] sm:$0xff] %vm4708_vm3, %v8834_v24 }
 0x375   : > { %v2390_v52 = vpop.permute.xlu1 %2389 }
 0x376   : > { %v2697_v27 = vsub.f32 %v11983_v43, %v2390_v52  ;;  %v2698_v60 = vsub.f32 %v11984_v38, %v2390_v52  ;;  %v2699_v7 = vsub.f32 %v11985_v23, %v2390_v52  ;;  %v2700_v17 = vsub.f32 %v11986_v6, %v2390_v52  ;;  %v6145_v38 = vpop.eup %6144 }
 0x377   : > { %v11989_v52 = vmax.f32 %v8714_v13, %v8636_v11  ;;  %v6147_v59 = vpop.eup %6146  ;;  %v8862_v13 = vpop.permute.xlu0 %2414 }
 0x378   : > { %6152 = vpow2.f32 %v2697_v27  ;;  %v11990_v27 = vmax.f32 %v8507_v8, %v8501_v16  ;;  %v8864_v8 = vld [vmem:[#allocation2 + $0x1a0] sm:$0xff] }
 0x379   : > { %6154 = vpow2.f32 %v2698_v60  ;;  %11991 = vst [vmem:[#allocation11_spill] sm:$0xff] %v8864_v8  ;;  %v12190_v16 = vld [vmem:[#allocation84_spill] sm:$0xff] }
 0x37a   : > { %v4035_v62 = vpop.f32.mrb[128].mxu0  ;;  %6156 = vpow2.f32 %v2699_v7 }
 0x37b   : > { %v4037_v42 = vpop.f32.mrb[129].mxu0  ;;  %6158 = vpow2.f32 %v2700_v17 }
 0x37c   : > { %v4324_v58 = vpop.f32.mrb[128].mxu1  ;;  %v4038_v3 = vpop.f32.mrb[130].mxu0 }
 0x37d   : > { %v8850_v15 = vadd.f32 %v4324_v58, %v4035_v62  ;;  %v4326_v44 = vpop.f32.mrb[129].mxu1  ;;  %v4040_v45 = vpop.f32.mrb[131].mxu0 }
 0x37e   : > { %v4327_v26 = vpop.f32.mrb[130].mxu1  ;;  %v6149_v42 = vpop.eup %6148 }
 0x37f   : > { %11987 = vst [vmem:[#allocation8_spill] sm:$0xff] %v8850_v15  ;;  %v8852_v43 = vadd.f32 %v4327_v26, %v4038_v3  ;;  %v4329_v22 = vpop.f32.mrb[131].mxu1  ;;  %v6151_v62 = vpop.eup %6150 }
 0x380   : > { %v11993_v22 = vmax.f32 %v8620_v28, %v8624_v51 }
 0x381   : > { %11988 = vst [vmem:[#allocation9_spill] sm:$0xff] %v8852_v43  ;;  %2113 = vmax.xlane.f32.xlu0 %v11989_v52  ;;  %v8877_v52 = vld [vmem:[#allocation2 + $0x178] sm:$0xff] }
 0x382   : > { %v6153_v7 = vpop.eup %6152 }
 0x383   : > { %2083 = vmax.xlane.f32.xlu1 %v11990_v27  ;;  %v6155_v60 = vpop.eup %6154  ;;  %v3637_v23 = vpack.c.bf16 %v6145_v38, %v6153_v7  ;;  %v8873_v38 = vmax.f32 %v11993_v22, %v8622_v31 }
 0x384   : > { %v6157_v17 = vpop.eup %6156  ;;  %v3638_v6 = vpack.c.bf16 %v6147_v59, %v6155_v60  ;;  %v11995_v60 = vld [vmem:[#allocation35_spill] sm:$0xff] }
 0x385   : > { %v6159_v3 = vpop.eup %6158  ;;  %v3639_v58 = vpack.c.bf16 %v6149_v42, %v6157_v17  ;;  %v11996_v17 = vld [vmem:[#allocation34_spill] sm:$0xff] }
 0x386   : > { %4073 = vmatprep.mubr.bf16.mxu0 %v3638_v6  ;;  %v3640_v44 = vpack.c.bf16 %v6151_v62, %v6159_v3  ;;  %v11994_v62 = vld [vmem:[#allocation33_spill] sm:$0xff]  ;;  %v2711_v6 = vsub.f32 %v11996_v17, %v8806_v0 }
 0x387   : > { %4074 = vmatmul.mubr.bf16.gmra.mrb[148].mxu0 %v3637_v23  ;;  %v2709_v7 = vsub.f32 %v11994_v62, %v8806_v0  ;;  %v2710_v23 = vsub.f32 %v11995_v60, %v8806_v0  ;;  %v12000_v62 = vld [vmem:[#allocation30_spill] sm:$0xff]  ;;  %v12001_v60 = vld [vmem:[#allocation32_spill] sm:$0xff] }
 0x388   : > { %4362 = vmatprep.mubr.bf16.mxu1 %v3640_v44 }
 0x389   : > { %4363 = vmatmul.mubr.bf16.gmra.mrb[148].mxu1 %v3639_v58  ;;  %v11997_v58 = vld [vmem:[#allocation36_spill] sm:$0xff]  ;;  %6160 = vpow2.f32 %v2709_v7 }
 0x38a   : > { %v2712_v44 = vsub.f32 %v11997_v58, %v8806_v0  ;;  %6162 = vpow2.f32 %v2710_v23 }
 0x38b   : > { %6164 = vpow2.f32 %v2711_v6 }
 0x38c   : > { %6166 = vpow2.f32 %v2712_v44 }
 0x394   : > { %2419 = vperm.xlu1 %5967, %v8290_v49   ;;  %v12040_v49 = vld [vmem:[#allocation252_spill] sm:$0xff] }
 0x397   : > { %2454 = vperm.xlu0 %5966, %v8343_v61  }
 0x3a0   : > { %v2089_v45 = vpop.xlane.xlu0 %2088 }
 0x3a1   : > { %v8867_v26 = vmax.f32 %v8864_v8, %v2089_v45  ;;  %v11998_v45 = vld [vmem:[#allocation29_spill] sm:$0xff] }
 0x3a3   : > { %11992 = vst [vmem:[#allocation10_spill] sm:$0xff] %v8867_v26  ;;  %4761 = vst.msk [vmem:[#allocation2 + $0x1a0] sm:$0xff] %vm4708_vm3, %v8867_v26  ;;  %v12046_v26 = vld [vmem:[#allocation48_spill] sm:$0xff] }
 0x3a6   : > { %v2064_v42 = vpop.xlane.xlu1 %2063 }
 0x3a7   : > { %v8882_v27 = vmax.f32 %v8877_v52, %v2064_v42  ;;  %v11999_v42 = vld [vmem:[#allocation31_spill] sm:$0xff] }
 0x3a9   : > { %4756 = vst.msk [vmem:[#allocation2 + $0x178] sm:$0xff] %vm4708_vm3, %v8882_v27 }
 0x3aa   : > { %v2400_v3 = vpop.permute.xlu1 %2399 }
 0x3ab   : > { %v2705_v22 = vsub.f32 %v11998_v45, %v2400_v3  ;;  %v2706_v59 = vsub.f32 %v11999_v42, %v2400_v3  ;;  %v2707_v15 = vsub.f32 %v12000_v62, %v2400_v3  ;;  %v2708_v8 = vsub.f32 %v12001_v60, %v2400_v3  ;;  %v6161_v42 = vpop.eup %6160 }
 0x3ac   : > { %v12004_v3 = vmax.f32 %v8759_v50, %v8656_v55  ;;  %v6163_v44 = vpop.eup %6162  ;;  %v12006_v50 = vld [vmem:[#allocation214_spill] sm:$0xff] }
 0x3ad   : > { %6168 = vpow2.f32 %v2705_v22 }
 0x3ae   : > { %6170 = vpow2.f32 %v2706_v59  ;;  %v12005_v59 = vmax.f32 %v8578_v29, %v8580_v2  ;;  %v8912_v29 = vld [vmem:[#allocation2 + $0x1b0] sm:$0xff] }
 0x3af   : > { %v4043_v54 = vpop.f32.mrb[132].mxu0  ;;  %6172 = vpow2.f32 %v2707_v15  ;;  %12008 = vst [vmem:[#allocation19_spill] sm:$0xff] %v8912_v29 }
 0x3b0   : > { %v4045_v31 = vpop.f32.mrb[133].mxu0  ;;  %6174 = vpow2.f32 %v2708_v8 }
 0x3b1   : > { %v4332_v17 = vpop.f32.mrb[132].mxu1  ;;  %v4046_v51 = vpop.f32.mrb[134].mxu0 }
 0x3b2   : > { %v8898_v0 = vadd.f32 %v4332_v17, %v4043_v54  ;;  %v4334_v7 = vpop.f32.mrb[133].mxu1  ;;  %v4048_v58 = vpop.f32.mrb[135].mxu0 }
 0x3b3   : > { %v4335_v23 = vpop.f32.mrb[134].mxu1  ;;  %v6165_v31 = vpop.eup %6164  ;;  %v12007_v58 = vld [vmem:[#allocation230_spill] sm:$0xff] }
 0x3b4   : > { %12002 = vst [vmem:[#allocation12_spill] sm:$0xff] %v8898_v0  ;;  %v8900_v45 = vadd.f32 %v4335_v23, %v4046_v51  ;;  %v4337_v6 = vpop.f32.mrb[135].mxu1  ;;  %v6167_v54 = vpop.eup %6166 }
 0x3b5   : > { %v8910_v23 = vpop.permute.xlu0 %2424 }
 0x3b6   : > { %12003 = vst [vmem:[#allocation17_spill] sm:$0xff] %v8900_v45  ;;  %2123 = vmax.xlane.f32.xlu0 %v12004_v3  ;;  %v12010_v3 = vld [vmem:[#allocation296_spill] sm:$0xff] }
 0x3b7   : > { %v6169_v15 = vpop.eup %6168 }
 0x3b8   : > { %2093 = vmax.xlane.f32.xlu1 %v12005_v59  ;;  %v6171_v22 = vpop.eup %6170  ;;  %v3641_v62 = vpack.c.bf16 %v6161_v42, %v6169_v15  ;;  %v12014_v15 = vld [vmem:[#allocation298_spill] sm:$0xff] }
 0x3b9   : > { %v6173_v8 = vpop.eup %6172  ;;  %v3642_v60 = vpack.c.bf16 %v6163_v44, %v6171_v22  ;;  %v12011_v44 = vld [vmem:[#allocation295_spill] sm:$0xff]  ;;  %v12018_v22 = vld [vmem:[#allocation44_spill] sm:$0xff] }
 0x3ba   : > { %v6175_v51 = vpop.eup %6174  ;;  %v3643_v17 = vpack.c.bf16 %v6165_v31, %v6173_v8  ;;  %v12012_v31 = vld [vmem:[#allocation297_spill] sm:$0xff] }
 0x3bb   : > { %4081 = vmatprep.mubr.bf16.mxu0 %v3642_v60  ;;  %v3644_v7 = vpack.c.bf16 %v6167_v54, %v6175_v51  ;;  %v12013_v59 = vmax.f32 %v12011_v44, %v12012_v31  ;;  %v12015_v51 = vld [vmem:[#allocation41_spill] sm:$0xff]  ;;  %v12020_v44 = vld [vmem:[#allocation39_spill] sm:$0xff] }
 0x3bc   : > { %4082 = vmatmul.mubr.bf16.gmra.mrb[152].mxu0 %v3641_v62  ;;  %v8927_v62 = vld [vmem:[#allocation2 + $0x188] sm:$0xff] }
 0x3bd   : > { %4370 = vmatprep.mubr.bf16.mxu1 %v3644_v7  ;;  %v8921_v54 = vmax.f32 %v12013_v59, %v12010_v3  ;;  %v12016_v7 = vld [vmem:[#allocation43_spill] sm:$0xff]  ;;  %v12017_v59 = vld [vmem:[#allocation42_spill] sm:$0xff]  ;;  %v2720_v3 = vsub.f32 %v12018_v22, %v8862_v13  ;;  %v12019_v31 = vld [vmem:[#allocation37_spill] sm:$0xff] }
 0x3be   : > { %4371 = vmatmul.mubr.bf16.gmra.mrb[152].mxu1 %v3643_v17  ;;  %v2717_v17 = vsub.f32 %v12015_v51, %v8862_v13  ;;  %v2719_v0 = vsub.f32 %v12017_v59, %v8862_v13  ;;  %v12021_v51 = vld [vmem:[#allocation38_spill] sm:$0xff] }
 0x3c0   : > { %6176 = vpow2.f32 %v2717_v17 }
 0x3c9   : > { %2429 = vperm.xlu1 %5967, %v12006_v50  }
 0x3ca   : > { %v6177_v22 = vpop.eup %6176 }
 0x3cc   : > { %2464 = vperm.xlu0 %5966, %v12007_v58  }
 0x3d5   : > { %v2099_v6 = vpop.xlane.xlu0 %2098 }
 0x3d6   : > { %v8915_v42 = vmax.f32 %v8912_v29, %v2099_v6  ;;  %v2718_v6 = vsub.f32 %v12016_v7, %v8862_v13  ;;  %v12022_v7 = vld [vmem:[#allocation40_spill] sm:$0xff] }
 0x3d8   : > { %12009 = vst [vmem:[#allocation18_spill] sm:$0xff] %v8915_v42  ;;  %4763 = vst.msk [vmem:[#allocation2 + $0x1b0] sm:$0xff] %vm4708_vm3, %v8915_v42  ;;  %6178 = vpow2.f32 %v2718_v6  ;;  %v12044_v42 = vld [vmem:[#allocation46_spill] sm:$0xff] }
 0x3d9   : > { %6180 = vpow2.f32 %v2719_v0  ;;  %v12024_v0 = vmax.f32 %v8823_v46, %v8676_v21 }
 0x3da   : > { %6182 = vpow2.f32 %v2720_v3 }
 0x3db   : > { %v2074_v8 = vpop.xlane.xlu1 %2073 }
 0x3dc   : > { %v8930_v60 = vmax.f32 %v8927_v62, %v2074_v8 }
 0x3de   : > { %4758 = vst.msk [vmem:[#allocation2 + $0x188] sm:$0xff] %vm4708_vm3, %v8930_v60 }
 0x3df   : > { %v2410_v29 = vpop.permute.xlu1 %2409 }
 0x3e0   : > { %v2713_v8 = vsub.f32 %v12019_v31, %v2410_v29  ;;  %v2714_v28 = vsub.f32 %v12020_v44, %v2410_v29  ;;  %v2715_v37 = vsub.f32 %v12021_v51, %v2410_v29  ;;  %v2716_v45 = vsub.f32 %v12022_v7, %v2410_v29 }
 0x3e2   : > { %6184 = vpow2.f32 %v2713_v8  ;;  %v6179_v3 = vpop.eup %6178 }
 0x3e3   : > { %6186 = vpow2.f32 %v2714_v28  ;;  %v6181_v29 = vpop.eup %6180  ;;  %v12026_v28 = vmax.f32 %v8814_v20, %v8613_v34  ;;  %v12029_v20 = vld [vmem:[#allocation240_spill] sm:$0xff] }
 0x3e4   : > { %6188 = vpow2.f32 %v2715_v37 }
 0x3e5   : > { %6190 = vpow2.f32 %v2716_v45 }
 0x3e8   : > { %v4051_v59 = vpop.f32.mrb[136].mxu0 }
 0x3e9   : > { %v4053_v43 = vpop.f32.mrb[137].mxu0 }
 0x3ea   : > { %v4340_v50 = vpop.f32.mrb[136].mxu1  ;;  %v4054_v13 = vpop.f32.mrb[138].mxu0 }
 0x3eb   : > { %v8946_v17 = vadd.f32 %v4340_v50, %v4051_v59  ;;  %v4342_v31 = vpop.f32.mrb[137].mxu1  ;;  %v4056_v6 = vpop.f32.mrb[139].mxu0  ;;  %2133 = vmax.xlane.f32.xlu0 %v12024_v0  ;;  %v12028_v0 = vld [vmem:[#allocation236_spill] sm:$0xff] }
 0x3ec   : > { %v4343_v44 = vpop.f32.mrb[138].mxu1  ;;  %v6183_v43 = vpop.eup %6182 }
 0x3ed   : > { %12023 = vst [vmem:[#allocation20_spill] sm:$0xff] %v8946_v17  ;;  %v8951_v8 = vadd.f32 %v4343_v44, %v4054_v13  ;;  %v4345_v37 = vpop.f32.mrb[139].mxu1  ;;  %2103 = vmax.xlane.f32.xlu1 %v12026_v28  ;;  %v6185_v45 = vpop.eup %6184  ;;  %v12027_v13 = vld [vmem:[#allocation217_spill] sm:$0xff]  ;;  %v12032_v28 = vld [vmem:[#allocation304_spill] sm:$0xff] }
 0x3ee   : > { %v6187_v50 = vpop.eup %6186  ;;  %v3645_v51 = vpack.c.bf16 %v6177_v22, %v6185_v45  ;;  %v8958_v44 = vpop.permute.xlu0 %2434  ;;  %v12030_v37 = vld [vmem:[#allocation244_spill] sm:$0xff] }
 0x3ef   : > { %12025 = vst [vmem:[#allocation13_spill] sm:$0xff] %v8951_v8  ;;  %v6189_v7 = vpop.eup %6188  ;;  %v3646_v59 = vpack.c.bf16 %v6179_v3, %v6187_v50  ;;  %v8964_v3 = vld [vmem:[#allocation2 + $0x1c8] sm:$0xff]  ;;  %v12038_v8 = vld [vmem:[#allocation51_spill] sm:$0xff] }
 0x3f0   : > { %v6191_v31 = vpop.eup %6190  ;;  %v3647_v6 = vpack.c.bf16 %v6181_v29, %v6189_v7  ;;  %v12031_v29 = vld [vmem:[#allocation303_spill] sm:$0xff] }
 0x3f1   : > { %4089 = vmatprep.mubr.bf16.mxu0 %v3646_v59  ;;  %v3648_v46 = vpack.c.bf16 %v6183_v43, %v6191_v31  ;;  %v12033_v43 = vld [vmem:[#allocation306_spill] sm:$0xff]  ;;  %v8973_v7 = vld [vmem:[#allocation2 + $0x198] sm:$0xff]  ;;  %v12036_v31 = vld [vmem:[#allocation305_spill] sm:$0xff] }
 0x3f2   : > { %4090 = vmatmul.mubr.bf16.gmra.mrb[156].mxu0 %v3645_v51  ;;  %v8962_v22 = vpop.permute.xlu0 %2444  ;;  %v12034_v45 = vmax.f32 %v12032_v28, %v12033_v43  ;;  %v12035_v51 = vld [vmem:[#allocation248_spill] sm:$0xff] }
 0x3f3   : > { %4378 = vmatprep.mubr.bf16.mxu1 %v3648_v46  ;;  %v12037_v46 = vld [vmem:[#allocation49_spill] sm:$0xff] }
 0x3f4   : > { %4379 = vmatmul.mubr.bf16.gmra.mrb[156].mxu1 %v3647_v6  ;;  %v8970_v50 = vmax.f32 %v12034_v45, %v12031_v29  ;;  %v2725_v17 = vsub.f32 %v12037_v46, %v8910_v23  ;;  %v12039_v45 = vld [vmem:[#allocation50_spill] sm:$0xff]  ;;  %v12041_v46 = vld [vmem:[#allocation52_spill] sm:$0xff] }
 0x3f5   : > { %v2727_v29 = vsub.f32 %v12039_v45, %v8910_v23  ;;  %v2728_v6 = vsub.f32 %v12041_v46, %v8910_v23 }
 0x3f6   : > { %6192 = vpow2.f32 %v2725_v17 }
 0x3fe   : > { %2439 = vperm.xlu1 %5967, %v12027_v13   ;;  %v2726_v13 = vsub.f32 %v12038_v8, %v8910_v23  ;;  %v12047_v23 = vld [vmem:[#allocation266_spill] sm:$0xff] }
 0x400   : > { %6194 = vpow2.f32 %v2726_v13  ;;  %v6193_v17 = vpop.eup %6192  ;;  %v12048_v13 = vld [vmem:[#allocation269_spill] sm:$0xff] }
 0x401   : > { %2474 = vperm.xlu0 %5966, %v12028_v0   ;;  %6196 = vpow2.f32 %v2727_v29 }
 0x402   : > { %6198 = vpow2.f32 %v2728_v6 }
 0x405   : > { %2484 = vperm.xlu0 %5966, %v12029_v20  }
 0x409   : > { %2494 = vperm.xlu0 %5966, %v12030_v37  }
 0x40a   : > { %v6195_v29 = vpop.eup %6194 }
 0x40b   : > { %v6197_v46 = vpop.eup %6196 }
 0x40d   : > { %2504 = vperm.xlu0 %5966, %v12035_v51  }
 0x40e   : > { %v2114_v59 = vpop.xlane.xlu0 %2113 }
 0x40f   : > { %v8980_v21 = vmax.f32 %v8964_v3, %v2114_v59  ;;  %v12042_v59 = vld [vmem:[#allocation45_spill] sm:$0xff] }
 0x410   : > { %v2084_v43 = vpop.xlane.xlu1 %2083 }
 0x411   : > { %v8987_v28 = vmax.f32 %v8973_v7, %v2084_v43  ;;  %2514 = vperm.xlu0 %5966, %v12040_v49   ;;  %4766 = vst.msk [vmem:[#allocation2 + $0x1c8] sm:$0xff] %vm4708_vm3, %v8980_v21 }
 0x413   : > { %4760 = vst.msk [vmem:[#allocation2 + $0x198] sm:$0xff] %vm4708_vm3, %v8987_v28 }
 0x414   : > { %v2420_v8 = vpop.permute.xlu1 %2419 }
 0x415   : > { %v2721_v45 = vsub.f32 %v12042_v59, %v2420_v8  ;;  %v2722_v43 = vsub.f32 %v12043_v14, %v2420_v8  ;;  %v2723_v55 = vsub.f32 %v12044_v42, %v2420_v8  ;;  %2524 = vperm.xlu0 %5966, %v12045_v36   ;;  %v2724_v11 = vsub.f32 %v12046_v26, %v2420_v8  ;;  %v6199_v59 = vpop.eup %6198  ;;  %v12049_v42 = vld [vmem:[#allocation276_spill] sm:$0xff] }
 0x416   : > { %v12050_v26 = vmax.f32 %v8873_v38, %v8626_v53 }
 0x417   : > { %6200 = vpow2.f32 %v2721_v45 }
 0x418   : > { %6202 = vpow2.f32 %v2722_v43 }
 0x419   : > { %6204 = vpow2.f32 %v2723_v55  ;;  %2529 = vperm.xlu0 %5966, %v12047_v23  }
 0x41a   : > { %6206 = vpow2.f32 %v2724_v11 }
 0x41d   : > { %2539 = vperm.xlu0 %5966, %v12048_v13  }
 0x421   : > { %v6201_v14 = vpop.eup %6200  ;;  %v4059_v10 = vpop.f32.mrb[140].mxu0  ;;  %2549 = vperm.xlu0 %5966, %v12049_v42  }
 0x422   : > { %v6203_v33 = vpop.eup %6202  ;;  %v4061_v6 = vpop.f32.mrb[141].mxu0  ;;  %2108 = vmax.xlane.f32.xlu1 %v12050_v26  ;;  %v3649_v55 = vpack.c.bf16 %v6193_v17, %v6201_v14 }
 0x423   : > { %v6205_v8 = vpop.eup %6204  ;;  %v4348_v45 = vpop.f32.mrb[140].mxu1  ;;  %v3650_v43 = vpack.c.bf16 %v6195_v29, %v6203_v33 }
 0x424   : > { %v4062_v11 = vpop.f32.mrb[142].mxu0  ;;  %v6207_v23 = vpop.eup %6206  ;;  %v9007_v13 = vadd.f32 %v4348_v45, %v4059_v10  ;;  %v3651_v63 = vpack.c.bf16 %v6197_v46, %v6205_v8  ;;  %v12055_v8 = vld [vmem:[#allocation220_spill] sm:$0xff] }
 0x425   : > { %v4350_v34 = vpop.f32.mrb[141].mxu1  ;;  %v4064_v32 = vpop.f32.mrb[143].mxu0  ;;  %4097 = vmatprep.mubr.bf16.mxu0 %v3650_v43  ;;  %v3652_v42 = vpack.c.bf16 %v6199_v59, %v6207_v23  ;;  %v12056_v23 = vmax.f32 %v8723_v19, %v8702_v30  ;;  %v9023_v59 = vld [vmem:[#allocation2 + $0x1a8] sm:$0xff]  ;;  %v12058_v43 = vld [vmem:[#allocation59_spill] sm:$0xff] }
 0x426   : > { %12051 = vst [vmem:[#allocation15_spill] sm:$0xff] %v9007_v13  ;;  %v4351_v12 = vpop.f32.mrb[142].mxu1  ;;  %4098 = vmatmul.mubr.bf16.gmra.mrb[160].mxu0 %v3649_v55  ;;  %v12057_v55 = vld [vmem:[#allocation57_spill] sm:$0xff]  ;;  %v12065_v13 = vld [vmem:[#allocation282_spill] sm:$0xff] }
 0x427   : > { %v9009_v41 = vadd.f32 %v4351_v12, %v4062_v11  ;;  %v4353_v6 = vpop.f32.mrb[143].mxu1  ;;  %4386 = vmatprep.mubr.bf16.mxu1 %v3652_v42  ;;  %v9016_v12 = vpop.permute.xlu0 %2454  ;;  %v2733_v45 = vsub.f32 %v12057_v55, %v8958_v44  ;;  %v12062_v55 = vld [vmem:[#allocation55_spill] sm:$0xff] }
 0x428   : > { %4387 = vmatmul.mubr.bf16.gmra.mrb[160].mxu1 %v3651_v63  ;;  %v9021_v63 = vld [vmem:[#allocation2 + $0x1d8] sm:$0xff]  ;;  %v2734_v6 = vsub.f32 %v12058_v43, %v8958_v44 }
 0x429   : > { %12052 = vst [vmem:[#allocation14_spill] sm:$0xff] %v9009_v41  ;;  %v4067_v38 = vpop.f32.mrb[144].mxu0  ;;  %6208 = vpow2.f32 %v2733_v45  ;;  %v12109_v41 = vld [vmem:[#allocation239_spill] sm:$0xff] }
 0x42a   : > { %v4069_v17 = vpop.f32.mrb[145].mxu0  ;;  %6210 = vpow2.f32 %v2734_v6 }
 0x42b   : > { %v4356_v14 = vpop.f32.mrb[144].mxu1  ;;  %v4070_v26 = vpop.f32.mrb[146].mxu0  ;;  %v12059_v17 = vld [vmem:[#allocation58_spill] sm:$0xff] }
 0x42c   : > { %v9011_v33 = vadd.f32 %v4356_v14, %v4067_v38  ;;  %v4358_v10 = vpop.f32.mrb[145].mxu1  ;;  %v4072_v29 = vpop.f32.mrb[147].mxu0  ;;  %v2735_v14 = vsub.f32 %v12059_v17, %v8958_v44 }
 0x42d   : > { %v4359_v34 = vpop.f32.mrb[146].mxu1  ;;  %v12060_v10 = vld [vmem:[#allocation60_spill] sm:$0xff] }
 0x42e   : > { %12053 = vst [vmem:[#allocation16_spill] sm:$0xff] %v9011_v33  ;;  %v9013_v32 = vadd.f32 %v4359_v34, %v4070_v26  ;;  %v4361_v46 = vpop.f32.mrb[147].mxu1  ;;  %v2736_v29 = vsub.f32 %v12060_v10, %v8958_v44  ;;  %6212 = vpow2.f32 %v2735_v14  ;;  %v12064_v26 = vld [vmem:[#allocation56_spill] sm:$0xff] }
 0x430   : > { %12054 = vst [vmem:[#allocation25_spill] sm:$0xff] %v9013_v32  ;;  %6214 = vpow2.f32 %v2736_v29 }
 0x433   : > { %2449 = vperm.xlu1 %5967, %v12055_v8   ;;  %v6209_v44 = vpop.eup %6208 }
 0x434   : > { %v6211_v45 = vpop.eup %6210 }
 0x438   : > { %v6213_v10 = vpop.eup %6212 }
 0x43a   : > { %v6215_v34 = vpop.eup %6214 }
 0x440   : > { %2143 = vmax.xlane.f32.xlu0 %v12056_v23  ;;  %v12061_v23 = vld [vmem:[#allocation53_spill] sm:$0xff] }
 0x443   : > { %v2124_v42 = vpop.xlane.xlu0 %2123 }
 0x444   : > { %v9028_v11 = vmax.f32 %v9021_v63, %v2124_v42 }
 0x445   : > { %v2094_v38 = vpop.xlane.xlu1 %2093 }
 0x446   : > { %v9035_v19 = vmax.f32 %v9023_v59, %v2094_v38  ;;  %4768 = vst.msk [vmem:[#allocation2 + $0x1d8] sm:$0xff] %vm4708_vm3, %v9028_v11  ;;  %v12063_v38 = vld [vmem:[#allocation54_spill] sm:$0xff] }
 0x448   : > { %4762 = vst.msk [vmem:[#allocation2 + $0x1a8] sm:$0xff] %vm4708_vm3, %v9035_v19 }
 0x449   : > { %v2430_v46 = vpop.permute.xlu1 %2429 }
 0x44a   : > { %v2729_v42 = vsub.f32 %v12061_v23, %v2430_v46  ;;  %v2730_v43 = vsub.f32 %v12062_v55, %v2430_v46  ;;  %v2731_v17 = vsub.f32 %v12063_v38, %v2430_v46  ;;  %v2732_v33 = vsub.f32 %v12064_v26, %v2430_v46 }
 0x44b   : > { %v12066_v23 = vmax.f32 %v8921_v54, %v12014_v15 }
 0x44c   : > { %6216 = vpow2.f32 %v2729_v42 }
 0x44d   : > { %6218 = vpow2.f32 %v2730_v43 }
 0x44e   : > { %6220 = vpow2.f32 %v2731_v17 }
 0x44f   : > { %6222 = vpow2.f32 %v2732_v33 }
 0x456   : > { %v6217_v6 = vpop.eup %6216  ;;  %2559 = vperm.xlu0 %5966, %v12065_v13  }
 0x457   : > { %v6219_v14 = vpop.eup %6218  ;;  %2118 = vmax.xlane.f32.xlu1 %v12066_v23  ;;  %v3653_v55 = vpack.c.bf16 %v6209_v44, %v6217_v6  ;;  %v9064_v23 = vpop.permute.xlu0 %2464 }
 0x458   : > { %v6221_v29 = vpop.eup %6220  ;;  %v3654_v38 = vpack.c.bf16 %v6211_v45, %v6219_v14 }
 0x459   : > { %v6223_v26 = vpop.eup %6222  ;;  %v3655_v46 = vpack.c.bf16 %v6213_v10, %v6221_v29  ;;  %v9068_v29 = vld [vmem:[#allocation2 + $0x1b8] sm:$0xff] }
 0x45a   : > { %4105 = vmatprep.mubr.bf16.mxu0 %v3654_v38  ;;  %v3656_v42 = vpack.c.bf16 %v6215_v34, %v6223_v26  ;;  %2574 = vperm.xlu0 %5966, %v8882_v27   ;;  %v4075_v33 = vpop.f32.mrb[148].mxu0  ;;  %v12069_v34 = vld [vmem:[#allocation226_spill] sm:$0xff]  ;;  %v12070_v26 = vld [vmem:[#allocation65_spill] sm:$0xff] }
 0x45b   : > { %4106 = vmatmul.mubr.bf16.gmra.mrb[164].mxu0 %v3653_v55  ;;  %v4077_v43 = vpop.f32.mrb[149].mxu0  ;;  %v9066_v55 = vld [vmem:[#allocation2 + $0x1e8] sm:$0xff] }
 0x45c   : > { %4394 = vmatprep.mubr.bf16.mxu1 %v3656_v42  ;;  %v4364_v17 = vpop.f32.mrb[148].mxu1  ;;  %v4078_v13 = vpop.f32.mrb[150].mxu0  ;;  %v12071_v42 = vld [vmem:[#allocation67_spill] sm:$0xff] }
 0x45d   : > { %4395 = vmatmul.mubr.bf16.gmra.mrb[164].mxu1 %v3655_v46  ;;  %v9057_v54 = vadd.f32 %v4364_v17, %v4075_v33  ;;  %v4366_v44 = vpop.f32.mrb[149].mxu1  ;;  %v4080_v6 = vpop.f32.mrb[151].mxu0  ;;  %v2741_v46 = vsub.f32 %v12070_v26, %v8962_v22  ;;  %v2742_v33 = vsub.f32 %v12071_v42, %v8962_v22  ;;  %v12072_v17 = vld [vmem:[#allocation66_spill] sm:$0xff]  ;;  %v12082_v26 = vld [vmem:[#allocation113_spill] sm:$0xff] }
 0x45e   : > { %2584 = vperm.xlu0 %5966, %v8930_v60   ;;  %v4367_v45 = vpop.f32.mrb[150].mxu1  ;;  %v2743_v44 = vsub.f32 %v12072_v17, %v8962_v22 }
 0x45f   : > { %12067 = vst [vmem:[#allocation27_spill] sm:$0xff] %v9057_v54  ;;  %v9059_v14 = vadd.f32 %v4367_v45, %v4078_v13  ;;  %v4369_v10 = vpop.f32.mrb[151].mxu1  ;;  %6224 = vpow2.f32 %v2741_v46  ;;  %v12076_v45 = vld [vmem:[#allocation63_spill] sm:$0xff] }
 0x460   : > { %v12074_v10 = vld [vmem:[#allocation68_spill] sm:$0xff]  ;;  %6226 = vpow2.f32 %v2742_v33 }
 0x461   : > { %12068 = vst [vmem:[#allocation26_spill] sm:$0xff] %v9059_v14  ;;  %6228 = vpow2.f32 %v2743_v44  ;;  %v12120_v14 = vld [vmem:[#allocation75_spill] sm:$0xff] }
 0x462   : > { %2594 = vperm.xlu0 %5966, %v8987_v28  }
 0x466   : > { %2604 = vperm.xlu0 %5966, %v9035_v19  }
 0x468   : > { %2459 = vperm.xlu1 %5967, %v12069_v34   ;;  %v12077_v34 = vld [vmem:[#allocation62_spill] sm:$0xff] }
 0x469   : > { %v6225_v44 = vpop.eup %6224 }
 0x478   : > { %v2134_v38 = vpop.xlane.xlu0 %2133 }
 0x479   : > { %v9073_v13 = vmax.f32 %v9066_v55, %v2134_v38  ;;  %v2744_v38 = vsub.f32 %v12074_v10, %v8962_v22  ;;  %v12078_v22 = vld [vmem:[#allocation64_spill] sm:$0xff] }
 0x47a   : > { %v2104_v43 = vpop.xlane.xlu1 %2103 }
 0x47b   : > { %v9080_v6 = vmax.f32 %v9068_v29, %v2104_v43  ;;  %4770 = vst.msk [vmem:[#allocation2 + $0x1e8] sm:$0xff] %vm4708_vm3, %v9073_v13  ;;  %v12075_v43 = vld [vmem:[#allocation61_spill] sm:$0xff]  ;;  %6230 = vpow2.f32 %v2744_v38 }
 0x47d   : > { %12073 = vst [vmem:[#allocation28_spill] sm:$0xff] %v9080_v6  ;;  %4764 = vst.msk [vmem:[#allocation2 + $0x1b8] sm:$0xff] %vm4708_vm3, %v9080_v6  ;;  %2614 = vperm.xlu0 %5966, %v9080_v6  }
 0x47e   : > { %v2440_v42 = vpop.permute.xlu1 %2439 }
 0x47f   : > { %v2737_v17 = vsub.f32 %v12075_v43, %v2440_v42  ;;  %v2738_v54 = vsub.f32 %v12076_v45, %v2440_v42  ;;  %v2739_v8 = vsub.f32 %v12077_v34, %v2440_v42  ;;  %v2740_v46 = vsub.f32 %v12078_v22, %v2440_v42  ;;  %v6227_v43 = vpop.eup %6226 }
 0x480   : > { %v9097_v10 = vpop.permute.xlu0 %2474  ;;  %v6229_v34 = vpop.eup %6228 }
 0x481   : > { %6232 = vpow2.f32 %v2737_v17  ;;  %2624 = vperm.xlu0 %5966, %v8980_v21   ;;  %v12081_v17 = vmax.f32 %v8970_v50, %v12036_v31 }
 0x482   : > { %6234 = vpow2.f32 %v2738_v54 }
 0x483   : > { %6236 = vpow2.f32 %v2739_v8 }
 0x484   : > { %6238 = vpow2.f32 %v2740_v46  ;;  %v9100_v33 = vpop.permute.xlu0 %2484 }
 0x485   : > { %12079 = vst [vmem:[#allocation21_spill] sm:$0xff] %v9100_v33  ;;  %2634 = vperm.xlu0 %5966, %v9028_v11   ;;  %v6231_v38 = vpop.eup %6230 }
 0x488   : > { %v9103_v45 = vpop.permute.xlu0 %2494 }
 0x489   : > { %12080 = vst [vmem:[#allocation23_spill] sm:$0xff] %v9103_v45  ;;  %2644 = vperm.xlu0 %5966, %v9073_v13  }
 0x48b   : > { %v6233_v42 = vpop.eup %6232 }
 0x48c   : > { %v6235_v22 = vpop.eup %6234  ;;  %2128 = vmax.xlane.f32.xlu1 %v12081_v17  ;;  %v9109_v8 = vpop.permute.xlu0 %2504  ;;  %v3657_v54 = vpack.c.bf16 %v6225_v44, %v6233_v42 }
 0x48d   : > { %v6237_v46 = vpop.eup %6236  ;;  %v3658_v6 = vpack.c.bf16 %v6227_v43, %v6235_v22  ;;  %v12129_v43 = vld [vmem:[#allocation273_spill] sm:$0xff] }
 0x48e   : > { %v6239_v30 = vpop.eup %6238  ;;  %v3659_v50 = vpack.c.bf16 %v6229_v34, %v6237_v46 }
 0x48f   : > { %v3660_v17 = vpack.c.bf16 %v6231_v38, %v6239_v30  ;;  %4113 = vmatprep.mubr.bf16.mxu0 %v3658_v6  ;;  %v4083_v53 = vpop.f32.mrb[152].mxu0 }
 0x490   : > { %v9119_v31 = vpop.permute.xlu0 %2514  ;;  %4114 = vmatmul.mubr.bf16.gmra.mrb[168].mxu0 %v3657_v54  ;;  %v4085_v30 = vpop.f32.mrb[153].mxu0 }
 0x491   : > { %12086 = vst [vmem:[#allocation22_spill] sm:$0xff] %v9119_v31  ;;  %4402 = vmatprep.mubr.bf16.mxu1 %v3660_v17  ;;  %v4372_v6 = vpop.f32.mrb[152].mxu1  ;;  %v4086_v38 = vpop.f32.mrb[154].mxu0 }
 0x492   : > { %4403 = vmatmul.mubr.bf16.gmra.mrb[168].mxu1 %v3659_v50  ;;  %v9129_v22 = vadd.f32 %v4372_v6, %v4083_v53  ;;  %v4374_v54 = vpop.f32.mrb[153].mxu1  ;;  %v4088_v46 = vpop.f32.mrb[155].mxu0  ;;  %v12103_v50 = vld [vmem:[#allocation235_spill] sm:$0xff]  ;;  %v12121_v6 = vld [vmem:[#allocation74_spill] sm:$0xff] }
 0x493   : > { %v4375_v17 = vpop.f32.mrb[154].mxu1  ;;  %v12115_v46 = vld [vmem:[#allocation243_spill] sm:$0xff]  ;;  %v2751_v53 = vsub.f32 %v12121_v6, %v9016_v12  ;;  %v12127_v6 = vld [vmem:[#allocation70_spill] sm:$0xff] }
 0x494   : > { %12091 = vst [vmem:[#allocation24_spill] sm:$0xff] %v9129_v22  ;;  %v9131_v42 = vpop.permute.xlu0 %2524  ;;  %v9133_v33 = vadd.f32 %v4375_v17, %v4086_v38  ;;  %v4377_v15 = vpop.f32.mrb[155].mxu1  ;;  %v12116_v22 = vld [vmem:[#allocation247_spill] sm:$0xff] }
 0x495   : > { %12092 = vst [vmem:[#allocation33_spill] sm:$0xff] %v9131_v42  ;;  %v12117_v38 = vld [vmem:[#allocation251_spill] sm:$0xff]  ;;  %v12119_v15 = vld [vmem:[#allocation73_spill] sm:$0xff] }
 0x496   : > { %12093 = vst [vmem:[#allocation35_spill] sm:$0xff] %v9133_v33  ;;  %v12124_v42 = vld [vmem:[#allocation255_spill] sm:$0xff] }
 0x498   : > { %v9143_v54 = vpop.permute.xlu0 %2529 }
 0x499   : > { %12098 = vst [vmem:[#allocation34_spill] sm:$0xff] %v9143_v54  ;;  %v2750_v54 = vsub.f32 %v12120_v14, %v9016_v12  ;;  %v12125_v14 = vld [vmem:[#allocation69_spill] sm:$0xff] }
 0x49c   : > { %v9154_v34 = vpop.permute.xlu0 %2539 }
 0x49d   : > { %2469 = vperm.xlu1 %5967, %v12103_v50   ;;  %12104 = vst [vmem:[#allocation36_spill] sm:$0xff] %v9154_v34  ;;  %v2749_v50 = vsub.f32 %v12119_v15, %v9016_v12 }
 0x49f   : > { %6240 = vpow2.f32 %v2749_v50 }
 0x4a0   : > { %v9165_v17 = vpop.permute.xlu0 %2549  ;;  %6242 = vpow2.f32 %v2750_v54 }
 0x4a1   : > { %2479 = vperm.xlu1 %5967, %v12109_v41   ;;  %12110 = vst [vmem:[#allocation29_spill] sm:$0xff] %v9165_v17  ;;  %v9178_v41 = vld [vmem:[#allocation2 + $0x1c0] sm:$0xff]  ;;  %6244 = vpow2.f32 %v2751_v53  ;;  %v12126_v17 = vld [vmem:[#allocation71_spill] sm:$0xff] }
 0x4a2   : > { %12118 = vst [vmem:[#allocation31_spill] sm:$0xff] %v9178_v41 }
 0x4a5   : > { %2489 = vperm.xlu1 %5967, %v12115_v46   ;;  %v12123_v46 = vld [vmem:[#allocation76_spill] sm:$0xff] }
 0x4a9   : > { %2499 = vperm.xlu1 %5967, %v12116_v22   ;;  %v2752_v22 = vsub.f32 %v12123_v46, %v9016_v12  ;;  %v6241_v12 = vpop.eup %6240 }
 0x4aa   : > { %v6243_v50 = vpop.eup %6242 }
 0x4ab   : > { %6246 = vpow2.f32 %v2752_v22  ;;  %v6245_v53 = vpop.eup %6244 }
 0x4ad   : > { %2509 = vperm.xlu1 %5967, %v12117_v38  }
 0x4af   : > { %v2109_v33 = vpop.xlane.xlu1 %2108 }
 0x4b0   : > { %v9187_v30 = vmax.f32 %v9178_v41, %v2109_v33  ;;  %v12128_v33 = vld [vmem:[#allocation72_spill] sm:$0xff] }
 0x4b1   : > { %2519 = vperm.xlu1 %5967, %v12124_v42   ;;  %v12131_v42 = vld [vmem:[#allocation138_spill] sm:$0xff] }
 0x4b2   : > { %12122 = vst [vmem:[#allocation30_spill] sm:$0xff] %v9187_v30  ;;  %4765 = vst.msk [vmem:[#allocation2 + $0x1c0] sm:$0xff] %vm4708_vm3, %v9187_v30 }
 0x4b3   : > { %v2450_v15 = vpop.permute.xlu1 %2449 }
 0x4b4   : > { %v2745_v38 = vsub.f32 %v12125_v14, %v2450_v15  ;;  %v2746_v34 = vsub.f32 %v12126_v17, %v2450_v15  ;;  %v2747_v32 = vsub.f32 %v12127_v6, %v2450_v15  ;;  %v2748_v41 = vsub.f32 %v12128_v33, %v2450_v15 }
 0x4b5   : > { %2534 = vperm.xlu1 %5967, %v12129_v43   ;;  %v6247_v54 = vpop.eup %6246 }
 0x4b6   : > { %6248 = vpow2.f32 %v2745_v38 }
 0x4b7   : > { %6250 = vpow2.f32 %v2746_v34  ;;  %v12130_v34 = vld [vmem:[#allocation135_spill] sm:$0xff] }
 0x4b8   : > { %6252 = vpow2.f32 %v2747_v32  ;;  %v12132_v31 = vsub.f32 %v12130_v34, %v12131_v42  ;;  %v12151_v34 = vld [vmem:[#allocation210_spill] sm:$0xff] }
 0x4b9   : > { %6254 = vpow2.f32 %v2748_v41  ;;  %2544 = vperm.xlu1 %5967, %v8718_v5  }
 0x4ba   : > { %6256 = vpow2.f32 %v12132_v31 }
 0x4bd   : > { %2554 = vperm.xlu1 %5967, %v8774_v18  }
 0x4c0   : > { %v6249_v46 = vpop.eup %6248 }
 0x4c1   : > { %v6251_v17 = vpop.eup %6250  ;;  %v3661_v14 = vpack.c.bf16 %v6241_v12, %v6249_v46 }
 0x4c2   : > { %v6253_v22 = vpop.eup %6252  ;;  %v3662_v6 = vpack.c.bf16 %v6243_v50, %v6251_v17  ;;  %v9206_v17 = vld [vmem:[#allocation2 + $0x1f8] sm:$0xff] }
 0x4c3   : > { %v6255_v15 = vpop.eup %6254  ;;  %v3663_v33 = vpack.c.bf16 %v6245_v53, %v6253_v22  ;;  %v12136_v22 = vld [vmem:[#allocation150_spill] sm:$0xff] }
 0x4c4   : > { %4121 = vmatprep.mubr.bf16.mxu0 %v3662_v6  ;;  %v3664_v38 = vpack.c.bf16 %v6247_v54, %v6255_v15  ;;  %v12138_v15 = vld [vmem:[#allocation160_spill] sm:$0xff] }
 0x4c5   : > { %4122 = vmatmul.mubr.bf16.gmra.mrb[172].mxu0 %v3661_v14  ;;  %v4091_v41 = vpop.f32.mrb[156].mxu0  ;;  %v12135_v14 = vld [vmem:[#allocation147_spill] sm:$0xff] }
 0x4c6   : > { %4410 = vmatprep.mubr.bf16.mxu1 %v3664_v38  ;;  %v4093_v32 = vpop.f32.mrb[157].mxu0  ;;  %v12137_v6 = vsub.f32 %v12135_v14, %v12136_v22  ;;  %v12145_v14 = vld [vmem:[#allocation202_spill] sm:$0xff] }
 0x4c7   : > { %4411 = vmatmul.mubr.bf16.gmra.mrb[172].mxu1 %v3663_v33  ;;  %v4380_v44 = vpop.f32.mrb[156].mxu1  ;;  %v4094_v30 = vpop.f32.mrb[158].mxu0  ;;  %v12139_v33 = vld [vmem:[#allocation157_spill] sm:$0xff] }
 0x4c8   : > { %v9204_v45 = vadd.f32 %v4380_v44, %v4091_v41  ;;  %v4382_v12 = vpop.f32.mrb[157].mxu1  ;;  %v4096_v46 = vpop.f32.mrb[159].mxu0  ;;  %6258 = vpow2.f32 %v12137_v6  ;;  %v2214_v42 = vsub.f32 %v12139_v33, %v12138_v15  ;;  %v12140_v44 = vld [vmem:[#allocation172_spill] sm:$0xff]  ;;  %v12141_v41 = vld [vmem:[#allocation170_spill] sm:$0xff] }
 0x4c9   : > { %v4383_v50 = vpop.f32.mrb[158].mxu1  ;;  %v2216_v32 = vsub.f32 %v12141_v41, %v12140_v44  ;;  %v12142_v12 = vld [vmem:[#allocation196_spill] sm:$0xff]  ;;  %v12143_v46 = vld [vmem:[#allocation194_spill] sm:$0xff] }
 0x4ca   : > { %12133 = vst [vmem:[#allocation32_spill] sm:$0xff] %v9204_v45  ;;  %v9208_v53 = vadd.f32 %v4383_v50, %v4094_v30  ;;  %v4385_v54 = vpop.f32.mrb[159].mxu1  ;;  %6260 = vpow2.f32 %v2214_v42  ;;  %v6257_v30 = vpop.eup %6256  ;;  %v2220_v50 = vsub.f32 %v12143_v46, %v12142_v12  ;;  %v12146_v6 = vld [vmem:[#allocation182_spill] sm:$0xff]  ;;  %v12147_v15 = vld [vmem:[#allocation184_spill] sm:$0xff]  ;;  %v2226_v45 = vsub.f32 %v12151_v34, %v8295_v39 }
 0x4cb   : > { %6262 = vpow2.f32 %v2216_v32  ;;  %v12144_v54 = vld [vmem:[#allocation204_spill] sm:$0xff]  ;;  %v12148_v33 = vsub.f32 %v12146_v6, %v12147_v15  ;;  %v12150_v44 = vld [vmem:[#allocation206_spill] sm:$0xff] }
 0x4cc   : > { %12134 = vst [vmem:[#allocation230_spill] sm:$0xff] %v9208_v53  ;;  %v2222_v22 = vsub.f32 %v12145_v14, %v12144_v54  ;;  %v12158_v39 = vld [vmem:[#allocation216_spill] sm:$0xff]  ;;  %v12306_v32 = vld [vmem:[#allocation110_spill] sm:$0xff] }
 0x4cd   : > { %v2144_v31 = vpop.xlane.xlu0 %2143  ;;  %6264 = vpow2.f32 %v12148_v33  ;;  %v12157_v33 = vld [vmem:[#allocation213_spill] sm:$0xff]  ;;  %v2230_v34 = vsub.f32 %v12158_v39, %v8327_v57  ;;  %v12164_v57 = vld [vmem:[#allocation224_spill] sm:$0xff]  ;;  %v12166_v39 = vld [vmem:[#allocation238_spill] sm:$0xff] }
 0x4ce   : > { %v9216_v38 = vmax.f32 %v9206_v17, %v2144_v31  ;;  %v12149_v31 = vld [vmem:[#allocation208_spill] sm:$0xff]  ;;  %6266 = vpow2.f32 %v2220_v50 }
 0x4cf   : > { %v2224_v41 = vsub.f32 %v12150_v44, %v12149_v31  ;;  %v2228_v31 = vsub.f32 %v12157_v33, %v8312_v48  ;;  %6268 = vpow2.f32 %v2222_v22  ;;  %v12159_v44 = vld [vmem:[#allocation219_spill] sm:$0xff] }
 0x4d0   : > { %4772 = vst.msk [vmem:[#allocation2 + $0x1f8] sm:$0xff] %vm4708_vm3, %v9216_v38  ;;  %2654 = vperm.xlu0 %5966, %v9216_v38   ;;  %v2232_v46 = vsub.f32 %v12159_v44, %v8343_v61  ;;  %v2238_v44 = vsub.f32 %v12166_v39, %v12029_v20 }
 0x4d1   : > { %6270 = vpow2.f32 %v2224_v41  ;;  %v2234_v41 = vsub.f32 %v12164_v57, %v12007_v58  ;;  %v12295_v58 = vld [vmem:[#allocation95_spill] sm:$0xff] }
 0x4d2   : > { %v6259_v15 = vpop.eup %6258  ;;  %6272 = vpow2.f32 %v2226_v45  ;;  %v12165_v45 = vld [vmem:[#allocation234_spill] sm:$0xff] }
 0x4d3   : > { %6274 = vpow2.f32 %v2228_v31  ;;  %v12168_v31 = vld [vmem:[#allocation242_spill] sm:$0xff] }
 0x4d4   : > { %3240 = vperm.xlu0 %5966, %v6257_v30   ;;  %v6261_v33 = vpop.eup %6260  ;;  %6276 = vpow2.f32 %v2230_v34  ;;  %v2240_v6 = vsub.f32 %v12168_v31, %v12030_v37  ;;  %v12173_v37 = vld [vmem:[#allocation250_spill] sm:$0xff]  ;;  %v12305_v30 = vld [vmem:[#allocation111_spill] sm:$0xff] }
 0x4d5   : > { %v9236_v42 = vpop.permute.xlu0 %2559  ;;  %6278 = vpow2.f32 %v2232_v46  ;;  %v6263_v22 = vpop.eup %6262  ;;  %v12172_v46 = vld [vmem:[#allocation246_spill] sm:$0xff]  ;;  %v2244_v39 = vsub.f32 %v12173_v37, %v12040_v49 }
 0x4d6   : > { %12152 = vst [vmem:[#allocation41_spill] sm:$0xff] %v9236_v42  ;;  %6280 = vpow2.f32 %v2234_v41  ;;  %v2242_v20 = vsub.f32 %v12172_v46, %v12035_v51  ;;  %v12174_v34 = vld [vmem:[#allocation254_spill] sm:$0xff]  ;;  %v12192_v46 = vld [vmem:[#allocation79_spill] sm:$0xff] }
 0x4d7   : > { %v2246_v57 = vsub.f32 %v12174_v34, %v12045_v36  ;;  %v9297_v37 = vld [vmem:[#allocation2 + $0x1d0] sm:$0xff] }
 0x4d8   : > { %3250 = vperm.xlu0 %5966, %v6259_v15   ;;  %v2236_v15 = vsub.f32 %v12165_v45, %v12028_v0  ;;  %v12175_v0 = vmax.f32 %v8706_v35, %v8686_v25  ;;  %12180 = vst [vmem:[#allocation37_spill] sm:$0xff] %v9297_v37  ;;  %v12181_v35 = vld [vmem:[#allocation268_spill] sm:$0xff] }
 0x4d9   : > { %v9252_v12 = vpop.permute.xlu0 %2574  ;;  %v2248_v34 = vsub.f32 %v12181_v35, %v12129_v43 }
 0x4da   : > { %12160 = vst [vmem:[#allocation43_spill] sm:$0xff] %v9252_v12  ;;  %6282 = vpow2.f32 %v2236_v15  ;;  %v2250_v15 = vsub.f32 %v8698_v9, %v8718_v5  ;;  %v2760_v5 = vsub.f32 %v12190_v16, %v9064_v23  ;;  %v12194_v16 = vld [vmem:[#allocation80_spill] sm:$0xff]  ;;  %v12300_v12 = vld [vmem:[#allocation102_spill] sm:$0xff] }
 0x4db   : > { %6284 = vpow2.f32 %v2238_v44  ;;  %v12182_v44 = vld [vmem:[#allocation81_spill] sm:$0xff] }
 0x4dc   : > { %3260 = vperm.xlu0 %5966, %v6261_v33   ;;  %v6265_v33 = vpop.eup %6264  ;;  %6286 = vpow2.f32 %v2240_v6 }
 0x4dd   : > { %v9268_v14 = vpop.permute.xlu0 %2584  ;;  %v6267_v31 = vpop.eup %6266  ;;  %6288 = vpow2.f32 %v2242_v20 }
 0x4de   : > { %12167 = vst [vmem:[#allocation42_spill] sm:$0xff] %v9268_v14  ;;  %v6269_v51 = vpop.eup %6268  ;;  %6290 = vpow2.f32 %v2244_v39  ;;  %v12185_v39 = vld [vmem:[#allocation83_spill] sm:$0xff] }
 0x4df   : > { %v6271_v36 = vpop.eup %6270  ;;  %6292 = vpow2.f32 %v2246_v57 }
 0x4e0   : > { %3270 = vperm.xlu0 %5966, %v6263_v22   ;;  %v6273_v6 = vpop.eup %6272  ;;  %v2757_v22 = vsub.f32 %v12182_v44, %v9064_v23  ;;  %6294 = vpow2.f32 %v2248_v34  ;;  %v12191_v34 = vld [vmem:[#allocation77_spill] sm:$0xff] }
 0x4e1   : > { %2138 = vmax.xlane.f32.xlu1 %v12175_v0  ;;  %v9289_v41 = vpop.permute.xlu0 %2594  ;;  %v9305_v49 = vpop.eup %6274  ;;  %v2758_v0 = vsub.f32 %v12185_v39, %v9064_v23  ;;  %6296 = vpow2.f32 %v2250_v15  ;;  %v12193_v39 = vld [vmem:[#allocation78_spill] sm:$0xff] }
 0x4e2   : > { %12176 = vst [vmem:[#allocation44_spill] sm:$0xff] %v9289_v41  ;;  %v9314_v35 = vpop.eup %6276  ;;  %6298 = vpow2.f32 %v2757_v22  ;;  %v2252_v22 = vsub.f32 %v8761_v4, %v8774_v18  ;;  %v2266_v4 = vsub.f32 %v8964_v3, %v8980_v21  ;;  %v12195_v3 = vsub.f32 %v9021_v63, %v9028_v11  ;;  %v12200_v63 = vld [vmem:[#allocation90_spill] sm:$0xff] }
 0x4e3   : > { %v9324_v44 = vpop.eup %6278  ;;  %6300 = vpow2.f32 %v2758_v0  ;;  %v2767_v11 = vsub.f32 %v12200_v63, %v9097_v10  ;;  %v12236_v63 = vld [vmem:[#allocation115_spill] sm:$0xff] }
 0x4e4   : > { %v2119_v25 = vpop.xlane.xlu1 %2118  ;;  %3280 = vperm.xlu0 %5966, %v6265_v33   ;;  %v9336_v57 = vpop.eup %6280 }
 0x4e5   : > { %v9310_v20 = vmax.f32 %v9297_v37, %v2119_v25  ;;  %v9312_v43 = vpop.permute.xlu0 %2604  ;;  %v12189_v25 = vld [vmem:[#allocation82_spill] sm:$0xff]  ;;  %v9339_v33 = vpop.eup %6282 }
 0x4e6   : > { %12184 = vst [vmem:[#allocation38_spill] sm:$0xff] %v9312_v43  ;;  %v2759_v41 = vsub.f32 %v12189_v25, %v9064_v23  ;;  %v9342_v9 = vpop.eup %6284 }
 0x4e7   : > { %12183 = vst [vmem:[#allocation39_spill] sm:$0xff] %v9310_v20  ;;  %4767 = vst.msk [vmem:[#allocation2 + $0x1d0] sm:$0xff] %vm4708_vm3, %v9310_v20  ;;  %v9345_v2 = vpop.eup %6286 }
 0x4e8   : > { %v2460_v45 = vpop.permute.xlu1 %2459  ;;  %3290 = vperm.xlu0 %5966, %v6267_v31   ;;  %6302 = vpow2.f32 %v2759_v41  ;;  %v9348_v31 = vpop.eup %6288 }
 0x4e9   : > { %v2753_v25 = vsub.f32 %v12191_v34, %v2460_v45  ;;  %v2754_v37 = vsub.f32 %v12192_v46, %v2460_v45  ;;  %v2755_v15 = vsub.f32 %v12193_v39, %v2460_v45  ;;  %6304 = vpow2.f32 %v2760_v5  ;;  %v9352_v0 = vpop.eup %6290 }
 0x4ea   : > { %v2756_v23 = vsub.f32 %v12194_v16, %v2460_v45  ;;  %v2254_v46 = vsub.f32 %v8829_v1, %v8834_v24  ;;  %v9356_v41 = vpop.eup %6292  ;;  %v2256_v5 = vsub.f32 %v8877_v52, %v8882_v27  ;;  %v2258_v45 = vsub.f32 %v8927_v62, %v8930_v60 }
 0x4eb   : > { %6306 = vpow2.f32 %v2753_v25  ;;  %v2260_v1 = vsub.f32 %v8973_v7, %v8987_v28  ;;  %v12196_v28 = vld [vmem:[#allocation89_spill] sm:$0xff]  ;;  %v12199_v25 = vsub.f32 %v9066_v55, %v9073_v13 }
 0x4ec   : > { %3300 = vperm.xlu0 %5966, %v6269_v51   ;;  %6308 = vpow2.f32 %v2754_v37  ;;  %v9362_v51 = vpop.eup %6294  ;;  %v2765_v7 = vsub.f32 %v12196_v28, %v9097_v10  ;;  %v12197_v37 = vsub.f32 %v9023_v59, %v9035_v19  ;;  %v12201_v59 = vld [vmem:[#allocation28_spill] sm:$0xff] }
 0x4ed   : > { %6310 = vpow2.f32 %v2755_v15  ;;  %v9366_v18 = vpop.eup %6296  ;;  %v12202_v19 = vsub.f32 %v9068_v29, %v12201_v59  ;;  %v12206_v29 = vld [vmem:[#allocation97_spill] sm:$0xff] }
 0x4ee   : > { %6312 = vpow2.f32 %v2756_v23  ;;  %v6299_v52 = vpop.eup %6298 }
 0x4ef   : > { %6314 = vpow2.f32 %v2252_v22  ;;  %v6301_v27 = vpop.eup %6300 }
 0x4f0   : > { %3310 = vperm.xlu0 %5966, %v6271_v36   ;;  %6316 = vpow2.f32 %v2254_v46  ;;  %v12198_v36 = vld [vmem:[#allocation91_spill] sm:$0xff] }
 0x4f1   : > { %6318 = vpow2.f32 %v2256_v5  ;;  %v12203_v5 = vld [vmem:[#allocation5_spill] sm:$0xff] }
 0x4f2   : > { %2564 = vperm.xlu1 %5967, %v8834_v24   ;;  %6320 = vpow2.f32 %v2258_v45  ;;  %v6303_v62 = vpop.eup %6302  ;;  %v12204_v45 = vld [vmem:[#allocation92_spill] sm:$0xff] }
 0x4f3   : > { %6322 = vpow2.f32 %v2266_v4  ;;  %v6305_v60 = vpop.eup %6304  ;;  %v2768_v55 = vsub.f32 %v12204_v45, %v9097_v10 }
 0x4f4   : > { %3320 = vperm.xlu0 %5966, %v6273_v6   ;;  %6324 = vpow2.f32 %v2260_v1  ;;  %v2766_v6 = vsub.f32 %v12198_v36, %v9097_v10  ;;  %v12208_v10 = vld [vmem:[#allocation99_spill] sm:$0xff] }
 0x4f5   : > { %v6307_v21 = vpop.eup %6306  ;;  %6326 = vpow2.f32 %v12195_v3 }
 0x4f6   : > { %2569 = vperm.xlu1 %5967, %v8733_v40   ;;  %v6309_v24 = vpop.eup %6308  ;;  %6328 = vpow2.f32 %v12197_v37  ;;  %v3665_v39 = vpack.c.bf16 %v6299_v52, %v6307_v21  ;;  %v12237_v40 = vsub.f32 %v12236_v63, %v9109_v8 }
 0x4f7   : > { %v6311_v34 = vpop.eup %6310  ;;  %6330 = vpow2.f32 %v12199_v25  ;;  %v3666_v16 = vpack.c.bf16 %v6301_v27, %v6309_v24  ;;  %v12205_v27 = vld [vmem:[#allocation21_spill] sm:$0xff] }
 0x4f8   : > { %3330 = vperm.xlu0 %5966, %v9305_v49   ;;  %v6313_v23 = vpop.eup %6312  ;;  %6332 = vpow2.f32 %v12202_v19  ;;  %v3667_v46 = vpack.c.bf16 %v6303_v62, %v6311_v34  ;;  %v2773_v21 = vsub.f32 %v12206_v29, %v12205_v27  ;;  %v12215_v19 = vld [vmem:[#allocation100_spill] sm:$0xff]  ;;  %v12219_v29 = vld [vmem:[#allocation105_spill] sm:$0xff] }
 0x4f9   : > { %v4099_v15 = vpop.f32.mrb[160].mxu0  ;;  %v9392_v49 = vpop.eup %6314  ;;  %6334 = vpow2.f32 %v2765_v7  ;;  %4129 = vmatprep.mubr.bf16.mxu0 %v3666_v16  ;;  %v3668_v4 = vpack.c.bf16 %v6305_v60, %v6313_v23  ;;  %v2774_v60 = vsub.f32 %v12208_v10, %v12205_v27  ;;  %v12209_v7 = vld [vmem:[#allocation98_spill] sm:$0xff] }
 0x4fa   : > { %v4101_v22 = vpop.f32.mrb[161].mxu0  ;;  %2579 = vperm.xlu1 %5967, %v12203_v5   ;;  %v9396_v52 = vpop.eup %6316  ;;  %6336 = vpow2.f32 %v2766_v6  ;;  %4130 = vmatmul.mubr.bf16.gmra.mrb[176].mxu0 %v3665_v39  ;;  %v2775_v37 = vsub.f32 %v12209_v7, %v12205_v27  ;;  %v12234_v5 = vld [vmem:[#allocation18_spill] sm:$0xff] }
 0x4fb   : > { %v4388_v13 = vpop.f32.mrb[160].mxu1  ;;  %v4102_v1 = vpop.f32.mrb[162].mxu0  ;;  %6338 = vpow2.f32 %v2767_v11  ;;  %4418 = vmatprep.mubr.bf16.mxu1 %v3668_v4  ;;  %v2776_v22 = vsub.f32 %v12215_v19, %v12205_v27  ;;  %v12221_v27 = vld [vmem:[#allocation106_spill] sm:$0xff] }
 0x4fc   : > { %v9400_v3 = vadd.f32 %v4388_v13, %v4099_v15  ;;  %v4390_v62 = vpop.f32.mrb[161].mxu1  ;;  %v4104_v28 = vpop.f32.mrb[163].mxu0  ;;  %3340 = vperm.xlu0 %5966, %v9314_v35   ;;  %4419 = vmatmul.mubr.bf16.gmra.mrb[176].mxu1 %v3667_v46  ;;  %6340 = vpow2.f32 %v2768_v55  ;;  %v12217_v13 = vld [vmem:[#allocation6_spill] sm:$0xff]  ;;  %v12220_v55 = vld [vmem:[#allocation107_spill] sm:$0xff] }
 0x4fd   : > { %v9403_v24 = vpop.eup %6318  ;;  %v4391_v36 = vpop.f32.mrb[162].mxu1  ;;  %6342 = vpow2.f32 %v2773_v21  ;;  %v12262_v15 = vld [vmem:[#allocation34_spill] sm:$0xff]  ;;  %v12272_v21 = vld [vmem:[#allocation36_spill] sm:$0xff] }
 0x4fe   : > { %12207 = vst [vmem:[#allocation40_spill] sm:$0xff] %v9400_v3  ;;  %v9409_v6 = vpop.permute.xlu0 %2614  ;;  %v9411_v34 = vpop.eup %6320  ;;  %v9413_v39 = vadd.f32 %v4391_v36, %v4102_v1  ;;  %2589 = vperm.xlu1 %5967, %v12217_v13   ;;  %v12218_v1 = vld [vmem:[#allocation23_spill] sm:$0xff]  ;;  %6344 = vpow2.f32 %v2774_v60  ;;  %v12228_v3 = vld [vmem:[#allocation10_spill] sm:$0xff] }
 0x4ff   : > { %12210 = vst [vmem:[#allocation236_spill] sm:$0xff] %v9409_v6  ;;  %v4393_v25 = vpop.f32.mrb[163].mxu1  ;;  %v9421_v59 = vpop.eup %6322  ;;  %v2781_v62 = vsub.f32 %v12219_v29, %v12218_v1  ;;  %v2782_v10 = vsub.f32 %v12220_v55, %v12218_v1  ;;  %v2783_v7 = vsub.f32 %v12221_v27, %v12218_v1  ;;  %6346 = vpow2.f32 %v2775_v37  ;;  %v12226_v55 = vld [vmem:[#allocation108_spill] sm:$0xff] }
 0x500   : > { %12211 = vst [vmem:[#allocation240_spill] sm:$0xff] %v9413_v39  ;;  %v9428_v4 = vpop.eup %6324  ;;  %3350 = vperm.xlu0 %5966, %v9324_v44   ;;  %6348 = vpow2.f32 %v2776_v22  ;;  %v2784_v27 = vsub.f32 %v12226_v55, %v12218_v1  ;;  %v12266_v29 = vld [vmem:[#allocation140_spill] sm:$0xff] }
 0x501   : > { %v9433_v28 = vpop.eup %6326  ;;  %6350 = vpow2.f32 %v2781_v62 }
 0x502   : > { %v9439_v36 = vpop.permute.xlu0 %2624  ;;  %v9441_v25 = vpop.eup %6328  ;;  %2599 = vperm.xlu1 %5967, %v12228_v3   ;;  %6352 = vpow2.f32 %v2782_v10  ;;  %v12244_v3 = vld [vmem:[#allocation22_spill] sm:$0xff] }
 0x503   : > { %12222 = vst [vmem:[#allocation244_spill] sm:$0xff] %v9439_v36  ;;  %v9449_v23 = vpop.eup %6330  ;;  %6354 = vpow2.f32 %v2783_v7  ;;  %v12235_v7 = vsub.f32 %v12082_v26, %v9109_v8  ;;  %v12271_v36 = vld [vmem:[#allocation148_spill] sm:$0xff] }
 0x504   : > { %v9456_v37 = vpop.eup %6332  ;;  %3360 = vperm.xlu0 %5966, %v9336_v57   ;;  %6356 = vpow2.f32 %v2784_v27  ;;  %v12238_v27 = vld [vmem:[#allocation114_spill] sm:$0xff]  ;;  %v12243_v57 = vld [vmem:[#allocation121_spill] sm:$0xff] }
 0x505   : > { %v9459_v44 = vpop.eup %6334  ;;  %6358 = vpow2.f32 %v12235_v7  ;;  %v12239_v39 = vsub.f32 %v12238_v27, %v9109_v8  ;;  %v12242_v7 = vld [vmem:[#allocation30_spill] sm:$0xff]  ;;  %v12245_v63 = vsub.f32 %v12243_v57, %v12244_v3  ;;  %v12246_v27 = vld [vmem:[#allocation123_spill] sm:$0xff] }
 0x506   : > { %v9461_v60 = vpop.permute.xlu0 %2634  ;;  %v9463_v19 = vpop.eup %6336  ;;  %2609 = vperm.xlu1 %5967, %v12234_v5   ;;  %6360 = vpow2.f32 %v12237_v40  ;;  %v12240_v5 = vld [vmem:[#allocation116_spill] sm:$0xff] }
 0x507   : > { %12229 = vst [vmem:[#allocation248_spill] sm:$0xff] %v9461_v60  ;;  %v9471_v62 = vpop.eup %6338  ;;  %6362 = vpow2.f32 %v12239_v39  ;;  %v12241_v26 = vsub.f32 %v12240_v5, %v9109_v8  ;;  %v12247_v39 = vsub.f32 %v12246_v27, %v12244_v3  ;;  %v12248_v8 = vld [vmem:[#allocation122_spill] sm:$0xff]  ;;  %v12253_v60 = vld [vmem:[#allocation33_spill] sm:$0xff] }
 0x508   : > { %3370 = vperm.xlu0 %5966, %v9339_v33   ;;  %v9480_v1 = vpop.eup %6340  ;;  %v12249_v5 = vsub.f32 %v12248_v8, %v12244_v3  ;;  %v12255_v8 = vld [vmem:[#allocation131_spill] sm:$0xff] }
 0x509   : > { %v9485_v13 = vpop.eup %6342  ;;  %6364 = vpow2.f32 %v12241_v26 }
 0x50a   : > { %v9490_v10 = vpop.eup %6344  ;;  %2619 = vperm.xlu1 %5967, %v12242_v7   ;;  %6366 = vpow2.f32 %v12245_v63  ;;  %v12250_v7 = vld [vmem:[#allocation124_spill] sm:$0xff]  ;;  %v12252_v63 = vld [vmem:[#allocation129_spill] sm:$0xff] }
 0x50b   : > { %v9496_v33 = vpop.eup %6346  ;;  %6368 = vpow2.f32 %v12247_v39  ;;  %v12251_v57 = vsub.f32 %v12250_v7, %v12244_v3  ;;  %v12254_v27 = vsub.f32 %v12252_v63, %v12253_v60  ;;  %v12257_v3 = vld [vmem:[#allocation130_spill] sm:$0xff] }
 0x50c   : > { %3380 = vperm.xlu0 %5966, %v9342_v9   ;;  %v9502_v40 = vpop.eup %6348  ;;  %6370 = vpow2.f32 %v12249_v5  ;;  %v12256_v5 = vsub.f32 %v12255_v8, %v12253_v60  ;;  %v12258_v7 = vsub.f32 %v12257_v3, %v12253_v60 }
 0x50d   : > { %v9507_v55 = vpop.eup %6350  ;;  %6372 = vpow2.f32 %v12251_v57 }
 0x50e   : > { %v9512_v26 = vpop.eup %6352  ;;  %2629 = vperm.xlu1 %5967, %v9310_v20   ;;  %6374 = vpow2.f32 %v12254_v27  ;;  %v12259_v20 = vld [vmem:[#allocation133_spill] sm:$0xff] }
 0x50f   : > { %v9518_v9 = vpop.eup %6354  ;;  %6376 = vpow2.f32 %v12256_v5  ;;  %v12260_v63 = vsub.f32 %v12259_v20, %v12253_v60  ;;  %v12264_v5 = vld [vmem:[#allocation137_spill] sm:$0xff]  ;;  %v12267_v20 = vsub.f32 %v12266_v29, %v12262_v15 }
 0x510   : > { %3390 = vperm.xlu0 %5966, %v9345_v2   ;;  %v9524_v39 = vpop.eup %6356  ;;  %6378 = vpow2.f32 %v12258_v7  ;;  %v12261_v2 = vld [vmem:[#allocation136_spill] sm:$0xff]  ;;  %v12265_v3 = vsub.f32 %v12264_v5, %v12262_v15  ;;  %v12273_v5 = vsub.f32 %v12271_v36, %v12272_v21  ;;  %v12274_v29 = vld [vmem:[#allocation149_spill] sm:$0xff] }
 0x511   : > { %v9529_v22 = vpop.eup %6358  ;;  %6380 = vpow2.f32 %v12260_v63  ;;  %v12263_v45 = vsub.f32 %v12261_v2, %v12262_v15  ;;  %v12268_v63 = vld [vmem:[#allocation143_spill] sm:$0xff] }
 0x512   : > { %v9534_v57 = vpop.eup %6360  ;;  %v12269_v2 = vsub.f32 %v12268_v63, %v12262_v15  ;;  %v12276_v15 = vld [vmem:[#allocation152_spill] sm:$0xff] }
 0x513   : > { %v9539_v27 = vpop.eup %6362  ;;  %6382 = vpow2.f32 %v12263_v45  ;;  %v9560_v45 = vld [vmem:[#allocation2 + $0x1e0] sm:$0xff]  ;;  %v12277_v63 = vsub.f32 %v12276_v15, %v12272_v21 }
 0x514   : > { %3400 = vperm.xlu0 %5966, %v9348_v31   ;;  %v9545_v8 = vpop.eup %6364  ;;  %6384 = vpow2.f32 %v12265_v3  ;;  %12270 = vst [vmem:[#allocation49_spill] sm:$0xff] %v9560_v45 }
 0x515   : > { %v9550_v7 = vpop.eup %6366  ;;  %6386 = vpow2.f32 %v12267_v20  ;;  %v12275_v20 = vsub.f32 %v12274_v29, %v12272_v21  ;;  %v12281_v29 = vld [vmem:[#allocation161_spill] sm:$0xff] }
 0x516   : > { %v9555_v60 = vpop.eup %6368  ;;  %6388 = vpow2.f32 %v12269_v2 }
 0x517   : > { %v9562_v31 = vpop.eup %6370  ;;  %6390 = vpow2.f32 %v12273_v5  ;;  %v12279_v5 = vld [vmem:[#allocation155_spill] sm:$0xff] }
 0x518   : > { %3410 = vperm.xlu0 %5966, %v9352_v0   ;;  %v9568_v3 = vpop.eup %6372  ;;  %6392 = vpow2.f32 %v12275_v20  ;;  %v12280_v0 = vsub.f32 %v12279_v5, %v12272_v21  ;;  %v12282_v20 = vld [vmem:[#allocation29_spill] sm:$0xff]  ;;  %v12284_v21 = vld [vmem:[#allocation162_spill] sm:$0xff] }
 0x519   : > { %v2129_v46 = vpop.xlane.xlu1 %2128  ;;  %v9573_v16 = vpop.eup %6374  ;;  %6394 = vpow2.f32 %v12277_v63  ;;  %v12283_v6 = vsub.f32 %v12281_v29, %v12282_v20  ;;  %v12285_v15 = vsub.f32 %v12284_v21, %v12282_v20  ;;  %v12288_v29 = vld [vmem:[#allocation85_spill] sm:$0xff]  ;;  %v12292_v61 = vsub.f32 %v12291_v47, %v12282_v20  ;;  %v12293_v21 = vld [vmem:[#allocation88_spill] sm:$0xff]  ;;  %v12296_v47 = vld [vmem:[#allocation94_spill] sm:$0xff] }
 0x51a   : > { %v9579_v2 = vmax.f32 %v9560_v45, %v2129_v46  ;;  %v9581_v36 = vpop.eup %6376  ;;  %6396 = vpow2.f32 %v12280_v0  ;;  %v12289_v45 = vld [vmem:[#allocation87_spill] sm:$0xff] }
 0x51b   : > { %v9586_v11 = vpop.eup %6378  ;;  %6398 = vpow2.f32 %v12283_v6  ;;  %v12286_v6 = vld [vmem:[#allocation163_spill] sm:$0xff] }
 0x51c   : > { %12278 = vst [vmem:[#allocation51_spill] sm:$0xff] %v9579_v2  ;;  %4769 = vst.msk [vmem:[#allocation2 + $0x1e0] sm:$0xff] %vm4708_vm3, %v9579_v2  ;;  %2639 = vperm.xlu1 %5967, %v9579_v2   ;;  %3420 = vperm.xlu0 %5966, %v9356_v41   ;;  %v9597_v46 = vpop.eup %6380  ;;  %6400 = vpow2.f32 %v12285_v15  ;;  %v12287_v0 = vsub.f32 %v12286_v6, %v12282_v20  ;;  %v12290_v2 = vld [vmem:[#allocation86_spill] sm:$0xff] }
 0x51d   : > { %v2470_v63 = vpop.permute.xlu1 %2469  ;;  %v9602_v5 = vpop.eup %6382 }
 0x51e   : > { %6402 = vpow2.f32 %v12287_v0  ;;  %v2761_v35 = vsub.f32 %v12288_v29, %v2470_v63  ;;  %v2762_v43 = vsub.f32 %v12289_v45, %v2470_v63  ;;  %v2763_v56 = vsub.f32 %v12290_v2, %v2470_v63  ;;  %v9610_v41 = vpop.eup %6384  ;;  %v12294_v2 = vld [vmem:[#allocation93_spill] sm:$0xff] }
 0x51f   : > { %6404 = vpow2.f32 %v12292_v61  ;;  %v2764_v15 = vsub.f32 %v12293_v21, %v2470_v63  ;;  %v9616_v14 = vpop.eup %6386  ;;  %v12297_v63 = vld [vmem:[#allocation96_spill] sm:$0xff] }
 0x520   : > { %6406 = vpow2.f32 %v2761_v35  ;;  %3430 = vperm.xlu0 %5966, %v9362_v51   ;;  %v9619_v6 = vpop.eup %6388 }
 0x521   : > { %6408 = vpow2.f32 %v2762_v43  ;;  %v2480_v0 = vpop.permute.xlu1 %2479  ;;  %v9621_v45 = vpop.eup %6390 }
 0x522   : > { %6410 = vpow2.f32 %v2763_v56  ;;  %v2769_v29 = vsub.f32 %v12294_v2, %v2480_v0  ;;  %v2770_v48 = vsub.f32 %v12295_v58, %v2480_v0  ;;  %v2771_v61 = vsub.f32 %v12296_v47, %v2480_v0  ;;  %v9626_v20 = vpop.eup %6392  ;;  %v12298_v58 = vld [vmem:[#allocation101_spill] sm:$0xff]  ;;  %v12299_v47 = vld [vmem:[#allocation103_spill] sm:$0xff] }
 0x523   : > { %6412 = vpow2.f32 %v2764_v15  ;;  %v2772_v35 = vsub.f32 %v12297_v63, %v2480_v0  ;;  %v9629_v21 = vpop.eup %6394  ;;  %v12301_v0 = vld [vmem:[#allocation104_spill] sm:$0xff] }
 0x524   : > { %6414 = vpow2.f32 %v2769_v29  ;;  %3440 = vperm.xlu0 %5966, %v9366_v18   ;;  %v9632_v43 = vpop.eup %6396 }
 0x525   : > { %6416 = vpow2.f32 %v2770_v48  ;;  %v2490_v56 = vpop.permute.xlu1 %2489  ;;  %v9634_v51 = vpop.eup %6398 }
 0x526   : > { %6418 = vpow2.f32 %v2771_v61  ;;  %v2777_v2 = vsub.f32 %v12298_v58, %v2490_v56  ;;  %v2778_v50 = vsub.f32 %v12299_v47, %v2490_v56  ;;  %v2779_v15 = vsub.f32 %v12300_v12, %v2490_v56  ;;  %v9639_v54 = vpop.eup %6400  ;;  %v12304_v58 = vld [vmem:[#allocation109_spill] sm:$0xff] }
 0x527   : > { %6420 = vpow2.f32 %v2772_v35  ;;  %v2780_v29 = vsub.f32 %v12301_v0, %v2490_v56  ;;  %v12307_v56 = vld [vmem:[#allocation112_spill] sm:$0xff] }
 0x528   : > { %v9642_v63 = vpop.eup %6402  ;;  %6422 = vpow2.f32 %v2777_v2  ;;  %3450 = vperm.xlu0 %5966, %v9392_v49  }
 0x529   : > { %12302 = vst [vmem:[#allocation50_spill] sm:$0xff] %v9642_v63  ;;  %v9645_v48 = vpop.eup %6404  ;;  %6424 = vpow2.f32 %v2778_v50  ;;  %v2500_v18 = vpop.permute.xlu1 %2499 }
 0x52a   : > { %12303 = vst [vmem:[#allocation252_spill] sm:$0xff] %v9645_v48  ;;  %v6407_v61 = vpop.eup %6406  ;;  %6426 = vpow2.f32 %v2779_v15  ;;  %v2785_v47 = vsub.f32 %v12304_v58, %v2500_v18  ;;  %v2786_v12 = vsub.f32 %v12305_v30, %v2500_v18  ;;  %v2787_v42 = vsub.f32 %v12306_v32, %v2500_v18  ;;  %v12308_v32 = vld [vmem:[#allocation117_spill] sm:$0xff] }
 0x52b   : > { %v6409_v35 = vpop.eup %6408  ;;  %6428 = vpow2.f32 %v2780_v29  ;;  %v2788_v0 = vsub.f32 %v12307_v56, %v2500_v18  ;;  %v3669_v2 = vpack.c.bf16 %v9459_v44, %v6407_v61  ;;  %v12309_v29 = vld [vmem:[#allocation119_spill] sm:$0xff]  ;;  %v12310_v18 = vld [vmem:[#allocation118_spill] sm:$0xff] }
 0x52c   : > { %v6411_v53 = vpop.eup %6410  ;;  %6430 = vpow2.f32 %v2785_v47  ;;  %3460 = vperm.xlu0 %5966, %v9396_v52   ;;  %v3670_v50 = vpack.c.bf16 %v9463_v19, %v6409_v35  ;;  %v12311_v52 = vld [vmem:[#allocation120_spill] sm:$0xff] }
 0x52d   : > { %v6413_v49 = vpop.eup %6412  ;;  %6432 = vpow2.f32 %v2786_v12  ;;  %v2510_v15 = vpop.permute.xlu1 %2509  ;;  %v3671_v58 = vpack.c.bf16 %v9471_v62, %v6411_v53 }
 0x52e   : > { %v6415_v30 = vpop.eup %6414  ;;  %6434 = vpow2.f32 %v2787_v42  ;;  %v2793_v48 = vsub.f32 %v12308_v32, %v2510_v15  ;;  %v2794_v63 = vsub.f32 %v12309_v29, %v2510_v15  ;;  %v2795_v56 = vsub.f32 %v12310_v18, %v2510_v15  ;;  %v4107_v44 = vpop.f32.mrb[164].mxu0  ;;  %4137 = vmatprep.mubr.bf16.mxu0 %v3670_v50 }
 0x52f   : > { %v6417_v61 = vpop.eup %6416  ;;  %6436 = vpow2.f32 %v2788_v0  ;;  %v2796_v47 = vsub.f32 %v12311_v52, %v2510_v15  ;;  %v3672_v19 = vpack.c.bf16 %v9480_v1, %v6413_v49  ;;  %v4109_v12 = vpop.f32.mrb[165].mxu0  ;;  %4138 = vmatmul.mubr.bf16.gmra.mrb[180].mxu0 %v3669_v2  ;;  %v3673_v53 = vpack.c.bf16 %v9485_v13, %v6415_v30  ;;  %v12313_v30 = vld [vmem:[#allocation125_spill] sm:$0xff] }
 0x530   : > { %v6419_v62 = vpop.eup %6418  ;;  %v4396_v42 = vpop.f32.mrb[164].mxu1  ;;  %6438 = vpow2.f32 %v2793_v48  ;;  %3470 = vperm.xlu0 %5966, %v9403_v24   ;;  %v3674_v32 = vpack.c.bf16 %v9490_v10, %v6417_v61 }
 0x531   : > { %v4110_v35 = vpop.f32.mrb[166].mxu0  ;;  %v6421_v29 = vpop.eup %6420  ;;  %6440 = vpow2.f32 %v2794_v63  ;;  %v9663_v50 = vadd.f32 %v4396_v42, %v4107_v44  ;;  %4426 = vmatprep.mubr.bf16.mxu1 %v3672_v19  ;;  %v3675_v1 = vpack.c.bf16 %v9496_v33, %v6419_v62  ;;  %v12314_v44 = vld [vmem:[#allocation127_spill] sm:$0xff]  ;;  %v12315_v33 = vsub.f32 %v9206_v17, %v9216_v38  ;;  %v12317_v19 = vld [vmem:[#allocation128_spill] sm:$0xff] }
 0x532   : > { %v4398_v0 = vpop.f32.mrb[165].mxu1  ;;  %v4112_v15 = vpop.f32.mrb[167].mxu0  ;;  %6442 = vpow2.f32 %v2795_v56  ;;  %4427 = vmatmul.mubr.bf16.gmra.mrb[180].mxu1 %v3671_v58  ;;  %4145 = vmatprep.mubr.bf16.mxu0 %v3674_v32  ;;  %v3676_v24 = vpack.c.bf16 %v9502_v40, %v6421_v29  ;;  %v12316_v58 = vld [vmem:[#allocation126_spill] sm:$0xff]  ;;  %v12318_v29 = vld [vmem:[#allocation139_spill] sm:$0xff] }
 0x533   : > { %12312 = vst [vmem:[#allocation52_spill] sm:$0xff] %v9663_v50  ;;  %v9666_v2 = vpop.eup %6422  ;;  %v4399_v13 = vpop.f32.mrb[166].mxu1  ;;  %6444 = vpow2.f32 %v2796_v47  ;;  %v12319_v0 = vld [vmem:[#allocation142_spill] sm:$0xff]  ;;  %v12320_v15 = vld [vmem:[#allocation144_spill] sm:$0xff] }
 0x534   : > { %v2520_v48 = vpop.permute.xlu1 %2519  ;;  %v6425_v49 = vpop.eup %6424  ;;  %v9669_v10 = vadd.f32 %v4399_v13, %v4110_v35  ;;  %6446 = vpow2.f32 %v12315_v33  ;;  %4434 = vmatprep.mubr.bf16.mxu1 %v3676_v24  ;;  %3480 = vperm.xlu0 %5966, %v9411_v34   ;;  %v3677_v62 = vpack.c.bf16 %v9507_v55, %v9666_v2  ;;  %v12321_v55 = vld [vmem:[#allocation145_spill] sm:$0xff] }
 0x535   : > { %v4401_v63 = vpop.f32.mrb[167].mxu1  ;;  %v2801_v18 = vsub.f32 %v12313_v30, %v2520_v48  ;;  %v2802_v61 = vsub.f32 %v12314_v44, %v2520_v48  ;;  %v9673_v52 = vpop.eup %6426  ;;  %v2803_v56 = vsub.f32 %v12316_v58, %v2520_v48  ;;  %v2804_v12 = vsub.f32 %v12317_v19, %v2520_v48  ;;  %v12323_v44 = vld [vmem:[#allocation154_spill] sm:$0xff] }
 0x536   : > { %v3678_v40 = vpack.c.bf16 %v9512_v26, %v6425_v49  ;;  %v6429_v47 = vpop.eup %6428  ;;  %v3679_v42 = vpack.c.bf16 %v9518_v9, %v9673_v52  ;;  %v12325_v58 = vld [vmem:[#allocation158_spill] sm:$0xff] }
 0x537   : > { %6448 = vpow2.f32 %v2801_v18  ;;  %v9686_v35 = vpop.eup %6430  ;;  %v3680_v38 = vpack.c.bf16 %v9524_v39, %v6429_v47  ;;  %4146 = vmatmul.mubr.bf16.gmra.mrb[184].mxu0 %v3673_v53 }
 0x538   : > { %6450 = vpow2.f32 %v2802_v61  ;;  %v2535_v17 = vpop.permute.xlu1 %2534  ;;  %v6433_v32 = vpop.eup %6432  ;;  %4153 = vmatprep.mubr.bf16.mxu0 %v3678_v40  ;;  %3490 = vperm.xlu0 %5966, %v9428_v4   ;;  %v3681_v39 = vpack.c.bf16 %v9529_v22, %v9686_v35  ;;  %v12322_v4 = vld [vmem:[#allocation151_spill] sm:$0xff]  ;;  %v12324_v22 = vld [vmem:[#allocation156_spill] sm:$0xff] }
 0x539   : > { %6452 = vpow2.f32 %v2803_v56  ;;  %v2813_v34 = vsub.f32 %v12318_v29, %v2535_v17  ;;  %v2814_v26 = vsub.f32 %v12319_v0, %v2535_v17  ;;  %v2815_v13 = vsub.f32 %v12320_v15, %v2535_v17  ;;  %v9692_v48 = vpop.eup %6434  ;;  %v12328_v29 = vld [vmem:[#allocation168_spill] sm:$0xff] }
 0x53a   : > { %6454 = vpow2.f32 %v2804_v12  ;;  %v2816_v9 = vsub.f32 %v12321_v55, %v2535_v17  ;;  %v3682_v2 = vpack.c.bf16 %v9534_v57, %v6433_v32  ;;  %v6437_v24 = vpop.eup %6436  ;;  %v3683_v49 = vpack.c.bf16 %v9539_v27, %v9692_v48  ;;  %4435 = vmatmul.mubr.bf16.gmra.mrb[184].mxu1 %v3675_v1  ;;  %v12355_v48 = vld [vmem:[#allocation215_spill] sm:$0xff] }
 0x53b   : > { %6456 = vpow2.f32 %v2813_v34  ;;  %v9701_v63 = vpop.eup %6438  ;;  %v3684_v30 = vpack.c.bf16 %v9545_v8, %v6437_v24  ;;  %4442 = vmatprep.mubr.bf16.mxu1 %v3680_v38 }
 0x53c   : > { %6458 = vpow2.f32 %v2814_v26  ;;  %v2545_v53 = vpop.permute.xlu1 %2544  ;;  %v6441_v18 = vpop.eup %6440  ;;  %3500 = vperm.xlu0 %5966, %v9441_v25   ;;  %v3685_v8 = vpack.c.bf16 %v9550_v7, %v9701_v63  ;;  %v12326_v25 = vld [vmem:[#allocation164_spill] sm:$0xff]  ;;  %v12329_v26 = vld [vmem:[#allocation169_spill] sm:$0xff] }
 0x53d   : > { %6460 = vpow2.f32 %v2815_v13  ;;  %v2821_v57 = vsub.f32 %v12322_v4, %v2545_v53  ;;  %v2822_v61 = vsub.f32 %v12323_v44, %v2545_v53  ;;  %v2823_v52 = vsub.f32 %v12324_v22, %v2545_v53  ;;  %v9707_v33 = vpop.eup %6442  ;;  %v12331_v44 = vld [vmem:[#allocation166_spill] sm:$0xff]  ;;  %v3170_v7 = vld [vmem:[#allocation3 + $0x8] sm:$0xff] }
 0x53e   : > { %6462 = vpow2.f32 %v2816_v9  ;;  %v2824_v56 = vsub.f32 %v12325_v58, %v2545_v53  ;;  %v3686_v1 = vpack.c.bf16 %v9555_v60, %v6441_v18  ;;  %v6445_v19 = vpop.eup %6444  ;;  %v3687_v12 = vpack.c.bf16 %v9562_v31, %v9707_v33  ;;  %v12327_v60 = vld [vmem:[#allocation167_spill] sm:$0xff]  ;;  %v12332_v58 = vld [vmem:[#allocation132_spill] sm:$0xff]  ;;  %v12364_v31 = vld [vmem:[#allocation174_spill] sm:$0xff] }
 0x53f   : > { %6464 = vpow2.f32 %v2821_v57  ;;  %v9716_v40 = vpop.eup %6446  ;;  %v3688_v35 = vpack.c.bf16 %v9568_v3, %v6445_v19  ;;  %4154 = vmatmul.mubr.bf16.gmra.mrb[188].mxu0 %v3677_v62  ;;  %v12330_v57 = vld [vmem:[#allocation171_spill] sm:$0xff] }
 0x540   : > { %6466 = vpow2.f32 %v2822_v61  ;;  %v2555_v47 = vpop.permute.xlu1 %2554  ;;  %4161 = vmatprep.mubr.bf16.mxu0 %v3682_v2  ;;  %3510 = vperm.xlu0 %5966, %v9456_v37   ;;  %v2215_v61 = vsub.f32 %v12331_v44, %v12330_v57  ;;  %v12343_v57 = vld [vmem:[#allocation159_spill] sm:$0xff] }
 0x541   : > { %v9719_v17 = vpop.eup %6448  ;;  %6468 = vpow2.f32 %v2823_v52  ;;  %v2829_v38 = vsub.f32 %v12326_v25, %v2555_v47  ;;  %v2830_v32 = vsub.f32 %v12327_v60, %v2555_v47  ;;  %v2831_v34 = vsub.f32 %v12328_v29, %v2555_v47  ;;  %v12340_v29 = vld [vmem:[#allocation195_spill] sm:$0xff] }
 0x542   : > { %v9724_v0 = vpop.eup %6450  ;;  %6470 = vpow2.f32 %v2824_v56  ;;  %v2832_v15 = vsub.f32 %v12329_v26, %v2555_v47  ;;  %v3689_v3 = vpack.c.bf16 %v9573_v16, %v9719_v17  ;;  %4443 = vmatmul.mubr.bf16.gmra.mrb[188].mxu1 %v3679_v42  ;;  %v12333_v56 = vld [vmem:[#allocation134_spill] sm:$0xff]  ;;  %v3174_v17 = vld [vmem:[#allocation3 + $0x28] sm:$0xff] }
 0x543   : > { %v9730_v13 = vpop.eup %6452  ;;  %6472 = vpow2.f32 %v2829_v38  ;;  %v3690_v55 = vpack.c.bf16 %v9581_v36, %v9724_v0  ;;  %4450 = vmatprep.mubr.bf16.mxu1 %v3684_v30  ;;  %v12334_v19 = vsub.f32 %v12332_v58, %v12333_v56  ;;  %v12336_v47 = vld [vmem:[#allocation178_spill] sm:$0xff]  ;;  %v12345_v58 = vld [vmem:[#allocation203_spill] sm:$0xff]  ;;  %v12346_v56 = vld [vmem:[#allocation200_spill] sm:$0xff] }
 0x544   : > { %v9734_v9 = vpop.eup %6454  ;;  %6474 = vpow2.f32 %v2830_v32  ;;  %v3691_v62 = vpack.c.bf16 %v9586_v11, %v9730_v13  ;;  %3520 = vperm.xlu0 %5966, %v9421_v59   ;;  %v12338_v32 = vld [vmem:[#allocation146_spill] sm:$0xff] }
 0x545   : > { %v9738_v24 = vpop.eup %6456  ;;  %6476 = vpow2.f32 %v2831_v34  ;;  %v3692_v37 = vpack.c.bf16 %v9597_v46, %v9734_v9  ;;  %v12341_v34 = vld [vmem:[#allocation190_spill] sm:$0xff]  ;;  %v12342_v9 = vld [vmem:[#allocation153_spill] sm:$0xff] }
 0x546   : > { %v9742_v2 = vpop.eup %6458  ;;  %6478 = vpow2.f32 %v2832_v15  ;;  %v3693_v36 = vpack.c.bf16 %v9738_v24, %v9602_v5  ;;  %v2219_v0 = vsub.f32 %v12341_v34, %v12340_v29  ;;  %v12344_v44 = vsub.f32 %v12342_v9, %v12343_v57  ;;  %v12349_v34 = vld [vmem:[#allocation211_spill] sm:$0xff]  ;;  %v12350_v9 = vld [vmem:[#allocation209_spill] sm:$0xff]  ;;  %v12351_v57 = vld [vmem:[#allocation50_spill] sm:$0xff] }
 0x547   : > { %v9747_v53 = vpop.eup %6460  ;;  %v3694_v42 = vpack.c.bf16 %v9742_v2, %v9610_v41  ;;  %4162 = vmatmul.mubr.bf16.gmra.mrb[192].mxu0 %v3681_v39  ;;  %6480 = vpow2.f32 %v12334_v19  ;;  %v12335_v39 = vld [vmem:[#allocation183_spill] sm:$0xff]  ;;  %v2221_v19 = vsub.f32 %v12346_v56, %v12345_v58  ;;  %v12353_v58 = vld [vmem:[#allocation212_spill] sm:$0xff]  ;;  %v3178_v24 = vld [vmem:[#allocation3 + $0x48] sm:$0xff] }
 0x548   : > { %v9751_v18 = vpop.eup %6462  ;;  %v3695_v30 = vpack.c.bf16 %v9747_v53, %v9616_v14  ;;  %4169 = vmatprep.mubr.bf16.mxu0 %v3686_v1  ;;  %3530 = vperm.xlu0 %5966, %v9433_v28   ;;  %v2217_v25 = vsub.f32 %v12336_v47, %v12335_v39  ;;  %v12337_v1 = vld [vmem:[#allocation141_spill] sm:$0xff]  ;;  %v9794_v39 = vpop.permute.xlu0 %2644  ;;  %v12377_v2 = vld [vmem:[#allocation192_spill] sm:$0xff] }
 0x549   : > { %v9755_v4 = vpop.eup %6464  ;;  %v3696_v46 = vpack.c.bf16 %v9751_v18, %v9619_v6  ;;  %v12339_v28 = vsub.f32 %v12337_v1, %v12338_v32  ;;  %v12347_v1 = vld [vmem:[#allocation207_spill] sm:$0xff]  ;;  %v12348_v32 = vld [vmem:[#allocation205_spill] sm:$0xff] }
 0x54a   : > { %v9759_v59 = vpop.eup %6466  ;;  %v3697_v22 = vpack.c.bf16 %v9755_v4, %v9621_v45  ;;  %4451 = vmatmul.mubr.bf16.gmra.mrb[192].mxu1 %v3683_v49  ;;  %v12384_v6 = vld [vmem:[#allocation225_spill] sm:$0xff]  ;;  %v12412_v45 = vld [vmem:[#allocation283_spill] sm:$0xff]  ;;  %v12413_v4 = vld [vmem:[#allocation236_spill] sm:$0xff] }
 0x54b   : > { %v9766_v52 = vpop.eup %6468  ;;  %v3698_v38 = vpack.c.bf16 %v9759_v59, %v9626_v20  ;;  %6482 = vpow2.f32 %v12339_v28  ;;  %4458 = vmatprep.mubr.bf16.mxu1 %v3688_v35  ;;  %v2223_v28 = vsub.f32 %v12348_v32, %v12347_v1  ;;  %v12396_v20 = vld [vmem:[#allocation14_spill] sm:$0xff] }
 0x54c   : > { %v9775_v60 = vpop.eup %6470  ;;  %6484 = vpow2.f32 %v12344_v44  ;;  %3540 = vperm.xlu0 %5966, %v9449_v23   ;;  %v12352_v44 = vld [vmem:[#allocation214_spill] sm:$0xff] }
 0x54d   : > { %v9787_v15 = vpop.eup %6472  ;;  %v3700_v47 = vpack.c.bf16 %v9775_v60, %v9632_v43  ;;  %6486 = vpow2.f32 %v2215_v61  ;;  %v2225_v61 = vsub.f32 %v12350_v9, %v12349_v34  ;;  %v2227_v56 = vsub.f32 %v12353_v58, %v12352_v44  ;;  %v12357_v34 = vld [vmem:[#allocation316_spill] sm:$0xff] }
 0x54e   : > { %v9798_v27 = vpop.eup %6474  ;;  %6488 = vpow2.f32 %v2217_v25  ;;  %v12354_v25 = vld [vmem:[#allocation217_spill] sm:$0xff] }
 0x54f   : > { %v9803_v49 = vpop.eup %6476  ;;  %v3702_v35 = vpack.c.bf16 %v9798_v27, %v9639_v54  ;;  %6490 = vpow2.f32 %v2219_v0  ;;  %v2229_v26 = vsub.f32 %v12355_v48, %v12354_v25  ;;  %4170 = vmatmul.mubr.bf16.gmra.mrb[196].mxu0 %v3685_v8  ;;  %v9822_v1 = vpop.permute.xlu0 %2654  ;;  %v12356_v0 = vld [vmem:[#allocation252_spill] sm:$0xff]  ;;  %v12362_v25 = vld [vmem:[#allocation41_spill] sm:$0xff] }
 0x550   : > { %v9809_v29 = vpop.eup %6478  ;;  %6492 = vpow2.f32 %v2221_v19  ;;  %4177 = vmatprep.mubr.bf16.mxu0 %v3690_v55  ;;  %3550 = vperm.xlu0 %5966, %v9716_v40   ;;  %v12365_v33 = vsub.f32 %v12364_v31, %v12362_v25  ;;  %v3182_v54 = vld [vmem:[#allocation3 + $0x68] sm:$0xff]  ;;  %v12461_v19 = vld [vmem:[#allocation231_spill] sm:$0xff] }
 0x551   : > { %6494 = vpow2.f32 %v2223_v28  ;;  %v9838_v63 = vpop.eup %6480  ;;  %v12361_v28 = vld [vmem:[#allocation173_spill] sm:$0xff] }
 0x552   : > { %6496 = vpow2.f32 %v2225_v61  ;;  %4459 = vmatmul.mubr.bf16.gmra.mrb[196].mxu1 %v3687_v12  ;;  %v12363_v40 = vsub.f32 %v12361_v28, %v12362_v25  ;;  %v3172_v61 = vld [vmem:[#allocation3 + $0x18] sm:$0xff]  ;;  %v12366_v12 = vld [vmem:[#allocation9_spill] sm:$0xff] }
 0x553   : > { %6498 = vpow2.f32 %v2227_v56  ;;  %4466 = vmatprep.mubr.bf16.mxu1 %v3692_v37  ;;  %v3241_v8 = vpop.permute.xlu0 %3240 }
 0x554   : > { %6500 = vpow2.f32 %v2229_v26  ;;  %v3554_v58 = vmul.f32 %v3241_v8, %v3170_v7  ;;  %v12367_v26 = vld [vmem:[#allocation175_spill] sm:$0xff] }
 0x555   : > { %v9840_v55 = vpop.eup %6482  ;;  %6502 = vpow2.f32 %v12363_v40  ;;  %v12368_v7 = vsub.f32 %v12367_v26, %v12362_v25  ;;  %v12369_v40 = vld [vmem:[#allocation176_spill] sm:$0xff] }
 0x556   : > { %v9842_v23 = vpop.eup %6484  ;;  %6504 = vpow2.f32 %v12365_v33  ;;  %v4580_v37 = vadd.f32 %v12366_v12, %v3554_v58  ;;  %v12370_v32 = vsub.f32 %v12369_v40, %v12362_v25  ;;  %v12371_v33 = vld [vmem:[#allocation189_spill] sm:$0xff]  ;;  %v12372_v12 = vld [vmem:[#allocation43_spill] sm:$0xff]  ;;  %v12382_v40 = vld [vmem:[#allocation42_spill] sm:$0xff] }
 0x557   : > { %v9847_v9 = vpop.eup %6486  ;;  %6506 = vpow2.f32 %v12368_v7  ;;  %4178 = vmatmul.mubr.bf16.gmra.mrb[200].mxu0 %v3689_v3  ;;  %v3251_v8 = vpop.permute.xlu0 %3250  ;;  %v12373_v16 = vsub.f32 %v12371_v33, %v12372_v12  ;;  %v12374_v3 = vld [vmem:[#allocation191_spill] sm:$0xff]  ;;  %v12379_v7 = vld [vmem:[#allocation193_spill] sm:$0xff]  ;;  %v12385_v18 = vsub.f32 %v12384_v6, %v12382_v40 }
 0x558   : > { %v9853_v56 = vpop.eup %6488  ;;  %6508 = vpow2.f32 %v12370_v32  ;;  %4645 = vst.msk [vmem:[#allocation3 + $0x8] sm:$0xff] %vm4643_vm4, %v4580_v37  ;;  %4185 = vmatprep.mubr.bf16.mxu0 %v3694_v42  ;;  %v3556_v58 = vmul.f32 %v3251_v8, %v3172_v61  ;;  %v12375_v26 = vsub.f32 %v12374_v3, %v12372_v12  ;;  %v12376_v32 = vld [vmem:[#allocation17_spill] sm:$0xff]  ;;  %v12378_v42 = vsub.f32 %v12377_v2, %v12372_v12  ;;  %v3176_v33 = vld [vmem:[#allocation3 + $0x38] sm:$0xff]  ;;  %v12389_v2 = vld [vmem:[#allocation228_spill] sm:$0xff] }
 0x559   : > { %v9861_v28 = vpop.eup %6490  ;;  %6510 = vpow2.f32 %v12373_v16  ;;  %v12380_v8 = vsub.f32 %v12379_v7, %v12372_v12 }
 0x55a   : > { %v9870_v31 = vpop.eup %6492  ;;  %6512 = vpow2.f32 %v12375_v26  ;;  %4467 = vmatmul.mubr.bf16.gmra.mrb[200].mxu1 %v3691_v62  ;;  %v4582_v25 = vadd.f32 %v12376_v32, %v3556_v58  ;;  %v12381_v62 = vld [vmem:[#allocation222_spill] sm:$0xff]  ;;  %v12387_v26 = vld [vmem:[#allocation223_spill] sm:$0xff] }
 0x55b   : > { %v9882_v41 = vpop.eup %6494  ;;  %6514 = vpow2.f32 %v12378_v42  ;;  %4474 = vmatprep.mubr.bf16.mxu1 %v3696_v46  ;;  %v3261_v61 = vpop.permute.xlu0 %3260  ;;  %v12383_v58 = vsub.f32 %v12381_v62, %v12382_v40  ;;  %v12386_v46 = vld [vmem:[#allocation13_spill] sm:$0xff]  ;;  %v12390_v42 = vsub.f32 %v12389_v2, %v12382_v40  ;;  %v12394_v62 = vld [vmem:[#allocation258_spill] sm:$0xff] }
 0x55c   : > { %v9890_v37 = vpop.eup %6496  ;;  %6516 = vpow2.f32 %v12380_v8  ;;  %4647 = vst.msk [vmem:[#allocation3 + $0x18] sm:$0xff] %vm4643_vm4, %v4582_v25  ;;  %v3558_v11 = vmul.f32 %v3261_v61, %v3174_v17  ;;  %v12388_v17 = vsub.f32 %v12387_v26, %v12382_v40  ;;  %v12391_v8 = vld [vmem:[#allocation257_spill] sm:$0xff]  ;;  %v12401_v26 = vld [vmem:[#allocation270_spill] sm:$0xff] }
 0x55d   : > { %v9896_v13 = vpop.eup %6498  ;;  %6518 = vpow2.f32 %v12383_v58  ;;  %v12397_v58 = vld [vmem:[#allocation260_spill] sm:$0xff] }
 0x55e   : > { %v9901_v16 = vpop.eup %6500  ;;  %6520 = vpow2.f32 %v12385_v18  ;;  %v4584_v3 = vadd.f32 %v12386_v46, %v3558_v11  ;;  %v12392_v11 = vld [vmem:[#allocation44_spill] sm:$0xff]  ;;  %v12399_v46 = vld [vmem:[#allocation262_spill] sm:$0xff] }
 0x55f   : > { %v9907_v12 = vpop.eup %6502  ;;  %6522 = vpow2.f32 %v12388_v17  ;;  %4186 = vmatmul.mubr.bf16.gmra.mrb[204].mxu0 %v3693_v36  ;;  %v3271_v32 = vpop.permute.xlu0 %3270  ;;  %v12393_v5 = vsub.f32 %v12391_v8, %v12392_v11  ;;  %v12395_v40 = vsub.f32 %v12394_v62, %v12392_v11  ;;  %v12402_v17 = vld [vmem:[#allocation38_spill] sm:$0xff]  ;;  %v3180_v62 = vld [vmem:[#allocation3 + $0x58] sm:$0xff] }
 0x560   : > { %v9915_v25 = vpop.eup %6504  ;;  %6524 = vpow2.f32 %v12390_v42  ;;  %4649 = vst.msk [vmem:[#allocation3 + $0x28] sm:$0xff] %vm4643_vm4, %v4584_v3  ;;  %4193 = vmatprep.mubr.bf16.mxu0 %v3698_v38  ;;  %v3560_v61 = vmul.f32 %v3271_v32, %v3176_v33  ;;  %v12398_v33 = vsub.f32 %v12397_v58, %v12392_v11  ;;  %v12400_v3 = vsub.f32 %v12399_v46, %v12392_v11  ;;  %v12407_v11 = vld [vmem:[#allocation25_spill] sm:$0xff]  ;;  %v12410_v46 = vld [vmem:[#allocation279_spill] sm:$0xff] }
 0x561   : > { %v9924_v7 = vpop.eup %6506  ;;  %6526 = vpow2.f32 %v12393_v5  ;;  %v12403_v32 = vsub.f32 %v12401_v26, %v12402_v17 }
 0x562   : > { %v9929_v36 = vpop.eup %6508  ;;  %6528 = vpow2.f32 %v12395_v40  ;;  %4475 = vmatmul.mubr.bf16.gmra.mrb[204].mxu1 %v3695_v30  ;;  %v4586_v59 = vadd.f32 %v12396_v20, %v3560_v61  ;;  %v12408_v20 = vld [vmem:[#allocation277_spill] sm:$0xff] }
 0x563   : > { %v9938_v38 = vpop.eup %6510  ;;  %6530 = vpow2.f32 %v12398_v33  ;;  %4482 = vmatprep.mubr.bf16.mxu1 %v3700_v47  ;;  %v3281_v6 = vpop.permute.xlu0 %3280  ;;  %v12404_v47 = vld [vmem:[#allocation272_spill] sm:$0xff] }
 0x564   : > { %v9946_v18 = vpop.eup %6512  ;;  %6532 = vpow2.f32 %v12400_v3  ;;  %4651 = vst.msk [vmem:[#allocation3 + $0x38] sm:$0xff] %vm4643_vm4, %v4586_v59  ;;  %v4115_v14 = vpop.f32.mrb[168].mxu0  ;;  %v3562_v53 = vmul.f32 %v3281_v6, %v3178_v24  ;;  %v12405_v42 = vsub.f32 %v12404_v47, %v12402_v17  ;;  %v12409_v59 = vsub.f32 %v12408_v20, %v12402_v17  ;;  %v12422_v20 = vld [vmem:[#allocation286_spill] sm:$0xff] }
 0x565   : > { %v9952_v30 = vpop.eup %6514  ;;  %6534 = vpow2.f32 %v12403_v32  ;;  %v4404_v2 = vpop.f32.mrb[168].mxu1  ;;  %v12411_v3 = vsub.f32 %v12410_v46, %v12402_v17  ;;  %v12415_v17 = vld [vmem:[#allocation285_spill] sm:$0xff]  ;;  %v12425_v46 = vld [vmem:[#allocation244_spill] sm:$0xff] }
 0x566   : > { %v4117_v43 = vpop.f32.mrb[169].mxu0  ;;  %v9957_v60 = vpop.eup %6516  ;;  %6536 = vpow2.f32 %v12405_v42  ;;  %v9962_v61 = vadd.f32 %v4404_v2, %v4115_v14  ;;  %v4588_v5 = vadd.f32 %v12407_v11, %v3562_v53  ;;  %v12416_v47 = vsub.f32 %v12415_v17, %v12413_v4 }
 0x567   : > { %v4406_v8 = vpop.f32.mrb[169].mxu1  ;;  %v4118_v24 = vpop.f32.mrb[170].mxu0  ;;  %6538 = vpow2.f32 %v12409_v59  ;;  %4194 = vmatmul.mubr.bf16.gmra.mrb[208].mxu0 %v3697_v22  ;;  %v12414_v22 = vsub.f32 %v12412_v45, %v12413_v4  ;;  %v12417_v42 = vpack.c.bf16 %v9766_v52, %v9629_v21  ;;  %v12420_v11 = vpack.c.bf16 %v9809_v29, %v12356_v0  ;;  %v10011_v52 = vld [vmem:[#allocation2 + $0x1f0] sm:$0xff] }
 0x568   : > { %12406 = vst [vmem:[#allocation45_spill] sm:$0xff] %v9962_v61  ;;  %v9965_v40 = vpop.eup %6518  ;;  %v4407_v58 = vpop.f32.mrb[170].mxu1  ;;  %6540 = vpow2.f32 %v12411_v3  ;;  %4653 = vst.msk [vmem:[#allocation3 + $0x48] sm:$0xff] %vm4643_vm4, %v4588_v5  ;;  %4201 = vmatprep.mubr.bf16.mxu0 %v3702_v35  ;;  %v12418_v35 = vld [vmem:[#allocation284_spill] sm:$0xff]  ;;  %v12421_v5 = vld [vmem:[#allocation26_spill] sm:$0xff]  ;;  %v12423_v59 = vsub.f32 %v12422_v20, %v12413_v4 }
 0x569   : > { %v4120_v33 = vpop.f32.mrb[171].mxu0  ;;  %v9973_v6 = vpop.eup %6520  ;;  %v9979_v14 = vadd.f32 %v4407_v58, %v4118_v24  ;;  %6542 = vpow2.f32 %v12414_v22  ;;  %v12419_v8 = vsub.f32 %v12418_v35, %v12413_v4  ;;  %v3184_v4 = vld [vmem:[#allocation3 + $0x78] sm:$0xff]  ;;  %v12432_v35 = vpack.c.bf16 %v9787_v15, %v9634_v51 }
 0x56a   : > { %v4409_v53 = vpop.f32.mrb[171].mxu1  ;;  %v3291_v26 = vpop.permute.xlu0 %3290  ;;  %6544 = vpow2.f32 %v12416_v47  ;;  %4483 = vmatmul.mubr.bf16.gmra.mrb[208].mxu1 %v12417_v42  ;;  %v12424_v33 = vld [vmem:[#allocation291_spill] sm:$0xff] }
 0x56b   : > { %v9984_v32 = vpop.eup %6522  ;;  %v3564_v2 = vmul.f32 %v3291_v26, %v3180_v62  ;;  %6546 = vpow2.f32 %v12419_v8  ;;  %4490 = vmatprep.mubr.bf16.mxu1 %v12420_v11  ;;  %v12426_v3 = vsub.f32 %v12424_v33, %v12425_v46  ;;  %v12427_v53 = vld [vmem:[#allocation293_spill] sm:$0xff]  ;;  %v12431_v47 = vld [vmem:[#allocation35_spill] sm:$0xff]  ;;  %v12433_v11 = vld [vmem:[#allocation294_spill] sm:$0xff] }
 0x56c   : > { %v9989_v43 = vpop.eup %6524  ;;  %6548 = vpow2.f32 %v12423_v59  ;;  %v12428_v26 = vsub.f32 %v12427_v53, %v12425_v46  ;;  %v12435_v59 = vld [vmem:[#allocation299_spill] sm:$0xff]  ;;  %v12440_v53 = vpack.c.bf16 %v9803_v49, %v12351_v57  ;;  %v12448_v57 = vld [vmem:[#allocation180_spill] sm:$0xff] }
 0x56d   : > { %v9997_v27 = vpop.eup %6526  ;;  %v4590_v24 = vadd.f32 %v12421_v5, %v3564_v2  ;;  %6550 = vpow2.f32 %v12426_v3  ;;  %v12429_v2 = vld [vmem:[#allocation292_spill] sm:$0xff]  ;;  %v12434_v5 = vsub.f32 %v12433_v11, %v12425_v46  ;;  %v12438_v3 = vld [vmem:[#allocation301_spill] sm:$0xff] }
 0x56e   : > { %v10006_v62 = vpop.eup %6528  ;;  %v3301_v21 = vpop.permute.xlu0 %3300  ;;  %6552 = vpow2.f32 %v12428_v26  ;;  %v12430_v17 = vsub.f32 %v12429_v2, %v12425_v46 }
 0x56f   : > { %v10013_v58 = vpop.eup %6530  ;;  %4655 = vst.msk [vmem:[#allocation3 + $0x58] sm:$0xff] %vm4643_vm4, %v4590_v24  ;;  %v3566_v29 = vmul.f32 %v3301_v21, %v3182_v54  ;;  %v2139_v45 = vpop.xlane.xlu1 %2138  ;;  %4202 = vmatmul.mubr.bf16.gmra.mrb[212].mxu0 %v12432_v35  ;;  %v12436_v21 = vld [vmem:[#allocation248_spill] sm:$0xff]  ;;  %v12444_v35 = vld [vmem:[#allocation177_spill] sm:$0xff] }
 0x570   : > { %v10019_v0 = vpop.eup %6532  ;;  %6554 = vpow2.f32 %v12430_v17  ;;  %v10034_v54 = vmax.f32 %v10011_v52, %v2139_v45  ;;  %v12437_v33 = vsub.f32 %v12435_v59, %v12436_v21  ;;  %v3186_v45 = vld [vmem:[#allocation3 + $0x88] sm:$0xff]  ;;  %v12441_v17 = vld [vmem:[#allocation300_spill] sm:$0xff] }
 0x571   : > { %v10024_v22 = vpop.eup %6534  ;;  %v4592_v42 = vadd.f32 %v12431_v47, %v3566_v29  ;;  %6556 = vpow2.f32 %v12434_v5  ;;  %v12439_v29 = vsub.f32 %v12438_v3, %v12436_v21  ;;  %v12442_v47 = vsub.f32 %v12441_v17, %v12436_v21  ;;  %v12445_v5 = vld [vmem:[#allocation179_spill] sm:$0xff] }
 0x572   : > { %v10036_v8 = vpop.eup %6536  ;;  %v3311_v24 = vpop.permute.xlu0 %3310  ;;  %6558 = vpow2.f32 %v12437_v33  ;;  %4771 = vst.msk [vmem:[#allocation2 + $0x1f0] sm:$0xff] %vm4708_vm3, %v10034_v54  ;;  %2649 = vperm.xlu1 %5967, %v10034_v54   ;;  %4491 = vmatmul.mubr.bf16.gmra.mrb[212].mxu1 %v12440_v53  ;;  %v12446_v33 = vld [vmem:[#allocation302_spill] sm:$0xff] }
 0x573   : > { %v10041_v20 = vpop.eup %6538  ;;  %4657 = vst.msk [vmem:[#allocation3 + $0x68] sm:$0xff] %vm4643_vm4, %v4592_v42  ;;  %v3568_v15 = vmul.f32 %v3311_v24, %v3184_v4  ;;  %6560 = vpow2.f32 %v12439_v29  ;;  %v2565_v26 = vpop.permute.xlu1 %2564  ;;  %v12443_v4 = vld [vmem:[#allocation230_spill] sm:$0xff]  ;;  %v12447_v49 = vsub.f32 %v12446_v33, %v12436_v21  ;;  %v12449_v29 = vld [vmem:[#allocation181_spill] sm:$0xff] }
 0x574   : > { %v10052_v46 = vpop.eup %6540  ;;  %6562 = vpow2.f32 %v12442_v47  ;;  %v2837_v11 = vsub.f32 %v12444_v35, %v2565_v26  ;;  %v2838_v24 = vsub.f32 %v12445_v5, %v2565_v26  ;;  %v2839_v3 = vsub.f32 %v12448_v57, %v2565_v26  ;;  %v12450_v35 = vld [vmem:[#allocation240_spill] sm:$0xff] }
 0x575   : > { %v10060_v2 = vpop.eup %6542  ;;  %v4594_v42 = vadd.f32 %v12443_v4, %v3568_v15  ;;  %6564 = vpow2.f32 %v12447_v49  ;;  %v2840_v53 = vsub.f32 %v12449_v29, %v2565_v26  ;;  %v3188_v4 = vld [vmem:[#allocation3 + $0x98] sm:$0xff]  ;;  %v12451_v26 = vld [vmem:[#allocation185_spill] sm:$0xff]  ;;  %v12452_v49 = vld [vmem:[#allocation186_spill] sm:$0xff] }
 0x576   : > { %v10068_v59 = vpop.eup %6544  ;;  %v3321_v51 = vpop.permute.xlu0 %3320  ;;  %6566 = vpow2.f32 %v2837_v11  ;;  %3235 = vperm.xlu1 %5967, %v9838_v63   ;;  %v12454_v63 = vld [vmem:[#allocation188_spill] sm:$0xff] }
 0x577   : > { %v10075_v61 = vpop.eup %6546  ;;  %4659 = vst.msk [vmem:[#allocation3 + $0x78] sm:$0xff] %vm4643_vm4, %v4594_v42  ;;  %v3570_v15 = vmul.f32 %v3321_v51, %v3186_v45  ;;  %6568 = vpow2.f32 %v2838_v24  ;;  %v2570_v47 = vpop.permute.xlu1 %2569  ;;  %v12453_v51 = vld [vmem:[#allocation187_spill] sm:$0xff] }
 0x578   : > { %v10079_v17 = vpop.eup %6548  ;;  %6570 = vpow2.f32 %v2839_v3  ;;  %v2841_v33 = vsub.f32 %v12451_v26, %v2570_v47  ;;  %v2842_v57 = vsub.f32 %v12452_v49, %v2570_v47  ;;  %v2843_v45 = vsub.f32 %v12453_v51, %v2570_v47  ;;  %v3190_v26 = vld [vmem:[#allocation3 + $0xa8] sm:$0xff] }
 0x579   : > { %v10081_v21 = vpop.eup %6550  ;;  %v4596_v5 = vadd.f32 %v12450_v35, %v3570_v15  ;;  %6572 = vpow2.f32 %v2840_v53  ;;  %v2844_v42 = vsub.f32 %v12454_v63, %v2570_v47  ;;  %v12455_v47 = vld [vmem:[#allocation197_spill] sm:$0xff]  ;;  %v12456_v63 = vld [vmem:[#allocation198_spill] sm:$0xff] }
 0x57a   : > { %v10086_v29 = vpop.eup %6552  ;;  %v3331_v11 = vpop.permute.xlu0 %3330  ;;  %6574 = vpow2.f32 %v2841_v33  ;;  %3245 = vperm.xlu1 %5967, %v9840_v55   ;;  %v12458_v55 = vld [vmem:[#allocation201_spill] sm:$0xff] }
 0x57b   : > { %v10090_v24 = vpop.eup %6554  ;;  %4661 = vst.msk [vmem:[#allocation3 + $0x88] sm:$0xff] %vm4643_vm4, %v4596_v5  ;;  %v3572_v3 = vmul.f32 %v3331_v11, %v3188_v4  ;;  %6576 = vpow2.f32 %v2842_v57  ;;  %v2580_v35 = vpop.permute.xlu1 %2579  ;;  %v12457_v4 = vld [vmem:[#allocation199_spill] sm:$0xff] }
 0x57c   : > { %v10094_v15 = vpop.eup %6556  ;;  %6578 = vpow2.f32 %v2843_v45  ;;  %v2849_v51 = vsub.f32 %v12455_v47, %v2580_v35  ;;  %v2850_v50 = vsub.f32 %v12456_v63, %v2580_v35  ;;  %v2851_v5 = vsub.f32 %v12457_v4, %v2580_v35  ;;  %v12459_v63 = vld [vmem:[#allocation227_spill] sm:$0xff] }
 0x57d   : > { %v10096_v49 = vpop.eup %6558  ;;  %v4598_v53 = vadd.f32 %v9669_v10, %v3572_v3  ;;  %6580 = vpow2.f32 %v2844_v42  ;;  %v2852_v33 = vsub.f32 %v12458_v55, %v2580_v35  ;;  %v12460_v35 = vld [vmem:[#allocation229_spill] sm:$0xff] }
 0x57e   : > { %v10101_v48 = vpop.eup %6560  ;;  %v3341_v11 = vpop.permute.xlu0 %3340  ;;  %6582 = vpow2.f32 %v2849_v51  ;;  %3255 = vperm.xlu1 %5967, %v9842_v23   ;;  %v12462_v51 = vld [vmem:[#allocation232_spill] sm:$0xff] }
 0x57f   : > { %v10105_v57 = vpop.eup %6562  ;;  %4663 = vst.msk [vmem:[#allocation3 + $0x98] sm:$0xff] %vm4643_vm4, %v4598_v53  ;;  %v3574_v45 = vmul.f32 %v3341_v11, %v3190_v26  ;;  %6584 = vpow2.f32 %v2850_v50  ;;  %v2590_v3 = vpop.permute.xlu1 %2589 }
 0x580   : > { %v10109_v10 = vpop.eup %6564  ;;  %6586 = vpow2.f32 %v2851_v5  ;;  %v2857_v4 = vsub.f32 %v12459_v63, %v2590_v3  ;;  %v2858_v55 = vsub.f32 %v12460_v35, %v2590_v3  ;;  %v2859_v53 = vsub.f32 %v12461_v19, %v2590_v3  ;;  %v12463_v19 = vld [vmem:[#allocation259_spill] sm:$0xff] }
 0x581   : > { %v6567_v47 = vpop.eup %6566  ;;  %v4600_v42 = vadd.f32 %v9979_v14, %v3574_v45  ;;  %6588 = vpow2.f32 %v2852_v33  ;;  %v2860_v26 = vsub.f32 %v12462_v51, %v2590_v3  ;;  %v12464_v3 = vld [vmem:[#allocation261_spill] sm:$0xff] }
 0x582   : > { %v6569_v44 = vpop.eup %6568  ;;  %v3705_v23 = vpack.c.bf16 %v6567_v47, %v9907_v12  ;;  %6590 = vpow2.f32 %v2857_v4  ;;  %3265 = vperm.xlu1 %5967, %v9847_v9   ;;  %v12465_v12 = vld [vmem:[#allocation263_spill] sm:$0xff]  ;;  %v12466_v4 = vld [vmem:[#allocation264_spill] sm:$0xff] }
 0x583   : > { %v6571_v11 = vpop.eup %6570  ;;  %4665 = vst.msk [vmem:[#allocation3 + $0xa8] sm:$0xff] %vm4643_vm4, %v4600_v42  ;;  %v3706_v50 = vpack.c.bf16 %v6569_v44, %v9915_v25  ;;  %6592 = vpow2.f32 %v2858_v55  ;;  %v2600_v5 = vpop.permute.xlu1 %2599 }
 0x584   : > { %v6573_v14 = vpop.eup %6572  ;;  %v3707_v45 = vpack.c.bf16 %v6571_v11, %v9924_v7  ;;  %6594 = vpow2.f32 %v2859_v53  ;;  %v2865_v63 = vsub.f32 %v12463_v19, %v2600_v5  ;;  %v2866_v35 = vsub.f32 %v12464_v3, %v2600_v5 }
 0x585   : > { %v6575_v33 = vpop.eup %6574  ;;  %v2867_v47 = vsub.f32 %v12465_v12, %v2600_v5  ;;  %4209 = vmatprep.mubr.bf16.mxu0 %v3706_v50  ;;  %6596 = vpow2.f32 %v2860_v26  ;;  %v2868_v9 = vsub.f32 %v12466_v4, %v2600_v5  ;;  %v3708_v44 = vpack.c.bf16 %v6573_v14, %v9929_v36  ;;  %v12467_v36 = vld [vmem:[#allocation274_spill] sm:$0xff]  ;;  %v12468_v50 = vld [vmem:[#allocation275_spill] sm:$0xff]  ;;  %v12469_v14 = vld [vmem:[#allocation280_spill] sm:$0xff] }
 0x586   : > { %v6577_v42 = vpop.eup %6576  ;;  %4210 = vmatmul.mubr.bf16.gmra.mrb[216].mxu0 %v3705_v23  ;;  %v3709_v25 = vpack.c.bf16 %v9938_v38, %v6575_v33  ;;  %6598 = vpow2.f32 %v2865_v63  ;;  %3275 = vperm.xlu1 %5967, %v9853_v56  }
 0x587   : > { %v6579_v55 = vpop.eup %6578  ;;  %v3710_v7 = vpack.c.bf16 %v9946_v18, %v6577_v42  ;;  %6600 = vpow2.f32 %v2866_v35  ;;  %4498 = vmatprep.mubr.bf16.mxu1 %v3708_v44  ;;  %v2610_v51 = vpop.permute.xlu1 %2609  ;;  %v12470_v18 = vld [vmem:[#allocation281_spill] sm:$0xff] }
 0x588   : > { %v6581_v53 = vpop.eup %6580  ;;  %v3711_v11 = vpack.c.bf16 %v9952_v30, %v6579_v55  ;;  %6602 = vpow2.f32 %v2867_v47  ;;  %4499 = vmatmul.mubr.bf16.gmra.mrb[216].mxu1 %v3707_v45  ;;  %v2873_v23 = vsub.f32 %v12467_v36, %v2610_v51  ;;  %v2874_v38 = vsub.f32 %v12468_v50, %v2610_v51 }
 0x589   : > { %v10130_v26 = vpop.eup %6582  ;;  %v2875_v5 = vsub.f32 %v12469_v14, %v2610_v51  ;;  %4217 = vmatprep.mubr.bf16.mxu0 %v3710_v7  ;;  %6604 = vpow2.f32 %v2868_v9  ;;  %v2876_v33 = vsub.f32 %v12470_v18, %v2610_v51  ;;  %v3712_v19 = vpack.c.bf16 %v9957_v60, %v6581_v53  ;;  %v12471_v60 = vld [vmem:[#allocation287_spill] sm:$0xff]  ;;  %v12473_v9 = vld [vmem:[#allocation288_spill] sm:$0xff] }
 0x58a   : > { %v6585_v56 = vpop.eup %6584  ;;  %v3713_v30 = vpack.c.bf16 %v9965_v40, %v10130_v26  ;;  %6606 = vpow2.f32 %v2873_v23  ;;  %3285 = vperm.xlu1 %5967, %v9861_v28   ;;  %v12472_v40 = vld [vmem:[#allocation289_spill] sm:$0xff]  ;;  %v12474_v28 = vld [vmem:[#allocation290_spill] sm:$0xff] }
 0x58b   : > { %v10139_v63 = vpop.eup %6586  ;;  %v3714_v45 = vpack.c.bf16 %v9973_v6, %v6585_v56  ;;  %6608 = vpow2.f32 %v2874_v38  ;;  %4506 = vmatprep.mubr.bf16.mxu1 %v3712_v19  ;;  %v2620_v35 = vpop.permute.xlu1 %2619  ;;  %v12476_v38 = vld [vmem:[#allocation297_spill] sm:$0xff] }
 0x58c   : > { %v6589_v3 = vpop.eup %6588  ;;  %v3715_v12 = vpack.c.bf16 %v9984_v32, %v10139_v63  ;;  %6610 = vpow2.f32 %v2875_v5  ;;  %v2881_v42 = vsub.f32 %v12471_v60, %v2620_v35  ;;  %v2882_v4 = vsub.f32 %v12472_v40, %v2620_v35  ;;  %v12477_v5 = vld [vmem:[#allocation296_spill] sm:$0xff]  ;;  %v12480_v60 = vld [vmem:[#allocation218_spill] sm:$0xff] }
 0x58d   : > { %v10145_v47 = vpop.eup %6590  ;;  %v2883_v44 = vsub.f32 %v12473_v9, %v2620_v35  ;;  %6612 = vpow2.f32 %v2876_v33  ;;  %v2884_v6 = vsub.f32 %v12474_v28, %v2620_v35  ;;  %v3716_v7 = vpack.c.bf16 %v9989_v43, %v6589_v3  ;;  %v12475_v43 = vld [vmem:[#allocation295_spill] sm:$0xff]  ;;  %v12482_v9 = vld [vmem:[#allocation221_spill] sm:$0xff] }
 0x58e   : > { %v6593_v55 = vpop.eup %6592  ;;  %4218 = vmatmul.mubr.bf16.gmra.mrb[220].mxu0 %v3709_v25  ;;  %v3717_v53 = vpack.c.bf16 %v9997_v27, %v10145_v47  ;;  %6614 = vpow2.f32 %v2881_v42  ;;  %3295 = vperm.xlu1 %5967, %v9870_v31   ;;  %v12478_v31 = vld [vmem:[#allocation298_spill] sm:$0xff]  ;;  %v12492_v27 = vld [vmem:[#allocation305_spill] sm:$0xff] }
 0x58f   : > { %v10154_v32 = vpop.eup %6594  ;;  %4225 = vmatprep.mubr.bf16.mxu0 %v3714_v45  ;;  %v3718_v51 = vpack.c.bf16 %v10006_v62, %v6593_v55  ;;  %6616 = vpow2.f32 %v2882_v4  ;;  %v2630_v36 = vpop.permute.xlu1 %2629 }
 0x590   : > { %v6597_v26 = vpop.eup %6596  ;;  %v3719_v23 = vpack.c.bf16 %v10013_v58, %v10154_v32  ;;  %6618 = vpow2.f32 %v2883_v44  ;;  %4507 = vmatmul.mubr.bf16.gmra.mrb[220].mxu1 %v3711_v11  ;;  %v2889_v50 = vsub.f32 %v12475_v43, %v2630_v36  ;;  %v2890_v14 = vsub.f32 %v12476_v38, %v2630_v36  ;;  %v12496_v58 = vld [vmem:[#allocation241_spill] sm:$0xff] }
 0x591   : > { %v10160_v25 = vpop.eup %6598  ;;  %v2891_v56 = vsub.f32 %v12477_v5, %v2630_v36  ;;  %6620 = vpow2.f32 %v2884_v6  ;;  %4514 = vmatprep.mubr.bf16.mxu1 %v3716_v7  ;;  %v2892_v62 = vsub.f32 %v12478_v31, %v2630_v36  ;;  %v3720_v33 = vpack.c.bf16 %v10019_v0, %v6597_v26  ;;  %v12479_v0 = vld [vmem:[#allocation220_spill] sm:$0xff]  ;;  %v12483_v6 = vld [vmem:[#allocation235_spill] sm:$0xff]  ;;  %v12484_v7 = vld [vmem:[#allocation233_spill] sm:$0xff] }
 0x592   : > { %v10165_v18 = vpop.eup %6600  ;;  %v3721_v19 = vpack.c.bf16 %v10024_v22, %v10160_v25  ;;  %6622 = vpow2.f32 %v2889_v50  ;;  %3305 = vperm.xlu1 %5967, %v9882_v41   ;;  %v2231_v42 = vsub.f32 %v12480_v60, %v12479_v0  ;;  %v12481_v41 = vld [vmem:[#allocation226_spill] sm:$0xff]  ;;  %v2235_v26 = vsub.f32 %v12484_v7, %v12483_v6  ;;  %v12485_v50 = vld [vmem:[#allocation308_spill] sm:$0xff]  ;;  %v12487_v31 = vld [vmem:[#allocation307_spill] sm:$0xff] }
 0x593   : > { %v10171_v63 = vpop.eup %6602  ;;  %v3722_v11 = vpack.c.bf16 %v10036_v8, %v10165_v18  ;;  %6624 = vpow2.f32 %v2890_v14  ;;  %v2233_v44 = vsub.f32 %v12482_v9, %v12481_v41  ;;  %v2901_v38 = vsub.f32 %v12485_v50, %v9794_v39  ;;  %v12486_v5 = vld [vmem:[#allocation310_spill] sm:$0xff]  ;;  %v3351_v9 = vpop.permute.xlu0 %3350  ;;  %v12488_v7 = vld [vmem:[#allocation309_spill] sm:$0xff] }
 0x594   : > { %v10176_v45 = vpop.eup %6604  ;;  %v3723_v3 = vpack.c.bf16 %v10041_v20, %v10171_v63  ;;  %6626 = vpow2.f32 %v2891_v56  ;;  %v2902_v56 = vsub.f32 %v12486_v5, %v9794_v39 }
 0x595   : > { %v10180_v35 = vpop.eup %6606  ;;  %v3724_v40 = vpack.c.bf16 %v10052_v46, %v10176_v45  ;;  %6628 = vpow2.f32 %v2892_v62  ;;  %v2903_v62 = vsub.f32 %v12487_v31, %v9794_v39  ;;  %v12497_v45 = vld [vmem:[#allocation247_spill] sm:$0xff] }
 0x596   : > { %v10186_v4 = vpop.eup %6608  ;;  %4226 = vmatmul.mubr.bf16.gmra.mrb[224].mxu0 %v3713_v30  ;;  %3315 = vperm.xlu1 %5967, %v9890_v37   ;;  %6630 = vpow2.f32 %v2231_v42  ;;  %v3192_v42 = vld [vmem:[#allocation3 + $0xb8] sm:$0xff]  ;;  %v12490_v30 = vld [vmem:[#allocation306_spill] sm:$0xff]  ;;  %v12502_v20 = vpack.c.bf16 %v10060_v2, %v10180_v35 }
 0x597   : > { %v10192_v28 = vpop.eup %6610  ;;  %4233 = vmatprep.mubr.bf16.mxu0 %v3718_v51  ;;  %v3726_v36 = vpack.c.bf16 %v10068_v59, %v10186_v4  ;;  %6632 = vpow2.f32 %v2233_v44  ;;  %v12491_v37 = vld [vmem:[#allocation303_spill] sm:$0xff] }
 0x598   : > { %v10199_v43 = vpop.eup %6612  ;;  %4515 = vmatmul.mubr.bf16.gmra.mrb[224].mxu1 %v3715_v12  ;;  %v4123_v0 = vpop.f32.mrb[172].mxu0  ;;  %6634 = vpow2.f32 %v2235_v26 }
 0x599   : > { %v10205_v14 = vpop.eup %6614  ;;  %4522 = vmatprep.mubr.bf16.mxu1 %v3720_v33  ;;  %v4125_v12 = vpop.f32.mrb[173].mxu0  ;;  %v2904_v33 = vsub.f32 %v12488_v7, %v9794_v39  ;;  %6636 = vpow2.f32 %v2901_v38  ;;  %v3576_v39 = vmul.f32 %v3351_v9, %v3192_v42  ;;  %v12499_v22 = vpack.c.bf16 %v10079_v17, %v10199_v43 }
 0x59a   : > { %v10211_v51 = vpop.eup %6616  ;;  %3325 = vperm.xlu1 %5967, %v9896_v13   ;;  %v4412_v50 = vpop.f32.mrb[172].mxu1  ;;  %6638 = vpow2.f32 %v2902_v56 }
 0x59b   : > { %v10217_v41 = vpop.eup %6618  ;;  %v4126_v5 = vpop.f32.mrb[174].mxu0  ;;  %v10230_v12 = vadd.f32 %v4412_v50, %v4123_v0  ;;  %6640 = vpow2.f32 %v2903_v62  ;;  %v12503_v17 = vpack.c.bf16 %v10086_v29, %v10211_v51  ;;  %v12509_v29 = vld [vmem:[#allocation265_spill] sm:$0xff] }
 0x59c   : > { %v10222_v44 = vpop.eup %6620  ;;  %v4414_v13 = vpop.f32.mrb[173].mxu1  ;;  %6642 = vpow2.f32 %v2904_v33  ;;  %v12501_v33 = vld [vmem:[#allocation249_spill] sm:$0xff] }
 0x59d   : > { %v10228_v26 = vpop.eup %6622  ;;  %v4128_v60 = vpop.f32.mrb[175].mxu0  ;;  %v12489_v13 = vld [vmem:[#allocation304_spill] sm:$0xff]  ;;  %v12507_v2 = vpack.c.bf16 %v10094_v15, %v10222_v44  ;;  %v12513_v15 = vpack.c.bf16 %v10090_v24, %v10217_v41 }
 0x59e   : > { %v10234_v6 = vpop.eup %6624  ;;  %v4415_v38 = vpop.f32.mrb[174].mxu1  ;;  %4234 = vmatmul.mubr.bf16.gmra.mrb[228].mxu0 %v3717_v53  ;;  %v3733_v56 = vpack.c.bf16 %v10096_v49, %v10228_v26  ;;  %3335 = vperm.xlu1 %5967, %v9901_v16   ;;  %v12518_v41 = vld [vmem:[#allocation320_spill] sm:$0xff]  ;;  %v12520_v26 = vld [vmem:[#allocation5_spill] sm:$0xff] }
 0x59f   : > { %v2640_v7 = vpop.permute.xlu1 %2639  ;;  %v10241_v0 = vpop.eup %6626  ;;  %v4416_v50 = vadd.f32 %v4415_v38, %v4126_v5  ;;  %4241 = vmatprep.mubr.bf16.mxu0 %v3722_v11  ;;  %v3734_v53 = vpack.c.bf16 %v10101_v48, %v10234_v6  ;;  %v12494_v5 = vld [vmem:[#allocation237_spill] sm:$0xff]  ;;  %v12495_v11 = vld [vmem:[#allocation243_spill] sm:$0xff] }
 0x5a0   : > { %v4417_v60 = vpop.f32.mrb[175].mxu1  ;;  %v2897_v31 = vsub.f32 %v12489_v13, %v2640_v7  ;;  %v2898_v55 = vsub.f32 %v12490_v30, %v2640_v7  ;;  %v2899_v62 = vsub.f32 %v12491_v37, %v2640_v7  ;;  %v10249_v42 = vpop.eup %6628  ;;  %v2900_v47 = vsub.f32 %v12492_v27, %v2640_v7  ;;  %v12493_v30 = vld [vmem:[#allocation239_spill] sm:$0xff]  ;;  %4523 = vmatmul.mubr.bf16.gmra.mrb[228].mxu1 %v3719_v23 }
 0x5a1   : > { %v3735_v9 = vpack.c.bf16 %v10105_v57, %v10241_v0  ;;  %v2237_v37 = vsub.f32 %v12494_v5, %v12493_v30  ;;  %v4602_v38 = vadd.f32 %v4416_v50, %v3576_v39  ;;  %v3736_v8 = vpack.c.bf16 %v10109_v10, %v10249_v42  ;;  %4530 = vmatprep.mubr.bf16.mxu1 %v3724_v40  ;;  %v6631_v48 = vpop.eup %6630  ;;  %v12498_v40 = vld [vmem:[#allocation245_spill] sm:$0xff]  ;;  %v12504_v50 = vld [vmem:[#allocation255_spill] sm:$0xff]  ;;  %v12508_v42 = vld [vmem:[#allocation266_spill] sm:$0xff] }
 0x5a2   : > { %6644 = vpow2.f32 %v2897_v31  ;;  %v6633_v16 = vpop.eup %6632  ;;  %3345 = vperm.xlu1 %5967, %v6631_v48   ;;  %v2239_v32 = vsub.f32 %v12496_v58, %v12495_v11  ;;  %v12505_v60 = vld [vmem:[#allocation253_spill] sm:$0xff]  ;;  %v2247_v51 = vsub.f32 %v12509_v29, %v12508_v42  ;;  %v12510_v27 = vpack.c.bf16 %v10081_v21, %v10205_v14  ;;  %v12514_v5 = vld [vmem:[#allocation276_spill] sm:$0xff]  ;;  %v12516_v14 = vld [vmem:[#allocation282_spill] sm:$0xff] }
 0x5a3   : > { %6646 = vpow2.f32 %v2898_v55  ;;  %4667 = vst.msk [vmem:[#allocation3 + $0xb8] sm:$0xff] %vm4643_vm4, %v4602_v38  ;;  %v6635_v18 = vpop.eup %6634  ;;  %v2241_v55 = vsub.f32 %v12498_v40, %v12497_v45  ;;  %v2245_v13 = vsub.f32 %v12505_v60, %v12504_v50  ;;  %v12522_v57 = vld [vmem:[#allocation6_spill] sm:$0xff]  ;;  %v12523_v0 = vld [vmem:[#allocation7_spill] sm:$0xff]  ;;  %v3361_v45 = vpop.permute.xlu0 %3360 }
 0x5a4   : > { %6648 = vpow2.f32 %v2899_v62  ;;  %v6637_v23 = vpop.eup %6636  ;;  %v12506_v62 = vpack.c.bf16 %v10075_v61, %v10192_v28  ;;  %v12511_v61 = vld [vmem:[#allocation269_spill] sm:$0xff]  ;;  %v12512_v28 = vld [vmem:[#allocation267_spill] sm:$0xff] }
 0x5a5   : > { %6650 = vpow2.f32 %v2900_v47  ;;  %v6639_v10 = vpop.eup %6638  ;;  %v2249_v30 = vsub.f32 %v12512_v28, %v12511_v61  ;;  %v12529_v50 = vld [vmem:[#allocation31_spill] sm:$0xff]  ;;  %v12536_v28 = vsub.f32 %v10011_v52, %v10034_v54  ;;  %v12542_v52 = vld [vmem:[#allocation312_spill] sm:$0xff] }
 0x5a6   : > { %6652 = vpow2.f32 %v2237_v37  ;;  %4242 = vmatmul.mubr.bf16.gmra.mrb[232].mxu0 %v3721_v19  ;;  %v6641_v46 = vpop.eup %6640  ;;  %3355 = vperm.xlu1 %5967, %v6633_v16   ;;  %v12515_v37 = vld [vmem:[#allocation271_spill] sm:$0xff] }
 0x5a7   : > { %4249 = vmatprep.mubr.bf16.mxu0 %v3726_v36  ;;  %6654 = vpow2.f32 %v2239_v32  ;;  %v6643_v6 = vpop.eup %6642  ;;  %v12500_v36 = vld [vmem:[#allocation251_spill] sm:$0xff]  ;;  %v2251_v38 = vsub.f32 %v12515_v37, %v12514_v5  ;;  %v12524_v32 = vld [vmem:[#allocation10_spill] sm:$0xff]  ;;  %v12538_v5 = vld [vmem:[#allocation317_spill] sm:$0xff] }
 0x5a8   : > { %4531 = vmatmul.mubr.bf16.gmra.mrb[232].mxu1 %v3723_v3  ;;  %6656 = vpow2.f32 %v2241_v55  ;;  %v2243_v31 = vsub.f32 %v12501_v33, %v12500_v36  ;;  %v12526_v36 = vld [vmem:[#allocation18_spill] sm:$0xff]  ;;  %v12527_v33 = vld [vmem:[#allocation19_spill] sm:$0xff]  ;;  %v12539_v37 = vsub.f32 %v12538_v5, %v9822_v1  ;;  %v12552_v5 = vld [vmem:[#allocation16_spill] sm:$0xff] }
 0x5a9   : > { %4538 = vmatprep.mubr.bf16.mxu1 %v12499_v22 }
 0x5aa   : > { %3365 = vperm.xlu1 %5967, %v6635_v18   ;;  %6658 = vpow2.f32 %v2243_v31  ;;  %v2263_v31 = vsub.f32 %v12527_v33, %v12526_v36 }
 0x5ab   : > { %6660 = vpow2.f32 %v2245_v13 }
 0x5ac   : > { %v6645_v25 = vpop.eup %6644  ;;  %6662 = vpow2.f32 %v2247_v51  ;;  %v12533_v51 = vld [vmem:[#allocation49_spill] sm:$0xff] }
 0x5ad   : > { %v6647_v19 = vpop.eup %6646  ;;  %v3737_v59 = vpack.c.bf16 %v6637_v23, %v6645_v25  ;;  %6664 = vpow2.f32 %v2249_v30  ;;  %v12525_v23 = vld [vmem:[#allocation11_spill] sm:$0xff] }
 0x5ae   : > { %v6649_v4 = vpop.eup %6648  ;;  %v3738_v39 = vpack.c.bf16 %v6639_v10, %v6647_v19  ;;  %4250 = vmatmul.mubr.bf16.gmra.mrb[236].mxu0 %v12502_v20  ;;  %6666 = vpow2.f32 %v2251_v38  ;;  %v2261_v10 = vsub.f32 %v12525_v23, %v12524_v32 }
 0x5af   : > { %v6651_v7 = vpop.eup %6650  ;;  %v3739_v63 = vpack.c.bf16 %v6641_v46, %v6649_v4  ;;  %4257 = vmatprep.mubr.bf16.mxu0 %v12503_v17 }
 0x5b0   : > { %v6653_v3 = vpop.eup %6652  ;;  %v3740_v43 = vpack.c.bf16 %v6643_v6, %v6651_v7  ;;  %4539 = vmatmul.mubr.bf16.gmra.mrb[236].mxu1 %v12506_v62  ;;  %v3194_v6 = vld [vmem:[#allocation3 + $0xc8] sm:$0xff] }
 0x5b1   : > { %3375 = vperm.xlu1 %5967, %v6653_v3   ;;  %4546 = vmatprep.mubr.bf16.mxu1 %v12507_v2  ;;  %v6655_v35 = vpop.eup %6654  ;;  %v3578_v7 = vmul.f32 %v3361_v45, %v3194_v6  ;;  %v12530_v2 = vld [vmem:[#allocation37_spill] sm:$0xff]  ;;  %v12549_v45 = vld [vmem:[#allocation12_spill] sm:$0xff] }
 0x5b2   : > { %v6657_v47 = vpop.eup %6656 }
 0x5b4   : > { %v6659_v44 = vpop.eup %6658 }
 0x5b5   : > { %3385 = vperm.xlu1 %5967, %v6655_v35   ;;  %v6661_v21 = vpop.eup %6660  ;;  %v12531_v35 = vld [vmem:[#allocation39_spill] sm:$0xff] }
 0x5b6   : > { %4258 = vmatmul.mubr.bf16.gmra.mrb[240].mxu0 %v12510_v27  ;;  %v6663_v24 = vpop.eup %6662  ;;  %v12532_v42 = vsub.f32 %v12530_v2, %v12531_v35  ;;  %v12534_v27 = vld [vmem:[#allocation51_spill] sm:$0xff] }
 0x5b7   : > { %4265 = vmatprep.mubr.bf16.mxu0 %v3734_v53  ;;  %v12517_v53 = vld [vmem:[#allocation278_spill] sm:$0xff]  ;;  %v6665_v49 = vpop.eup %6664 }
 0x5b8   : > { %4547 = vmatmul.mubr.bf16.gmra.mrb[240].mxu1 %v12513_v15  ;;  %v2253_v48 = vsub.f32 %v12517_v53, %v12516_v14  ;;  %v6667_v11 = vpop.eup %6666  ;;  %v12540_v14 = vld [vmem:[#allocation315_spill] sm:$0xff] }
 0x5b9   : > { %3395 = vperm.xlu1 %5967, %v6657_v47   ;;  %4554 = vmatprep.mubr.bf16.mxu1 %v3736_v8  ;;  %v12519_v8 = vld [vmem:[#allocation319_spill] sm:$0xff]  ;;  %v12535_v47 = vsub.f32 %v12533_v51, %v12534_v27  ;;  %v12541_v53 = vsub.f32 %v12540_v14, %v9822_v1 }
 0x5ba   : > { %6668 = vpow2.f32 %v2253_v48  ;;  %v2255_v16 = vsub.f32 %v12519_v8, %v12518_v41  ;;  %v12543_v48 = vld [vmem:[#allocation314_spill] sm:$0xff]  ;;  %v12544_v41 = vld [vmem:[#allocation311_spill] sm:$0xff] }
 0x5bb   : > { %v3196_v51 = vld [vmem:[#allocation3 + $0xd8] sm:$0xff] }
 0x5bc   : > { %6670 = vpow2.f32 %v2255_v16  ;;  %v12545_v16 = vld [vmem:[#allocation318_spill] sm:$0xff] }
 0x5bd   : > { %3405 = vperm.xlu1 %5967, %v6659_v44   ;;  %v12537_v44 = vsub.f32 %v12357_v34, %v9822_v1  ;;  %v12546_v34 = vsub.f32 %v12545_v16, %v9822_v1 }
 0x5be   : > { %4266 = vmatmul.mubr.bf16.gmra.mrb[244].mxu0 %v3733_v56  ;;  %v12521_v56 = vld [vmem:[#allocation4_spill] sm:$0xff] }
 0x5bf   : > { %4273 = vmatprep.mubr.bf16.mxu0 %v3738_v39  ;;  %v2257_v18 = vsub.f32 %v12521_v56, %v12520_v26  ;;  %v3169_v56 = vld [vmem:[#allocation3] sm:$0xff] }
 0x5c0   : > { %4555 = vmatmul.mubr.bf16.gmra.mrb[244].mxu1 %v3735_v9  ;;  %v2259_v9 = vsub.f32 %v12523_v0, %v12522_v57  ;;  %v3171_v57 = vld [vmem:[#allocation3 + $0x10] sm:$0xff]  ;;  %v12548_v0 = vld [vmem:[#allocation8_spill] sm:$0xff] }
 0x5c1   : > { %3415 = vperm.xlu1 %5967, %v6661_v21   ;;  %4562 = vmatprep.mubr.bf16.mxu1 %v3740_v43  ;;  %6672 = vpow2.f32 %v2257_v18  ;;  %v12528_v43 = vld [vmem:[#allocation30_spill] sm:$0xff] }
 0x5c2   : > { %6674 = vpow2.f32 %v2259_v9  ;;  %v2265_v60 = vsub.f32 %v12529_v50, %v12528_v43 }
 0x5c3   : > { %6676 = vpow2.f32 %v2261_v10  ;;  %v3173_v10 = vld [vmem:[#allocation3 + $0x20] sm:$0xff] }
 0x5c4   : > { %v6669_v58 = vpop.eup %6668  ;;  %6678 = vpow2.f32 %v2263_v31  ;;  %v12550_v31 = vld [vmem:[#allocation20_spill] sm:$0xff] }
 0x5c5   : > { %3425 = vperm.xlu1 %5967, %v6663_v24   ;;  %6680 = vpow2.f32 %v2265_v60  ;;  %v3177_v60 = vld [vmem:[#allocation3 + $0x40] sm:$0xff] }
 0x5c6   : > { %4274 = vmatmul.mubr.bf16.gmra.mrb[248].mxu0 %v3737_v59  ;;  %v6671_v55 = vpop.eup %6670  ;;  %6682 = vpow2.f32 %v12532_v42 }
 0x5c7   : > { %6684 = vpow2.f32 %v12535_v47 }
 0x5c8   : > { %4563 = vmatmul.mubr.bf16.gmra.mrb[248].mxu1 %v3739_v63  ;;  %6686 = vpow2.f32 %v12536_v28 }
 0x5c9   : > { %3435 = vperm.xlu1 %5967, %v6665_v49   ;;  %6688 = vpow2.f32 %v12537_v44  ;;  %v12547_v49 = vld [vmem:[#allocation313_spill] sm:$0xff] }
 0x5ca   : > { %6690 = vpow2.f32 %v12539_v37 }
 0x5cb   : > { %v6673_v3 = vpop.eup %6672  ;;  %6692 = vpow2.f32 %v12541_v53 }
 0x5cc   : > { %v6675_v13 = vpop.eup %6674  ;;  %6694 = vpow2.f32 %v12546_v34 }
 0x5cd   : > { %3445 = vperm.xlu1 %5967, %v6667_v11   ;;  %v4131_v46 = vpop.f32.mrb[176].mxu0  ;;  %v6677_v62 = vpop.eup %6676 }
 0x5ce   : > { %v4133_v40 = vpop.f32.mrb[177].mxu0  ;;  %v6679_v29 = vpop.eup %6678 }
 0x5cf   : > { %v4420_v22 = vpop.f32.mrb[176].mxu1  ;;  %v4134_v25 = vpop.f32.mrb[178].mxu0 }
 0x5d0   : > { %v10328_v19 = vadd.f32 %v4420_v22, %v4131_v46  ;;  %v4422_v59 = vpop.f32.mrb[177].mxu1  ;;  %v4136_v4 = vpop.f32.mrb[179].mxu0 }
 0x5d1   : > { %3455 = vperm.xlu1 %5967, %v6669_v58   ;;  %v4423_v39 = vpop.f32.mrb[178].mxu1  ;;  %v6681_v61 = vpop.eup %6680  ;;  %v3175_v4 = vld [vmem:[#allocation3 + $0x30] sm:$0xff] }
 0x5d2   : > { %v4424_v20 = vadd.f32 %v4423_v39, %v4134_v25  ;;  %v4425_v63 = vpop.f32.mrb[179].mxu1  ;;  %v6683_v30 = vpop.eup %6682 }
 0x5d3   : > { %v6685_v15 = vpop.eup %6684 }
 0x5d4   : > { %v4604_v17 = vadd.f32 %v4424_v20, %v3578_v7  ;;  %v6687_v21 = vpop.eup %6686 }
 0x5d5   : > { %3465 = vperm.xlu1 %5967, %v6671_v55   ;;  %v6689_v32 = vpop.eup %6688 }
 0x5d6   : > { %4669 = vst.msk [vmem:[#allocation3 + $0xc8] sm:$0xff] %vm4643_vm4, %v4604_v17  ;;  %v6691_v1 = vpop.eup %6690 }
 0x5d7   : > { %v6693_v46 = vpop.eup %6692 }
 0x5d8   : > { %v6695_v55 = vpop.eup %6694 }
 0x5d9   : > { %3475 = vperm.xlu1 %5967, %v6673_v3  }
 0x5dd   : > { %3485 = vperm.xlu1 %5967, %v6675_v13   ;;  %v3371_v13 = vpop.permute.xlu0 %3370 }
 0x5e1   : > { %3495 = vperm.xlu1 %5967, %v6677_v62   ;;  %v12551_v62 = vld [vmem:[#allocation15_spill] sm:$0xff] }
 0x5e5   : > { %3505 = vperm.xlu1 %5967, %v6679_v29  }
 0x5e9   : > { %3515 = vperm.xlu1 %5967, %v6681_v61  }
 0x5ed   : > { %3525 = vperm.xlu1 %5967, %v6683_v30  }
 0x5f1   : > { %3535 = vperm.xlu1 %5967, %v6685_v15   ;;  %v2650_v38 = vpop.permute.xlu1 %2649  ;;  %v3179_v15 = vld [vmem:[#allocation3 + $0x50] sm:$0xff] }
 0x5f2   : > { %v2905_v54 = vsub.f32 %v12542_v52, %v2650_v38  ;;  %v2906_v24 = vsub.f32 %v12543_v48, %v2650_v38  ;;  %v2907_v8 = vsub.f32 %v12544_v41, %v2650_v38  ;;  %v2908_v26 = vsub.f32 %v12547_v49, %v2650_v38  ;;  %v3381_v41 = vpop.permute.xlu0 %3380 }
 0x5f3   : > { %v3580_v38 = vmul.f32 %v3371_v13, %v3196_v51  ;;  %v12556_v13 = vld [vmem:[#allocation40_spill] sm:$0xff] }
 0x5f4   : > { %6696 = vpow2.f32 %v2905_v54 }
 0x5f5   : > { %3545 = vperm.xlu1 %5967, %v6687_v21   ;;  %6698 = vpow2.f32 %v2906_v24  ;;  %v3236_v18 = vpop.permute.xlu1 %3235  ;;  %v3181_v24 = vld [vmem:[#allocation3 + $0x60] sm:$0xff] }
 0x5f6   : > { %6700 = vpow2.f32 %v2907_v8  ;;  %v3553_v11 = vmul.f32 %v3236_v18, %v3169_v56  ;;  %v12553_v8 = vld [vmem:[#allocation27_spill] sm:$0xff]  ;;  %v3198_v56 = vld [vmem:[#allocation3 + $0xe8] sm:$0xff] }
 0x5f7   : > { %6702 = vpow2.f32 %v2908_v26 }
 0x5f8   : > { %v4579_v9 = vadd.f32 %v12548_v0, %v3553_v11 }
 0x5f9   : > { %v3246_v58 = vpop.permute.xlu1 %3245 }
 0x5fa   : > { %4644 = vst.msk [vmem:[#allocation3] sm:$0xff] %vm4643_vm4, %v4579_v9  ;;  %v3555_v23 = vmul.f32 %v3246_v58, %v3171_v57  ;;  %v3183_v58 = vld [vmem:[#allocation3 + $0x70] sm:$0xff] }
 0x5fc   : > { %v4581_v40 = vadd.f32 %v12549_v45, %v3555_v23  ;;  %v12554_v23 = vld [vmem:[#allocation24_spill] sm:$0xff] }
 0x5fd   : > { %v3256_v6 = vpop.permute.xlu1 %3255 }
 0x5fe   : > { %v6697_v22 = vpop.eup %6696  ;;  %4646 = vst.msk [vmem:[#allocation3 + $0x10] sm:$0xff] %vm4643_vm4, %v4581_v40  ;;  %v3557_v25 = vmul.f32 %v3256_v6, %v3173_v10  ;;  %v3582_v10 = vmul.f32 %v3381_v41, %v3198_v56  ;;  %v3191_v41 = vld [vmem:[#allocation3 + $0xb0] sm:$0xff] }
 0x5ff   : > { %v6699_v59 = vpop.eup %6698  ;;  %v3741_v36 = vpack.c.bf16 %v6689_v32, %v6697_v22 }
 0x600   : > { %v6701_v33 = vpop.eup %6700  ;;  %v4583_v39 = vadd.f32 %v12550_v31, %v3557_v25  ;;  %v3742_v7 = vpack.c.bf16 %v6691_v1, %v6699_v59  ;;  %v3185_v25 = vld [vmem:[#allocation3 + $0x80] sm:$0xff]  ;;  %v3391_v59 = vpop.permute.xlu0 %3390 }
 0x601   : > { %v6703_v20 = vpop.eup %6702  ;;  %v3266_v63 = vpop.permute.xlu1 %3265  ;;  %v3743_v3 = vpack.c.bf16 %v6693_v46, %v6701_v33 }
 0x602   : > { %4648 = vst.msk [vmem:[#allocation3 + $0x20] sm:$0xff] %vm4643_vm4, %v4583_v39  ;;  %v3559_v17 = vmul.f32 %v3266_v63, %v3175_v4  ;;  %4281 = vmatprep.mubr.bf16.mxu0 %v3742_v7  ;;  %v3744_v43 = vpack.c.bf16 %v6695_v55, %v6703_v20  ;;  %v4139_v50 = vpop.f32.mrb[180].mxu0  ;;  %v12555_v4 = vld [vmem:[#allocation32_spill] sm:$0xff]  ;;  %v3200_v7 = vld [vmem:[#allocation3 + $0xf8] sm:$0xff] }
 0x603   : > { %4282 = vmatmul.mubr.bf16.gmra.mrb[252].mxu0 %v3741_v36  ;;  %v4141_v35 = vpop.f32.mrb[181].mxu0 }
 0x604   : > { %v4585_v2 = vadd.f32 %v12551_v62, %v3559_v17  ;;  %4570 = vmatprep.mubr.bf16.mxu1 %v3744_v43  ;;  %v4142_v42 = vpop.f32.mrb[182].mxu0 }
 0x605   : > { %4571 = vmatmul.mubr.bf16.gmra.mrb[252].mxu1 %v3743_v3  ;;  %v3276_v29 = vpop.permute.xlu1 %3275  ;;  %v4428_v27 = vpop.f32.mrb[180].mxu1 }
 0x606   : > { %4650 = vst.msk [vmem:[#allocation3 + $0x30] sm:$0xff] %vm4643_vm4, %v4585_v2  ;;  %v3561_v47 = vmul.f32 %v3276_v29, %v3177_v60  ;;  %v4144_v61 = vpop.f32.mrb[183].mxu0  ;;  %v10368_v28 = vadd.f32 %v4428_v27, %v4139_v50  ;;  %v4430_v30 = vpop.f32.mrb[181].mxu1  ;;  %v3187_v50 = vld [vmem:[#allocation3 + $0x90] sm:$0xff]  ;;  %v3584_v2 = vmul.f32 %v3391_v59, %v3200_v7 }
 0x607   : > { %v4431_v44 = vpop.f32.mrb[182].mxu1  ;;  %v12557_v61 = vld [vmem:[#allocation52_spill] sm:$0xff]  ;;  %v3195_v59 = vld [vmem:[#allocation3 + $0xd0] sm:$0xff] }
 0x608   : > { %v4587_v37 = vadd.f32 %v12552_v5, %v3561_v47  ;;  %v4432_v21 = vadd.f32 %v4431_v44, %v4142_v42  ;;  %v4433_v14 = vpop.f32.mrb[183].mxu1  ;;  %v3189_v44 = vld [vmem:[#allocation3 + $0xa0] sm:$0xff]  ;;  %v3401_v5 = vpop.permute.xlu0 %3400 }
 0x609   : > { %v3286_v53 = vpop.permute.xlu1 %3285 }
 0x60a   : > { %4652 = vst.msk [vmem:[#allocation3 + $0x40] sm:$0xff] %vm4643_vm4, %v4587_v37  ;;  %v3563_v52 = vmul.f32 %v3286_v53, %v3179_v15  ;;  %v4606_v54 = vadd.f32 %v4432_v21, %v3580_v38  ;;  %v4147_v48 = vpop.f32.mrb[184].mxu0  ;;  %v3202_v38 = vld [vmem:[#allocation3 + $0x108] sm:$0xff] }
 0x60b   : > { %v4149_v34 = vpop.f32.mrb[185].mxu0 }
 0x60c   : > { %v4589_v16 = vadd.f32 %v12553_v8, %v3563_v52  ;;  %4671 = vst.msk [vmem:[#allocation3 + $0xd8] sm:$0xff] %vm4643_vm4, %v4606_v54  ;;  %v4150_v49 = vpop.f32.mrb[186].mxu0  ;;  %v3586_v8 = vmul.f32 %v3401_v5, %v3202_v38 }
 0x60d   : > { %v3296_v26 = vpop.permute.xlu1 %3295  ;;  %v4436_v18 = vpop.f32.mrb[184].mxu1 }
 0x60e   : > { %4654 = vst.msk [vmem:[#allocation3 + $0x50] sm:$0xff] %vm4643_vm4, %v4589_v16  ;;  %v3565_v11 = vmul.f32 %v3296_v26, %v3181_v24  ;;  %v4152_v57 = vpop.f32.mrb[187].mxu0  ;;  %v10375_v0 = vadd.f32 %v4436_v18, %v4147_v48  ;;  %v4438_v9 = vpop.f32.mrb[185].mxu1 }
 0x60f   : > { %v4439_v32 = vpop.f32.mrb[186].mxu1 }
 0x610   : > { %v4591_v1 = vadd.f32 %v12554_v23, %v3565_v11  ;;  %v4440_v46 = vadd.f32 %v4439_v32, %v4150_v49  ;;  %v4441_v45 = vpop.f32.mrb[187].mxu1  ;;  %v12558_v49 = vld [vmem:[#allocation45_spill] sm:$0xff]  ;;  %v3411_v32 = vpop.permute.xlu0 %3410 }
 0x611   : > { %v3306_v40 = vpop.permute.xlu1 %3305 }
 0x612   : > { %4656 = vst.msk [vmem:[#allocation3 + $0x60] sm:$0xff] %vm4643_vm4, %v4591_v1  ;;  %v3567_v55 = vmul.f32 %v3306_v40, %v3183_v58  ;;  %v4608_v6 = vadd.f32 %v4440_v46, %v3582_v10  ;;  %v4155_v22 = vpop.f32.mrb[188].mxu0  ;;  %v3193_v58 = vld [vmem:[#allocation3 + $0xc0] sm:$0xff]  ;;  %v3204_v10 = vld [vmem:[#allocation3 + $0x118] sm:$0xff] }
 0x613   : > { %v4157_v33 = vpop.f32.mrb[189].mxu0 }
 0x614   : > { %v4593_v36 = vadd.f32 %v12555_v4, %v3567_v55  ;;  %4673 = vst.msk [vmem:[#allocation3 + $0xe8] sm:$0xff] %vm4643_vm4, %v4608_v6  ;;  %v4158_v31 = vpop.f32.mrb[190].mxu0  ;;  %v3588_v4 = vmul.f32 %v3411_v32, %v3204_v10 }
 0x615   : > { %v3316_v39 = vpop.permute.xlu1 %3315  ;;  %v4444_v20 = vpop.f32.mrb[188].mxu1 }
 0x616   : > { %4658 = vst.msk [vmem:[#allocation3 + $0x70] sm:$0xff] %vm4643_vm4, %v4593_v36  ;;  %v3569_v63 = vmul.f32 %v3316_v39, %v3185_v25  ;;  %v4160_v3 = vpop.f32.mrb[191].mxu0  ;;  %v10382_v17 = vadd.f32 %v4444_v20, %v4155_v22  ;;  %v4446_v43 = vpop.f32.mrb[189].mxu1 }
 0x617   : > { %v4447_v60 = vpop.f32.mrb[190].mxu1  ;;  %v3197_v3 = vld [vmem:[#allocation3 + $0xe0] sm:$0xff]  ;;  %v3421_v43 = vpop.permute.xlu0 %3420 }
 0x618   : > { %v4595_v62 = vadd.f32 %v12556_v13, %v3569_v63  ;;  %v4448_v35 = vadd.f32 %v4447_v60, %v4158_v31  ;;  %v4449_v42 = vpop.f32.mrb[191].mxu1  ;;  %v3206_v13 = vld [vmem:[#allocation3 + $0x128] sm:$0xff] }
 0x619   : > { %v3326_v29 = vpop.permute.xlu1 %3325 }
 0x61a   : > { %4660 = vst.msk [vmem:[#allocation3 + $0x80] sm:$0xff] %vm4643_vm4, %v4595_v62  ;;  %v3571_v51 = vmul.f32 %v3326_v29, %v3187_v50  ;;  %v4610_v27 = vadd.f32 %v4448_v35, %v3584_v2  ;;  %v4163_v47 = vpop.f32.mrb[192].mxu0 }
 0x61b   : > { %v4165_v15 = vpop.f32.mrb[193].mxu0 }
 0x61c   : > { %v4597_v30 = vadd.f32 %v12557_v61, %v3571_v51  ;;  %4675 = vst.msk [vmem:[#allocation3 + $0xf8] sm:$0xff] %vm4643_vm4, %v4610_v27  ;;  %v4166_v37 = vpop.f32.mrb[194].mxu0  ;;  %v3199_v27 = vld [vmem:[#allocation3 + $0xf0] sm:$0xff] }
 0x61d   : > { %v4452_v21 = vpop.f32.mrb[192].mxu1  ;;  %v3336_v14 = vpop.permute.xlu1 %3335 }
 0x61e   : > { %4662 = vst.msk [vmem:[#allocation3 + $0x90] sm:$0xff] %vm4643_vm4, %v4597_v30  ;;  %v10389_v53 = vadd.f32 %v4452_v21, %v4163_v47  ;;  %v4454_v52 = vpop.f32.mrb[193].mxu1  ;;  %v3573_v54 = vmul.f32 %v3336_v14, %v3189_v44  ;;  %v4168_v48 = vpop.f32.mrb[195].mxu0  ;;  %v3590_v47 = vmul.f32 %v3421_v43, %v3206_v13  ;;  %v3201_v21 = vld [vmem:[#allocation3 + $0x100] sm:$0xff] }
 0x61f   : > { %v4455_v24 = vpop.f32.mrb[194].mxu1  ;;  %v3431_v14 = vpop.permute.xlu0 %3430  ;;  %v3208_v48 = vld [vmem:[#allocation3 + $0x138] sm:$0xff] }
 0x620   : > { %v4456_v16 = vadd.f32 %v4455_v24, %v4166_v37  ;;  %v4457_v34 = vpop.f32.mrb[195].mxu1  ;;  %v4599_v26 = vadd.f32 %v12558_v49, %v3573_v54 }
 0x621   : > { %v3346_v56 = vpop.permute.xlu1 %3345 }
 0x622   : > { %v4612_v18 = vadd.f32 %v4456_v16, %v3586_v8  ;;  %4664 = vst.msk [vmem:[#allocation3 + $0xa0] sm:$0xff] %vm4643_vm4, %v4599_v26  ;;  %v3575_v11 = vmul.f32 %v3346_v56, %v3191_v41  ;;  %v4171_v57 = vpop.f32.mrb[196].mxu0  ;;  %v3203_v26 = vld [vmem:[#allocation3 + $0x110] sm:$0xff]  ;;  %v3592_v56 = vmul.f32 %v3431_v14, %v3208_v48 }
 0x623   : > { %v4173_v9 = vpop.f32.mrb[197].mxu0  ;;  %v3441_v10 = vpop.permute.xlu0 %3440 }
 0x624   : > { %4677 = vst.msk [vmem:[#allocation3 + $0x108] sm:$0xff] %vm4643_vm4, %v4612_v18  ;;  %v4601_v23 = vadd.f32 %v10230_v12, %v3575_v11  ;;  %v4174_v1 = vpop.f32.mrb[198].mxu0 }
 0x625   : > { %v4460_v46 = vpop.f32.mrb[196].mxu1  ;;  %v3356_v45 = vpop.permute.xlu1 %3355 }
 0x626   : > { %4666 = vst.msk [vmem:[#allocation3 + $0xb0] sm:$0xff] %vm4643_vm4, %v4601_v23  ;;  %v10396_v40 = vadd.f32 %v4460_v46, %v4171_v57  ;;  %v4462_v55 = vpop.f32.mrb[197].mxu1  ;;  %v3577_v6 = vmul.f32 %v3356_v45, %v3193_v58  ;;  %v4176_v22 = vpop.f32.mrb[199].mxu0 }
 0x627   : > { %v4463_v25 = vpop.f32.mrb[198].mxu1  ;;  %v3210_v55 = vld [vmem:[#allocation3 + $0x148] sm:$0xff] }
 0x628   : > { %v4464_v36 = vadd.f32 %v4463_v25, %v4174_v1  ;;  %v4465_v33 = vpop.f32.mrb[199].mxu1  ;;  %v4603_v31 = vadd.f32 %v10328_v19, %v3577_v6  ;;  %v3205_v1 = vld [vmem:[#allocation3 + $0x120] sm:$0xff] }
 0x629   : > { %v3366_v39 = vpop.permute.xlu1 %3365  ;;  %v3207_v33 = vld [vmem:[#allocation3 + $0x130] sm:$0xff] }
 0x62a   : > { %v4614_v12 = vadd.f32 %v4464_v36, %v3588_v4  ;;  %4668 = vst.msk [vmem:[#allocation3 + $0xc0] sm:$0xff] %vm4643_vm4, %v4603_v31  ;;  %v3579_v7 = vmul.f32 %v3366_v39, %v3195_v59  ;;  %v4179_v20 = vpop.f32.mrb[200].mxu0  ;;  %v3594_v31 = vmul.f32 %v3441_v10, %v3210_v55 }
 0x62b   : > { %v4181_v63 = vpop.f32.mrb[201].mxu0 }
 0x62c   : > { %4679 = vst.msk [vmem:[#allocation3 + $0x118] sm:$0xff] %vm4643_vm4, %v4614_v12  ;;  %v4605_v50 = vadd.f32 %v10368_v28, %v3579_v7  ;;  %v4182_v60 = vpop.f32.mrb[202].mxu0 }
 0x62d   : > { %v4468_v62 = vpop.f32.mrb[200].mxu1  ;;  %v4184_v29 = vpop.f32.mrb[203].mxu0 }
 0x62e   : > { %4670 = vst.msk [vmem:[#allocation3 + $0xd0] sm:$0xff] %vm4643_vm4, %v4605_v50  ;;  %v4469_v19 = vadd.f32 %v4468_v62, %v4179_v20  ;;  %v4470_v35 = vpop.f32.mrb[201].mxu1  ;;  %v3209_v50 = vld [vmem:[#allocation3 + $0x140] sm:$0xff] }
 0x62f   : > { %v4471_v51 = vpop.f32.mrb[202].mxu1 }
 0x630   : > { %v3376_v2 = vpop.permute.xlu1 %3375  ;;  %v4472_v61 = vadd.f32 %v4471_v51, %v4182_v60  ;;  %v4473_v30 = vpop.f32.mrb[203].mxu1 }
 0x631   : > { %v3581_v42 = vmul.f32 %v3376_v2, %v3197_v3  ;;  %v3451_v60 = vpop.permute.xlu0 %3450  ;;  %v3212_v2 = vld [vmem:[#allocation3 + $0x158] sm:$0xff] }
 0x632   : > { %v4616_v5 = vadd.f32 %v4472_v61, %v3590_v47  ;;  %v4187_v37 = vpop.f32.mrb[204].mxu0  ;;  %v3211_v61 = vld [vmem:[#allocation3 + $0x150] sm:$0xff]  ;;  %v3596_v30 = vmul.f32 %v3451_v60, %v3212_v2 }
 0x633   : > { %v4607_v15 = vadd.f32 %v10375_v0, %v3581_v42  ;;  %v4189_v38 = vpop.f32.mrb[205].mxu0 }
 0x634   : > { %v3386_v44 = vpop.permute.xlu1 %3385  ;;  %4681 = vst.msk [vmem:[#allocation3 + $0x128] sm:$0xff] %vm4643_vm4, %v4616_v5  ;;  %v4190_v54 = vpop.f32.mrb[206].mxu0 }
 0x635   : > { %4672 = vst.msk [vmem:[#allocation3 + $0xe0] sm:$0xff] %vm4643_vm4, %v4607_v15  ;;  %v3583_v28 = vmul.f32 %v3386_v44, %v3199_v27  ;;  %v4476_v24 = vpop.f32.mrb[204].mxu1  ;;  %v4192_v34 = vpop.f32.mrb[207].mxu0 }
 0x636   : > { %v4477_v0 = vadd.f32 %v4476_v24, %v4187_v37  ;;  %v4478_v8 = vpop.f32.mrb[205].mxu1  ;;  %v3461_v24 = vpop.permute.xlu0 %3460 }
 0x637   : > { %v4609_v52 = vadd.f32 %v10382_v17, %v3583_v28  ;;  %v4479_v49 = vpop.f32.mrb[206].mxu1 }
 0x638   : > { %v3396_v41 = vpop.permute.xlu1 %3395  ;;  %v4480_v18 = vadd.f32 %v4479_v49, %v4190_v54  ;;  %v4481_v11 = vpop.f32.mrb[207].mxu1 }
 0x639   : > { %4674 = vst.msk [vmem:[#allocation3 + $0xf0] sm:$0xff] %vm4643_vm4, %v4609_v52  ;;  %v3585_v16 = vmul.f32 %v3396_v41, %v3201_v21  ;;  %v3213_v52 = vld [vmem:[#allocation3 + $0x160] sm:$0xff] }
 0x63a   : > { %v4618_v58 = vadd.f32 %v4480_v18, %v3592_v56  ;;  %v4195_v32 = vpop.f32.mrb[208].mxu0  ;;  %v3471_v10 = vpop.permute.xlu0 %3470 }
 0x63b   : > { %v4611_v57 = vadd.f32 %v10389_v53, %v3585_v16  ;;  %v4197_v23 = vpop.f32.mrb[209].mxu0 }
 0x63c   : > { %v3406_v9 = vpop.permute.xlu1 %3405  ;;  %4683 = vst.msk [vmem:[#allocation3 + $0x138] sm:$0xff] %vm4643_vm4, %v4618_v58  ;;  %v4198_v45 = vpop.f32.mrb[210].mxu0 }
 0x63d   : > { %4676 = vst.msk [vmem:[#allocation3 + $0x100] sm:$0xff] %vm4643_vm4, %v4611_v57  ;;  %v3587_v17 = vmul.f32 %v3406_v9, %v3203_v26  ;;  %v4484_v6 = vpop.f32.mrb[208].mxu1  ;;  %v4200_v4 = vpop.f32.mrb[211].mxu0 }
 0x63e   : > { %v4485_v53 = vadd.f32 %v4484_v6, %v4195_v32  ;;  %v4486_v25 = vpop.f32.mrb[209].mxu1  ;;  %v3215_v32 = vld [vmem:[#allocation3 + $0x170] sm:$0xff] }
 0x63f   : > { %v4613_v46 = vadd.f32 %v10396_v40, %v3587_v17  ;;  %v4487_v36 = vpop.f32.mrb[210].mxu1 }
 0x640   : > { %v3416_v22 = vpop.permute.xlu1 %3415  ;;  %v4488_v39 = vadd.f32 %v4487_v36, %v4198_v45  ;;  %v4489_v12 = vpop.f32.mrb[211].mxu1  ;;  %v3216_v45 = vld [vmem:[#allocation3 + $0x178] sm:$0xff] }
 0x641   : > { %4678 = vst.msk [vmem:[#allocation3 + $0x110] sm:$0xff] %vm4643_vm4, %v4613_v46  ;;  %v3589_v59 = vmul.f32 %v3416_v22, %v3205_v1  ;;  %v3600_v4 = vmul.f32 %v3471_v10, %v3216_v45 }
 0x642   : > { %v4620_v63 = vadd.f32 %v4488_v39, %v3594_v31  ;;  %v4203_v3 = vpop.f32.mrb[212].mxu0 }
 0x643   : > { %v4615_v7 = vadd.f32 %v4469_v19, %v3589_v59  ;;  %v4205_v43 = vpop.f32.mrb[213].mxu0 }
 0x644   : > { %v3426_v20 = vpop.permute.xlu1 %3425  ;;  %4685 = vst.msk [vmem:[#allocation3 + $0x148] sm:$0xff] %vm4643_vm4, %v4620_v63  ;;  %v4206_v62 = vpop.f32.mrb[214].mxu0  ;;  %v3218_v43 = vld [vmem:[#allocation3 + $0x188] sm:$0xff] }
 0x645   : > { %4680 = vst.msk [vmem:[#allocation3 + $0x120] sm:$0xff] %vm4643_vm4, %v4615_v7  ;;  %v3591_v40 = vmul.f32 %v3426_v20, %v3207_v33  ;;  %v4492_v35 = vpop.f32.mrb[212].mxu1  ;;  %v4208_v27 = vpop.f32.mrb[215].mxu0  ;;  %v3217_v7 = vld [vmem:[#allocation3 + $0x180] sm:$0xff] }
 0x646   : > { %v4493_v29 = vadd.f32 %v4492_v35, %v4203_v3  ;;  %v4494_v19 = vpop.f32.mrb[213].mxu1 }
 0x647   : > { %v4617_v13 = vadd.f32 %v4477_v0, %v3591_v40  ;;  %v4495_v47 = vpop.f32.mrb[214].mxu1  ;;  %v3214_v0 = vld [vmem:[#allocation3 + $0x168] sm:$0xff]  ;;  %v3481_v40 = vpop.permute.xlu0 %3480 }
 0x648   : > { %v3436_v42 = vpop.permute.xlu1 %3435  ;;  %v4496_v15 = vadd.f32 %v4495_v47, %v4206_v62  ;;  %v4497_v44 = vpop.f32.mrb[215].mxu1  ;;  %v3598_v18 = vmul.f32 %v3461_v24, %v3214_v0 }
 0x649   : > { %4682 = vst.msk [vmem:[#allocation3 + $0x130] sm:$0xff] %vm4643_vm4, %v4617_v13  ;;  %v3593_v51 = vmul.f32 %v3436_v42, %v3209_v50  ;;  %v3602_v42 = vmul.f32 %v3481_v40, %v3218_v43 }
 0x64a   : > { %v4622_v37 = vadd.f32 %v4496_v15, %v3596_v30 }
 0x64b   : > { %v4619_v5 = vadd.f32 %v4485_v53, %v3593_v51  ;;  %v3491_v44 = vpop.permute.xlu0 %3490 }
 0x64c   : > { %v3446_v28 = vpop.permute.xlu1 %3445  ;;  %4687 = vst.msk [vmem:[#allocation3 + $0x158] sm:$0xff] %vm4643_vm4, %v4622_v37 }
 0x64d   : > { %4684 = vst.msk [vmem:[#allocation3 + $0x140] sm:$0xff] %vm4643_vm4, %v4619_v5  ;;  %v3595_v38 = vmul.f32 %v3446_v28, %v3211_v61  ;;  %v3219_v61 = vld [vmem:[#allocation3 + $0x190] sm:$0xff]  ;;  %v3220_v28 = vld [vmem:[#allocation3 + $0x198] sm:$0xff] }
 0x64f   : > { %v4621_v21 = vadd.f32 %v4493_v29, %v3595_v38 }
 0x650   : > { %v3456_v54 = vpop.permute.xlu1 %3455 }
 0x651   : > { %4686 = vst.msk [vmem:[#allocation3 + $0x150] sm:$0xff] %vm4643_vm4, %v4621_v21  ;;  %v3597_v34 = vmul.f32 %v3456_v54, %v3213_v52 }
 0x654   : > { %v3466_v23 = vpop.permute.xlu1 %3465 }
 0x655   : > { %v3599_v22 = vmul.f32 %v3466_v23, %v3215_v32 }
 0x658   : > { %v3476_v20 = vpop.permute.xlu1 %3475 }
 0x659   : > { %v4211_v14 = vpop.f32.mrb[216].mxu0  ;;  %v3601_v13 = vmul.f32 %v3476_v20, %v3217_v7 }
 0x65a   : > { %v4213_v48 = vpop.f32.mrb[217].mxu0 }
 0x65b   : > { %v4214_v41 = vpop.f32.mrb[218].mxu0  ;;  %v4500_v8 = vpop.f32.mrb[216].mxu1  ;;  %v3604_v48 = vmul.f32 %v3491_v44, %v3220_v28 }
 0x65c   : > { %v4216_v16 = vpop.f32.mrb[219].mxu0  ;;  %v4501_v49 = vadd.f32 %v4500_v8, %v4211_v14  ;;  %v4502_v26 = vpop.f32.mrb[217].mxu1 }
 0x65d   : > { %v4503_v56 = vpop.f32.mrb[218].mxu1  ;;  %v3486_v30 = vpop.permute.xlu1 %3485 }
 0x65e   : > { %v4623_v11 = vadd.f32 %v4501_v49, %v3597_v34  ;;  %v4504_v57 = vadd.f32 %v4503_v56, %v4214_v41  ;;  %v4505_v9 = vpop.f32.mrb[219].mxu1  ;;  %v3603_v21 = vmul.f32 %v3486_v30, %v3219_v61  ;;  %v3221_v34 = vld [vmem:[#allocation3 + $0x1a0] sm:$0xff]  ;;  %v3501_v56 = vpop.permute.xlu0 %3500 }
 0x660   : > { %4688 = vst.msk [vmem:[#allocation3 + $0x160] sm:$0xff] %vm4643_vm4, %v4623_v11  ;;  %v4624_v58 = vadd.f32 %v4504_v57, %v3598_v18  ;;  %v3222_v11 = vld [vmem:[#allocation3 + $0x1a8] sm:$0xff] }
 0x661   : > { %v4219_v17 = vpop.f32.mrb[220].mxu0  ;;  %v3496_v49 = vpop.permute.xlu1 %3495 }
 0x662   : > { %v4221_v1 = vpop.f32.mrb[221].mxu0  ;;  %4689 = vst.msk [vmem:[#allocation3 + $0x168] sm:$0xff] %vm4643_vm4, %v4624_v58  ;;  %v3605_v58 = vmul.f32 %v3496_v49, %v3221_v34 }
 0x663   : > { %v4222_v46 = vpop.f32.mrb[222].mxu0  ;;  %v4508_v55 = vpop.f32.mrb[220].mxu1  ;;  %v3606_v1 = vmul.f32 %v3501_v56, %v3222_v11 }
 0x664   : > { %v4224_v6 = vpop.f32.mrb[223].mxu0  ;;  %v4509_v53 = vadd.f32 %v4508_v55, %v4219_v17  ;;  %v4510_v25 = vpop.f32.mrb[221].mxu1 }
 0x665   : > { %v4511_v59 = vpop.f32.mrb[222].mxu1 }
 0x666   : > { %v4625_v36 = vadd.f32 %v4509_v53, %v3599_v22  ;;  %v4512_v33 = vadd.f32 %v4511_v59, %v4222_v46  ;;  %v4513_v31 = vpop.f32.mrb[223].mxu1  ;;  %v3223_v22 = vld [vmem:[#allocation3 + $0x1b0] sm:$0xff]  ;;  %v3506_v53 = vpop.permute.xlu1 %3505 }
 0x667   : > { %v3511_v59 = vpop.permute.xlu0 %3510 }
 0x668   : > { %4690 = vst.msk [vmem:[#allocation3 + $0x170] sm:$0xff] %vm4643_vm4, %v4625_v36  ;;  %v4626_v39 = vadd.f32 %v4512_v33, %v3600_v4  ;;  %v3224_v36 = vld [vmem:[#allocation3 + $0x1b8] sm:$0xff] }
 0x669   : > { %v4227_v12 = vpop.f32.mrb[224].mxu0 }
 0x66a   : > { %v4229_v63 = vpop.f32.mrb[225].mxu0  ;;  %4691 = vst.msk [vmem:[#allocation3 + $0x178] sm:$0xff] %vm4643_vm4, %v4626_v39  ;;  %v3607_v39 = vmul.f32 %v3506_v53, %v3223_v22 }
 0x66b   : > { %v4230_v3 = vpop.f32.mrb[226].mxu0  ;;  %v4516_v50 = vpop.f32.mrb[224].mxu1  ;;  %v3608_v63 = vmul.f32 %v3511_v59, %v3224_v36 }
 0x66c   : > { %v4232_v60 = vpop.f32.mrb[227].mxu0  ;;  %v4517_v62 = vadd.f32 %v4516_v50, %v4227_v12  ;;  %v4518_v2 = vpop.f32.mrb[225].mxu1 }
 0x66d   : > { %v4519_v35 = vpop.f32.mrb[226].mxu1 }
 0x66e   : > { %v4627_v29 = vadd.f32 %v4517_v62, %v3601_v13  ;;  %v4520_v19 = vadd.f32 %v4519_v35, %v4230_v3  ;;  %v4521_v51 = vpop.f32.mrb[227].mxu1  ;;  %v3225_v13 = vld [vmem:[#allocation3 + $0x1c0] sm:$0xff]  ;;  %v3516_v62 = vpop.permute.xlu1 %3515 }
 0x66f   : > { %v3521_v35 = vpop.permute.xlu0 %3520 }
 0x670   : > { %4692 = vst.msk [vmem:[#allocation3 + $0x180] sm:$0xff] %vm4643_vm4, %v4627_v29  ;;  %v4628_v27 = vadd.f32 %v4520_v19, %v3602_v42  ;;  %v3226_v29 = vld [vmem:[#allocation3 + $0x1c8] sm:$0xff] }
 0x671   : > { %v4235_v47 = vpop.f32.mrb[228].mxu0 }
 0x672   : > { %v4237_v15 = vpop.f32.mrb[229].mxu0  ;;  %4693 = vst.msk [vmem:[#allocation3 + $0x188] sm:$0xff] %vm4643_vm4, %v4628_v27  ;;  %v3609_v27 = vmul.f32 %v3516_v62, %v3225_v13 }
 0x673   : > { %v4238_v5 = vpop.f32.mrb[230].mxu0  ;;  %v4524_v37 = vpop.f32.mrb[228].mxu1  ;;  %v3610_v15 = vmul.f32 %v3521_v35, %v3226_v29 }
 0x674   : > { %v4240_v38 = vpop.f32.mrb[231].mxu0  ;;  %v4525_v14 = vadd.f32 %v4524_v37, %v4235_v47  ;;  %v4526_v52 = vpop.f32.mrb[229].mxu1 }
 0x675   : > { %v4527_v54 = vpop.f32.mrb[230].mxu1 }
 0x676   : > { %v4629_v24 = vadd.f32 %v4525_v14, %v3603_v21  ;;  %v4528_v41 = vadd.f32 %v4527_v54, %v4238_v5  ;;  %v4529_v0 = vpop.f32.mrb[231].mxu1  ;;  %v3227_v21 = vld [vmem:[#allocation3 + $0x1d0] sm:$0xff]  ;;  %v3526_v14 = vpop.permute.xlu1 %3525 }
 0x677   : > { %v3531_v54 = vpop.permute.xlu0 %3530 }
 0x678   : > { %4694 = vst.msk [vmem:[#allocation3 + $0x190] sm:$0xff] %vm4643_vm4, %v4629_v24  ;;  %v4630_v8 = vadd.f32 %v4528_v41, %v3604_v48  ;;  %v3228_v24 = vld [vmem:[#allocation3 + $0x1d8] sm:$0xff] }
 0x679   : > { %v4243_v16 = vpop.f32.mrb[232].mxu0 }
 0x67a   : > { %v4245_v26 = vpop.f32.mrb[233].mxu0  ;;  %4695 = vst.msk [vmem:[#allocation3 + $0x198] sm:$0xff] %vm4643_vm4, %v4630_v8  ;;  %v3611_v8 = vmul.f32 %v3526_v14, %v3227_v21 }
 0x67b   : > { %v4246_v18 = vpop.f32.mrb[234].mxu0  ;;  %v4532_v57 = vpop.f32.mrb[232].mxu1  ;;  %v3612_v26 = vmul.f32 %v3531_v54, %v3228_v24 }
 0x67c   : > { %v4248_v9 = vpop.f32.mrb[235].mxu0  ;;  %v4533_v17 = vadd.f32 %v4532_v57, %v4243_v16  ;;  %v4534_v32 = vpop.f32.mrb[233].mxu1 }
 0x67d   : > { %v4535_v23 = vpop.f32.mrb[234].mxu1 }
 0x67e   : > { %v4631_v10 = vadd.f32 %v4533_v17, %v3605_v58  ;;  %v4536_v46 = vadd.f32 %v4535_v23, %v4246_v18  ;;  %v4537_v45 = vpop.f32.mrb[235].mxu1  ;;  %v3229_v58 = vld [vmem:[#allocation3 + $0x1e0] sm:$0xff]  ;;  %v3536_v17 = vpop.permute.xlu1 %3535 }
 0x67f   : > { %v3541_v23 = vpop.permute.xlu0 %3540 }
 0x680   : > { %4696 = vst.msk [vmem:[#allocation3 + $0x1a0] sm:$0xff] %vm4643_vm4, %v4631_v10  ;;  %v4632_v55 = vadd.f32 %v4536_v46, %v3606_v1  ;;  %v3230_v10 = vld [vmem:[#allocation3 + $0x1e8] sm:$0xff] }
 0x681   : > { %v4251_v6 = vpop.f32.mrb[236].mxu0 }
 0x682   : > { %v4253_v25 = vpop.f32.mrb[237].mxu0  ;;  %4697 = vst.msk [vmem:[#allocation3 + $0x1a8] sm:$0xff] %vm4643_vm4, %v4632_v55  ;;  %v3613_v55 = vmul.f32 %v3536_v17, %v3229_v58 }
 0x683   : > { %v4254_v4 = vpop.f32.mrb[238].mxu0  ;;  %v4540_v33 = vpop.f32.mrb[236].mxu1  ;;  %v3614_v25 = vmul.f32 %v3541_v23, %v3230_v10 }
 0x684   : > { %v4256_v31 = vpop.f32.mrb[239].mxu0  ;;  %v4541_v12 = vadd.f32 %v4540_v33, %v4251_v6  ;;  %v4542_v7 = vpop.f32.mrb[237].mxu1 }
 0x685   : > { %v4543_v20 = vpop.f32.mrb[238].mxu1  ;;  %v3231_v31 = vld [vmem:[#allocation3 + $0x1f0] sm:$0xff]  ;;  %v3551_v7 = vpop.permute.xlu0 %3550 }
 0x686   : > { %v4633_v40 = vadd.f32 %v4541_v12, %v3607_v39  ;;  %v4544_v3 = vadd.f32 %v4543_v20, %v4254_v4  ;;  %v4545_v43 = vpop.f32.mrb[239].mxu1  ;;  %v3546_v39 = vpop.permute.xlu1 %3545 }
 0x687   : > { %v3615_v43 = vmul.f32 %v3546_v39, %v3231_v31 }
 0x688   : > { %4698 = vst.msk [vmem:[#allocation3 + $0x1b0] sm:$0xff] %vm4643_vm4, %v4633_v40  ;;  %v4634_v50 = vadd.f32 %v4544_v3, %v3608_v63  ;;  %v3232_v63 = vld [vmem:[#allocation3 + $0x1f8] sm:$0xff] }
 0x689   : > { %v4259_v60 = vpop.f32.mrb[240].mxu0 }
 0x68a   : > { %v4261_v2 = vpop.f32.mrb[241].mxu0  ;;  %4699 = vst.msk [vmem:[#allocation3 + $0x1b8] sm:$0xff] %vm4643_vm4, %v4634_v50 }
 0x68b   : > { %v4262_v42 = vpop.f32.mrb[242].mxu0  ;;  %v4548_v19 = vpop.f32.mrb[240].mxu1  ;;  %v3616_v2 = vmul.f32 %v3551_v7, %v3232_v63 }
 0x68c   : > { %v4264_v51 = vpop.f32.mrb[243].mxu0  ;;  %v4549_v47 = vadd.f32 %v4548_v19, %v4259_v60  ;;  %v4550_v61 = vpop.f32.mrb[241].mxu1 }
 0x68d   : > { %v4551_v30 = vpop.f32.mrb[242].mxu1 }
 0x68e   : > { %v4635_v44 = vadd.f32 %v4549_v47, %v3609_v27  ;;  %v4552_v5 = vadd.f32 %v4551_v30, %v4262_v42  ;;  %v4553_v28 = vpop.f32.mrb[243].mxu1 }
 0x690   : > { %4700 = vst.msk [vmem:[#allocation3 + $0x1c0] sm:$0xff] %vm4643_vm4, %v4635_v44  ;;  %v4636_v37 = vadd.f32 %v4552_v5, %v3610_v15 }
 0x691   : > { %v4267_v38 = vpop.f32.mrb[244].mxu0 }
 0x692   : > { %v4269_v52 = vpop.f32.mrb[245].mxu0  ;;  %4701 = vst.msk [vmem:[#allocation3 + $0x1c8] sm:$0xff] %vm4643_vm4, %v4636_v37 }
 0x693   : > { %v4270_v48 = vpop.f32.mrb[246].mxu0  ;;  %v4556_v41 = vpop.f32.mrb[244].mxu1 }
 0x694   : > { %v4272_v0 = vpop.f32.mrb[247].mxu0  ;;  %v4557_v16 = vadd.f32 %v4556_v41, %v4267_v38  ;;  %v4558_v34 = vpop.f32.mrb[245].mxu1 }
 0x695   : > { %v4559_v49 = vpop.f32.mrb[246].mxu1 }
 0x696   : > { %v4637_v56 = vadd.f32 %v4557_v16, %v3611_v8  ;;  %v4560_v18 = vadd.f32 %v4559_v49, %v4270_v48  ;;  %v4561_v11 = vpop.f32.mrb[247].mxu1 }
 0x698   : > { %4702 = vst.msk [vmem:[#allocation3 + $0x1d0] sm:$0xff] %vm4643_vm4, %v4637_v56  ;;  %v4638_v57 = vadd.f32 %v4560_v18, %v3612_v26 }
 0x699   : > { %v4275_v9 = vpop.f32.mrb[248].mxu0 }
 0x69a   : > { %v4277_v32 = vpop.f32.mrb[249].mxu0  ;;  %4703 = vst.msk [vmem:[#allocation3 + $0x1d8] sm:$0xff] %vm4643_vm4, %v4638_v57 }
 0x69b   : > { %v4278_v1 = vpop.f32.mrb[250].mxu0  ;;  %v4564_v46 = vpop.f32.mrb[248].mxu1 }
 0x69c   : > { %v4280_v45 = vpop.f32.mrb[251].mxu0  ;;  %v4565_v6 = vadd.f32 %v4564_v46, %v4275_v9  ;;  %v4566_v22 = vpop.f32.mrb[249].mxu1 }
 0x69d   : > { %v4567_v53 = vpop.f32.mrb[250].mxu1 }
 0x69e   : > { %v4639_v59 = vadd.f32 %v4565_v6, %v3613_v55  ;;  %v4568_v4 = vadd.f32 %v4567_v53, %v4278_v1  ;;  %v4569_v36 = vpop.f32.mrb[251].mxu1 }
 0x6a0   : > { %4704 = vst.msk [vmem:[#allocation3 + $0x1e0] sm:$0xff] %vm4643_vm4, %v4639_v59  ;;  %v4640_v33 = vadd.f32 %v4568_v4, %v3614_v25 }
 0x6a2   : > { %4705 = vst.msk [vmem:[#allocation3 + $0x1e8] sm:$0xff] %vm4643_vm4, %v4640_v33 }
 0x6d6   : > { %v4283_v12 = vpop.f32.mrb[252].mxu0 }
 0x6d7   : > { %v4285_v20 = vpop.f32.mrb[253].mxu0 }
 0x6d8   : > { %v4572_v40 = vpop.f32.mrb[252].mxu1  ;;  %v4286_v3 = vpop.f32.mrb[254].mxu0 }
 0x6d9   : > { %v4573_v50 = vadd.f32 %v4572_v40, %v4283_v12  ;;  %v4574_v60 = vpop.f32.mrb[253].mxu1  ;;  %v4288_v13 = vpop.f32.mrb[255].mxu0  ;;  %4776 = sbr.rel (%p5757_p6) target bundleno = 2030 (0x7ee), region = 44 }
 0x6da   : > { %v4575_v62 = vpop.f32.mrb[254].mxu1 }
 0x6db   : > { %v4641_v35 = vadd.f32 %v4573_v50, %v3615_v43  ;;  %v4576_v42 = vadd.f32 %v4575_v62, %v4286_v3  ;;  %v4577_v29 = vpop.f32.mrb[255].mxu1 }
 0x6dd   : > { %4706 = vst.msk [vmem:[#allocation3 + $0x1f0] sm:$0xff] %vm4643_vm4, %v4641_v35  ;;  %v4642_v19 = vadd.f32 %v4576_v42, %v3616_v2 }
 0x6df   : > { %4707 = vst.msk [vmem:[#allocation3 + $0x1f8] sm:$0xff] %vm4643_vm4, %v4642_v19 }
 0x6e0   : > { %v10440_v51 = vld [vmem:[#allocation3 + $0x10] sm:$0xff]  ;;  %v10442_v27 = vld [vmem:[#allocation3] sm:$0xff]  ;;  %v10444_v47 = vld [vmem:[#allocation3 + $0x18] sm:$0xff]  ;;  %v6861_v61 = vmov 4   ;;  %vm5417_vm5 = vcmask 31744  }
 0x6e1   : > { %6705 = vset.pattern.permute.xlu1 %v6861_v61  ;;  %6704 = vset.pattern.permute.xlu0 %v6861_v61  ;;  %6706 = vrcp.f32 %v10440_v51  ;;  %v10447_v30 = vld [vmem:[#allocation3 + $0x8] sm:$0xff]  ;;  %v10454_v44 = vld [vmem:[#allocation3 + $0x20] sm:$0xff]  ;;  %v10458_v5 = vld [vmem:[#allocation3 + $0x38] sm:$0xff] }
 0x6e2   : > { %6708 = vrcp.f32 %v10442_v27  ;;  %v10452_v15 = vld [vmem:[#allocation3 + $0x28] sm:$0xff]  ;;  %v10460_v28 = vld [vmem:[#allocation3 + $0x30] sm:$0xff]  ;;  %v10466_v52 = vld [vmem:[#allocation3 + $0x40] sm:$0xff] }
 0x6e3   : > { %6710 = vrcp.f32 %v10444_v47  ;;  %v10464_v21 = vld [vmem:[#allocation3 + $0x48] sm:$0xff]  ;;  %v10470_v48 = vld [vmem:[#allocation3 + $0x58] sm:$0xff]  ;;  %v10472_v41 = vld [vmem:[#allocation3 + $0x50] sm:$0xff] }
 0x6e4   : > { %6712 = vrcp.f32 %v10447_v30  ;;  %v10476_v8 = vld [vmem:[#allocation3 + $0x68] sm:$0xff]  ;;  %v10478_v34 = vld [vmem:[#allocation3 + $0x60] sm:$0xff]  ;;  %v10482_v26 = vld [vmem:[#allocation3 + $0x78] sm:$0xff] }
 0x6e5   : > { %6714 = vrcp.f32 %v10452_v15  ;;  %v10484_v18 = vld [vmem:[#allocation3 + $0x70] sm:$0xff]  ;;  %v10488_v57 = vld [vmem:[#allocation3 + $0x88] sm:$0xff]  ;;  %v10490_v58 = vld [vmem:[#allocation3 + $0x80] sm:$0xff] }
 0x6e6   : > { %6716 = vrcp.f32 %v10454_v44  ;;  %v10494_v32 = vld [vmem:[#allocation3 + $0x98] sm:$0xff]  ;;  %v10496_v1 = vld [vmem:[#allocation3 + $0x90] sm:$0xff]  ;;  %v10500_v46 = vld [vmem:[#allocation3 + $0xa8] sm:$0xff] }
 0x6e7   : > { %6718 = vrcp.f32 %v10458_v5  ;;  %v10502_v55 = vld [vmem:[#allocation3 + $0xa0] sm:$0xff]  ;;  %v10506_v22 = vld [vmem:[#allocation3 + $0xb8] sm:$0xff]  ;;  %v10508_v25 = vld [vmem:[#allocation3 + $0xb0] sm:$0xff] }
 0x6e8   : > { %6720 = vrcp.f32 %v10460_v28  ;;  %v10512_v4 = vld [vmem:[#allocation3 + $0xc8] sm:$0xff]  ;;  %v10514_v33 = vld [vmem:[#allocation3 + $0xc0] sm:$0xff]  ;;  %v10518_v39 = vld [vmem:[#allocation3 + $0xd8] sm:$0xff] }
 0x6e9   : > { %6722 = vrcp.f32 %v10464_v21  ;;  %v10520_v7 = vld [vmem:[#allocation3 + $0xd0] sm:$0xff]  ;;  %v10524_v63 = vld [vmem:[#allocation3 + $0xe8] sm:$0xff]  ;;  %v10526_v3 = vld [vmem:[#allocation3 + $0xe0] sm:$0xff] }
 0x6ea   : > { %6724 = vrcp.f32 %v10466_v52  ;;  %v10530_v50 = vld [vmem:[#allocation3 + $0xf8] sm:$0xff]  ;;  %v10532_v13 = vld [vmem:[#allocation3 + $0xf0] sm:$0xff]  ;;  %v10536_v2 = vld [vmem:[#allocation3 + $0x108] sm:$0xff] }
 0x6eb   : > { %v6707_v37 = vpop.eup %6706  ;;  %6726 = vrcp.f32 %v10470_v48  ;;  %v10538_v42 = vld [vmem:[#allocation3 + $0x100] sm:$0xff]  ;;  %v10542_v19 = vld [vmem:[#allocation3 + $0x118] sm:$0xff] }
 0x6ec   : > { %v6709_v38 = vpop.eup %6708  ;;  %4917 = vperm.xlu1 %6705, %v6707_v37   ;;  %6728 = vrcp.f32 %v10472_v41  ;;  %v10544_v37 = vld [vmem:[#allocation3 + $0x110] sm:$0xff] }
 0x6ed   : > { %v6711_v14 = vpop.eup %6710  ;;  %4907 = vperm.xlu0 %6704, %v6709_v38   ;;  %6730 = vrcp.f32 %v10476_v8 }
 0x6ee   : > { %v6713_v54 = vpop.eup %6712  ;;  %6732 = vrcp.f32 %v10478_v34 }
 0x6ef   : > { %v6715_v24 = vpop.eup %6714  ;;  %6734 = vrcp.f32 %v10482_v26 }
 0x6f0   : > { %4922 = vperm.xlu1 %6705, %v6711_v14   ;;  %v6717_v0 = vpop.eup %6716  ;;  %6736 = vrcp.f32 %v10484_v18  ;;  %v10548_v14 = vld [vmem:[#allocation3 + $0x128] sm:$0xff] }
 0x6f1   : > { %4912 = vperm.xlu0 %6704, %v6713_v54   ;;  %v6719_v16 = vpop.eup %6718  ;;  %6738 = vrcp.f32 %v10488_v57 }
 0x6f2   : > { %v6721_v49 = vpop.eup %6720  ;;  %6740 = vrcp.f32 %v10490_v58 }
 0x6f3   : > { %v6723_v56 = vpop.eup %6722  ;;  %6742 = vrcp.f32 %v10494_v32 }
 0x6f4   : > { %4932 = vperm.xlu1 %6705, %v6715_v24   ;;  %v6725_v11 = vpop.eup %6724  ;;  %6744 = vrcp.f32 %v10496_v1  ;;  %v10550_v24 = vld [vmem:[#allocation3 + $0x120] sm:$0xff] }
 0x6f5   : > { %4927 = vperm.xlu0 %6704, %v6717_v0   ;;  %v6727_v9 = vpop.eup %6726  ;;  %6746 = vrcp.f32 %v10500_v46 }
 0x6f6   : > { %v6729_v17 = vpop.eup %6728  ;;  %6748 = vrcp.f32 %v10502_v55 }
 0x6f7   : > { %v6731_v23 = vpop.eup %6730  ;;  %6750 = vrcp.f32 %v10506_v22 }
 0x6f8   : > { %4942 = vperm.xlu1 %6705, %v6719_v16   ;;  %v6733_v10 = vpop.eup %6732  ;;  %6752 = vrcp.f32 %v10508_v25  ;;  %v10554_v16 = vld [vmem:[#allocation3 + $0x138] sm:$0xff] }
 0x6f9   : > { %4937 = vperm.xlu0 %6704, %v6721_v49   ;;  %v6735_v45 = vpop.eup %6734  ;;  %6754 = vrcp.f32 %v10512_v4 }
 0x6fa   : > { %v6737_v6 = vpop.eup %6736  ;;  %6756 = vrcp.f32 %v10514_v33 }
 0x6fb   : > { %v6739_v53 = vpop.eup %6738  ;;  %6758 = vrcp.f32 %v10518_v39 }
 0x6fc   : > { %4952 = vperm.xlu1 %6705, %v6723_v56   ;;  %v6741_v59 = vpop.eup %6740  ;;  %6760 = vrcp.f32 %v10520_v7  ;;  %v10556_v56 = vld [vmem:[#allocation3 + $0x130] sm:$0xff] }
 0x6fd   : > { %4947 = vperm.xlu0 %6704, %v6725_v11   ;;  %v6743_v36 = vpop.eup %6742  ;;  %6762 = vrcp.f32 %v10524_v63 }
 0x6fe   : > { %v6745_v31 = vpop.eup %6744  ;;  %6764 = vrcp.f32 %v10526_v3 }
 0x6ff   : > { %v6747_v12 = vpop.eup %6746  ;;  %6766 = vrcp.f32 %v10530_v50 }
 0x700   : > { %4962 = vperm.xlu1 %6705, %v6727_v9   ;;  %v6749_v20 = vpop.eup %6748  ;;  %6768 = vrcp.f32 %v10532_v13  ;;  %v10560_v9 = vld [vmem:[#allocation3 + $0x148] sm:$0xff] }
 0x701   : > { %4957 = vperm.xlu0 %6704, %v6729_v17   ;;  %v6751_v40 = vpop.eup %6750  ;;  %6770 = vrcp.f32 %v10536_v2 }
 0x702   : > { %v6753_v43 = vpop.eup %6752  ;;  %6772 = vrcp.f32 %v10538_v42 }
 0x703   : > { %v6755_v60 = vpop.eup %6754  ;;  %6774 = vrcp.f32 %v10542_v19 }
 0x704   : > { %4972 = vperm.xlu1 %6705, %v6731_v23   ;;  %v6757_v62 = vpop.eup %6756  ;;  %6776 = vrcp.f32 %v10544_v37  ;;  %v10562_v23 = vld [vmem:[#allocation3 + $0x140] sm:$0xff] }
 0x705   : > { %4967 = vperm.xlu0 %6704, %v6733_v10   ;;  %v6759_v35 = vpop.eup %6758  ;;  %6778 = vrcp.f32 %v10548_v14 }
 0x706   : > { %v6761_v29 = vpop.eup %6760  ;;  %6780 = vrcp.f32 %v10550_v24 }
 0x707   : > { %v6763_v61 = vpop.eup %6762  ;;  %6782 = vrcp.f32 %v10554_v16 }
 0x708   : > { %4982 = vperm.xlu1 %6705, %v6735_v45   ;;  %v6765_v38 = vpop.eup %6764  ;;  %6784 = vrcp.f32 %v10556_v56  ;;  %v10566_v45 = vld [vmem:[#allocation3 + $0x158] sm:$0xff] }
 0x709   : > { %4977 = vperm.xlu0 %6704, %v6737_v6   ;;  %v6767_v54 = vpop.eup %6766  ;;  %6786 = vrcp.f32 %v10560_v9 }
 0x70a   : > { %v6769_v0 = vpop.eup %6768  ;;  %6788 = vrcp.f32 %v10562_v23 }
 0x70b   : > { %v6771_v49 = vpop.eup %6770  ;;  %6790 = vrcp.f32 %v10566_v45 }
 0x70c   : > { %4992 = vperm.xlu1 %6705, %v6739_v53   ;;  %v6773_v11 = vpop.eup %6772  ;;  %v10568_v53 = vld [vmem:[#allocation3 + $0x150] sm:$0xff] }
 0x70d   : > { %4987 = vperm.xlu0 %6704, %v6741_v59   ;;  %v6775_v17 = vpop.eup %6774  ;;  %6792 = vrcp.f32 %v10568_v53 }
 0x70e   : > { %v6777_v10 = vpop.eup %6776 }
 0x70f   : > { %v6779_v6 = vpop.eup %6778 }
 0x710   : > { %5002 = vperm.xlu1 %6705, %v6743_v36   ;;  %v6781_v59 = vpop.eup %6780  ;;  %v10572_v36 = vld [vmem:[#allocation3 + $0x168] sm:$0xff] }
 0x711   : > { %4997 = vperm.xlu0 %6704, %v6745_v31   ;;  %v6783_v31 = vpop.eup %6782  ;;  %6794 = vrcp.f32 %v10572_v36 }
 0x714   : > { %5012 = vperm.xlu1 %6705, %v6747_v12   ;;  %v10574_v12 = vld [vmem:[#allocation3 + $0x160] sm:$0xff] }
 0x715   : > { %5007 = vperm.xlu0 %6704, %v6749_v20   ;;  %v6785_v20 = vpop.eup %6784  ;;  %6796 = vrcp.f32 %v10574_v12 }
 0x718   : > { %5022 = vperm.xlu1 %6705, %v6751_v40   ;;  %v10578_v40 = vld [vmem:[#allocation3 + $0x178] sm:$0xff] }
 0x719   : > { %5017 = vperm.xlu0 %6704, %v6753_v43   ;;  %v6787_v43 = vpop.eup %6786  ;;  %6798 = vrcp.f32 %v10578_v40 }
 0x71c   : > { %5032 = vperm.xlu1 %6705, %v6755_v60   ;;  %v10580_v60 = vld [vmem:[#allocation3 + $0x170] sm:$0xff] }
 0x71d   : > { %5027 = vperm.xlu0 %6704, %v6757_v62   ;;  %v6789_v62 = vpop.eup %6788  ;;  %6800 = vrcp.f32 %v10580_v60 }
 0x720   : > { %5042 = vperm.xlu1 %6705, %v6759_v35   ;;  %v10584_v35 = vld [vmem:[#allocation3 + $0x188] sm:$0xff] }
 0x721   : > { %5037 = vperm.xlu0 %6704, %v6761_v29   ;;  %v6791_v29 = vpop.eup %6790  ;;  %6802 = vrcp.f32 %v10584_v35 }
 0x724   : > { %5052 = vperm.xlu1 %6705, %v6763_v61   ;;  %v10586_v61 = vld [vmem:[#allocation3 + $0x180] sm:$0xff] }
 0x725   : > { %5047 = vperm.xlu0 %6704, %v6765_v38   ;;  %v6793_v38 = vpop.eup %6792  ;;  %6804 = vrcp.f32 %v10586_v61 }
 0x728   : > { %5062 = vperm.xlu1 %6705, %v6767_v54   ;;  %v10590_v54 = vld [vmem:[#allocation3 + $0x198] sm:$0xff] }
 0x729   : > { %5057 = vperm.xlu0 %6704, %v6769_v0   ;;  %v6795_v0 = vpop.eup %6794  ;;  %6806 = vrcp.f32 %v10590_v54 }
 0x72c   : > { %5072 = vperm.xlu1 %6705, %v6771_v49   ;;  %v10592_v49 = vld [vmem:[#allocation3 + $0x190] sm:$0xff] }
 0x72d   : > { %5067 = vperm.xlu0 %6704, %v6773_v11   ;;  %v6797_v11 = vpop.eup %6796  ;;  %6808 = vrcp.f32 %v10592_v49 }
 0x730   : > { %5082 = vperm.xlu1 %6705, %v6775_v17   ;;  %v10596_v17 = vld [vmem:[#allocation3 + $0x1a8] sm:$0xff] }
 0x731   : > { %5077 = vperm.xlu0 %6704, %v6777_v10   ;;  %v6799_v10 = vpop.eup %6798  ;;  %6810 = vrcp.f32 %v10596_v17 }
 0x734   : > { %5092 = vperm.xlu1 %6705, %v6779_v6   ;;  %v10598_v6 = vld [vmem:[#allocation3 + $0x1a0] sm:$0xff] }
 0x735   : > { %5087 = vperm.xlu0 %6704, %v6781_v59   ;;  %12559 = vst [vmem:[#allocation321_spill] sm:$0xff] %v10598_v6  ;;  %v6801_v59 = vpop.eup %6800  ;;  %6812 = vrcp.f32 %v10598_v6 }
 0x738   : > { %5102 = vperm.xlu1 %6705, %v6783_v31   ;;  %v10602_v31 = vld [vmem:[#allocation3 + $0x1b8] sm:$0xff] }
 0x739   : > { %5097 = vperm.xlu0 %6704, %v6785_v20   ;;  %12560 = vst [vmem:[#allocation322_spill] sm:$0xff] %v10602_v31  ;;  %v6803_v20 = vpop.eup %6802  ;;  %6814 = vrcp.f32 %v10602_v31  ;;  %v10616_v31 = vld [vmem:[#allocation3 + $0x1d0] sm:$0xff] }
 0x73a   : > { %12565 = vst [vmem:[#allocation327_spill] sm:$0xff] %v10616_v31 }
 0x73c   : > { %5112 = vperm.xlu1 %6705, %v6787_v43   ;;  %v10604_v43 = vld [vmem:[#allocation3 + $0x1b0] sm:$0xff] }
 0x73d   : > { %5107 = vperm.xlu0 %6704, %v6789_v62   ;;  %12561 = vst [vmem:[#allocation323_spill] sm:$0xff] %v10604_v43  ;;  %v6805_v62 = vpop.eup %6804  ;;  %6816 = vrcp.f32 %v10604_v43 }
 0x740   : > { %5122 = vperm.xlu1 %6705, %v6791_v29   ;;  %v10608_v29 = vld [vmem:[#allocation3 + $0x1c8] sm:$0xff] }
 0x741   : > { %5117 = vperm.xlu0 %6704, %v6793_v38   ;;  %12562 = vst [vmem:[#allocation324_spill] sm:$0xff] %v10608_v29  ;;  %v6807_v38 = vpop.eup %6806  ;;  %6818 = vrcp.f32 %v10608_v29  ;;  %v10622_v29 = vld [vmem:[#allocation3 + $0x1e0] sm:$0xff] }
 0x742   : > { %12567 = vst [vmem:[#allocation329_spill] sm:$0xff] %v10622_v29 }
 0x744   : > { %5132 = vperm.xlu1 %6705, %v6795_v0   ;;  %v10610_v0 = vld [vmem:[#allocation3 + $0x1c0] sm:$0xff] }
 0x745   : > { %5127 = vperm.xlu0 %6704, %v6797_v11   ;;  %12563 = vst [vmem:[#allocation325_spill] sm:$0xff] %v10610_v0  ;;  %v6809_v11 = vpop.eup %6808  ;;  %6820 = vrcp.f32 %v10610_v0 }
 0x748   : > { %5142 = vperm.xlu1 %6705, %v6799_v10   ;;  %v10614_v10 = vld [vmem:[#allocation3 + $0x1d8] sm:$0xff] }
 0x749   : > { %5137 = vperm.xlu0 %6704, %v6801_v59   ;;  %12564 = vst [vmem:[#allocation326_spill] sm:$0xff] %v10614_v10  ;;  %v6811_v59 = vpop.eup %6810  ;;  %6822 = vrcp.f32 %v10614_v10  ;;  %v10628_v10 = vld [vmem:[#allocation3 + $0x1f0] sm:$0xff] }
 0x74a   : > { %6824 = vrcp.f32 %v10616_v31  ;;  %12569 = vst [vmem:[#allocation331_spill] sm:$0xff] %v10628_v10 }
 0x74c   : > { %5152 = vperm.xlu1 %6705, %v6803_v20   ;;  %v6813_v20 = vpop.eup %6812 }
 0x74d   : > { %5147 = vperm.xlu0 %6704, %v6805_v62   ;;  %v10620_v62 = vld [vmem:[#allocation3 + $0x1e8] sm:$0xff]  ;;  %v6815_v43 = vpop.eup %6814 }
 0x74e   : > { %12566 = vst [vmem:[#allocation328_spill] sm:$0xff] %v10620_v62  ;;  %6826 = vrcp.f32 %v10620_v62 }
 0x74f   : > { %6828 = vrcp.f32 %v10622_v29 }
 0x750   : > { %5162 = vperm.xlu1 %6705, %v6807_v38   ;;  %v6817_v38 = vpop.eup %6816 }
 0x751   : > { %5157 = vperm.xlu0 %6704, %v6809_v11   ;;  %v10626_v11 = vld [vmem:[#allocation3 + $0x1f8] sm:$0xff]  ;;  %v6819_v0 = vpop.eup %6818 }
 0x752   : > { %12568 = vst [vmem:[#allocation330_spill] sm:$0xff] %v10626_v11  ;;  %6830 = vrcp.f32 %v10626_v11 }
 0x753   : > { %6832 = vrcp.f32 %v10628_v10 }
 0x754   : > { %5172 = vperm.xlu1 %6705, %v6811_v59   ;;  %v6821_v59 = vpop.eup %6820 }
 0x755   : > { %5167 = vperm.xlu0 %6704, %v6813_v20   ;;  %v6823_v20 = vpop.eup %6822 }
 0x756   : > { %v6825_v31 = vpop.eup %6824 }
 0x758   : > { %5182 = vperm.xlu1 %6705, %v6815_v43   ;;  %v6827_v62 = vpop.eup %6826 }
 0x759   : > { %5177 = vperm.xlu0 %6704, %v6817_v38   ;;  %v6829_v43 = vpop.eup %6828  ;;  %v5291_v38 = vld [vmem:[%s11156_s3 + $0x10] sm:$0xff] }
 0x75c   : > { %5192 = vperm.xlu1 %6705, %v6819_v0   ;;  %v6831_v29 = vpop.eup %6830 }
 0x75d   : > { %5187 = vperm.xlu0 %6704, %v6821_v59   ;;  %v6833_v6 = vpop.eup %6832  ;;  %v5289_v59 = vld [vmem:[%s11156_s3] sm:$0xff] }
 0x760   : > { %5202 = vperm.xlu1 %6705, %v6823_v20  }
 0x761   : > { %5197 = vperm.xlu0 %6704, %v6825_v31  }
 0x764   : > { %5212 = vperm.xlu1 %6705, %v6827_v62  }
 0x765   : > { %5207 = vperm.xlu0 %6704, %v6829_v43  }
 0x768   : > { %5222 = vperm.xlu1 %6705, %v6831_v29  }
 0x769   : > { %5217 = vperm.xlu0 %6704, %v6833_v6   ;;  %v5292_v6 = vld [vmem:[%s11156_s3 + $0x18] sm:$0xff] }
 0x76b   : > { %v4918_v0 = vpop.permute.xlu1 %4917 }
 0x76c   : > { %v5227_v10 = vmul.f32 %v4918_v0, %v10440_v51  ;;  %v4908_v20 = vpop.permute.xlu0 %4907  ;;  %v5290_v0 = vld [vmem:[%s11156_s3 + $0x8] sm:$0xff] }
 0x76d   : > { %v5225_v31 = vmul.f32 %v4908_v20, %v10442_v27 }
 0x76e   : > { %v5355_v62 = vsub.f32 %v5227_v10, %v5291_v38 }
 0x76f   : > { %v5353_v43 = vsub.f32 %v5225_v31, %v5289_v59  ;;  %v4923_v29 = vpop.permute.xlu1 %4922  ;;  %v5294_v59 = vld [vmem:[%s11156_s3 + $0x28] sm:$0xff]  ;;  %v5293_v31 = vld [vmem:[%s11156_s3 + $0x20] sm:$0xff] }
 0x770   : > { %5420 = vst.msk [vmem:[%s11157_s4 + $0x10] sm:$0xff] %vm5417_vm5, %v5355_v62  ;;  %v5228_v51 = vmul.f32 %v4923_v29, %v10444_v47  ;;  %v4913_v11 = vpop.permute.xlu0 %4912 }
 0x771   : > { %5418 = vst.msk [vmem:[%s11157_s4] sm:$0xff] %vm5417_vm5, %v5353_v43  ;;  %v5226_v27 = vmul.f32 %v4913_v11, %v10447_v30 }
 0x772   : > { %v5356_v10 = vsub.f32 %v5228_v51, %v5292_v6  ;;  %v5296_v6 = vld [vmem:[%s11156_s3 + $0x38] sm:$0xff]  ;;  %v5295_v51 = vld [vmem:[%s11156_s3 + $0x30] sm:$0xff] }
 0x773   : > { %v5354_v38 = vsub.f32 %v5226_v27, %v5290_v0  ;;  %v4933_v20 = vpop.permute.xlu1 %4932 }
 0x774   : > { %5421 = vst.msk [vmem:[%s11157_s4 + $0x18] sm:$0xff] %vm5417_vm5, %v5356_v10  ;;  %v5230_v47 = vmul.f32 %v4933_v20, %v10452_v15  ;;  %v4928_v62 = vpop.permute.xlu0 %4927  ;;  %v5297_v20 = vld [vmem:[%s11156_s3 + $0x40] sm:$0xff] }
 0x775   : > { %5419 = vst.msk [vmem:[%s11157_s4 + $0x8] sm:$0xff] %vm5417_vm5, %v5354_v38  ;;  %v5229_v30 = vmul.f32 %v4928_v62, %v10454_v44  ;;  %v5298_v38 = vld [vmem:[%s11156_s3 + $0x48] sm:$0xff] }
 0x776   : > { %v5358_v11 = vsub.f32 %v5230_v47, %v5294_v59 }
 0x777   : > { %v5357_v43 = vsub.f32 %v5229_v30, %v5293_v31  ;;  %v4943_v29 = vpop.permute.xlu1 %4942  ;;  %v5300_v30 = vld [vmem:[%s11156_s3 + $0x58] sm:$0xff] }
 0x778   : > { %5423 = vst.msk [vmem:[%s11157_s4 + $0x28] sm:$0xff] %vm5417_vm5, %v5358_v11  ;;  %v5232_v15 = vmul.f32 %v4943_v29, %v10458_v5  ;;  %v4938_v0 = vpop.permute.xlu0 %4937 }
 0x779   : > { %5422 = vst.msk [vmem:[%s11157_s4 + $0x20] sm:$0xff] %vm5417_vm5, %v5357_v43  ;;  %v5231_v44 = vmul.f32 %v4938_v0, %v10460_v28  ;;  %v5299_v43 = vld [vmem:[%s11156_s3 + $0x50] sm:$0xff] }
 0x77a   : > { %v5360_v27 = vsub.f32 %v5232_v15, %v5296_v6 }
 0x77b   : > { %v5359_v10 = vsub.f32 %v5231_v44, %v5295_v51  ;;  %v4953_v59 = vpop.permute.xlu1 %4952  ;;  %v5302_v51 = vld [vmem:[%s11156_s3 + $0x68] sm:$0xff]  ;;  %v5301_v44 = vld [vmem:[%s11156_s3 + $0x60] sm:$0xff] }
 0x77c   : > { %5425 = vst.msk [vmem:[%s11157_s4 + $0x38] sm:$0xff] %vm5417_vm5, %v5360_v27  ;;  %v5234_v5 = vmul.f32 %v4953_v59, %v10464_v21  ;;  %v4948_v47 = vpop.permute.xlu0 %4947  ;;  %v5304_v59 = vld [vmem:[%s11156_s3 + $0x78] sm:$0xff] }
 0x77d   : > { %5424 = vst.msk [vmem:[%s11157_s4 + $0x30] sm:$0xff] %vm5417_vm5, %v5359_v10  ;;  %v5233_v28 = vmul.f32 %v4948_v47, %v10466_v52 }
 0x77e   : > { %v5362_v31 = vsub.f32 %v5234_v5, %v5298_v38 }
 0x77f   : > { %v5361_v62 = vsub.f32 %v5233_v28, %v5297_v20  ;;  %v4963_v11 = vpop.permute.xlu1 %4962  ;;  %v5303_v20 = vld [vmem:[%s11156_s3 + $0x70] sm:$0xff] }
 0x780   : > { %5427 = vst.msk [vmem:[%s11157_s4 + $0x48] sm:$0xff] %vm5417_vm5, %v5362_v31  ;;  %v5236_v21 = vmul.f32 %v4963_v11, %v10470_v48  ;;  %v4958_v6 = vpop.permute.xlu0 %4957  ;;  %v5305_v11 = vld [vmem:[%s11156_s3 + $0x80] sm:$0xff] }
 0x781   : > { %5426 = vst.msk [vmem:[%s11157_s4 + $0x40] sm:$0xff] %vm5417_vm5, %v5361_v62  ;;  %v5235_v52 = vmul.f32 %v4958_v6, %v10472_v41  ;;  %v5306_v62 = vld [vmem:[%s11156_s3 + $0x88] sm:$0xff] }
 0x782   : > { %v5364_v29 = vsub.f32 %v5236_v21, %v5300_v30 }
 0x783   : > { %v5363_v15 = vsub.f32 %v5235_v52, %v5299_v43  ;;  %v4973_v0 = vpop.permute.xlu1 %4972  ;;  %v5308_v52 = vld [vmem:[%s11156_s3 + $0x98] sm:$0xff] }
 0x784   : > { %5429 = vst.msk [vmem:[%s11157_s4 + $0x58] sm:$0xff] %vm5417_vm5, %v5364_v29  ;;  %v5238_v48 = vmul.f32 %v4973_v0, %v10476_v8  ;;  %v4968_v27 = vpop.permute.xlu0 %4967 }
 0x785   : > { %5428 = vst.msk [vmem:[%s11157_s4 + $0x50] sm:$0xff] %vm5417_vm5, %v5363_v15  ;;  %v5237_v41 = vmul.f32 %v4968_v27, %v10478_v34  ;;  %v5307_v15 = vld [vmem:[%s11156_s3 + $0x90] sm:$0xff] }
 0x786   : > { %v5366_v10 = vsub.f32 %v5238_v48, %v5302_v51 }
 0x787   : > { %v5365_v38 = vsub.f32 %v5237_v41, %v5301_v44  ;;  %v4983_v5 = vpop.permute.xlu1 %4982  ;;  %v5310_v44 = vld [vmem:[%s11156_s3 + $0xa8] sm:$0xff]  ;;  %v5309_v41 = vld [vmem:[%s11156_s3 + $0xa0] sm:$0xff] }
 0x788   : > { %5431 = vst.msk [vmem:[%s11157_s4 + $0x68] sm:$0xff] %vm5417_vm5, %v5366_v10  ;;  %v5240_v8 = vmul.f32 %v4983_v5, %v10482_v26  ;;  %v4978_v47 = vpop.permute.xlu0 %4977  ;;  %v5312_v5 = vld [vmem:[%s11156_s3 + $0xb8] sm:$0xff] }
 0x789   : > { %5430 = vst.msk [vmem:[%s11157_s4 + $0x60] sm:$0xff] %vm5417_vm5, %v5365_v38  ;;  %v5239_v34 = vmul.f32 %v4978_v47, %v10484_v18 }
 0x78a   : > { %v5368_v28 = vsub.f32 %v5240_v8, %v5304_v59 }
 0x78b   : > { %v5367_v31 = vsub.f32 %v5239_v34, %v5303_v20  ;;  %v4993_v30 = vpop.permute.xlu1 %4992  ;;  %v5311_v20 = vld [vmem:[%s11156_s3 + $0xb0] sm:$0xff] }
 0x78c   : > { %5433 = vst.msk [vmem:[%s11157_s4 + $0x78] sm:$0xff] %vm5417_vm5, %v5368_v28  ;;  %v5242_v26 = vmul.f32 %v4993_v30, %v10488_v57  ;;  %v4988_v21 = vpop.permute.xlu0 %4987  ;;  %v5313_v30 = vld [vmem:[%s11156_s3 + $0xc0] sm:$0xff] }
 0x78d   : > { %5432 = vst.msk [vmem:[%s11157_s4 + $0x70] sm:$0xff] %vm5417_vm5, %v5367_v31  ;;  %v5241_v18 = vmul.f32 %v4988_v21, %v10490_v58  ;;  %v5314_v31 = vld [vmem:[%s11156_s3 + $0xc8] sm:$0xff] }
 0x78e   : > { %v5370_v43 = vsub.f32 %v5242_v26, %v5306_v62 }
 0x78f   : > { %v5369_v6 = vsub.f32 %v5241_v18, %v5305_v11  ;;  %v5003_v29 = vpop.permute.xlu1 %5002  ;;  %v5316_v18 = vld [vmem:[%s11156_s3 + $0xd8] sm:$0xff] }
 0x790   : > { %5435 = vst.msk [vmem:[%s11157_s4 + $0x88] sm:$0xff] %vm5417_vm5, %v5370_v43  ;;  %v5244_v57 = vmul.f32 %v5003_v29, %v10494_v32  ;;  %v4998_v51 = vpop.permute.xlu0 %4997 }
 0x791   : > { %5434 = vst.msk [vmem:[%s11157_s4 + $0x80] sm:$0xff] %vm5417_vm5, %v5369_v6  ;;  %v5243_v58 = vmul.f32 %v4998_v51, %v10496_v1  ;;  %v5315_v6 = vld [vmem:[%s11156_s3 + $0xd0] sm:$0xff] }
 0x792   : > { %v5372_v0 = vsub.f32 %v5244_v57, %v5308_v52 }
 0x793   : > { %v5371_v48 = vsub.f32 %v5243_v58, %v5307_v15  ;;  %v5013_v27 = vpop.permute.xlu1 %5012  ;;  %v5318_v15 = vld [vmem:[%s11156_s3 + $0xe8] sm:$0xff]  ;;  %v5317_v58 = vld [vmem:[%s11156_s3 + $0xe0] sm:$0xff] }
 0x794   : > { %5437 = vst.msk [vmem:[%s11157_s4 + $0x98] sm:$0xff] %vm5417_vm5, %v5372_v0  ;;  %v5246_v32 = vmul.f32 %v5013_v27, %v10500_v46  ;;  %v5008_v10 = vpop.permute.xlu0 %5007  ;;  %v5320_v27 = vld [vmem:[%s11156_s3 + $0xf8] sm:$0xff] }
 0x795   : > { %5436 = vst.msk [vmem:[%s11157_s4 + $0x90] sm:$0xff] %vm5417_vm5, %v5371_v48  ;;  %v5245_v1 = vmul.f32 %v5008_v10, %v10502_v55 }
 0x796   : > { %v5374_v38 = vsub.f32 %v5246_v32, %v5310_v44 }
 0x797   : > { %v5373_v59 = vsub.f32 %v5245_v1, %v5309_v41  ;;  %v5023_v8 = vpop.permute.xlu1 %5022  ;;  %v5319_v41 = vld [vmem:[%s11156_s3 + $0xf0] sm:$0xff] }
 0x798   : > { %5439 = vst.msk [vmem:[%s11157_s4 + $0xa8] sm:$0xff] %vm5417_vm5, %v5374_v38  ;;  %v5248_v46 = vmul.f32 %v5023_v8, %v10506_v22  ;;  %v5018_v47 = vpop.permute.xlu0 %5017  ;;  %v5321_v8 = vld [vmem:[%s11156_s3 + $0x100] sm:$0xff] }
 0x799   : > { %5438 = vst.msk [vmem:[%s11157_s4 + $0xa0] sm:$0xff] %vm5417_vm5, %v5373_v59  ;;  %v5247_v55 = vmul.f32 %v5018_v47, %v10508_v25  ;;  %v5322_v59 = vld [vmem:[%s11156_s3 + $0x108] sm:$0xff] }
 0x79a   : > { %v5376_v34 = vsub.f32 %v5248_v46, %v5312_v5 }
 0x79b   : > { %v5375_v28 = vsub.f32 %v5247_v55, %v5311_v20  ;;  %v5033_v62 = vpop.permute.xlu1 %5032  ;;  %v5324_v55 = vld [vmem:[%s11156_s3 + $0x118] sm:$0xff] }
 0x79c   : > { %5441 = vst.msk [vmem:[%s11157_s4 + $0xb8] sm:$0xff] %vm5417_vm5, %v5376_v34  ;;  %v5250_v22 = vmul.f32 %v5033_v62, %v10512_v4  ;;  %v5028_v26 = vpop.permute.xlu0 %5027 }
 0x79d   : > { %5440 = vst.msk [vmem:[%s11157_s4 + $0xb0] sm:$0xff] %vm5417_vm5, %v5375_v28  ;;  %v5249_v25 = vmul.f32 %v5028_v26, %v10514_v33  ;;  %v5323_v28 = vld [vmem:[%s11156_s3 + $0x110] sm:$0xff] }
 0x79e   : > { %v5378_v11 = vsub.f32 %v5250_v22, %v5314_v31 }
 0x79f   : > { %v5377_v21 = vsub.f32 %v5249_v25, %v5313_v30  ;;  %v5043_v43 = vpop.permute.xlu1 %5042  ;;  %v5326_v30 = vld [vmem:[%s11156_s3 + $0x128] sm:$0xff]  ;;  %v5325_v25 = vld [vmem:[%s11156_s3 + $0x120] sm:$0xff] }
 0x7a0   : > { %5443 = vst.msk [vmem:[%s11157_s4 + $0xc8] sm:$0xff] %vm5417_vm5, %v5378_v11  ;;  %v5252_v4 = vmul.f32 %v5043_v43, %v10518_v39  ;;  %v5038_v52 = vpop.permute.xlu0 %5037  ;;  %v5328_v43 = vld [vmem:[%s11156_s3 + $0x138] sm:$0xff] }
 0x7a1   : > { %5442 = vst.msk [vmem:[%s11157_s4 + $0xc0] sm:$0xff] %vm5417_vm5, %v5377_v21  ;;  %v5251_v33 = vmul.f32 %v5038_v52, %v10520_v7 }
 0x7a2   : > { %v5380_v29 = vsub.f32 %v5252_v4, %v5316_v18 }
 0x7a3   : > { %v5379_v57 = vsub.f32 %v5251_v33, %v5315_v6  ;;  %v5053_v51 = vpop.permute.xlu1 %5052  ;;  %v5327_v6 = vld [vmem:[%s11156_s3 + $0x130] sm:$0xff] }
 0x7a4   : > { %5445 = vst.msk [vmem:[%s11157_s4 + $0xd8] sm:$0xff] %vm5417_vm5, %v5380_v29  ;;  %v5254_v39 = vmul.f32 %v5053_v51, %v10524_v63  ;;  %v5048_v0 = vpop.permute.xlu0 %5047  ;;  %v5329_v51 = vld [vmem:[%s11156_s3 + $0x140] sm:$0xff] }
 0x7a5   : > { %5444 = vst.msk [vmem:[%s11157_s4 + $0xd0] sm:$0xff] %vm5417_vm5, %v5379_v57  ;;  %v5253_v7 = vmul.f32 %v5048_v0, %v10526_v3  ;;  %v5330_v57 = vld [vmem:[%s11156_s3 + $0x148] sm:$0xff] }
 0x7a6   : > { %v5382_v48 = vsub.f32 %v5254_v39, %v5318_v15 }
 0x7a7   : > { %v5381_v44 = vsub.f32 %v5253_v7, %v5317_v58  ;;  %v5063_v32 = vpop.permute.xlu1 %5062  ;;  %v5332_v7 = vld [vmem:[%s11156_s3 + $0x158] sm:$0xff] }
 0x7a8   : > { %5447 = vst.msk [vmem:[%s11157_s4 + $0xe8] sm:$0xff] %vm5417_vm5, %v5382_v48  ;;  %v5256_v63 = vmul.f32 %v5063_v32, %v10530_v50  ;;  %v5058_v10 = vpop.permute.xlu0 %5057 }
 0x7a9   : > { %5446 = vst.msk [vmem:[%s11157_s4 + $0xe0] sm:$0xff] %vm5417_vm5, %v5381_v44  ;;  %v5255_v3 = vmul.f32 %v5058_v10, %v10532_v13  ;;  %v5331_v44 = vld [vmem:[%s11156_s3 + $0x150] sm:$0xff] }
 0x7aa   : > { %v5384_v1 = vsub.f32 %v5256_v63, %v5320_v27 }
 0x7ab   : > { %v5383_v38 = vsub.f32 %v5255_v3, %v5319_v41  ;;  %v5073_v5 = vpop.permute.xlu1 %5072  ;;  %v5334_v41 = vld [vmem:[%s11156_s3 + $0x168] sm:$0xff]  ;;  %v5333_v3 = vld [vmem:[%s11156_s3 + $0x160] sm:$0xff] }
 0x7ac   : > { %5449 = vst.msk [vmem:[%s11157_s4 + $0xf8] sm:$0xff] %vm5417_vm5, %v5384_v1  ;;  %v5258_v50 = vmul.f32 %v5073_v5, %v10536_v2  ;;  %v5068_v46 = vpop.permute.xlu0 %5067  ;;  %v5336_v5 = vld [vmem:[%s11156_s3 + $0x178] sm:$0xff] }
 0x7ad   : > { %5448 = vst.msk [vmem:[%s11157_s4 + $0xf0] sm:$0xff] %vm5417_vm5, %v5383_v38  ;;  %v5257_v13 = vmul.f32 %v5068_v46, %v10538_v42 }
 0x7ae   : > { %v5386_v20 = vsub.f32 %v5258_v50, %v5322_v59 }
 0x7af   : > { %v5385_v47 = vsub.f32 %v5257_v13, %v5321_v8  ;;  %v5083_v34 = vpop.permute.xlu1 %5082  ;;  %v5335_v8 = vld [vmem:[%s11156_s3 + $0x170] sm:$0xff] }
 0x7b0   : > { %5451 = vst.msk [vmem:[%s11157_s4 + $0x108] sm:$0xff] %vm5417_vm5, %v5386_v20  ;;  %v5260_v2 = vmul.f32 %v5083_v34, %v10542_v19  ;;  %v5078_v31 = vpop.permute.xlu0 %5077  ;;  %v5337_v34 = vld [vmem:[%s11156_s3 + $0x180] sm:$0xff] }
 0x7b1   : > { %5450 = vst.msk [vmem:[%s11157_s4 + $0x100] sm:$0xff] %vm5417_vm5, %v5385_v47  ;;  %v5259_v42 = vmul.f32 %v5078_v31, %v10544_v37  ;;  %v5338_v47 = vld [vmem:[%s11156_s3 + $0x188] sm:$0xff] }
 0x7b2   : > { %v5388_v62 = vsub.f32 %v5260_v2, %v5324_v55 }
 0x7b3   : > { %v5387_v22 = vsub.f32 %v5259_v42, %v5323_v28  ;;  %v5093_v26 = vpop.permute.xlu1 %5092  ;;  %v5340_v42 = vld [vmem:[%s11156_s3 + $0x198] sm:$0xff] }
 0x7b4   : > { %5453 = vst.msk [vmem:[%s11157_s4 + $0x118] sm:$0xff] %vm5417_vm5, %v5388_v62  ;;  %v5262_v19 = vmul.f32 %v5093_v26, %v10548_v14  ;;  %v5088_v11 = vpop.permute.xlu0 %5087 }
 0x7b5   : > { %5452 = vst.msk [vmem:[%s11157_s4 + $0x110] sm:$0xff] %vm5417_vm5, %v5387_v22  ;;  %v5261_v37 = vmul.f32 %v5088_v11, %v10550_v24  ;;  %v5339_v22 = vld [vmem:[%s11156_s3 + $0x190] sm:$0xff] }
 0x7b6   : > { %v5390_v21 = vsub.f32 %v5262_v19, %v5326_v30 }
 0x7b7   : > { %v5389_v18 = vsub.f32 %v5261_v37, %v5325_v25  ;;  %v5103_v4 = vpop.permute.xlu1 %5102  ;;  %v5342_v25 = vld [vmem:[%s11156_s3 + $0x1a8] sm:$0xff]  ;;  %v5341_v37 = vld [vmem:[%s11156_s3 + $0x1a0] sm:$0xff] }
 0x7b8   : > { %5455 = vst.msk [vmem:[%s11157_s4 + $0x128] sm:$0xff] %vm5417_vm5, %v5390_v21  ;;  %v5264_v14 = vmul.f32 %v5103_v4, %v10554_v16  ;;  %v5098_v52 = vpop.permute.xlu0 %5097 }
 0x7b9   : > { %5454 = vst.msk [vmem:[%s11157_s4 + $0x120] sm:$0xff] %vm5417_vm5, %v5389_v18  ;;  %v5263_v24 = vmul.f32 %v5098_v52, %v10556_v56 }
 0x7ba   : > { %v5392_v33 = vsub.f32 %v5264_v14, %v5328_v43  ;;  %v5344_v14 = vld [vmem:[%s11156_s3 + $0x1b8] sm:$0xff] }
 0x7bb   : > { %v5391_v29 = vsub.f32 %v5263_v24, %v5327_v6  ;;  %v5113_v15 = vpop.permute.xlu1 %5112  ;;  %v5343_v24 = vld [vmem:[%s11156_s3 + $0x1b0] sm:$0xff] }
 0x7bc   : > { %5457 = vst.msk [vmem:[%s11157_s4 + $0x138] sm:$0xff] %vm5417_vm5, %v5392_v33  ;;  %v5266_v16 = vmul.f32 %v5113_v15, %v10560_v9  ;;  %v5108_v39 = vpop.permute.xlu0 %5107 }
 0x7bd   : > { %5456 = vst.msk [vmem:[%s11157_s4 + $0x130] sm:$0xff] %vm5417_vm5, %v5391_v29  ;;  %v5265_v56 = vmul.f32 %v5108_v39, %v10562_v23  ;;  %v12572_v29 = vld [vmem:[#allocation323_spill] sm:$0xff] }
 0x7be   : > { %v5394_v58 = vsub.f32 %v5266_v16, %v5330_v57 }
 0x7bf   : > { %v5393_v0 = vsub.f32 %v5265_v56, %v5329_v51  ;;  %v5123_v48 = vpop.permute.xlu1 %5122  ;;  %v5346_v51 = vld [vmem:[%s11156_s3 + $0x1c8] sm:$0xff]  ;;  %v12573_v56 = vld [vmem:[#allocation324_spill] sm:$0xff] }
 0x7c0   : > { %5459 = vst.msk [vmem:[%s11157_s4 + $0x148] sm:$0xff] %vm5417_vm5, %v5394_v58  ;;  %v5268_v9 = vmul.f32 %v5123_v48, %v10566_v45  ;;  %v5118_v27 = vpop.permute.xlu0 %5117  ;;  %v12574_v48 = vld [vmem:[#allocation325_spill] sm:$0xff] }
 0x7c1   : > { %5458 = vst.msk [vmem:[%s11157_s4 + $0x140] sm:$0xff] %vm5417_vm5, %v5393_v0  ;;  %v5267_v23 = vmul.f32 %v5118_v27, %v10568_v53  ;;  %v5345_v0 = vld [vmem:[%s11156_s3 + $0x1c0] sm:$0xff] }
 0x7c2   : > { %v5396_v32 = vsub.f32 %v5268_v9, %v5332_v7 }
 0x7c3   : > { %v5395_v63 = vsub.f32 %v5267_v23, %v5331_v44  ;;  %v5133_v10 = vpop.permute.xlu1 %5132  ;;  %v5348_v23 = vld [vmem:[%s11156_s3 + $0x1d8] sm:$0xff] }
 0x7c4   : > { %5461 = vst.msk [vmem:[%s11157_s4 + $0x158] sm:$0xff] %vm5417_vm5, %v5396_v32  ;;  %v5270_v45 = vmul.f32 %v5133_v10, %v10572_v36  ;;  %v5128_v1 = vpop.permute.xlu0 %5127  ;;  %v5347_v10 = vld [vmem:[%s11156_s3 + $0x1d0] sm:$0xff] }
 0x7c5   : > { %5460 = vst.msk [vmem:[%s11157_s4 + $0x150] sm:$0xff] %vm5417_vm5, %v5395_v63  ;;  %v5269_v53 = vmul.f32 %v5128_v1, %v10574_v12  ;;  %v12575_v63 = vld [vmem:[#allocation326_spill] sm:$0xff] }
 0x7c6   : > { %v5398_v38 = vsub.f32 %v5270_v45, %v5334_v41 }
 0x7c7   : > { %v5397_v59 = vsub.f32 %v5269_v53, %v5333_v3  ;;  %v5143_v50 = vpop.permute.xlu1 %5142  ;;  %v12576_v3 = vld [vmem:[#allocation327_spill] sm:$0xff] }
 0x7c8   : > { %5463 = vst.msk [vmem:[%s11157_s4 + $0x168] sm:$0xff] %vm5417_vm5, %v5398_v38  ;;  %v5272_v36 = vmul.f32 %v5143_v50, %v10578_v40  ;;  %v5138_v46 = vpop.permute.xlu0 %5137  ;;  %v12577_v50 = vld [vmem:[#allocation328_spill] sm:$0xff] }
 0x7c9   : > { %5462 = vst.msk [vmem:[%s11157_s4 + $0x160] sm:$0xff] %vm5417_vm5, %v5397_v59  ;;  %v5271_v12 = vmul.f32 %v5138_v46, %v10580_v60  ;;  %v5350_v59 = vld [vmem:[%s11156_s3 + $0x1e8] sm:$0xff] }
 0x7ca   : > { %v5400_v13 = vsub.f32 %v5272_v36, %v5336_v5 }
 0x7cb   : > { %v5399_v20 = vsub.f32 %v5271_v12, %v5335_v8  ;;  %v5153_v55 = vpop.permute.xlu1 %5152  ;;  %v5349_v8 = vld [vmem:[%s11156_s3 + $0x1e0] sm:$0xff]  ;;  %v12578_v12 = vld [vmem:[#allocation329_spill] sm:$0xff] }
 0x7cc   : > { %5465 = vst.msk [vmem:[%s11157_s4 + $0x178] sm:$0xff] %vm5417_vm5, %v5400_v13  ;;  %v5274_v40 = vmul.f32 %v5153_v55, %v10584_v35  ;;  %v5148_v2 = vpop.permute.xlu0 %5147  ;;  %v5352_v55 = vld [vmem:[%s11156_s3 + $0x1f8] sm:$0xff] }
 0x7cd   : > { %5464 = vst.msk [vmem:[%s11157_s4 + $0x170] sm:$0xff] %vm5417_vm5, %v5399_v20  ;;  %v5273_v60 = vmul.f32 %v5148_v2, %v10586_v61 }
 0x7ce   : > { %v5402_v28 = vsub.f32 %v5274_v40, %v5338_v47 }
 0x7cf   : > { %v5401_v31 = vsub.f32 %v5273_v60, %v5337_v34  ;;  %v5163_v62 = vpop.permute.xlu1 %5162  ;;  %v12579_v34 = vld [vmem:[#allocation330_spill] sm:$0xff] }
 0x7d0   : > { %5467 = vst.msk [vmem:[%s11157_s4 + $0x188] sm:$0xff] %vm5417_vm5, %v5402_v28  ;;  %v5276_v35 = vmul.f32 %v5163_v62, %v10590_v54  ;;  %v5158_v30 = vpop.permute.xlu0 %5157  ;;  %v5351_v60 = vld [vmem:[%s11156_s3 + $0x1f0] sm:$0xff] }
 0x7d1   : > { %5466 = vst.msk [vmem:[%s11157_s4 + $0x180] sm:$0xff] %vm5417_vm5, %v5401_v31  ;;  %v5275_v61 = vmul.f32 %v5158_v30, %v10592_v49  ;;  %v12570_v49 = vld [vmem:[#allocation321_spill] sm:$0xff]  ;;  %v12580_v31 = vld [vmem:[#allocation331_spill] sm:$0xff] }
 0x7d2   : > { %v5404_v26 = vsub.f32 %v5276_v35, %v5340_v42 }
 0x7d3   : > { %v5403_v19 = vsub.f32 %v5275_v61, %v5339_v22  ;;  %v5173_v11 = vpop.permute.xlu1 %5172 }
 0x7d4   : > { %5469 = vst.msk [vmem:[%s11157_s4 + $0x198] sm:$0xff] %vm5417_vm5, %v5404_v26  ;;  %v5278_v54 = vmul.f32 %v5173_v11, %v10596_v17  ;;  %v5168_v21 = vpop.permute.xlu0 %5167  ;;  %v12571_v17 = vld [vmem:[#allocation322_spill] sm:$0xff] }
 0x7d5   : > { %5468 = vst.msk [vmem:[%s11157_s4 + $0x190] sm:$0xff] %vm5417_vm5, %v5403_v19  ;;  %v5277_v18 = vmul.f32 %v5168_v21, %v12570_v49 }
 0x7d6   : > { %v5406_v43 = vsub.f32 %v5278_v54, %v5342_v25 }
 0x7d7   : > { %v5405_v4 = vsub.f32 %v5277_v18, %v5341_v37  ;;  %v5183_v6 = vpop.permute.xlu1 %5182 }
 0x7d8   : > { %5471 = vst.msk [vmem:[%s11157_s4 + $0x1a8] sm:$0xff] %vm5417_vm5, %v5406_v43  ;;  %v5280_v52 = vmul.f32 %v5183_v6, %v12571_v17  ;;  %v5178_v33 = vpop.permute.xlu0 %5177 }
 0x7d9   : > { %5470 = vst.msk [vmem:[%s11157_s4 + $0x1a0] sm:$0xff] %vm5417_vm5, %v5405_v4  ;;  %v5279_v57 = vmul.f32 %v5178_v33, %v12572_v29 }
 0x7da   : > { %v5408_v15 = vsub.f32 %v5280_v52, %v5344_v14 }
 0x7db   : > { %v5407_v16 = vsub.f32 %v5279_v57, %v5343_v24  ;;  %v5193_v39 = vpop.permute.xlu1 %5192 }
 0x7dc   : > { %5473 = vst.msk [vmem:[%s11157_s4 + $0x1b8] sm:$0xff] %vm5417_vm5, %v5408_v15  ;;  %v5282_v58 = vmul.f32 %v5193_v39, %v12573_v56  ;;  %v5188_v7 = vpop.permute.xlu0 %5187 }
 0x7dd   : > { %5472 = vst.msk [vmem:[%s11157_s4 + $0x1b0] sm:$0xff] %vm5417_vm5, %v5407_v16  ;;  %v5281_v9 = vmul.f32 %v5188_v7, %v12574_v48 }
 0x7de   : > { %v5410_v44 = vsub.f32 %v5282_v58, %v5346_v51 }
 0x7df   : > { %v5409_v27 = vsub.f32 %v5281_v9, %v5345_v0  ;;  %v5203_v32 = vpop.permute.xlu1 %5202 }
 0x7e0   : > { %5475 = vst.msk [vmem:[%s11157_s4 + $0x1c8] sm:$0xff] %vm5417_vm5, %v5410_v44  ;;  %v5284_v41 = vmul.f32 %v5203_v32, %v12575_v63  ;;  %v5198_v45 = vpop.permute.xlu0 %5197 }
 0x7e1   : > { %5474 = vst.msk [vmem:[%s11157_s4 + $0x1c0] sm:$0xff] %vm5417_vm5, %v5409_v27  ;;  %v5283_v1 = vmul.f32 %v5198_v45, %v12576_v3 }
 0x7e2   : > { %v5412_v53 = vsub.f32 %v5284_v41, %v5348_v23 }
 0x7e3   : > { %v5411_v38 = vsub.f32 %v5283_v1, %v5347_v10  ;;  %v5213_v5 = vpop.permute.xlu1 %5212 }
 0x7e4   : > { %5477 = vst.msk [vmem:[%s11157_s4 + $0x1d8] sm:$0xff] %vm5417_vm5, %v5412_v53  ;;  %v5286_v36 = vmul.f32 %v5213_v5, %v12577_v50  ;;  %v5208_v46 = vpop.permute.xlu0 %5207 }
 0x7e5   : > { %5476 = vst.msk [vmem:[%s11157_s4 + $0x1d0] sm:$0xff] %vm5417_vm5, %v5411_v38  ;;  %v5285_v13 = vmul.f32 %v5208_v46, %v12578_v12 }
 0x7e6   : > { %v5414_v20 = vsub.f32 %v5286_v36, %v5350_v59 }
 0x7e7   : > { %v5413_v47 = vsub.f32 %v5285_v13, %v5349_v8  ;;  %v5223_v40 = vpop.permute.xlu1 %5222 }
 0x7e8   : > { %5479 = vst.msk [vmem:[%s11157_s4 + $0x1e8] sm:$0xff] %vm5417_vm5, %v5414_v20  ;;  %v5288_v2 = vmul.f32 %v5223_v40, %v12579_v34  ;;  %v5218_v28 = vpop.permute.xlu0 %5217 }
 0x7e9   : > { %5478 = vst.msk [vmem:[%s11157_s4 + $0x1e0] sm:$0xff] %vm5417_vm5, %v5413_v47  ;;  %v5287_v42 = vmul.f32 %v5218_v28, %v12580_v31 }
 0x7ea   : > { %v5416_v62 = vsub.f32 %v5288_v2, %v5352_v55 }
 0x7eb   : > { %v5415_v35 = vsub.f32 %v5287_v42, %v5351_v60 }
 0x7ec   : > { %5481 = vst.msk [vmem:[%s11157_s4 + $0x1f8] sm:$0xff] %vm5417_vm5, %v5416_v62 }
 0x7ed   : > { %5480 = vst.msk [vmem:[%s11157_s4 + $0x1f0] sm:$0xff] %vm5417_vm5, %v5415_v35 }
 0x7ee PF: > { %s14_s17 = sadd.s32 1, %s6856_s17   ;;  %s12581_s15 = smov %s6852_s16 }
 0x7ef   : > { %p11_p7 = scmp.ge.s32.totalorder %s14_s17, 6   ;;  %s12582_s16 = smov %s12584_s18 }
 0x7f1   :  { %13 = sbr.rel (!%p11_p7) target bundleno = 2 (0x2), region = 83 }

</bundles_post_ra>
